<compile_context>
chip_gen: v5e
topology: v5e:2x2
jax: 0.10.0
libtpu: 0.0.40
codegen_flags: <defaults>
</compile_context>

<pallas_src>
import functools

import jax
import jax.numpy as jnp
from jax.experimental import pallas as pl
from jax.experimental.pallas import tpu as pltpu


OFF = 8  # interior column offset inside the padded scratch (sublane aligned)


def _bottleneck_kernel(x_ref, w1_ref, b1_ref, w2_ref, b2_ref, o_ref,
                       xpad_ref, ypad_ref, *, H, W, add):
    """Fused Bottleneck for one image.

    x_ref   : (1, H, W, C1)  NHWC input block, bf16
    w*_ref  : (9, Cin, Cout) 3x3 conv weights (BN scale folded in), bf16,
              tap-major (kh*3 + kw)
    b*_ref  : (1, Cout)      folded BatchNorm bias, f32
    o_ref   : (1, H, W, C2)  output block, f32
    xpad_ref: VMEM (H+2, W+16, C1) bf16 zero-padded input   (data at [1:H+1, 8:8+W])
    ypad_ref: VMEM (H+2, W+16, C_) bf16 zero-padded intermediate activation
    """
    Wp = W + 16
    C1 = x_ref.shape[-1]
    Cm = w1_ref.shape[-1]
    C2 = w2_ref.shape[-1]

    def zero_pad_borders(pad_ref, c):
        # Only the pad region is zeroed (interior is overwritten below); all
        # stores are sublane-aligned (row 0 / row H+1 full width + two 8-wide
        # column strips covering the +/-1 halo columns 7 and 8+W).
        dt = pad_ref.dtype
        pad_ref[0:1, :, :] = jnp.zeros((1, Wp, c), dt)
        pad_ref[H + 1:H + 2, :, :] = jnp.zeros((1, Wp, c), dt)
        pad_ref[1:H + 1, 0:OFF, :] = jnp.zeros((H, OFF, c), dt)
        pad_ref[1:H + 1, OFF + W:OFF + W + 8, :] = jnp.zeros((H, 8, c), dt)

    zero_pad_borders(xpad_ref, C1)
    zero_pad_borders(ypad_ref, Cm)

    xi = x_ref[0]                                     # (H, W, C1) bf16
    xpad_ref[1:H + 1, OFF:OFF + W, :] = xi            # aligned interior store

    def conv3x3(src_ref, w_ref, cout):
        """'same' 3x3 conv: 3 aligned full-width row slabs, 9 MXU dots,
        kw shift applied as a static slice of the f32 dot result."""
        y = None
        for kh in range(3):
            # Aligned full-width load of rows [kh, kh+H) of the padded scratch.
            slab = src_ref[kh:kh + H, :, :].reshape(H * Wp, -1)    # bf16
            for kw in range(3):
                d = jnp.dot(slab, w_ref[kh * 3 + kw],
                            preferred_element_type=jnp.float32)    # (H*Wp, cout)
                d = d.reshape(H, Wp, cout)[:, OFF - 1 + kw:OFF - 1 + kw + W, :]
                y = d if y is None else y + d         # acc init from first tap
        return y.reshape(H * W, cout)                 # f32

    def silu(y):
        # exp + approximate reciprocal both run on the EUP slot.
        return y * pl.reciprocal(1.0 + jnp.exp(-y), approx=True)

    # cv1: conv (BN scale folded) -> +bias -> SiLU
    y1 = silu(conv3x3(xpad_ref, w1_ref, Cm) + b1_ref[...])
    ypad_ref[1:H + 1, OFF:OFF + W, :] = (
        y1.reshape(H, W, Cm).astype(ypad_ref.dtype))  # aligned bf16 store

    # cv2: conv (BN scale folded) -> +bias -> SiLU
    y2 = silu(conv3x3(ypad_ref, w2_ref, C2) + b2_ref[...])

    if add:                                           # residual (static flag)
        y2 = y2 + xi.reshape(H * W, C1).astype(jnp.float32)

    o_ref[0] = y2.reshape(H, W, C2)


def bottleneck_forward(x_nchw, w1, bn1, w2, bn2, *, shortcut=True, eps=1e-5):
    """Bottleneck forward (PyTorch NCHW in/out, inference BN semantics).

    x_nchw : (N, C1, H, W) f32
    w1     : (C_, C1, 3, 3) cv1 conv weight (bias=False)
    bn1    : (gamma, beta, running_mean, running_var), each (C_,)
    w2     : (C2, C_, 3, 3) cv2 conv weight
    bn2    : like bn1, each (C2,)
    returns (N, C2, H, W) f32
    """
    N, C1, H, W = x_nchw.shape
    Cm = w1.shape[0]
    C2 = w2.shape[0]
    assert w1.shape == (Cm, C1, 3, 3) and w2.shape == (C2, Cm, 3, 3)
    assert W % 8 == 0, "W must be a multiple of 8 (sublane granularity)"
    add = bool(shortcut) and (C1 == C2)
    Wp = W + 16

    # NHWC, channels on the lane axis; bf16 halves HBM bytes and feeds the
    # MXU natively.
    x = jnp.transpose(x_nchw, (0, 2, 3, 1)).astype(jnp.bfloat16)   # (N,H,W,C1)

    def fold(w, bn):
        """Conv weight -> (9, Cin, Cout) bf16 with BN scale folded; bias f32."""
        gamma, beta, mean, var = bn
        scale = (gamma / jnp.sqrt(var + eps)).astype(jnp.float32)
        bias = (beta - mean * scale).astype(jnp.float32)
        wk = jnp.transpose(w, (2, 3, 1, 0)).reshape(9, w.shape[1], w.shape[0])
        wk = (wk.astype(jnp.float32) * scale[None, None, :]).astype(jnp.bfloat16)
        return wk, bias.reshape(1, -1)

    w1k, b1 = fold(w1, bn1)
    w2k, b2 = fold(w2, bn2)

    kernel = functools.partial(_bottleneck_kernel, H=H, W=W, add=add)

    out = pl.pallas_call(
        kernel,
        out_shape=jax.ShapeDtypeStruct((N, H, W, C2), jnp.float32),
        grid_spec=pltpu.PrefetchScalarGridSpec(
            num_scalar_prefetch=0,
            grid=(N,),                        # >=2 steps: both v7x TCs get work
            in_specs=[
                pl.BlockSpec((1, H, W, C1), lambda n: (n, 0, 0, 0)),
                pl.BlockSpec((9, C1, Cm), lambda n: (0, 0, 0)),   # resident
                pl.BlockSpec((1, Cm), lambda n: (0, 0)),          # resident
                pl.BlockSpec((9, Cm, C2), lambda n: (0, 0, 0)),   # resident
                pl.BlockSpec((1, C2), lambda n: (0, 0)),          # resident
            ],
            out_specs=pl.BlockSpec((1, H, W, C2), lambda n: (n, 0, 0, 0)),
            scratch_shapes=[
                pltpu.VMEM((H + 2, Wp, C1), jnp.bfloat16),
                pltpu.VMEM((H + 2, Wp, Cm), jnp.bfloat16),
            ],
        ),
        compiler_params=pltpu.CompilerParams(
            dimension_semantics=("parallel",),
            vmem_limit_bytes=64 * 1024 * 1024),
    )(x, w1k, b1, w2k, b2)

    return jnp.transpose(out, (0, 3, 1, 2))            # back to NCHW


def bottleneck_reference(x_nchw, w1, bn1, w2, bn2, *, shortcut=True, eps=1e-5):
    """Pure-JAX reference (lax.conv, full f32 precision)."""
    def conv_bn_silu(x, w, bn):
        gamma, beta, mean, var = bn
        y = jax.lax.conv_general_dilated(
            x, w, window_strides=(1, 1), padding=((1, 1), (1, 1)),
            dimension_numbers=("NCHW", "OIHW", "NCHW"),
            precision=jax.lax.Precision.HIGHEST)
        scale = gamma / jnp.sqrt(var + eps)
        bias = beta - mean * scale
        y = y * scale[None, :, None, None] + bias[None, :, None, None]
        return y * jax.nn.sigmoid(y)                   # SiLU

    y = conv_bn_silu(x_nchw, w1, bn1)
    y = conv_bn_silu(y, w2, bn2)
    if shortcut and x_nchw.shape[1] == w2.shape[0]:
        y = x_nchw + y
    return y


if __name__ == "__main__":
    # Bottleneck(c1=32, c2=32, shortcut=True, e=0.5) -> c_ = 16, residual active.
    N, C1, H, W = 2, 32, 16, 16
    C2 = 32
    Cm = int(C2 * 0.5)

    key = jax.random.PRNGKey(0)
    ks = jax.random.split(key, 11)
    x = jax.random.normal(ks[0], (N, C1, H, W), dtype=jnp.float32)

    # Kaiming-ish conv weights (Conv2d bias=False in the module).
    w1 = jax.random.normal(ks[1], (Cm, C1, 3, 3), jnp.float32) * (2.0 / (9 * C1)) ** 0.5
    w2 = jax.random.normal(ks[2], (C2, Cm, 3, 3), jnp.float32) * (2.0 / (9 * Cm)) ** 0.5

    # Non-trivial eval-mode BatchNorm parameters (gamma, beta, mean, var).
    bn1 = (jax.random.uniform(ks[3], (Cm,), jnp.float32, 0.8, 1.2),
           0.2 * jax.random.normal(ks[4], (Cm,), jnp.float32),
           0.2 * jax.random.normal(ks[5], (Cm,), jnp.float32),
           jax.random.uniform(ks[6], (Cm,), jnp.float32, 0.8, 1.2))
    bn2 = (jax.random.uniform(ks[7], (C2,), jnp.float32, 0.8, 1.2),
           0.2 * jax.random.normal(ks[8], (C2,), jnp.float32),
           0.2 * jax.random.normal(ks[9], (C2,), jnp.float32),
           jax.random.uniform(ks[10], (C2,), jnp.float32, 0.8, 1.2))

    out = bottleneck_forward(x, w1, bn1, w2, bn2, shortcut=True)
    out = jax.block_until_ready(out)

    ref = bottleneck_reference(x, w1, bn1, w2, bn2, shortcut=True)
    assert out.shape == (N, C2, H, W)
    # bf16 MXU inputs + approx-reciprocal SiLU vs HIGHEST-precision f32 XLA
    # reference differ by ~1e-2 at most; semantic bugs would be O(1).
    max_diff = float(jnp.max(jnp.abs(out - ref)))
    assert jnp.allclose(out, ref, atol=5e-2, rtol=5e-2), f"max|diff|={max_diff}"
    print("KERNEL_OK")
</pallas_src>

<mosaic_0001>
module attributes {stable_mosaic.version = 11 : i64} {
  func.func @_bottleneck_kernel(%arg0: i32, %arg1: memref<1x16x16x32xbf16, #tpu.memory_space<vmem>>, %arg2: memref<9x32x16xbf16, #tpu.memory_space<vmem>>, %arg3: memref<1x16xf32, #tpu.memory_space<vmem>>, %arg4: memref<9x16x32xbf16, #tpu.memory_space<vmem>>, %arg5: memref<1x32xf32, #tpu.memory_space<vmem>>, %arg6: memref<1x16x16x32xf32, #tpu.memory_space<vmem>>, %arg7: memref<18x32x32xbf16, #tpu.memory_space<vmem>>, %arg8: memref<18x32x16xbf16, #tpu.memory_space<vmem>>) attributes {dimension_semantics = [#tpu.dimension_semantics<parallel>], iteration_bounds = array<i64: 2>, scalar_prefetch = 0 : i64, scratch_operands = 2 : i64, tpu.core_type = #tpu.core_type<tc>, window_params = [{transform_indices = @transform_0, window_bounds = array<i64: 1, 16, 16, 32>}, {pipeline_mode = #tpu.pipeline_mode<synchronous>, transform_indices = @transform_1, window_bounds = array<i64: 9, 32, 16>}, {pipeline_mode = #tpu.pipeline_mode<synchronous>, transform_indices = @transform_2, window_bounds = array<i64: 1, 16>}, {pipeline_mode = #tpu.pipeline_mode<synchronous>, transform_indices = @transform_3, window_bounds = array<i64: 9, 16, 32>}, {pipeline_mode = #tpu.pipeline_mode<synchronous>, transform_indices = @transform_4, window_bounds = array<i64: 1, 32>}, {transform_indices = @transform_5, window_bounds = array<i64: 1, 16, 16, 32>}]} {
    %cst = arith.constant 0.000000e+00 : bf16
    %0 = vector.broadcast %cst : bf16 to vector<1x32x32xbf16>
    %c0 = arith.constant 0 : index
    %c0_0 = arith.constant 0 : index
    %c0_1 = arith.constant 0 : index
    %1 = vector.load %arg7[%c0, %c0_0, %c0_1] : memref<18x32x32xbf16, #tpu.memory_space<vmem>>, vector<1x32x32xbf16>
    tpu.vector_store %arg7[%c0, %c0_0, %c0_1], %0 {strides = array<i32>} : memref<18x32x32xbf16, #tpu.memory_space<vmem>>, vector<1x32x32xbf16>,
    %cst_2 = arith.constant 0.000000e+00 : bf16
    %2 = vector.broadcast %cst_2 : bf16 to vector<1x32x32xbf16>
    %c17 = arith.constant 17 : index
    %c0_3 = arith.constant 0 : index
    %c0_4 = arith.constant 0 : index
    %3 = vector.load %arg7[%c17, %c0_3, %c0_4] : memref<18x32x32xbf16, #tpu.memory_space<vmem>>, vector<1x32x32xbf16>
    tpu.vector_store %arg7[%c17, %c0_3, %c0_4], %2 {strides = array<i32>} : memref<18x32x32xbf16, #tpu.memory_space<vmem>>, vector<1x32x32xbf16>,
    %cst_5 = arith.constant 0.000000e+00 : bf16
    %4 = vector.broadcast %cst_5 : bf16 to vector<16x8x32xbf16>
    %c1 = arith.constant 1 : index
    %c0_6 = arith.constant 0 : index
    %c0_7 = arith.constant 0 : index
    %5 = vector.load %arg7[%c1, %c0_6, %c0_7] : memref<18x32x32xbf16, #tpu.memory_space<vmem>>, vector<16x8x32xbf16>
    tpu.vector_store %arg7[%c1, %c0_6, %c0_7], %4 {strides = array<i32>} : memref<18x32x32xbf16, #tpu.memory_space<vmem>>, vector<16x8x32xbf16>,
    %cst_8 = arith.constant 0.000000e+00 : bf16
    %6 = vector.broadcast %cst_8 : bf16 to vector<16x8x32xbf16>
    %c1_9 = arith.constant 1 : index
    %c24 = arith.constant 24 : index
    %c0_10 = arith.constant 0 : index
    %7 = vector.load %arg7[%c1_9, %c24, %c0_10] : memref<18x32x32xbf16, #tpu.memory_space<vmem>>, vector<16x8x32xbf16>
    tpu.vector_store %arg7[%c1_9, %c24, %c0_10], %6 {strides = array<i32>} : memref<18x32x32xbf16, #tpu.memory_space<vmem>>, vector<16x8x32xbf16>,
    %cst_11 = arith.constant 0.000000e+00 : bf16
    %8 = vector.broadcast %cst_11 : bf16 to vector<1x32x16xbf16>
    %c0_12 = arith.constant 0 : index
    %c0_13 = arith.constant 0 : index
    %c0_14 = arith.constant 0 : index
    %9 = vector.load %arg8[%c0_12, %c0_13, %c0_14] : memref<18x32x16xbf16, #tpu.memory_space<vmem>>, vector<1x32x16xbf16>
    tpu.vector_store %arg8[%c0_12, %c0_13, %c0_14], %8 {strides = array<i32>} : memref<18x32x16xbf16, #tpu.memory_space<vmem>>, vector<1x32x16xbf16>,
    %cst_15 = arith.constant 0.000000e+00 : bf16
    %10 = vector.broadcast %cst_15 : bf16 to vector<1x32x16xbf16>
    %c17_16 = arith.constant 17 : index
    %c0_17 = arith.constant 0 : index
    %c0_18 = arith.constant 0 : index
    %11 = vector.load %arg8[%c17_16, %c0_17, %c0_18] : memref<18x32x16xbf16, #tpu.memory_space<vmem>>, vector<1x32x16xbf16>
    tpu.vector_store %arg8[%c17_16, %c0_17, %c0_18], %10 {strides = array<i32>} : memref<18x32x16xbf16, #tpu.memory_space<vmem>>, vector<1x32x16xbf16>,
    %cst_19 = arith.constant 0.000000e+00 : bf16
    %12 = vector.broadcast %cst_19 : bf16 to vector<16x8x16xbf16>
    %c1_20 = arith.constant 1 : index
    %c0_21 = arith.constant 0 : index
    %c0_22 = arith.constant 0 : index
    %13 = vector.load %arg8[%c1_20, %c0_21, %c0_22] : memref<18x32x16xbf16, #tpu.memory_space<vmem>>, vector<16x8x16xbf16>
    tpu.vector_store %arg8[%c1_20, %c0_21, %c0_22], %12 {strides = array<i32>} : memref<18x32x16xbf16, #tpu.memory_space<vmem>>, vector<16x8x16xbf16>,
    %cst_23 = arith.constant 0.000000e+00 : bf16
    %14 = vector.broadcast %cst_23 : bf16 to vector<16x8x16xbf16>
    %c1_24 = arith.constant 1 : index
    %c24_25 = arith.constant 24 : index
    %c0_26 = arith.constant 0 : index
    %15 = vector.load %arg8[%c1_24, %c24_25, %c0_26] : memref<18x32x16xbf16, #tpu.memory_space<vmem>>, vector<16x8x16xbf16>
    tpu.vector_store %arg8[%c1_24, %c24_25, %c0_26], %14 {strides = array<i32>} : memref<18x32x16xbf16, #tpu.memory_space<vmem>>, vector<16x8x16xbf16>,
    %c0_27 = arith.constant 0 : index
    %c0_28 = arith.constant 0 : index
    %c0_29 = arith.constant 0 : index
    %c0_30 = arith.constant 0 : index
    %16 = vector.load %arg1[%c0_27, %c0_28, %c0_29, %c0_30] : memref<1x16x16x32xbf16, #tpu.memory_space<vmem>>, vector<1x16x16x32xbf16>
    %17 = vector.shape_cast %16 : vector<1x16x16x32xbf16> to vector<16x16x32xbf16>
    %c1_31 = arith.constant 1 : index
    %c8 = arith.constant 8 : index
    %c0_32 = arith.constant 0 : index
    %18 = vector.load %arg7[%c1_31, %c8, %c0_32] : memref<18x32x32xbf16, #tpu.memory_space<vmem>>, vector<16x16x32xbf16>
    tpu.vector_store %arg7[%c1_31, %c8, %c0_32], %17 {strides = array<i32>} : memref<18x32x32xbf16, #tpu.memory_space<vmem>>, vector<16x16x32xbf16>,
    %c0_33 = arith.constant 0 : index
    %c0_34 = arith.constant 0 : index
    %c0_35 = arith.constant 0 : index
    %19 = vector.load %arg7[%c0_33, %c0_34, %c0_35] : memref<18x32x32xbf16, #tpu.memory_space<vmem>>, vector<16x32x32xbf16>
    %20 = vector.shape_cast %19 : vector<16x32x32xbf16> to vector<512x32xbf16>
    %c0_36 = arith.constant 0 : index
    %c0_37 = arith.constant 0 : index
    %c0_38 = arith.constant 0 : index
    %21 = vector.load %arg2[%c0_36, %c0_37, %c0_38] : memref<9x32x16xbf16, #tpu.memory_space<vmem>>, vector<1x32x16xbf16>
    %22 = vector.shape_cast %21 : vector<1x32x16xbf16> to vector<32x16xbf16>
    %cst_39 = arith.constant dense<0.000000e+00> : vector<512x16xf32>
    %23 = tpu.matmul %20, %22, %cst_39 {dimension_numbers = #tpu.dot_dimension_numbers<[1], [0], [0], [1], [0, 0, 1, 1], [], []>} : vector<512x32xbf16>, vector<32x16xbf16>, vector<512x16xf32> -> vector<512x16xf32>
    %24 = vector.shape_cast %23 : vector<512x16xf32> to vector<16x32x16xf32>
    %25 = vector.extract_strided_slice %24 {offsets = [0, 7, 0], sizes = [16, 16, 16], strides = [1, 1, 1]} : vector<16x32x16xf32> to vector<16x16x16xf32>
    %c1_40 = arith.constant 1 : index
    %c0_41 = arith.constant 0 : index
    %c0_42 = arith.constant 0 : index
    %26 = vector.load %arg2[%c1_40, %c0_41, %c0_42] : memref<9x32x16xbf16, #tpu.memory_space<vmem>>, vector<1x32x16xbf16>
    %27 = vector.shape_cast %26 : vector<1x32x16xbf16> to vector<32x16xbf16>
    %cst_43 = arith.constant dense<0.000000e+00> : vector<512x16xf32>
    %28 = tpu.matmul %20, %27, %cst_43 {dimension_numbers = #tpu.dot_dimension_numbers<[1], [0], [0], [1], [0, 0, 1, 1], [], []>} : vector<512x32xbf16>, vector<32x16xbf16>, vector<512x16xf32> -> vector<512x16xf32>
    %29 = vector.shape_cast %28 : vector<512x16xf32> to vector<16x32x16xf32>
    %30 = vector.extract_strided_slice %29 {offsets = [0, 8, 0], sizes = [16, 16, 16], strides = [1, 1, 1]} : vector<16x32x16xf32> to vector<16x16x16xf32>
    %31 = arith.addf %25, %30 : vector<16x16x16xf32>
    %c2 = arith.constant 2 : index
    %c0_44 = arith.constant 0 : index
    %c0_45 = arith.constant 0 : index
    %32 = vector.load %arg2[%c2, %c0_44, %c0_45] : memref<9x32x16xbf16, #tpu.memory_space<vmem>>, vector<1x32x16xbf16>
    %33 = vector.shape_cast %32 : vector<1x32x16xbf16> to vector<32x16xbf16>
    %cst_46 = arith.constant dense<0.000000e+00> : vector<512x16xf32>
    %34 = tpu.matmul %20, %33, %cst_46 {dimension_numbers = #tpu.dot_dimension_numbers<[1], [0], [0], [1], [0, 0, 1, 1], [], []>} : vector<512x32xbf16>, vector<32x16xbf16>, vector<512x16xf32> -> vector<512x16xf32>
    %35 = vector.shape_cast %34 : vector<512x16xf32> to vector<16x32x16xf32>
    %36 = vector.extract_strided_slice %35 {offsets = [0, 9, 0], sizes = [16, 16, 16], strides = [1, 1, 1]} : vector<16x32x16xf32> to vector<16x16x16xf32>
    %37 = arith.addf %31, %36 : vector<16x16x16xf32>
    %c1_47 = arith.constant 1 : index
    %c0_48 = arith.constant 0 : index
    %c0_49 = arith.constant 0 : index
    %38 = vector.load %arg7[%c1_47, %c0_48, %c0_49] : memref<18x32x32xbf16, #tpu.memory_space<vmem>>, vector<16x32x32xbf16>
    %39 = vector.shape_cast %38 : vector<16x32x32xbf16> to vector<512x32xbf16>
    %c3 = arith.constant 3 : index
    %c0_50 = arith.constant 0 : index
    %c0_51 = arith.constant 0 : index
    %40 = vector.load %arg2[%c3, %c0_50, %c0_51] : memref<9x32x16xbf16, #tpu.memory_space<vmem>>, vector<1x32x16xbf16>
    %41 = vector.shape_cast %40 : vector<1x32x16xbf16> to vector<32x16xbf16>
    %cst_52 = arith.constant dense<0.000000e+00> : vector<512x16xf32>
    %42 = tpu.matmul %39, %41, %cst_52 {dimension_numbers = #tpu.dot_dimension_numbers<[1], [0], [0], [1], [0, 0, 1, 1], [], []>} : vector<512x32xbf16>, vector<32x16xbf16>, vector<512x16xf32> -> vector<512x16xf32>
    %43 = vector.shape_cast %42 : vector<512x16xf32> to vector<16x32x16xf32>
    %44 = vector.extract_strided_slice %43 {offsets = [0, 7, 0], sizes = [16, 16, 16], strides = [1, 1, 1]} : vector<16x32x16xf32> to vector<16x16x16xf32>
    %45 = arith.addf %37, %44 : vector<16x16x16xf32>
    %c4 = arith.constant 4 : index
    %c0_53 = arith.constant 0 : index
    %c0_54 = arith.constant 0 : index
    %46 = vector.load %arg2[%c4, %c0_53, %c0_54] : memref<9x32x16xbf16, #tpu.memory_space<vmem>>, vector<1x32x16xbf16>
    %47 = vector.shape_cast %46 : vector<1x32x16xbf16> to vector<32x16xbf16>
    %cst_55 = arith.constant dense<0.000000e+00> : vector<512x16xf32>
    %48 = tpu.matmul %39, %47, %cst_55 {dimension_numbers = #tpu.dot_dimension_numbers<[1], [0], [0], [1], [0, 0, 1, 1], [], []>} : vector<512x32xbf16>, vector<32x16xbf16>, vector<512x16xf32> -> vector<512x16xf32>
    %49 = vector.shape_cast %48 : vector<512x16xf32> to vector<16x32x16xf32>
    %50 = vector.extract_strided_slice %49 {offsets = [0, 8, 0], sizes = [16, 16, 16], strides = [1, 1, 1]} : vector<16x32x16xf32> to vector<16x16x16xf32>
    %51 = arith.addf %45, %50 : vector<16x16x16xf32>
    %c5 = arith.constant 5 : index
    %c0_56 = arith.constant 0 : index
    %c0_57 = arith.constant 0 : index
    %52 = vector.load %arg2[%c5, %c0_56, %c0_57] : memref<9x32x16xbf16, #tpu.memory_space<vmem>>, vector<1x32x16xbf16>
    %53 = vector.shape_cast %52 : vector<1x32x16xbf16> to vector<32x16xbf16>
    %cst_58 = arith.constant dense<0.000000e+00> : vector<512x16xf32>
    %54 = tpu.matmul %39, %53, %cst_58 {dimension_numbers = #tpu.dot_dimension_numbers<[1], [0], [0], [1], [0, 0, 1, 1], [], []>} : vector<512x32xbf16>, vector<32x16xbf16>, vector<512x16xf32> -> vector<512x16xf32>
    %55 = vector.shape_cast %54 : vector<512x16xf32> to vector<16x32x16xf32>
    %56 = vector.extract_strided_slice %55 {offsets = [0, 9, 0], sizes = [16, 16, 16], strides = [1, 1, 1]} : vector<16x32x16xf32> to vector<16x16x16xf32>
    %57 = arith.addf %51, %56 : vector<16x16x16xf32>
    %c2_59 = arith.constant 2 : index
    %c0_60 = arith.constant 0 : index
    %c0_61 = arith.constant 0 : index
    %58 = vector.load %arg7[%c2_59, %c0_60, %c0_61] : memref<18x32x32xbf16, #tpu.memory_space<vmem>>, vector<16x32x32xbf16>
    %59 = vector.shape_cast %58 : vector<16x32x32xbf16> to vector<512x32xbf16>
    %c6 = arith.constant 6 : index
    %c0_62 = arith.constant 0 : index
    %c0_63 = arith.constant 0 : index
    %60 = vector.load %arg2[%c6, %c0_62, %c0_63] : memref<9x32x16xbf16, #tpu.memory_space<vmem>>, vector<1x32x16xbf16>
    %61 = vector.shape_cast %60 : vector<1x32x16xbf16> to vector<32x16xbf16>
    %cst_64 = arith.constant dense<0.000000e+00> : vector<512x16xf32>
    %62 = tpu.matmul %59, %61, %cst_64 {dimension_numbers = #tpu.dot_dimension_numbers<[1], [0], [0], [1], [0, 0, 1, 1], [], []>} : vector<512x32xbf16>, vector<32x16xbf16>, vector<512x16xf32> -> vector<512x16xf32>
    %63 = vector.shape_cast %62 : vector<512x16xf32> to vector<16x32x16xf32>
    %64 = vector.extract_strided_slice %63 {offsets = [0, 7, 0], sizes = [16, 16, 16], strides = [1, 1, 1]} : vector<16x32x16xf32> to vector<16x16x16xf32>
    %65 = arith.addf %57, %64 : vector<16x16x16xf32>
    %c7 = arith.constant 7 : index
    %c0_65 = arith.constant 0 : index
    %c0_66 = arith.constant 0 : index
    %66 = vector.load %arg2[%c7, %c0_65, %c0_66] : memref<9x32x16xbf16, #tpu.memory_space<vmem>>, vector<1x32x16xbf16>
    %67 = vector.shape_cast %66 : vector<1x32x16xbf16> to vector<32x16xbf16>
    %cst_67 = arith.constant dense<0.000000e+00> : vector<512x16xf32>
    %68 = tpu.matmul %59, %67, %cst_67 {dimension_numbers = #tpu.dot_dimension_numbers<[1], [0], [0], [1], [0, 0, 1, 1], [], []>} : vector<512x32xbf16>, vector<32x16xbf16>, vector<512x16xf32> -> vector<512x16xf32>
    %69 = vector.shape_cast %68 : vector<512x16xf32> to vector<16x32x16xf32>
    %70 = vector.extract_strided_slice %69 {offsets = [0, 8, 0], sizes = [16, 16, 16], strides = [1, 1, 1]} : vector<16x32x16xf32> to vector<16x16x16xf32>
    %71 = arith.addf %65, %70 : vector<16x16x16xf32>
    %c8_68 = arith.constant 8 : index
    %c0_69 = arith.constant 0 : index
    %c0_70 = arith.constant 0 : index
    %72 = vector.load %arg2[%c8_68, %c0_69, %c0_70] : memref<9x32x16xbf16, #tpu.memory_space<vmem>>, vector<1x32x16xbf16>
    %73 = vector.shape_cast %72 : vector<1x32x16xbf16> to vector<32x16xbf16>
    %cst_71 = arith.constant dense<0.000000e+00> : vector<512x16xf32>
    %74 = tpu.matmul %59, %73, %cst_71 {dimension_numbers = #tpu.dot_dimension_numbers<[1], [0], [0], [1], [0, 0, 1, 1], [], []>} : vector<512x32xbf16>, vector<32x16xbf16>, vector<512x16xf32> -> vector<512x16xf32>
    %75 = vector.shape_cast %74 : vector<512x16xf32> to vector<16x32x16xf32>
    %76 = vector.extract_strided_slice %75 {offsets = [0, 9, 0], sizes = [16, 16, 16], strides = [1, 1, 1]} : vector<16x32x16xf32> to vector<16x16x16xf32>
    %77 = arith.addf %71, %76 : vector<16x16x16xf32>
    %78 = vector.shape_cast %77 : vector<16x16x16xf32> to vector<256x16xf32>
    %c0_72 = arith.constant 0 : index
    %c0_73 = arith.constant 0 : index
    %79 = vector.load %arg3[%c0_72, %c0_73] : memref<1x16xf32, #tpu.memory_space<vmem>>, vector<1x16xf32>
    %80 = vector.broadcast %79 : vector<1x16xf32> to vector<256x16xf32>
    %81 = arith.addf %78, %80 : vector<256x16xf32>
    %cst_74 = arith.constant 0.000000e+00 : f32
    %82 = vector.broadcast %cst_74 : f32 to vector<256x16xf32>
    %83 = arith.subf %82, %81 : vector<256x16xf32>
    %84 = math.exp %83 : vector<256x16xf32>
    %cst_75 = arith.constant 1.000000e+00 : f32
    %85 = vector.broadcast %cst_75 : f32 to vector<256x16xf32>
    %86 = arith.addf %85, %84 : vector<256x16xf32>
    %87 = tpu.reciprocal %86 {approx = true} : vector<256x16xf32> -> vector<256x16xf32>
    %88 = arith.mulf %81, %87 : vector<256x16xf32>
    %89 = vector.shape_cast %88 : vector<256x16xf32> to vector<16x16x16xf32>
    %90 = arith.truncf %89 : vector<16x16x16xf32> to vector<16x16x16xbf16>
    %c1_76 = arith.constant 1 : index
    %c8_77 = arith.constant 8 : index
    %c0_78 = arith.constant 0 : index
    %91 = vector.load %arg8[%c1_76, %c8_77, %c0_78] : memref<18x32x16xbf16, #tpu.memory_space<vmem>>, vector<16x16x16xbf16>
    tpu.vector_store %arg8[%c1_76, %c8_77, %c0_78], %90 {strides = array<i32>} : memref<18x32x16xbf16, #tpu.memory_space<vmem>>, vector<16x16x16xbf16>,
    %c0_79 = arith.constant 0 : index
    %c0_80 = arith.constant 0 : index
    %c0_81 = arith.constant 0 : index
    %92 = vector.load %arg8[%c0_79, %c0_80, %c0_81] : memref<18x32x16xbf16, #tpu.memory_space<vmem>>, vector<16x32x16xbf16>
    %93 = vector.shape_cast %92 : vector<16x32x16xbf16> to vector<512x16xbf16>
    %c0_82 = arith.constant 0 : index
    %c0_83 = arith.constant 0 : index
    %c0_84 = arith.constant 0 : index
    %94 = vector.load %arg4[%c0_82, %c0_83, %c0_84] : memref<9x16x32xbf16, #tpu.memory_space<vmem>>, vector<1x16x32xbf16>
    %95 = vector.shape_cast %94 : vector<1x16x32xbf16> to vector<16x32xbf16>
    %cst_85 = arith.constant dense<0.000000e+00> : vector<512x32xf32>
    %96 = tpu.matmul %93, %95, %cst_85 {dimension_numbers = #tpu.dot_dimension_numbers<[1], [0], [0], [1], [0, 0, 1, 1], [], []>} : vector<512x16xbf16>, vector<16x32xbf16>, vector<512x32xf32> -> vector<512x32xf32>
    %97 = vector.shape_cast %96 : vector<512x32xf32> to vector<16x32x32xf32>
    %98 = vector.extract_strided_slice %97 {offsets = [0, 7, 0], sizes = [16, 16, 32], strides = [1, 1, 1]} : vector<16x32x32xf32> to vector<16x16x32xf32>
    %c1_86 = arith.constant 1 : index
    %c0_87 = arith.constant 0 : index
    %c0_88 = arith.constant 0 : index
    %99 = vector.load %arg4[%c1_86, %c0_87, %c0_88] : memref<9x16x32xbf16, #tpu.memory_space<vmem>>, vector<1x16x32xbf16>
    %100 = vector.shape_cast %99 : vector<1x16x32xbf16> to vector<16x32xbf16>
    %cst_89 = arith.constant dense<0.000000e+00> : vector<512x32xf32>
    %101 = tpu.matmul %93, %100, %cst_89 {dimension_numbers = #tpu.dot_dimension_numbers<[1], [0], [0], [1], [0, 0, 1, 1], [], []>} : vector<512x16xbf16>, vector<16x32xbf16>, vector<512x32xf32> -> vector<512x32xf32>
    %102 = vector.shape_cast %101 : vector<512x32xf32> to vector<16x32x32xf32>
    %103 = vector.extract_strided_slice %102 {offsets = [0, 8, 0], sizes = [16, 16, 32], strides = [1, 1, 1]} : vector<16x32x32xf32> to vector<16x16x32xf32>
    %104 = arith.addf %98, %103 : vector<16x16x32xf32>
    %c2_90 = arith.constant 2 : index
    %c0_91 = arith.constant 0 : index
    %c0_92 = arith.constant 0 : index
    %105 = vector.load %arg4[%c2_90, %c0_91, %c0_92] : memref<9x16x32xbf16, #tpu.memory_space<vmem>>, vector<1x16x32xbf16>
    %106 = vector.shape_cast %105 : vector<1x16x32xbf16> to vector<16x32xbf16>
    %cst_93 = arith.constant dense<0.000000e+00> : vector<512x32xf32>
    %107 = tpu.matmul %93, %106, %cst_93 {dimension_numbers = #tpu.dot_dimension_numbers<[1], [0], [0], [1], [0, 0, 1, 1], [], []>} : vector<512x16xbf16>, vector<16x32xbf16>, vector<512x32xf32> -> vector<512x32xf32>
    %108 = vector.shape_cast %107 : vector<512x32xf32> to vector<16x32x32xf32>
    %109 = vector.extract_strided_slice %108 {offsets = [0, 9, 0], sizes = [16, 16, 32], strides = [1, 1, 1]} : vector<16x32x32xf32> to vector<16x16x32xf32>
    %110 = arith.addf %104, %109 : vector<16x16x32xf32>
    %c1_94 = arith.constant 1 : index
    %c0_95 = arith.constant 0 : index
    %c0_96 = arith.constant 0 : index
    %111 = vector.load %arg8[%c1_94, %c0_95, %c0_96] : memref<18x32x16xbf16, #tpu.memory_space<vmem>>, vector<16x32x16xbf16>
    %112 = vector.shape_cast %111 : vector<16x32x16xbf16> to vector<512x16xbf16>
    %c3_97 = arith.constant 3 : index
    %c0_98 = arith.constant 0 : index
    %c0_99 = arith.constant 0 : index
    %113 = vector.load %arg4[%c3_97, %c0_98, %c0_99] : memref<9x16x32xbf16, #tpu.memory_space<vmem>>, vector<1x16x32xbf16>
    %114 = vector.shape_cast %113 : vector<1x16x32xbf16> to vector<16x32xbf16>
    %cst_100 = arith.constant dense<0.000000e+00> : vector<512x32xf32>
    %115 = tpu.matmul %112, %114, %cst_100 {dimension_numbers = #tpu.dot_dimension_numbers<[1], [0], [0], [1], [0, 0, 1, 1], [], []>} : vector<512x16xbf16>, vector<16x32xbf16>, vector<512x32xf32> -> vector<512x32xf32>
    %116 = vector.shape_cast %115 : vector<512x32xf32> to vector<16x32x32xf32>
    %117 = vector.extract_strided_slice %116 {offsets = [0, 7, 0], sizes = [16, 16, 32], strides = [1, 1, 1]} : vector<16x32x32xf32> to vector<16x16x32xf32>
    %118 = arith.addf %110, %117 : vector<16x16x32xf32>
    %c4_101 = arith.constant 4 : index
    %c0_102 = arith.constant 0 : index
    %c0_103 = arith.constant 0 : index
    %119 = vector.load %arg4[%c4_101, %c0_102, %c0_103] : memref<9x16x32xbf16, #tpu.memory_space<vmem>>, vector<1x16x32xbf16>
    %120 = vector.shape_cast %119 : vector<1x16x32xbf16> to vector<16x32xbf16>
    %cst_104 = arith.constant dense<0.000000e+00> : vector<512x32xf32>
    %121 = tpu.matmul %112, %120, %cst_104 {dimension_numbers = #tpu.dot_dimension_numbers<[1], [0], [0], [1], [0, 0, 1, 1], [], []>} : vector<512x16xbf16>, vector<16x32xbf16>, vector<512x32xf32> -> vector<512x32xf32>
    %122 = vector.shape_cast %121 : vector<512x32xf32> to vector<16x32x32xf32>
    %123 = vector.extract_strided_slice %122 {offsets = [0, 8, 0], sizes = [16, 16, 32], strides = [1, 1, 1]} : vector<16x32x32xf32> to vector<16x16x32xf32>
    %124 = arith.addf %118, %123 : vector<16x16x32xf32>
    %c5_105 = arith.constant 5 : index
    %c0_106 = arith.constant 0 : index
    %c0_107 = arith.constant 0 : index
    %125 = vector.load %arg4[%c5_105, %c0_106, %c0_107] : memref<9x16x32xbf16, #tpu.memory_space<vmem>>, vector<1x16x32xbf16>
    %126 = vector.shape_cast %125 : vector<1x16x32xbf16> to vector<16x32xbf16>
    %cst_108 = arith.constant dense<0.000000e+00> : vector<512x32xf32>
    %127 = tpu.matmul %112, %126, %cst_108 {dimension_numbers = #tpu.dot_dimension_numbers<[1], [0], [0], [1], [0, 0, 1, 1], [], []>} : vector<512x16xbf16>, vector<16x32xbf16>, vector<512x32xf32> -> vector<512x32xf32>
    %128 = vector.shape_cast %127 : vector<512x32xf32> to vector<16x32x32xf32>
    %129 = vector.extract_strided_slice %128 {offsets = [0, 9, 0], sizes = [16, 16, 32], strides = [1, 1, 1]} : vector<16x32x32xf32> to vector<16x16x32xf32>
    %130 = arith.addf %124, %129 : vector<16x16x32xf32>
    %c2_109 = arith.constant 2 : index
    %c0_110 = arith.constant 0 : index
    %c0_111 = arith.constant 0 : index
    %131 = vector.load %arg8[%c2_109, %c0_110, %c0_111] : memref<18x32x16xbf16, #tpu.memory_space<vmem>>, vector<16x32x16xbf16>
    %132 = vector.shape_cast %131 : vector<16x32x16xbf16> to vector<512x16xbf16>
    %c6_112 = arith.constant 6 : index
    %c0_113 = arith.constant 0 : index
    %c0_114 = arith.constant 0 : index
    %133 = vector.load %arg4[%c6_112, %c0_113, %c0_114] : memref<9x16x32xbf16, #tpu.memory_space<vmem>>, vector<1x16x32xbf16>
    %134 = vector.shape_cast %133 : vector<1x16x32xbf16> to vector<16x32xbf16>
    %cst_115 = arith.constant dense<0.000000e+00> : vector<512x32xf32>
    %135 = tpu.matmul %132, %134, %cst_115 {dimension_numbers = #tpu.dot_dimension_numbers<[1], [0], [0], [1], [0, 0, 1, 1], [], []>} : vector<512x16xbf16>, vector<16x32xbf16>, vector<512x32xf32> -> vector<512x32xf32>
    %136 = vector.shape_cast %135 : vector<512x32xf32> to vector<16x32x32xf32>
    %137 = vector.extract_strided_slice %136 {offsets = [0, 7, 0], sizes = [16, 16, 32], strides = [1, 1, 1]} : vector<16x32x32xf32> to vector<16x16x32xf32>
    %138 = arith.addf %130, %137 : vector<16x16x32xf32>
    %c7_116 = arith.constant 7 : index
    %c0_117 = arith.constant 0 : index
    %c0_118 = arith.constant 0 : index
    %139 = vector.load %arg4[%c7_116, %c0_117, %c0_118] : memref<9x16x32xbf16, #tpu.memory_space<vmem>>, vector<1x16x32xbf16>
    %140 = vector.shape_cast %139 : vector<1x16x32xbf16> to vector<16x32xbf16>
    %cst_119 = arith.constant dense<0.000000e+00> : vector<512x32xf32>
    %141 = tpu.matmul %132, %140, %cst_119 {dimension_numbers = #tpu.dot_dimension_numbers<[1], [0], [0], [1], [0, 0, 1, 1], [], []>} : vector<512x16xbf16>, vector<16x32xbf16>, vector<512x32xf32> -> vector<512x32xf32>
    %142 = vector.shape_cast %141 : vector<512x32xf32> to vector<16x32x32xf32>
    %143 = vector.extract_strided_slice %142 {offsets = [0, 8, 0], sizes = [16, 16, 32], strides = [1, 1, 1]} : vector<16x32x32xf32> to vector<16x16x32xf32>
    %144 = arith.addf %138, %143 : vector<16x16x32xf32>
    %c8_120 = arith.constant 8 : index
    %c0_121 = arith.constant 0 : index
    %c0_122 = arith.constant 0 : index
    %145 = vector.load %arg4[%c8_120, %c0_121, %c0_122] : memref<9x16x32xbf16, #tpu.memory_space<vmem>>, vector<1x16x32xbf16>
    %146 = vector.shape_cast %145 : vector<1x16x32xbf16> to vector<16x32xbf16>
    %cst_123 = arith.constant dense<0.000000e+00> : vector<512x32xf32>
    %147 = tpu.matmul %132, %146, %cst_123 {dimension_numbers = #tpu.dot_dimension_numbers<[1], [0], [0], [1], [0, 0, 1, 1], [], []>} : vector<512x16xbf16>, vector<16x32xbf16>, vector<512x32xf32> -> vector<512x32xf32>
    %148 = vector.shape_cast %147 : vector<512x32xf32> to vector<16x32x32xf32>
    %149 = vector.extract_strided_slice %148 {offsets = [0, 9, 0], sizes = [16, 16, 32], strides = [1, 1, 1]} : vector<16x32x32xf32> to vector<16x16x32xf32>
    %150 = arith.addf %144, %149 : vector<16x16x32xf32>
    %151 = vector.shape_cast %150 : vector<16x16x32xf32> to vector<256x32xf32>
    %c0_124 = arith.constant 0 : index
    %c0_125 = arith.constant 0 : index
    %152 = vector.load %arg5[%c0_124, %c0_125] : memref<1x32xf32, #tpu.memory_space<vmem>>, vector<1x32xf32>
    %153 = vector.broadcast %152 : vector<1x32xf32> to vector<256x32xf32>
    %154 = arith.addf %151, %153 : vector<256x32xf32>
    %cst_126 = arith.constant 0.000000e+00 : f32
    %155 = vector.broadcast %cst_126 : f32 to vector<256x32xf32>
    %156 = arith.subf %155, %154 : vector<256x32xf32>
    %157 = math.exp %156 : vector<256x32xf32>
    %cst_127 = arith.constant 1.000000e+00 : f32
    %158 = vector.broadcast %cst_127 : f32 to vector<256x32xf32>
    %159 = arith.addf %158, %157 : vector<256x32xf32>
    %160 = tpu.reciprocal %159 {approx = true} : vector<256x32xf32> -> vector<256x32xf32>
    %161 = arith.mulf %154, %160 : vector<256x32xf32>
    %162 = vector.shape_cast %17 : vector<16x16x32xbf16> to vector<256x32xbf16>
    %163 = arith.extf %162 : vector<256x32xbf16> to vector<256x32xf32>
    %164 = arith.addf %161, %163 : vector<256x32xf32>
    %165 = vector.shape_cast %164 : vector<256x32xf32> to vector<16x16x32xf32>
    %c0_128 = arith.constant 0 : index
    %c0_129 = arith.constant 0 : index
    %c0_130 = arith.constant 0 : index
    %c0_131 = arith.constant 0 : index
    %166 = vector.load %arg6[%c0_128, %c0_129, %c0_130, %c0_131] : memref<1x16x16x32xf32, #tpu.memory_space<vmem>>, vector<1x16x16x32xf32>
    %167 = vector.shape_cast %166 : vector<1x16x16x32xf32> to vector<16x16x32xf32>
    %168 = vector.shape_cast %165 : vector<16x16x32xf32> to vector<1x16x16x32xf32>
    tpu.vector_store %arg6[%c0_128, %c0_129, %c0_130, %c0_131], %168 {strides = array<i32>} : memref<1x16x16x32xf32, #tpu.memory_space<vmem>>, vector<1x16x16x32xf32>,
    return
  }
  func.func @transform_0(%arg0: i32) -> (i32, i32, i32, i32) {
    %c0_i32 = arith.constant 0 : i32
    %c0_i32_0 = arith.constant 0 : i32
    %c0_i32_1 = arith.constant 0 : i32
    %c0_i32_2 = arith.constant 0 : i32
    return %arg0, %c0_i32, %c0_i32_0, %c0_i32_1 : i32, i32, i32, i32
  }
  func.func @transform_1(%arg0: i32) -> (i32, i32, i32) {
    %c0_i32 = arith.constant 0 : i32
    %c0_i32_0 = arith.constant 0 : i32
    %c0_i32_1 = arith.constant 0 : i32
    %c0_i32_2 = arith.constant 0 : i32
    return %c0_i32, %c0_i32_0, %c0_i32_1 : i32, i32, i32
  }
  func.func @transform_2(%arg0: i32) -> (i32, i32) {
    %c0_i32 = arith.constant 0 : i32
    %c0_i32_0 = arith.constant 0 : i32
    %c0_i32_1 = arith.constant 0 : i32
    return %c0_i32, %c0_i32_0 : i32, i32
  }
  func.func @transform_3(%arg0: i32) -> (i32, i32, i32) {
    %c0_i32 = arith.constant 0 : i32
    %c0_i32_0 = arith.constant 0 : i32
    %c0_i32_1 = arith.constant 0 : i32
    %c0_i32_2 = arith.constant 0 : i32
    return %c0_i32, %c0_i32_0, %c0_i32_1 : i32, i32, i32
  }
  func.func @transform_4(%arg0: i32) -> (i32, i32) {
    %c0_i32 = arith.constant 0 : i32
    %c0_i32_0 = arith.constant 0 : i32
    %c0_i32_1 = arith.constant 0 : i32
    return %c0_i32, %c0_i32_0 : i32, i32
  }
  func.func @transform_5(%arg0: i32) -> (i32, i32, i32, i32) {
    %c0_i32 = arith.constant 0 : i32
    %c0_i32_0 = arith.constant 0 : i32
    %c0_i32_1 = arith.constant 0 : i32
    %c0_i32_2 = arith.constant 0 : i32
    return %arg0, %c0_i32, %c0_i32_0, %c0_i32_1 : i32, i32, i32, i32
  }
}

</mosaic_0001>

<bundles_post_ra>
// kernel: tpu_custom_call.1
= control target key start
LH: loop header
LB: loop body
LE: loop exit
PB: predicated region body
PF: predicated region fallthrough
CT: control target
= control target key end

     0   :  { %10 = vsyncpa [#allocation5], 0  ;;  %s14905_s0 = inlined_call_operand.hbm [shape: bf16[2,16,16,32], index: 0, kind: input, shape index: {}]   ;;  %s14906_s1 = inlined_call_operand.vmem [shape: bf16[9,32,16], index: 1, kind: input, shape index: {}]   ;;  %s14907_s2 = inlined_call_operand.vmem [shape: f32[1,16], index: 2, kind: input, shape index: {}]   ;;  %s14908_s3 = inlined_call_operand.vmem [shape: bf16[9,16,32], index: 3, kind: input, shape index: {}]   ;;  %s14909_s4 = inlined_call_operand.vmem [shape: f32[1,32], index: 4, kind: input, shape index: {}]   ;;  %s14910_s5 = inlined_call_operand.hbm [shape: f32[2,16,16,32], index: 5, kind: output, shape index: {}]  }
   0x1   :  { %12 = vsyncpa [#allocation5 + $0x1], 0 }
   0x2   :  { %13 = vsyncpa [#allocation6], 0 }
   0x3   :  { %15 = vsyncpa [#allocation6 + $0x1], 0  ;;  %s11094_s18 = smov 0   ;;  %s11096_s19 = smov 0  }
   0x4   :  { %s11098_s20 = smov 0   ;;  %s11100_s21 = smov 0  }
   0x5 LB: > { %s11115_s22 = sadd.s32 4294967295, %s11057_s21   ;;  %s8830_s23 = sadd.s32 4294967294, %s11057_s21   ;;  %s11057_s21 = sphi %s11100_s21, %s15242_s21   ;;  %s11053_s20 = sphi %s11098_s20, %s15241_s20   ;;  %s11049_s19 = sphi %s11096_s19, %s15240_s19   ;;  %s11045_s18 = sphi %s11094_s18, %s15239_s18  }
   0x6   : > { %s11119_s24 = sadd.s32 1, %s11057_s21   ;;  %s28_s25 = sadd.s32 1, %s11053_s20 }
   0x7   : > { %s25_s26 = ssub.s32 %s11057_s21, %s11119_s24  ;;  %p35_p0 = scmp.ne.s32.totalorder %s11053_s20, %s11049_s19 }
   0x8   : > { %p26_p1 = scmp.eq.s32.totalorder %s25_s26, 0  ;;  %p36_p2 = scmp.eq.s32.totalorder %s11057_s21, 0 }
   0x9   : > { %p41_p3 = scmp.ne.s32.totalorder %s11049_s19, %s11045_s18  ;;  %p42_p4 = scmp.eq.s32.totalorder %s11115_s22, 0 }
   0xa   : > { %s11131_s27 = scalar_select %p26_p1, %s11053_s20, %s28_s25  }
   0xb   : > { %p11133_p5 = por %p36_p2, %p35_p0  ;;  %p11137_p6 = por %p42_p4, %p41_p3 }
   0xc   : > { %p149_p7 = scmp.eq.s32.totalorder %s11115_s22, 1  ;;  %p155_p8 = scmp.eq.s32.totalorder %s8830_s23, 1 }
   0xd   : > { %p10581_p10 = scmp.lt.s32.totalorder %s11057_s21, 2  ;;  %s187_s7 = sand.u32 1, %s11053_s20  }
   0xe   : > { %p11144_p11 = por %p149_p7, %p35_p0  ;;  %p11148_p12 = por %p155_p8, %p41_p3 }
   0xf   : > { %s10344_s8 = sshll.u32 %s11057_s21, 7  ;;  %s8833_s9 = sshll.u32 %s187_s7, 7 }
  0x10   : > { %s196_s12 = scalar_lea.hbm %s14905_s0, %s10344_s8  ;;  %s191_s14 = scalar_lea.vmem [#allocation4], %s8833_s9 }
  0x11   : > { %s197_s13 = sshll.u32 %s196_s12, 4  ;;  %s199_s15 = sshll.u32 %s191_s14, 4  ;;  %s198_s13 = int_to_ptr.hbm [resolvable:$true] %s197_s13  ;;  %s200_s15 = int_to_ptr.vmem [resolvable:$true] %s199_s15 }
  0x12   : > { %p11159_p13 = pnand %p10581_p10, %p11133_p5  ;;  %p8836_p0 = scmp.ge.s32.totalorder %s11057_s21, 1 }
  0x13   : > { %p207_p1 = scmp.lt.s32.totalorder %s11057_s21, 3  ;;  %s188_s17 = scalar_lea.sflag [#allocation5], %s187_s7 }
  0x14   : > { %s10961_s23 = sshra.s32 %s198_s13, 4  ;;  %p10965_p3 = pneg %p11159_p13  ;;  %s10962_s23 = int_to_ptr.hbm [resolvable:$true] %s10961_s23 }
  0x15   : > { %s10963_s25 = scalar_lea.hbm %s10962_s23, 128  ;;  %s10968_s28 = scalar_lea.hbm %s14905_s0, 256 }
  0x16   : > { %p10964_p2 = scmp.ne.s32.totalorder %s10962_s23, %s10963_s25  ;;  %p10969_p5 = scmp.lt.s32.totalorder %s10962_s23, %s14905_s0 }
  0x17   : > { %p10970_p8 = scmp.lt.s32.totalorder %s10968_s28, %s10963_s25 }
  0x18   : > { %p10966_p4 = pnand %p10965_p3, %p10964_p2 }
  0x19   : > { %p10971_p10 = por %p10970_p8, %p10969_p5 }
  0x1a   : > { %p10967_p7 = pneg %p10966_p4 }
  0x1c   : > { %p10972_p9 = pnand %p10971_p10, %p10967_p7 }
  0x1e   : > { %10975 = shalt.err (!%p10972_p9)
}
  0x1f   : > { %s11059_s7 = smov 64   ;;  %s11060_s11 = smov 4  }
  0x20   : > { %10576 = dma.hbm_to_vmem [thread:$0]  (!%p11159_p13), %s198_s13, 2048, %s200_s15, %s188_s17, %s11059_s7, %s11059_s7, %s11060_s11  }
  0x21   : > { %p208_p2 = pnand %p8836_p0, %p207_p1 }
  0x23   : > { %211 = sbr.rel (%p208_p2) target bundleno = 2717 (0xa9d), region = 40 }
  0x28   : > { %s11180_s12 = sand.u32 1, %s11049_s19  }
  0x29   : > { %s8837_s14 = sshll.u32 %s11180_s12, 7  ;;  %s214_s23 = scalar_lea.sflag [#allocation5], %s11180_s12 }
  0x2a   : > { %s11184_s25 = scalar_lea.vmem [#allocation4], %s8837_s14 }
  0x2b   : > { %11036 = dma.done.wait (%p11137_p6), %s214_s23, 2048  }
  0x2c   : > { %11038 = vsyncadd (%p11137_p6), %s214_s23, 4294965248  ;;  %vm246_vm0 = vcmask 257024   ;;  %v14911_v0 = vmov 0   ;;  %v10378_v1 = vld [vmem:[%s14906_s1 + $0x8] sm:$0xff]  ;;  %v10380_v2 = vld [vmem:[%s14906_s1 + $0x18] sm:$0xff]  ;;  %vm636_vm1 = vcmask 261120  }
  0x2d   : > { %247 = vst.msk [vmem:[#allocation2] sm:$0xf] %vm246_vm0, %v14911_v0  ;;  %739 = vmatpush.bf16.msra.mxu0 %v10378_v1  ;;  %909 = vmatpush.bf16.msra.mxu1 %v10380_v2  ;;  %v10377_v3 = vld [vmem:[%s14906_s1] sm:$0xff]  ;;  %v10379_v4 = vld [vmem:[%s14906_s1 + $0x10] sm:$0xff]  ;;  %v10416_v6 = vld [vmem:[%s14906_s1 + $0x38] sm:$0xff]  ;;  %vm1072_vm2 = vcmask 1046528  }
  0x2e   : > { %248 = vst.msk [vmem:[#allocation2 + $0x4] sm:$0xf] %vm246_vm0, %v14911_v0  ;;  %10565 = vmatpush.bf16.msra.mxu2 %v10378_v1  ;;  %10567 = vmatpush.bf16.msra.mxu3 %v10380_v2  ;;  %v10418_v7 = vld [vmem:[%s14906_s1 + $0x48] sm:$0xff]  ;;  %v11300_v10 = vld [vmem:[%s11184_s25 + $0x38] sm:$0xf]  ;;  %v10415_v42 = vld [vmem:[%s14906_s1 + $0x30] sm:$0xff] }
  0x2f   : > { %249 = vst.msk [vmem:[#allocation2 + $0x8] sm:$0xf] %vm246_vm0, %v14911_v0  ;;  %v10382_v8 = vld [vmem:[%s14906_s1 + $0x28] sm:$0xff]  ;;  %v11305_v11 = vld [vmem:[%s11184_s25 + $0x3c] sm:$0xf]  ;;  %v10417_v45 = vld [vmem:[%s14906_s1 + $0x40] sm:$0xff] }
  0x30   : > { %250 = vst.msk [vmem:[#allocation2 + $0xc] sm:$0xf] %vm246_vm0, %v14911_v0  ;;  %v11310_v12 = vld [vmem:[%s11184_s25] sm:$0xf]  ;;  %v11328_v16 = vld [vmem:[%s11184_s25 + $0x4] sm:$0xf] }
  0x31   : > { %252 = vst.msk [vmem:[#allocation2 + $0x110] sm:$0xf] %vm246_vm0, %v14911_v0  ;;  %740 = vmatpush.bf16.msra.mxu0 %v10377_v3  ;;  %910 = vmatpush.bf16.msra.mxu1 %v10379_v4  ;;  %v11315_v13 = vld [vmem:[%s11184_s25 + $0x40] sm:$0xf]  ;;  %v11331_v17 = vld [vmem:[%s11184_s25 + $0x44] sm:$0xf] }
  0x32   : > { %253 = vst.msk [vmem:[#allocation2 + $0x114] sm:$0xf] %vm246_vm0, %v14911_v0  ;;  %10566 = vmatpush.bf16.msra.mxu2 %v10377_v3  ;;  %10568 = vmatpush.bf16.msra.mxu3 %v10379_v4  ;;  %v11346_v20 = vld [vmem:[%s11184_s25 + $0x8] sm:$0xf]  ;;  %v11364_v24 = vld [vmem:[%s11184_s25 + $0xc] sm:$0xf] }
  0x33   : > { %254 = vst.msk [vmem:[#allocation2 + $0x118] sm:$0xf] %vm246_vm0, %v14911_v0  ;;  %v11349_v21 = vld [vmem:[%s11184_s25 + $0x48] sm:$0xf]  ;;  %v11367_v25 = vld [vmem:[%s11184_s25 + $0x4c] sm:$0xf] }
  0x34   : > { %255 = vst.msk [vmem:[#allocation2 + $0x11c] sm:$0xf] %vm246_vm0, %v14911_v0  ;;  %v11382_v28 = vld [vmem:[%s11184_s25 + $0x10] sm:$0xf]  ;;  %v11400_v32 = vld [vmem:[%s11184_s25 + $0x14] sm:$0xf] }
  0x35   : > { %257 = vst.msk [vmem:[#allocation2 + $0x10] sm:$0xf] %vm246_vm0, %v14911_v0  ;;  %v11224_v5 = vld [vmem:[#allocation2] sm:$0xff]  ;;  %2173 = vmatpush.bf16.msrb.mxu0 %v10418_v7  ;;  %v11385_v29 = vld [vmem:[%s11184_s25 + $0x50] sm:$0xf]  ;;  %v10420_v4 = vld [vmem:[%s14906_s1 + $0x58] sm:$0xff] }
  0x36   : > { %258 = vst.msk [vmem:[#allocation2 + $0x20] sm:$0xf] %vm246_vm0, %v14911_v0  ;;  %8975 = vmatmul.msk.bf16.vlgmr.msra.gmra.mxu0 %vm636_vm1, %v11224_v5  ;;  %9019 = vmatmul.msk.bf16.vlgmr.msra.gmra.mxu1 %vm636_vm1, %v11224_v5  ;;  %v11403_v33 = vld [vmem:[%s11184_s25 + $0x54] sm:$0xf]  ;;  %v11418_v36 = vld [vmem:[%s11184_s25 + $0x18] sm:$0xf] }
  0x37   : > { %259 = vst.msk [vmem:[#allocation2 + $0x30] sm:$0xf] %vm246_vm0, %v14911_v0  ;;  %1955 = vmatpush.bf16.msrb.mxu3 %v10416_v6  ;;  %1240 = vmatpush.bf16.msrb.mxu2 %v10382_v8  ;;  %v11273_v9 = vld [vmem:[#allocation2 + $0x8] sm:$0xff]  ;;  %v11421_v37 = vld [vmem:[%s11184_s25 + $0x58] sm:$0xf]  ;;  %v10381_v46 = vld [vmem:[%s14906_s1 + $0x20] sm:$0xff] }
  0x38   : > { %260 = vst.msk [vmem:[#allocation2 + $0x40] sm:$0xf] %vm246_vm0, %v14911_v0  ;;  %v11449_v48 = vld [vmem:[%s11184_s25 + $0x1c] sm:$0xf]  ;;  %v11474_v61 = vld [vmem:[%s11184_s25 + $0x20] sm:$0xf]  ;;  %2503 = vmatpush.bf16.msrb.mxu1 %v10420_v4 }
  0x39   : > { %261 = vst.msk [vmem:[#allocation2 + $0x50] sm:$0xf] %vm246_vm0, %v14911_v0  ;;  %2174 = vmatpush.bf16.msrb.mxu0 %v10417_v45  ;;  %v11456_v50 = vld [vmem:[%s11184_s25 + $0x5c] sm:$0xf]  ;;  %v11479_v62 = vld [vmem:[%s11184_s25 + $0x60] sm:$0xf] }
  0x3a   : > { %262 = vst.msk [vmem:[#allocation2 + $0x60] sm:$0xf] %vm246_vm0, %v14911_v0  ;;  %v11495_v8 = vld [vmem:[%s11184_s25 + $0x24] sm:$0xf]  ;;  %vm1435_vm3 = vcmask 1045504   ;;  %vm289_vm4 = vcmask 125952  }
  0x3b   : > { %263 = vst.msk [vmem:[#allocation2 + $0x70] sm:$0xf] %vm246_vm0, %v14911_v0  ;;  %1956 = vmatpush.bf16.msrb.mxu3 %v10415_v42  ;;  %1241 = vmatpush.bf16.msrb.mxu2 %v10381_v46  ;;  %vm4822_vm5 = vcmask 130048   ;;  %vm4185_vm6 = vcmask 1040384   ;;  %s8838_s17 = sshll.u32 %s11180_s12, 8  ;;  %s10564_s9 = sshll.u32 %s11115_s22, 8 }
  0x3c   : > { %264 = vst.msk [vmem:[#allocation2 + $0x80] sm:$0xf] %vm246_vm0, %v14911_v0  ;;  %s14270_s26 = scalar_lea.vmem [#allocation7], %s8838_s17  ;;  %s8753_s7 = scalar_lea.hbm %s14910_s5, %s10564_s9 }
  0x3d   : > { %265 = vst.msk [vmem:[#allocation2 + $0x90] sm:$0xf] %vm246_vm0, %v14911_v0  ;;  %s8754_s11 = sshll.u32 %s14270_s26, 4  ;;  %s8756_s14 = sshll.u32 %s8753_s7, 4  ;;  %s8755_s11 = int_to_ptr.vmem [resolvable:$true] %s8754_s11  ;;  %s8757_s14 = int_to_ptr.hbm [resolvable:$true] %s8756_s14 }
  0x3e   : > { %266 = vst.msk [vmem:[#allocation2 + $0xa0] sm:$0xf] %vm246_vm0, %v14911_v0  ;;  %s8742_s22 = scalar_lea.sflag [#allocation6], %s11180_s12  ;;  %s11005_s23 = sshra.s32 %s8757_s14, 4  ;;  %s11006_s23 = int_to_ptr.hbm [resolvable:$true] %s11005_s23 }
  0x3f   : > { %267 = vst.msk [vmem:[#allocation2 + $0xb0] sm:$0xf] %vm246_vm0, %v14911_v0  ;;  %s11007_s29 = scalar_lea.hbm %s11006_s23, 256  ;;  %s11011_s16 = scalar_lea.hbm %s14910_s5, 512 }
  0x40   : > { %268 = vst.msk [vmem:[#allocation2 + $0xc0] sm:$0xf] %vm246_vm0, %v14911_v0  ;;  %p11008_p6 = scmp.ne.s32.totalorder %s11006_s23, %s11007_s29  ;;  %p11012_p0 = scmp.lt.s32.totalorder %s11006_s23, %s14910_s5 }
  0x41   : > { %269 = vst.msk [vmem:[#allocation2 + $0xd0] sm:$0xf] %vm246_vm0, %v14911_v0  ;;  %p11013_p1 = scmp.lt.s32.totalorder %s11011_s16, %s11007_s29 }
  0x42   : > { %270 = vst.msk [vmem:[#allocation2 + $0xe0] sm:$0xf] %vm246_vm0, %v14911_v0  ;;  %p11009_p9 = pnand %p11008_p6, %p11144_p11 }
  0x43   : > { %271 = vst.msk [vmem:[#allocation2 + $0xf0] sm:$0xf] %vm246_vm0, %v14911_v0  ;;  %p11014_p3 = por %p11013_p1, %p11012_p0 }
  0x44   : > { %272 = vst.msk [vmem:[#allocation2 + $0x100] sm:$0xf] %vm246_vm0, %v14911_v0  ;;  %p11010_p13 = pneg %p11009_p9 }
  0x45   : > { %273 = vst.msk [vmem:[#allocation2 + $0x1c] sm:$0xf] %vm246_vm0, %v14911_v0 }
  0x46   : > { %274 = vst.msk [vmem:[#allocation2 + $0x2c] sm:$0xf] %vm246_vm0, %v14911_v0  ;;  %8976 = vmatmul.msk.bf16.gmra.mxu0 %vm636_vm1, %v11273_v9  ;;  %9020 = vmatmul.msk.bf16.gmra.mxu1 %vm636_vm1, %v11273_v9  ;;  %p11015_p4 = pnand %p11014_p3, %p11010_p13 }
  0x47   : > { %275 = vst.msk [vmem:[#allocation2 + $0x3c] sm:$0xf] %vm246_vm0, %v14911_v0 }
  0x48   : > { %276 = vst.msk [vmem:[#allocation2 + $0x4c] sm:$0xf] %vm246_vm0, %v14911_v0 }
  0x49   : > { %277 = vst.msk [vmem:[#allocation2 + $0x5c] sm:$0xf] %vm246_vm0, %v14911_v0 }
  0x4a   : > { %278 = vst.msk [vmem:[#allocation2 + $0x6c] sm:$0xf] %vm246_vm0, %v14911_v0 }
  0x4b   : > { %279 = vst.msk [vmem:[#allocation2 + $0x7c] sm:$0xf] %vm246_vm0, %v14911_v0 }
  0x4c   : > { %280 = vst.msk [vmem:[#allocation2 + $0x8c] sm:$0xf] %vm246_vm0, %v14911_v0 }
  0x4d   : > { %281 = vst.msk [vmem:[#allocation2 + $0x9c] sm:$0xf] %vm246_vm0, %v14911_v0 }
  0x4e   : > { %282 = vst.msk [vmem:[#allocation2 + $0xac] sm:$0xf] %vm246_vm0, %v14911_v0 }
  0x4f   : > { %283 = vst.msk [vmem:[#allocation2 + $0xbc] sm:$0xf] %vm246_vm0, %v14911_v0 }
  0x50   : > { %284 = vst.msk [vmem:[#allocation2 + $0xcc] sm:$0xf] %vm246_vm0, %v14911_v0 }
  0x51   : > { %285 = vst.msk [vmem:[#allocation2 + $0xdc] sm:$0xf] %vm246_vm0, %v14911_v0 }
  0x52   : > { %286 = vst.msk [vmem:[#allocation2 + $0xec] sm:$0xf] %vm246_vm0, %v14911_v0 }
  0x53   : > { %14976 = vst [vmem:[#allocation10_spill] sm:$0xff] %v11300_v10 }
  0x54   : > { %287 = vst.msk [vmem:[#allocation2 + $0xfc] sm:$0xf] %vm246_vm0, %v14911_v0 }
  0x55   : > { %14977 = vst [vmem:[#allocation11_spill] sm:$0xff] %v11305_v11 }
  0x56   : > { %288 = vst.msk [vmem:[#allocation2 + $0x10c] sm:$0xf] %vm246_vm0, %v14911_v0 }
  0x57   : > { %14978 = vst [vmem:[#allocation12_spill] sm:$0xff] %v11310_v12 }
  0x58   : > { %378 = vst.msk [vmem:[#allocation2 + $0x84] sm:$0xf] %vm246_vm0, %v11300_v10 }
  0x59   : > { %14979 = vst [vmem:[#allocation13_spill] sm:$0xff] %v11315_v13 }
  0x5a   : > { %379 = vst.msk [vmem:[#allocation2 + $0x88] sm:$0xf] %vm246_vm0, %v11305_v11 }
  0x5b   : > { %364 = vst.msk [vmem:[#allocation2 + $0x14] sm:$0xf] %vm246_vm0, %v11310_v12 }
  0x5c   : > { %380 = vst.msk [vmem:[#allocation2 + $0x94] sm:$0xf] %vm246_vm0, %v11315_v13 }
  0x5d   : > { %14980 = vst [vmem:[#allocation14_spill] sm:$0xff] %v11328_v16 }
  0x5e   : > { %14981 = vst [vmem:[#allocation15_spill] sm:$0xff] %v11331_v17 }
  0x5f   : > { %v10361_v14 = vld [vmem:[#allocation2 + $0x80] sm:$0xff]  ;;  %365 = vst.msk [vmem:[#allocation2 + $0x18] sm:$0xf] %vm246_vm0, %v11328_v16 }
  0x60   : > { %8991 = vmatmul.msk.bf16.vlgmr.msra.gmra.mxu2 %vm636_vm1, %v10361_v14  ;;  %9035 = vmatmul.msk.bf16.vlgmr.msra.gmra.mxu3 %vm636_vm1, %v10361_v14  ;;  %381 = vst.msk [vmem:[#allocation2 + $0x98] sm:$0xf] %vm246_vm0, %v11331_v17  ;;  %v11500_v14 = vld [vmem:[%s11184_s25 + $0x64] sm:$0xf] }
  0x61   : > { %v10362_v18 = vld [vmem:[#allocation2 + $0x88] sm:$0xff]  ;;  %14982 = vst [vmem:[#allocation16_spill] sm:$0xff] %v11346_v20 }
  0x62   : > { %v11325_v15 = vld [vmem:[#allocation2 + $0x10] sm:$0xff]  ;;  %14983 = vst [vmem:[#allocation17_spill] sm:$0xff] %v11349_v21 }
  0x63   : > { %8977 = vmatmul.msk.bf16.gmra.mxu0 %vm636_vm1, %v11325_v15  ;;  %9021 = vmatmul.msk.bf16.gmra.mxu1 %vm636_vm1, %v11325_v15  ;;  %366 = vst.msk [vmem:[#allocation2 + $0x24] sm:$0xf] %vm246_vm0, %v11346_v20  ;;  %v10363_v22 = vld [vmem:[#allocation2 + $0x90] sm:$0xff] }
  0x64   : > { %382 = vst.msk [vmem:[#allocation2 + $0xa4] sm:$0xf] %vm246_vm0, %v11349_v21 }
  0x65   : > { %14984 = vst [vmem:[#allocation18_spill] sm:$0xff] %v11364_v24 }
  0x66   : > { %v11341_v19 = vld [vmem:[#allocation2 + $0x18] sm:$0xff]  ;;  %14985 = vst [vmem:[#allocation19_spill] sm:$0xff] %v11367_v25 }
  0x67   : > { %367 = vst.msk [vmem:[#allocation2 + $0x28] sm:$0xf] %vm246_vm0, %v11364_v24  ;;  %v10364_v26 = vld [vmem:[#allocation2 + $0x98] sm:$0xff] }
  0x68   : > { %383 = vst.msk [vmem:[#allocation2 + $0xa8] sm:$0xf] %vm246_vm0, %v11367_v25 }
  0x69   : > { %14986 = vst [vmem:[#allocation20_spill] sm:$0xff] %v11382_v28 }
  0x6a   : > { %v11359_v23 = vld [vmem:[#allocation2 + $0x20] sm:$0xff]  ;;  %14987 = vst [vmem:[#allocation21_spill] sm:$0xff] %v11385_v29 }
  0x6b   : > { %368 = vst.msk [vmem:[#allocation2 + $0x34] sm:$0xf] %vm246_vm0, %v11382_v28  ;;  %v10365_v30 = vld [vmem:[#allocation2 + $0xa0] sm:$0xff] }
  0x6c   : > { %384 = vst.msk [vmem:[#allocation2 + $0xb4] sm:$0xf] %vm246_vm0, %v11385_v29 }
  0x6d   : > { %14988 = vst [vmem:[#allocation22_spill] sm:$0xff] %v11400_v32 }
  0x6e   : > { %v11377_v27 = vld [vmem:[#allocation2 + $0x28] sm:$0xff]  ;;  %14989 = vst [vmem:[#allocation23_spill] sm:$0xff] %v11403_v33 }
  0x6f   : > { %369 = vst.msk [vmem:[#allocation2 + $0x38] sm:$0xf] %vm246_vm0, %v11400_v32  ;;  %v10366_v34 = vld [vmem:[#allocation2 + $0xa8] sm:$0xff] }
  0x70   : > { %8992 = vmatmul.msk.bf16.gmra.mxu2 %vm636_vm1, %v10362_v18  ;;  %9036 = vmatmul.msk.bf16.gmra.mxu3 %vm636_vm1, %v10362_v18  ;;  %385 = vst.msk [vmem:[#allocation2 + $0xb8] sm:$0xf] %vm246_vm0, %v11403_v33 }
  0x71   : > { %14990 = vst [vmem:[#allocation24_spill] sm:$0xff] %v11418_v36 }
  0x72   : > { %v11395_v31 = vld [vmem:[#allocation2 + $0x30] sm:$0xff]  ;;  %14991 = vst [vmem:[#allocation25_spill] sm:$0xff] %v11421_v37 }
  0x73   : > { %8978 = vmatmul.msk.bf16.gmra.mxu0 %vm636_vm1, %v11341_v19  ;;  %9022 = vmatmul.msk.bf16.gmra.mxu1 %vm636_vm1, %v11341_v19  ;;  %370 = vst.msk [vmem:[#allocation2 + $0x44] sm:$0xf] %vm246_vm0, %v11418_v36  ;;  %v10367_v40 = vld [vmem:[#allocation2 + $0xb0] sm:$0xff] }
  0x74   : > { %386 = vst.msk [vmem:[#allocation2 + $0xc4] sm:$0xf] %vm246_vm0, %v11421_v37 }
  0x75   : > { %14992 = vst [vmem:[#allocation26_spill] sm:$0xff] %v11449_v48 }
  0x76   : > { %v11413_v35 = vld [vmem:[#allocation2 + $0x38] sm:$0xff]  ;;  %371 = vst.msk [vmem:[#allocation2 + $0x48] sm:$0xf] %vm246_vm0, %v11449_v48 }
  0x77   : > { %14993 = vst [vmem:[#allocation27_spill] sm:$0xff] %v11456_v50  ;;  %v10368_v51 = vld [vmem:[#allocation2 + $0xb8] sm:$0xff] }
  0x78   : > { %387 = vst.msk [vmem:[#allocation2 + $0xc8] sm:$0xf] %vm246_vm0, %v11456_v50 }
  0x79   : > { %14994 = vst [vmem:[#allocation28_spill] sm:$0xff] %v11474_v61 }
  0x7a   : > { %v11431_v41 = vld [vmem:[#allocation2 + $0x40] sm:$0xff]  ;;  %372 = vst.msk [vmem:[#allocation2 + $0x54] sm:$0xf] %vm246_vm0, %v11474_v61 }
  0x7b   : > { %14995 = vst [vmem:[#allocation29_spill] sm:$0xff] %v11479_v62  ;;  %v10369_v63 = vld [vmem:[#allocation2 + $0xc0] sm:$0xff] }
  0x7c   : > { %388 = vst.msk [vmem:[#allocation2 + $0xd4] sm:$0xf] %vm246_vm0, %v11479_v62 }
  0x7d   : > { %v11460_v55 = vld [vmem:[#allocation2 + $0x48] sm:$0xff]  ;;  %14996 = vst [vmem:[#allocation30_spill] sm:$0xff] %v11495_v8 }
  0x7e   : > { %373 = vst.msk [vmem:[#allocation2 + $0x58] sm:$0xf] %vm246_vm0, %v11495_v8 }
  0x7f   : > { %14997 = vst [vmem:[#allocation31_spill] sm:$0xff] %v11500_v14 }
  0x80   : > { %8993 = vmatmul.msk.bf16.gmra.mxu2 %vm636_vm1, %v10363_v22  ;;  %9037 = vmatmul.msk.bf16.gmra.mxu3 %vm636_vm1, %v10363_v22  ;;  %389 = vst.msk [vmem:[#allocation2 + $0xd8] sm:$0xf] %vm246_vm0, %v11500_v14 }
  0x81   : > { %v11483_v1 = vld [vmem:[#allocation2 + $0x50] sm:$0xff] }
  0x83   : > { %8979 = vmatmul.msk.bf16.gmra.mxu0 %vm636_vm1, %v11359_v23  ;;  %9023 = vmatmul.msk.bf16.gmra.mxu1 %vm636_vm1, %v11359_v23 }
  0x90   : > { %8994 = vmatmul.msk.bf16.gmra.mxu2 %vm636_vm1, %v10364_v26  ;;  %9038 = vmatmul.msk.bf16.gmra.mxu3 %vm636_vm1, %v10364_v26 }
  0x93   : > { %8980 = vmatmul.msk.bf16.gmra.mxu0 %vm636_vm1, %v11377_v27  ;;  %9024 = vmatmul.msk.bf16.gmra.mxu1 %vm636_vm1, %v11377_v27 }
  0xa0   : > { %8995 = vmatmul.msk.bf16.gmra.mxu2 %vm636_vm1, %v10365_v30  ;;  %9039 = vmatmul.msk.bf16.gmra.mxu3 %vm636_vm1, %v10365_v30 }
  0xa3   : > { %8981 = vmatmul.msk.bf16.gmra.mxu0 %vm636_vm1, %v11395_v31  ;;  %9025 = vmatmul.msk.bf16.gmra.mxu1 %vm636_vm1, %v11395_v31 }
  0xb0   : > { %8996 = vmatmul.msk.bf16.gmra.mxu2 %vm636_vm1, %v10366_v34  ;;  %9040 = vmatmul.msk.bf16.gmra.mxu3 %vm636_vm1, %v10366_v34 }
  0xb3   : > { %8982 = vmatmul.msk.bf16.gmra.mxu0 %vm636_vm1, %v11413_v35  ;;  %9026 = vmatmul.msk.bf16.gmra.mxu1 %vm636_vm1, %v11413_v35  ;;  %v742_v38 = vpop.f32.mrf.mxu0  ;;  %v912_v39 = vpop.f32.mrf.mxu1 }
  0xbb   : > { %v744_v43 = vpop.f32.mrf.mxu0  ;;  %v913_v44 = vpop.f32.mrf.mxu1 }
  0xbc   : > { %v1073_v47 = vrot.slane %v913_v44, 1 }
  0xbe   : > { %v11451_v49 = vadd.f32 %v1073_v47, %v742_v38 }
  0xc0   : > { %8997 = vmatmul.msk.bf16.gmra.mxu2 %vm636_vm1, %v10367_v40  ;;  %9041 = vmatmul.msk.bf16.gmra.mxu3 %vm636_vm1, %v10367_v40  ;;  %v10370_v40 = vld [vmem:[#allocation2 + $0xc8] sm:$0xff] }
  0xc3   : > { %8983 = vmatmul.msk.bf16.gmra.mxu0 %vm636_vm1, %v11431_v41  ;;  %9027 = vmatmul.msk.bf16.gmra.mxu1 %vm636_vm1, %v11431_v41  ;;  %v747_v52 = vpop.f32.mrf.mxu0  ;;  %v916_v53 = vpop.f32.mrf.mxu1 }
  0xc4   : > { %v1074_v54 = vrot.slane %v916_v53, 1 }
  0xc6   : > { %v1075_v56 = vsel %vm1072_vm2, %v1073_v47, %v1074_v54  ;;  %v11463_v57 = vadd.f32 %v1074_v54, %v747_v52 }
  0xc7   : > { %v11467_v58 = vadd.f32 %v1075_v56, %v744_v43  ;;  %v11508_v43 = vld [vmem:[#allocation2 + $0x58] sm:$0xff] }
  0xcb   : > { %v749_v59 = vpop.f32.mrf.mxu0  ;;  %v918_v60 = vpop.f32.mrf.mxu1 }
  0xcc   : > { %v11522_v59 = vld [vmem:[%s11184_s25 + $0x28] sm:$0xf] }
  0xcd   : > { %14998 = vst [vmem:[#allocation32_spill] sm:$0xff] %v11522_v59 }
  0xce   : > { %374 = vst.msk [vmem:[#allocation2 + $0x64] sm:$0xf] %vm246_vm0, %v11522_v59 }
  0xd0   : > { %8998 = vmatmul.msk.bf16.gmra.mxu2 %vm636_vm1, %v10368_v51  ;;  %9042 = vmatmul.msk.bf16.gmra.mxu3 %vm636_vm1, %v10368_v51 }
  0xd3   : > { %8984 = vmatmul.msk.bf16.gmra.mxu0 %vm636_vm1, %v11460_v55  ;;  %9028 = vmatmul.msk.bf16.gmra.mxu1 %vm636_vm1, %v11460_v55 }
  0xe0   : > { %v751_v2 = vpop.f32.mrf.mxu0  ;;  %v920_v3 = vpop.f32.mrf.mxu1  ;;  %8999 = vmatmul.msk.bf16.gmra.mxu2 %vm636_vm1, %v10369_v63  ;;  %9043 = vmatmul.msk.bf16.gmra.mxu3 %vm636_vm1, %v10369_v63 }
  0xe3   : > { %8985 = vmatmul.msk.bf16.gmra.mxu0 %vm636_vm1, %v11483_v1  ;;  %9029 = vmatmul.msk.bf16.gmra.mxu1 %vm636_vm1, %v11483_v1  ;;  %v814_v6 = vpop.f32.mrf.mxu2  ;;  %v976_v7 = vpop.f32.mrf.mxu3 }
  0xe8   : > { %v753_v18 = vpop.f32.mrf.mxu0  ;;  %v921_v22 = vpop.f32.mrf.mxu1 }
  0xe9   : > { %v1076_v26 = vrot.slane %v921_v22, 1  ;;  %v10371_v22 = vld [vmem:[#allocation2 + $0xd0] sm:$0xff] }
  0xeb   : > { %v11504_v30 = vadd.f32 %v1076_v26, %v751_v2  ;;  %v816_v34 = vpop.f32.mrf.mxu2  ;;  %v977_v38 = vpop.f32.mrf.mxu3  ;;  %v11530_v2 = vld [vmem:[%s11184_s25 + $0x68] sm:$0xf] }
  0xec   : > { %v1097_v39 = vrot.slane %v977_v38, 1  ;;  %14999 = vst [vmem:[#allocation33_spill] sm:$0xff] %v11530_v2 }
  0xed   : > { %390 = vst.msk [vmem:[#allocation2 + $0xe4] sm:$0xf] %vm246_vm0, %v11530_v2  ;;  %v11572_v2 = vld [vmem:[%s11184_s25 + $0x30] sm:$0xf] }
  0xee   : > { %v11506_v42 = vadd.f32 %v1097_v39, %v814_v6  ;;  %15002 = vst [vmem:[#allocation36_spill] sm:$0xff] %v11572_v2 }
  0xef   : > { %376 = vst.msk [vmem:[#allocation2 + $0x74] sm:$0xf] %vm246_vm0, %v11572_v2 }
  0xf0   : > { %v756_v44 = vpop.f32.mrf.mxu0  ;;  %v924_v45 = vpop.f32.mrf.mxu1  ;;  %9000 = vmatmul.msk.bf16.gmra.mxu2 %vm636_vm1, %v10370_v40  ;;  %9044 = vmatmul.msk.bf16.gmra.mxu3 %vm636_vm1, %v10370_v40 }
  0xf1   : > { %v1077_v46 = vrot.slane %v924_v45, 1  ;;  %v11550_v45 = vld [vmem:[%s11184_s25 + $0x6c] sm:$0xf] }
  0xf2   : > { %15001 = vst [vmem:[#allocation35_spill] sm:$0xff] %v11550_v45 }
  0xf3   : > { %v1078_v47 = vsel %vm1072_vm2, %v1076_v26, %v1077_v46  ;;  %v11513_v51 = vadd.f32 %v1077_v46, %v756_v44  ;;  %8986 = vmatmul.msk.bf16.gmra.mxu0 %vm636_vm1, %v11508_v43  ;;  %9030 = vmatmul.msk.bf16.gmra.mxu1 %vm636_vm1, %v11508_v43  ;;  %v819_v52 = vpop.f32.mrf.mxu2  ;;  %v980_v53 = vpop.f32.mrf.mxu3  ;;  %v11536_v26 = vld [vmem:[#allocation2 + $0x60] sm:$0xff]  ;;  %v11545_v44 = vld [vmem:[%s11184_s25 + $0x2c] sm:$0xf]  ;;  %391 = vst.msk [vmem:[#allocation2 + $0xe8] sm:$0xf] %vm246_vm0, %v11550_v45 }
  0xf4   : > { %v11519_v54 = vadd.f32 %v1078_v47, %v753_v18  ;;  %v1098_v56 = vrot.slane %v980_v53, 1  ;;  %15000 = vst [vmem:[#allocation34_spill] sm:$0xff] %v11545_v44 }
  0xf5   : > { %375 = vst.msk [vmem:[#allocation2 + $0x68] sm:$0xf] %vm246_vm0, %v11545_v44 }
  0xf6   : > { %v1099_v60 = vsel %vm1072_vm2, %v1097_v39, %v1098_v56  ;;  %v11525_v63 = vadd.f32 %v1098_v56, %v819_v52 }
  0xf7   : > { %v11532_v3 = vadd.f32 %v1099_v60, %v816_v34 }
  0xf8   : > { %v758_v4 = vpop.f32.mrf.mxu0  ;;  %v926_v6 = vpop.f32.mrf.mxu1 }
  0xf9   : > { %v10372_v6 = vld [vmem:[#allocation2 + $0xd8] sm:$0xff] }
  0xfa   : > { %v10374_v37 = vld [vmem:[#allocation2 + $0xe8] sm:$0xff] }
  0xfb   : > { %v821_v7 = vpop.f32.mrf.mxu2  ;;  %v982_v18 = vpop.f32.mrf.mxu3 }
  0xfc   : > { %v11558_v18 = vld [vmem:[#allocation2 + $0x68] sm:$0xff] }
 0x100   : > { %v760_v38 = vpop.f32.mrf.mxu0  ;;  %v928_v39 = vpop.f32.mrf.mxu1  ;;  %9001 = vmatmul.msk.bf16.gmra.mxu2 %vm636_vm1, %v10371_v22  ;;  %9045 = vmatmul.msk.bf16.gmra.mxu3 %vm636_vm1, %v10371_v22 }
 0x103   : > { %8987 = vmatmul.msk.bf16.gmra.mxu0 %vm636_vm1, %v11536_v26  ;;  %9031 = vmatmul.msk.bf16.gmra.mxu1 %vm636_vm1, %v11536_v26  ;;  %v823_v34 = vpop.f32.mrf.mxu2  ;;  %v984_v40 = vpop.f32.mrf.mxu3 }
 0x108   : > { %v762_v46 = vpop.f32.mrf.mxu0  ;;  %v929_v47 = vpop.f32.mrf.mxu1 }
 0x109   : > { %v1079_v52 = vrot.slane %v929_v47, 1 }
 0x10b   : > { %v11554_v53 = vadd.f32 %v1079_v52, %v760_v38  ;;  %v825_v56 = vpop.f32.mrf.mxu2  ;;  %v985_v60 = vpop.f32.mrf.mxu3 }
 0x10c   : > { %v1100_v4 = vrot.slane %v985_v60, 1 }
 0x10e   : > { %v11556_v7 = vadd.f32 %v1100_v4, %v823_v34 }
 0x110   : > { %v765_v22 = vpop.f32.mrf.mxu0  ;;  %v932_v39 = vpop.f32.mrf.mxu1  ;;  %9002 = vmatmul.msk.bf16.gmra.mxu2 %vm636_vm1, %v10372_v6  ;;  %9046 = vmatmul.msk.bf16.gmra.mxu3 %vm636_vm1, %v10372_v6 }
 0x111   : > { %v1080_v40 = vrot.slane %v932_v39, 1 }
 0x113   : > { %v1081_v38 = vsel %vm1072_vm2, %v1079_v52, %v1080_v40  ;;  %v11563_v47 = vadd.f32 %v1080_v40, %v765_v22  ;;  %8988 = vmatmul.msk.bf16.gmra.mxu0 %vm636_vm1, %v11558_v18  ;;  %9032 = vmatmul.msk.bf16.gmra.mxu1 %vm636_vm1, %v11558_v18  ;;  %v828_v34 = vpop.f32.mrf.mxu2  ;;  %v988_v60 = vpop.f32.mrf.mxu3  ;;  %v11580_v52 = vld [vmem:[%s11184_s25 + $0x70] sm:$0xf] }
 0x114   : > { %v11569_v0 = vadd.f32 %v1081_v38, %v762_v46  ;;  %v1101_v45 = vrot.slane %v988_v60, 1  ;;  %15004 = vst [vmem:[#allocation38_spill] sm:$0xff] %v11580_v52  ;;  %v10373_v60 = vld [vmem:[#allocation2 + $0xe0] sm:$0xff] }
 0x115   : > { %392 = vst.msk [vmem:[#allocation2 + $0xf4] sm:$0xf] %vm246_vm0, %v11580_v52 }
 0x116   : > { %v1102_v6 = vsel %vm1072_vm2, %v1100_v4, %v1101_v45  ;;  %v11575_v39 = vadd.f32 %v1101_v45, %v828_v34  ;;  %v11586_v4 = vld [vmem:[#allocation2 + $0x70] sm:$0xff] }
 0x117   : > { %v11582_v22 = vadd.f32 %v1102_v6, %v825_v56  ;;  %v11595_v6 = vld [vmem:[%s11184_s25 + $0x34] sm:$0xf] }
 0x118   : > { %15003 = vst [vmem:[#allocation37_spill] sm:$0xff] %v11575_v39  ;;  %v767_v40 = vpop.f32.mrf.mxu0  ;;  %v934_v14 = vpop.f32.mrf.mxu1 }
 0x119   : > { %15005 = vst [vmem:[#allocation39_spill] sm:$0xff] %v11595_v6  ;;  %v11600_v40 = vld [vmem:[%s11184_s25 + $0x74] sm:$0xf] }
 0x11a   : > { %377 = vst.msk [vmem:[#allocation2 + $0x78] sm:$0xf] %vm246_vm0, %v11595_v6  ;;  %v10383_v6 = vld [vmem:[#allocation2 + $0x10] sm:$0xff] }
 0x11b   : > { %v830_v46 = vpop.f32.mrf.mxu2  ;;  %v990_v38 = vpop.f32.mrf.mxu3  ;;  %15006 = vst [vmem:[#allocation40_spill] sm:$0xff] %v11600_v40 }
 0x11c   : > { %393 = vst.msk [vmem:[#allocation2 + $0xf8] sm:$0xf] %vm246_vm0, %v11600_v40  ;;  %v10375_v10 = vld [vmem:[#allocation2 + $0xf0] sm:$0xff] }
 0x120   : > { %v769_v45 = vpop.f32.mrf.mxu0  ;;  %v936_v34 = vpop.f32.mrf.mxu1  ;;  %9003 = vmatmul.msk.bf16.gmra.mxu2 %vm636_vm1, %v10373_v60  ;;  %9047 = vmatmul.msk.bf16.gmra.mxu3 %vm636_vm1, %v10373_v60 }
 0x121   : > { %v11608_v33 = vld [vmem:[#allocation2 + $0x78] sm:$0xff] }
 0x123   : > { %8989 = vmatmul.msk.bf16.gmra.mxu0 %vm636_vm1, %v11586_v4  ;;  %9033 = vmatmul.msk.bf16.gmra.mxu1 %vm636_vm1, %v11586_v4  ;;  %v832_v14 = vpop.f32.mrf.mxu2  ;;  %v992_v56 = vpop.f32.mrf.mxu3 }
 0x128   : > { %v771_v46 = vpop.f32.mrf.mxu0  ;;  %v937_v38 = vpop.f32.mrf.mxu1 }
 0x129   : > { %v1082_v60 = vrot.slane %v937_v38, 1 }
 0x12b   : > { %v11604_v34 = vadd.f32 %v1082_v60, %v769_v45  ;;  %v834_v52 = vpop.f32.mrf.mxu2  ;;  %v993_v62 = vpop.f32.mrf.mxu3 }
 0x12c   : > { %v1103_v50 = vrot.slane %v993_v62, 1 }
 0x12e   : > { %v11606_v56 = vadd.f32 %v1103_v50, %v832_v14 }
 0x130   : > { %15007 = vst [vmem:[#allocation41_spill] sm:$0xff] %v11606_v56  ;;  %v774_v29 = vpop.f32.mrf.mxu0  ;;  %v940_v25 = vpop.f32.mrf.mxu1  ;;  %9004 = vmatmul.msk.bf16.gmra.mxu2 %vm636_vm1, %v10374_v37  ;;  %9048 = vmatmul.msk.bf16.gmra.mxu3 %vm636_vm1, %v10374_v37 }
 0x131   : > { %v1083_v21 = vrot.slane %v940_v25, 1 }
 0x133   : > { %v1084_v40 = vsel %vm1072_vm2, %v1082_v60, %v1083_v21  ;;  %v11613_v38 = vadd.f32 %v1083_v21, %v774_v29  ;;  %8990 = vmatmul.msk.bf16.gmra.mxu0 %vm636_vm1, %v11608_v33  ;;  %9034 = vmatmul.msk.bf16.gmra.mxu1 %vm636_vm1, %v11608_v33  ;;  %v837_v62 = vpop.f32.mrf.mxu2  ;;  %v996_v45 = vpop.f32.mrf.mxu3 }
 0x134   : > { %v11619_v14 = vadd.f32 %v1084_v40, %v771_v46  ;;  %v1104_v17 = vrot.slane %v996_v45, 1 }
 0x136   : > { %v1105_v13 = vsel %vm1072_vm2, %v1103_v50, %v1104_v17  ;;  %v11622_v11 = vadd.f32 %v1104_v17, %v837_v62  ;;  %v10456_v50 = vld [vmem:[%s14906_s1 + $0x78] sm:$0xff] }
 0x137   : > { %v11624_v25 = vadd.f32 %v1105_v13, %v834_v52  ;;  %3436 = vmatpush.bf16.msra.mxu3 %v10456_v50  ;;  %v10458_v52 = vld [vmem:[%s14906_s1 + $0x88] sm:$0xff] }
 0x138   : > { %15008 = vst [vmem:[#allocation42_spill] sm:$0xff] %v11622_v11  ;;  %v776_v37 = vpop.f32.mrf.mxu0  ;;  %v942_v21 = vpop.f32.mrf.mxu1  ;;  %3766 = vmatpush.bf16.msra.mxu0 %v10458_v52 }
 0x139   : > { %15009 = vst [vmem:[#allocation43_spill] sm:$0xff] %v11624_v25 }
 0x13b   : > { %v839_v29 = vpop.f32.mrf.mxu2  ;;  %v998_v60 = vpop.f32.mrf.mxu3 }
 0x13c   : > { %v10376_v60 = vld [vmem:[#allocation2 + $0xf8] sm:$0xff] }
 0x140   : > { %v778_v2 = vpop.f32.mrf.mxu0  ;;  %v944_v44 = vpop.f32.mrf.mxu1  ;;  %9005 = vmatmul.msk.bf16.gmra.mxu2 %vm636_vm1, %v10375_v10  ;;  %9049 = vmatmul.msk.bf16.gmra.mxu3 %vm636_vm1, %v10375_v10  ;;  %v10454_v10 = vld [vmem:[%s14906_s1 + $0x68] sm:$0xff] }
 0x141   : > { %v10419_v44 = vld [vmem:[%s14906_s1 + $0x50] sm:$0xff]  ;;  %3218 = vmatpush.bf16.msra.mxu2 %v10454_v10 }
 0x142   : > { %2504 = vmatpush.bf16.msrb.mxu1 %v10419_v44 }
 0x143   : > { %9279 = vmatmul.msk.bf16.vlgmr.msrb.gmra.mxu0 %vm636_vm1, %v10383_v6  ;;  %v841_v13 = vpop.f32.mrf.mxu2  ;;  %v1000_v17 = vpop.f32.mrf.mxu3 }
 0x144   : > { %v10384_v17 = vld [vmem:[#allocation2 + $0x18] sm:$0xff] }
 0x145   : > { %9323 = vmatmul.msk.bf16.vlgmr.msrb.gmra.mxu1 %vm636_vm1, %v10383_v6 }
 0x148   : > { %v780_v40 = vpop.f32.mrf.mxu0  ;;  %v945_v46 = vpop.f32.mrf.mxu1 }
 0x149   : > { %v1085_v62 = vrot.slane %v945_v46, 1 }
 0x14b   : > { %v11642_v45 = vadd.f32 %v1085_v62, %v778_v2  ;;  %v843_v37 = vpop.f32.mrf.mxu2  ;;  %v1001_v21 = vpop.f32.mrf.mxu3 }
 0x14c   : > { %v1106_v29 = vrot.slane %v1001_v21, 1 }
 0x14e   : > { %v11644_v50 = vadd.f32 %v1106_v29, %v841_v13 }
 0x150   : > { %15010 = vst [vmem:[#allocation44_spill] sm:$0xff] %v11644_v50  ;;  %v783_v59 = vpop.f32.mrf.mxu0  ;;  %v948_v8 = vpop.f32.mrf.mxu1  ;;  %9006 = vmatmul.msk.bf16.gmra.mxu2 %vm636_vm1, %v10376_v60  ;;  %9050 = vmatmul.msk.bf16.gmra.mxu3 %vm636_vm1, %v10376_v60 }
 0x151   : > { %v1086_v52 = vrot.slane %v948_v8, 1 }
 0x153   : > { %v1087_v44 = vsel %vm1072_vm2, %v1085_v62, %v1086_v52  ;;  %v11649_v10 = vadd.f32 %v1086_v52, %v783_v59  ;;  %9280 = vmatmul.msk.bf16.gmra.mxu0 %vm636_vm1, %v10384_v17  ;;  %v846_v2 = vpop.f32.mrf.mxu2  ;;  %v1004_v46 = vpop.f32.mrf.mxu3  ;;  %v10385_v62 = vld [vmem:[#allocation2 + $0x20] sm:$0xff] }
 0x154   : > { %v11652_v21 = vadd.f32 %v1087_v44, %v780_v40  ;;  %v1107_v13 = vrot.slane %v1004_v46, 1 }
 0x155   : > { %9324 = vmatmul.msk.bf16.gmra.mxu1 %vm636_vm1, %v10384_v17 }
 0x156   : > { %v1108_v61 = vsel %vm1072_vm2, %v1106_v29, %v1107_v13  ;;  %v11655_v48 = vadd.f32 %v1107_v13, %v846_v2 }
 0x157   : > { %v11657_v36 = vadd.f32 %v1108_v61, %v843_v37 }
 0x158   : > { %15011 = vst [vmem:[#allocation45_spill] sm:$0xff] %v11655_v48  ;;  %v785_v32 = vpop.f32.mrf.mxu0  ;;  %v950_v60 = vpop.f32.mrf.mxu1 }
 0x159   : > { %15012 = vst [vmem:[#allocation46_spill] sm:$0xff] %v11657_v36  ;;  %v10386_v60 = vld [vmem:[#allocation2 + $0x28] sm:$0xff]  ;;  %v10393_v36 = vld [vmem:[#allocation2 + $0x60] sm:$0xff] }
 0x15b   : > { %v848_v8 = vpop.f32.mrf.mxu2  ;;  %v1006_v59 = vpop.f32.mrf.mxu3 }
 0x160   : > { %v787_v52 = vpop.f32.mrf.mxu0  ;;  %v952_v28 = vpop.f32.mrf.mxu1  ;;  %9063 = vmatmul.msk.bf16.vlgmr.msrb.gmra.mxu2 %vm636_vm1, %v11224_v5  ;;  %9235 = vmatmul.msk.bf16.vlgmr.msrb.gmra.mxu3 %vm636_vm1, %v10383_v6 }
 0x163   : > { %9281 = vmatmul.msk.bf16.gmra.mxu0 %vm636_vm1, %v10385_v62  ;;  %v850_v40 = vpop.f32.mrf.mxu2  ;;  %v1008_v29 = vpop.f32.mrf.mxu3 }
 0x165   : > { %9325 = vmatmul.msk.bf16.gmra.mxu1 %vm636_vm1, %v10385_v62 }
 0x168   : > { %v789_v61 = vpop.f32.mrf.mxu0  ;;  %v953_v37 = vpop.f32.mrf.mxu1 }
 0x169   : > { %v1088_v32 = vrot.slane %v953_v37, 1 }
 0x16b   : > { %v11665_v44 = vadd.f32 %v1088_v32, %v787_v52  ;;  %v852_v2 = vpop.f32.mrf.mxu2  ;;  %v1009_v46 = vpop.f32.mrf.mxu3 }
 0x16c   : > { %v1109_v13 = vrot.slane %v1009_v46, 1 }
 0x16e   : > { %v11667_v28 = vadd.f32 %v1109_v13, %v850_v40 }
 0x170   : > { %15013 = vst [vmem:[#allocation47_spill] sm:$0xff] %v11667_v28  ;;  %v792_v5 = vpop.f32.mrf.mxu0  ;;  %v956_v8 = vpop.f32.mrf.mxu1  ;;  %9064 = vmatmul.msk.bf16.gmra.mxu2 %vm636_vm1, %v11273_v9  ;;  %9236 = vmatmul.msk.bf16.gmra.mxu3 %vm636_vm1, %v10384_v17 }
 0x171   : > { %v1089_v6 = vrot.slane %v956_v8, 1  ;;  %v10387_v8 = vld [vmem:[#allocation2 + $0x30] sm:$0xff] }
 0x173   : > { %v1090_v59 = vsel %vm1072_vm2, %v1088_v32, %v1089_v6  ;;  %v11673_v29 = vadd.f32 %v1089_v6, %v792_v5  ;;  %9282 = vmatmul.msk.bf16.gmra.mxu0 %vm636_vm1, %v10386_v60  ;;  %v855_v52 = vpop.f32.mrf.mxu2  ;;  %v1012_v37 = vpop.f32.mrf.mxu3 }
 0x174   : > { %v11676_v46 = vadd.f32 %v1090_v59, %v789_v61  ;;  %v1110_v40 = vrot.slane %v1012_v37, 1 }
 0x175   : > { %9326 = vmatmul.msk.bf16.gmra.mxu1 %vm636_vm1, %v10386_v60 }
 0x176   : > { %v1111_v24 = vsel %vm1072_vm2, %v1109_v13, %v1110_v40  ;;  %v11679_v20 = vadd.f32 %v1110_v40, %v855_v52 }
 0x177   : > { %v11681_v16 = vadd.f32 %v1111_v24, %v852_v2 }
 0x178   : > { %15014 = vst [vmem:[#allocation48_spill] sm:$0xff] %v11679_v20  ;;  %v794_v9 = vpop.f32.mrf.mxu0  ;;  %v958_v17 = vpop.f32.mrf.mxu1 }
 0x179   : > { %15015 = vst [vmem:[#allocation49_spill] sm:$0xff] %v11681_v16  ;;  %v10388_v17 = vld [vmem:[#allocation2 + $0x38] sm:$0xff] }
 0x17b   : > { %v857_v32 = vpop.f32.mrf.mxu2  ;;  %v1014_v5 = vpop.f32.mrf.mxu3 }
 0x180   : > { %v796_v6 = vpop.f32.mrf.mxu0  ;;  %v960_v12 = vpop.f32.mrf.mxu1  ;;  %9065 = vmatmul.msk.bf16.gmra.mxu2 %vm636_vm1, %v11325_v15  ;;  %9237 = vmatmul.msk.bf16.gmra.mxu3 %vm636_vm1, %v10385_v62 }
 0x183   : > { %9283 = vmatmul.msk.bf16.gmra.mxu0 %vm636_vm1, %v10387_v8  ;;  %v859_v61 = vpop.f32.mrf.mxu2  ;;  %v1016_v13 = vpop.f32.mrf.mxu3 }
 0x185   : > { %9327 = vmatmul.msk.bf16.gmra.mxu1 %vm636_vm1, %v10387_v8 }
 0x188   : > { %v798_v24 = vpop.f32.mrf.mxu0  ;;  %v961_v2 = vpop.f32.mrf.mxu1 }
 0x189   : > { %v1091_v59 = vrot.slane %v961_v2, 1 }
 0x18b   : > { %v11689_v52 = vadd.f32 %v1091_v59, %v796_v6  ;;  %v861_v37 = vpop.f32.mrf.mxu2  ;;  %v1017_v40 = vpop.f32.mrf.mxu3 }
 0x18c   : > { %v1112_v9 = vrot.slane %v1017_v40, 1 }
 0x18e   : > { %v11691_v12 = vadd.f32 %v1112_v9, %v859_v61 }
 0x190   : > { %15016 = vst [vmem:[#allocation50_spill] sm:$0xff] %v11691_v12  ;;  %v801_v15 = vpop.f32.mrf.mxu0  ;;  %v964_v32 = vpop.f32.mrf.mxu1  ;;  %9066 = vmatmul.msk.bf16.gmra.mxu2 %vm636_vm1, %v11341_v19  ;;  %9238 = vmatmul.msk.bf16.gmra.mxu3 %vm636_vm1, %v10386_v60 }
 0x191   : > { %v1092_v62 = vrot.slane %v964_v32, 1  ;;  %v10389_v32 = vld [vmem:[#allocation2 + $0x40] sm:$0xff] }
 0x193   : > { %v1093_v5 = vsel %vm1072_vm2, %v1091_v59, %v1092_v62  ;;  %v11697_v13 = vadd.f32 %v1092_v62, %v801_v15  ;;  %9284 = vmatmul.msk.bf16.gmra.mxu0 %vm636_vm1, %v10388_v17  ;;  %v864_v6 = vpop.f32.mrf.mxu2  ;;  %v1020_v2 = vpop.f32.mrf.mxu3 }
 0x194   : > { %v11700_v40 = vadd.f32 %v1093_v5, %v798_v24  ;;  %v1113_v61 = vrot.slane %v1020_v2, 1 }
 0x195   : > { %9328 = vmatmul.msk.bf16.gmra.mxu1 %vm636_vm1, %v10388_v17 }
 0x196   : > { %v1114_v12 = vsel %vm1072_vm2, %v1112_v9, %v1113_v61  ;;  %v11703_v20 = vadd.f32 %v1113_v61, %v864_v6 }
 0x197   : > { %v11705_v16 = vadd.f32 %v1114_v12, %v861_v37 }
 0x198   : > { %15017 = vst [vmem:[#allocation51_spill] sm:$0xff] %v11703_v20  ;;  %v803_v19 = vpop.f32.mrf.mxu0  ;;  %v966_v60 = vpop.f32.mrf.mxu1 }
 0x199   : > { %15018 = vst [vmem:[#allocation52_spill] sm:$0xff] %v11705_v16  ;;  %v10390_v60 = vld [vmem:[#allocation2 + $0x48] sm:$0xff] }
 0x19b   : > { %v866_v59 = vpop.f32.mrf.mxu2  ;;  %v1022_v15 = vpop.f32.mrf.mxu3 }
 0x1a0   : > { %v805_v62 = vpop.f32.mrf.mxu0  ;;  %v968_v28 = vpop.f32.mrf.mxu1  ;;  %9067 = vmatmul.msk.bf16.gmra.mxu2 %vm636_vm1, %v11359_v23  ;;  %9239 = vmatmul.msk.bf16.gmra.mxu3 %vm636_vm1, %v10387_v8 }
 0x1a3   : > { %9285 = vmatmul.msk.bf16.gmra.mxu0 %vm636_vm1, %v10389_v32  ;;  %v868_v24 = vpop.f32.mrf.mxu2  ;;  %v1024_v9 = vpop.f32.mrf.mxu3 }
 0x1a5   : > { %9329 = vmatmul.msk.bf16.gmra.mxu1 %vm636_vm1, %v10389_v32 }
 0x1a8   : > { %v807_v37 = vpop.f32.mrf.mxu0  ;;  %v969_v12 = vpop.f32.mrf.mxu1 }
 0x1a9   : > { %v1094_v5 = vrot.slane %v969_v12, 1 }
 0x1ab   : > { %v11713_v6 = vadd.f32 %v1094_v5, %v805_v62  ;;  %v870_v2 = vpop.f32.mrf.mxu2  ;;  %v1025_v61 = vpop.f32.mrf.mxu3 }
 0x1ac   : > { %v1115_v19 = vrot.slane %v1025_v61, 1 }
 0x1ae   : > { %v11715_v28 = vadd.f32 %v1115_v19, %v868_v24 }
 0x1b0   : > { %15019 = vst [vmem:[#allocation53_spill] sm:$0xff] %v11715_v28  ;;  %v810_v23 = vpop.f32.mrf.mxu0  ;;  %v972_v59 = vpop.f32.mrf.mxu1  ;;  %9068 = vmatmul.msk.bf16.gmra.mxu2 %vm636_vm1, %v11377_v27  ;;  %9240 = vmatmul.msk.bf16.gmra.mxu3 %vm636_vm1, %v10388_v17 }
 0x1b1   : > { %v1095_v8 = vrot.slane %v972_v59, 1  ;;  %v10391_v59 = vld [vmem:[#allocation2 + $0x50] sm:$0xff] }
 0x1b3   : > { %v1096_v15 = vsel %vm1072_vm2, %v1094_v5, %v1095_v8  ;;  %v11721_v9 = vadd.f32 %v1095_v8, %v810_v23  ;;  %9286 = vmatmul.msk.bf16.gmra.mxu0 %vm636_vm1, %v10390_v60  ;;  %v873_v62 = vpop.f32.mrf.mxu2  ;;  %v1028_v12 = vpop.f32.mrf.mxu3 }
 0x1b4   : > { %v11724_v61 = vadd.f32 %v1096_v15, %v807_v37  ;;  %v1116_v24 = vrot.slane %v1028_v12, 1 }
 0x1b5   : > { %9330 = vmatmul.msk.bf16.gmra.mxu1 %vm636_vm1, %v10390_v60 }
 0x1b6   : > { %v1117_v28 = vsel %vm1072_vm2, %v1115_v19, %v1116_v24  ;;  %v11727_v20 = vadd.f32 %v1116_v24, %v873_v62 }
 0x1b7   : > { %v11729_v16 = vadd.f32 %v1117_v28, %v870_v2 }
 0x1b8   : > { %15020 = vst [vmem:[#allocation54_spill] sm:$0xff] %v11727_v20  ;;  %v812_v27 = vpop.f32.mrf.mxu0  ;;  %v974_v17 = vpop.f32.mrf.mxu1 }
 0x1b9   : > { %15021 = vst [vmem:[#allocation55_spill] sm:$0xff] %v11729_v16  ;;  %v10392_v27 = vld [vmem:[#allocation2 + $0x58] sm:$0xff] }
 0x1bb   : > { %v875_v5 = vpop.f32.mrf.mxu2  ;;  %v1030_v23 = vpop.f32.mrf.mxu3 }
 0x1c0   : > { %v2176_v8 = vpop.f32.mrf.mxu0  ;;  %9069 = vmatmul.msk.bf16.gmra.mxu2 %vm636_vm1, %v11395_v31  ;;  %9241 = vmatmul.msk.bf16.gmra.mxu3 %vm636_vm1, %v10389_v32 }
 0x1c2   : > { %v2506_v15 = vpop.f32.mrf.mxu1 }
 0x1c3   : > { %9287 = vmatmul.msk.bf16.gmra.mxu0 %vm636_vm1, %v10391_v59  ;;  %v877_v37 = vpop.f32.mrf.mxu2  ;;  %v1032_v19 = vpop.f32.mrf.mxu3 }
 0x1c5   : > { %9331 = vmatmul.msk.bf16.gmra.mxu1 %vm636_vm1, %v10391_v59 }
 0x1c8   : > { %v2177_v2 = vpop.f32.mrf.mxu0 }
 0x1c9   : > { %v2336_v31 = vrot.slane %v2177_v2, 1 }
 0x1ca   : > { %v2507_v5 = vpop.f32.mrf.mxu1 }
 0x1cb   : > { %v879_v28 = vpop.f32.mrf.mxu2  ;;  %v1033_v62 = vpop.f32.mrf.mxu3  ;;  %v2698_v20 = vrot.slane %v2507_v5, 2 }
 0x1cc   : > { %v1118_v12 = vrot.slane %v1033_v62, 1 }
 0x1ce   : > { %v11737_v24 = vadd.f32 %v1118_v12, %v877_v37 }
 0x1d0   : > { %15022 = vst [vmem:[#allocation56_spill] sm:$0xff] %v11737_v24  ;;  %v11739_v17 = vpop.f32.mrf.mxu0  ;;  %9070 = vmatmul.msk.bf16.gmra.mxu2 %vm636_vm1, %v11413_v35  ;;  %9242 = vmatmul.msk.bf16.gmra.mxu3 %vm636_vm1, %v10390_v60 }
 0x1d1   : > { %v14943_v32 = vrot.slane %v11739_v17, 1 }
 0x1d2   : > { %v2510_v2 = vpop.f32.mrf.mxu1 }
 0x1d3   : > { %v2338_v23 = vsel %vm1072_vm2, %v2336_v31, %v14943_v32  ;;  %9288 = vmatmul.msk.bf16.gmra.mxu0 %vm636_vm1, %v10392_v27  ;;  %v882_v8 = vpop.f32.mrf.mxu2  ;;  %v1036_v37 = vpop.f32.mrf.mxu3  ;;  %v2699_v24 = vrot.slane %v2510_v2, 2 }
 0x1d4   : > { %v1119_v19 = vrot.slane %v1036_v37, 1 }
 0x1d5   : > { %9332 = vmatmul.msk.bf16.gmra.mxu1 %vm636_vm1, %v10392_v27  ;;  %v2700_v32 = vsel %vm1435_vm3, %v2698_v20, %v2699_v24 }
 0x1d6   : > { %v1120_v15 = vsel %vm1072_vm2, %v1118_v12, %v1119_v19  ;;  %v11750_v62 = vadd.f32 %v1119_v19, %v882_v8  ;;  %v10491_v12 = vld [vmem:[%s14908_s3] sm:$0xff] }
 0x1d7   : > { %v11752_v35 = vadd.f32 %v1120_v15, %v879_v28  ;;  %4926 = vmatpush.bf16.msra.mxu1 %v10491_v12 }
 0x1d8   : > { %15023 = vst [vmem:[#allocation57_spill] sm:$0xff] %v11750_v62  ;;  %v2182_v60 = vpop.f32.mrf.mxu0 }
 0x1d9   : > { %15024 = vst [vmem:[#allocation58_spill] sm:$0xff] %v11752_v35  ;;  %v10394_v60 = vld [vmem:[#allocation2 + $0x68] sm:$0xff] }
 0x1da   : > { %v2512_v28 = vpop.f32.mrf.mxu1 }
 0x1db   : > { %v884_v16 = vpop.f32.mrf.mxu2  ;;  %v1038_v48 = vpop.f32.mrf.mxu3  ;;  %v2701_v8 = vrot.slane %v2512_v28, 2 }
 0x1dd   : > { %v2702_v5 = vsel %vm1435_vm3, %v2699_v24, %v2701_v8 }
 0x1e0   : > { %v2184_v50 = vpop.f32.mrf.mxu0  ;;  %9071 = vmatmul.msk.bf16.gmra.mxu2 %vm636_vm1, %v11431_v41  ;;  %9243 = vmatmul.msk.bf16.gmra.mxu3 %vm636_vm1, %v10391_v59 }
 0x1e2   : > { %v2515_v50 = vpop.f32.mrf.mxu1 }
 0x1e3   : > { %9289 = vmatmul.msk.bf16.gmra.mxu0 %vm636_vm1, %v10393_v36  ;;  %v1243_v16 = vpop.f32.mrf.mxu2  ;;  %v1958_v48 = vpop.f32.mrf.mxu3 }
 0x1e5   : > { %9333 = vmatmul.msk.bf16.gmra.mxu1 %vm636_vm1, %v10393_v36 }
 0x1e8   : > { %v11764_v37 = vpop.f32.mrf.mxu0 }
 0x1e9   : > { %v2339_v24 = vrot.slane %v11764_v37, 1 }
 0x1ea   : > { %v2516_v8 = vpop.f32.mrf.mxu1 }
 0x1eb   : > { %v1244_v41 = vpop.f32.mrf.mxu2  ;;  %v1960_v59 = vpop.f32.mrf.mxu3  ;;  %v2703_v56 = vrot.slane %v2516_v8, 2 }
 0x1ec   : > { %v1436_v19 = vrot.slane %v1244_v41, 2 }
 0x1ee   : > { %v1564_v15 = vadd.f32 %v1436_v19, %v11451_v49 }
 0x1f0   : > { %v11768_v2 = vpop.f32.mrf.mxu0  ;;  %v2102_v28 = vadd.f32 %v1958_v48, %v1564_v15  ;;  %9072 = vmatmul.msk.bf16.gmra.mxu2 %vm636_vm1, %v11460_v55  ;;  %9244 = vmatmul.msk.bf16.gmra.mxu3 %vm636_vm1, %v10392_v27 }
 0x1f1   : > { %v14944_v12 = vrot.slane %v11768_v2, 1 }
 0x1f2   : > { %v2432_v49 = vadd.f32 %v2336_v31, %v2102_v28  ;;  %v2519_v62 = vpop.f32.mrf.mxu1 }
 0x1f3   : > { %v11778_v16 = vsel %vm1072_vm2, %v2339_v24, %v14944_v12  ;;  %9290 = vmatmul.msk.bf16.gmra.mxu0 %vm636_vm1, %v10394_v60  ;;  %v1247_v50 = vpop.f32.mrf.mxu2  ;;  %v1963_v48 = vpop.f32.mrf.mxu3  ;;  %v2704_v35 = vrot.slane %v2519_v62, 2 }
 0x1f4   : > { %v1437_v41 = vrot.slane %v1247_v50, 2  ;;  %v11781_v15 = vadd.f32 %v2698_v20, %v2432_v49 }
 0x1f5   : > { %9334 = vmatmul.msk.bf16.gmra.mxu1 %vm636_vm1, %v10394_v60  ;;  %v2705_v20 = vsel %vm1435_vm3, %v2703_v56, %v2704_v35 }
 0x1f6   : > { %v1438_v55 = vsel %vm1435_vm3, %v1436_v19, %v1437_v41  ;;  %v10395_v19 = vld [vmem:[#allocation2 + $0x70] sm:$0xff] }
 0x1f7   : > { %v1565_v27 = vadd.f32 %v1438_v55, %v11467_v58 }
 0x1f8   : > { %v2190_v37 = vpop.f32.mrf.mxu0 }
 0x1f9   : > { %v2103_v11 = vadd.f32 %v1960_v59, %v1565_v27  ;;  %v10396_v27 = vld [vmem:[#allocation2 + $0x78] sm:$0xff] }
 0x1fa   : > { %v2521_v62 = vpop.f32.mrf.mxu1 }
 0x1fb   : > { %v1249_v12 = vpop.f32.mrf.mxu2  ;;  %v1965_v25 = vpop.f32.mrf.mxu3  ;;  %v2433_v39 = vadd.f32 %v2338_v23, %v2103_v11 }
 0x1fc   : > { %v1439_v31 = vrot.slane %v1249_v12, 2  ;;  %v2706_v25 = vrot.slane %v2521_v62, 2 }
 0x1fd   : > { %v11786_v28 = vadd.f32 %v2700_v32, %v2433_v39  ;;  %v15025_v32 = vrot.slane %v11739_v17, 1 }
 0x1fe   : > { %v1440_v49 = vsel %vm1435_vm3, %v1437_v41, %v1439_v31 }
 0x1ff   : > { %v1566_v58 = vadd.f32 %v1440_v49, %v11463_v57  ;;  %v2707_v57 = vsel %vm1435_vm3, %v2704_v35, %v2706_v25 }
 0x200   : > { %v2192_v50 = vpop.f32.mrf.mxu0  ;;  %9073 = vmatmul.msk.bf16.gmra.mxu2 %vm636_vm1, %v11483_v1  ;;  %9245 = vmatmul.msk.bf16.gmra.mxu3 %vm636_vm1, %v10393_v36 }
 0x201   : > { %v2104_v59 = vadd.f32 %v1963_v48, %v1566_v58 }
 0x202   : > { %v2524_v41 = vpop.f32.mrf.mxu1 }
 0x203   : > { %9291 = vmatmul.msk.bf16.gmra.mxu0 %vm636_vm1, %v10395_v19  ;;  %v1252_v11 = vpop.f32.mrf.mxu2  ;;  %v1967_v39 = vpop.f32.mrf.mxu3  ;;  %v2434_v23 = vadd.f32 %v15025_v32, %v2104_v59 }
 0x205   : > { %v11797_v12 = vadd.f32 %v2702_v5, %v2434_v23  ;;  %9335 = vmatmul.msk.bf16.gmra.mxu1 %vm636_vm1, %v10395_v19 }
 0x208   : > { %v11800_v8 = vpop.f32.mrf.mxu0 }
 0x209   : > { %v2342_v17 = vrot.slane %v11800_v8, 1 }
 0x20a   : > { %v2525_v5 = vpop.f32.mrf.mxu1 }
 0x20b   : > { %v1253_v36 = vpop.f32.mrf.mxu2  ;;  %v1969_v1 = vpop.f32.mrf.mxu3  ;;  %v2708_v41 = vrot.slane %v2525_v5, 2 }
 0x20c   : > { %v1441_v55 = vrot.slane %v1253_v36, 2 }
 0x20e   : > { %v1567_v48 = vadd.f32 %v1441_v55, %v11504_v30 }
 0x210   : > { %v11804_v37 = vpop.f32.mrf.mxu0  ;;  %v2105_v31 = vadd.f32 %v1967_v39, %v1567_v48  ;;  %9074 = vmatmul.msk.bf16.gmra.mxu2 %vm636_vm1, %v11508_v43  ;;  %9246 = vmatmul.msk.bf16.gmra.mxu3 %vm636_vm1, %v10394_v60 }
 0x211   : > { %v2343_v35 = vrot.slane %v11804_v37, 1 }
 0x212   : > { %v2435_v30 = vadd.f32 %v2339_v24, %v2105_v31  ;;  %v2528_v11 = vpop.f32.mrf.mxu1  ;;  %v10397_v31 = vld [vmem:[#allocation2 + $0x80] sm:$0xff] }
 0x213   : > { %v11814_v49 = vsel %vm1072_vm2, %v2342_v17, %v2343_v35  ;;  %9292 = vmatmul.msk.bf16.gmra.mxu0 %vm636_vm1, %v10396_v27  ;;  %v1256_v58 = vpop.f32.mrf.mxu2  ;;  %v1972_v50 = vpop.f32.mrf.mxu3  ;;  %v2709_v39 = vrot.slane %v2528_v11, 2 }
 0x214   : > { %v1442_v62 = vrot.slane %v1256_v58, 2  ;;  %v11817_v25 = vadd.f32 %v2703_v56, %v2435_v30 }
 0x215   : > { %9336 = vmatmul.msk.bf16.gmra.mxu1 %vm636_vm1, %v10396_v27  ;;  %v2710_v56 = vsel %vm1435_vm3, %v2708_v41, %v2709_v39 }
 0x216   : > { %v1443_v43 = vsel %vm1435_vm3, %v1441_v55, %v1442_v62 }
 0x217   : > { %v1568_v60 = vadd.f32 %v1443_v43, %v11519_v54  ;;  %v15026_v43 = vrot.slane %v11768_v2, 1 }
 0x218   : > { %v2198_v59 = vpop.f32.mrf.mxu0 }
 0x219   : > { %v2106_v32 = vadd.f32 %v1969_v1, %v1568_v60 }
 0x21a   : > { %v2530_v1 = vpop.f32.mrf.mxu1 }
 0x21b   : > { %v1258_v23 = vpop.f32.mrf.mxu2  ;;  %v1974_v8 = vpop.f32.mrf.mxu3  ;;  %v2436_v24 = vadd.f32 %v11778_v16, %v2106_v32  ;;  %v2711_v5 = vrot.slane %v2530_v1, 2 }
 0x21c   : > { %v1444_v36 = vrot.slane %v1258_v23, 2  ;;  %v10398_v23 = vld [vmem:[#allocation2 + $0x88] sm:$0xff] }
 0x21d   : > { %v11823_v48 = vadd.f32 %v2705_v20, %v2436_v24 }
 0x21e   : > { %v1445_v55 = vsel %vm1435_vm3, %v1442_v62, %v1444_v36 }
 0x21f   : > { %v1569_v54 = vadd.f32 %v1445_v55, %v11513_v51  ;;  %v2712_v51 = vsel %vm1435_vm3, %v2709_v39, %v2711_v5 }
 0x220   : > { %v2200_v30 = vpop.f32.mrf.mxu0  ;;  %9075 = vmatmul.msk.bf16.gmra.mxu2 %vm636_vm1, %v11536_v26  ;;  %9247 = vmatmul.msk.bf16.gmra.mxu3 %vm636_vm1, %v10395_v19 }
 0x221   : > { %v2107_v58 = vadd.f32 %v1972_v50, %v1569_v54 }
 0x222   : > { %v2533_v11 = vpop.f32.mrf.mxu1 }
 0x223   : > { %9293 = vmatmul.msk.bf16.gmra.mxu0 %vm636_vm1, %v10397_v31  ;;  %v1261_v16 = vpop.f32.mrf.mxu2  ;;  %v1976_v20 = vpop.f32.mrf.mxu3  ;;  %v2437_v60 = vadd.f32 %v15026_v43, %v2107_v58 }
 0x225   : > { %v11834_v62 = vadd.f32 %v2707_v57, %v2437_v60  ;;  %9337 = vmatmul.msk.bf16.gmra.mxu1 %vm636_vm1, %v10397_v31 }
 0x228   : > { %v11837_v59 = vpop.f32.mrf.mxu0 }
 0x229   : > { %v2345_v2 = vrot.slane %v11837_v59, 1 }
 0x22a   : > { %v11848_v39 = vpop.f32.mrf.mxu1 }
 0x22b   : > { %v1262_v26 = vpop.f32.mrf.mxu2  ;;  %v1978_v19 = vpop.f32.mrf.mxu3  ;;  %v2713_v59 = vrot.slane %v11848_v39, 2 }
 0x22c   : > { %v1446_v32 = vrot.slane %v1262_v26, 2 }
 0x22e   : > { %v1570_v50 = vadd.f32 %v1446_v32, %v11554_v53 }
 0x230   : > { %v11841_v8 = vpop.f32.mrf.mxu0  ;;  %v2108_v24 = vadd.f32 %v1976_v20, %v1570_v50  ;;  %9076 = vmatmul.msk.bf16.gmra.mxu2 %vm636_vm1, %v11558_v18  ;;  %9248 = vmatmul.msk.bf16.gmra.mxu3 %vm636_vm1, %v10396_v27 }
 0x231   : > { %v2346_v57 = vrot.slane %v11841_v8, 1  ;;  %v10879_v8 = vld [vmem:[#allocation2 + $0x88] sm:$0xff] }
 0x232   : > { %v2438_v53 = vadd.f32 %v2342_v17, %v2108_v24  ;;  %v2537_v58 = vpop.f32.mrf.mxu1 }
 0x233   : > { %v11853_v36 = vsel %vm1072_vm2, %v2345_v2, %v2346_v57  ;;  %9294 = vmatmul.msk.bf16.gmra.mxu0 %vm636_vm1, %v10398_v23  ;;  %v1265_v55 = vpop.f32.mrf.mxu2  ;;  %v1981_v54 = vpop.f32.mrf.mxu3  ;;  %v2714_v16 = vrot.slane %v2537_v58, 2 }
 0x234   : > { %v1447_v30 = vrot.slane %v1265_v55, 2  ;;  %v11856_v18 = vadd.f32 %v2708_v41, %v2438_v53 }
 0x235   : > { %9338 = vmatmul.msk.bf16.gmra.mxu1 %vm636_vm1, %v10398_v23  ;;  %v2715_v41 = vsel %vm1435_vm3, %v2713_v59, %v2714_v16 }
 0x236   : > { %v1448_v27 = vsel %vm1435_vm3, %v1446_v32, %v1447_v30 }
 0x237   : > { %v1571_v1 = vadd.f32 %v1448_v27, %v11569_v0  ;;  %v10399_v0 = vld [vmem:[#allocation2 + $0x90] sm:$0xff] }
 0x238   : > { %v2206_v5 = vpop.f32.mrf.mxu0 }
 0x239   : > { %v2109_v20 = vadd.f32 %v1978_v19, %v1571_v1 }
 0x23a   : > { %v2539_v19 = vpop.f32.mrf.mxu1 }
 0x23b   : > { %v1267_v43 = vpop.f32.mrf.mxu2  ;;  %v1983_v60 = vpop.f32.mrf.mxu3  ;;  %v2439_v17 = vadd.f32 %v11814_v49, %v2109_v20  ;;  %v10455_v49 = vld [vmem:[%s14906_s1 + $0x70] sm:$0xff] }
 0x23c   : > { %v1449_v11 = vrot.slane %v1267_v43, 2  ;;  %3437 = vmatpush.bf16.msra.mxu3 %v10455_v49  ;;  %v10400_v60 = vld [vmem:[#allocation2 + $0x98] sm:$0xff] }
 0x23d   : > { %v11863_v26 = vadd.f32 %v2710_v56, %v2439_v17  ;;  %v2716_v56 = vrot.slane %v2539_v19, 2 }
 0x23e   : > { %v1450_v32 = vsel %vm1435_vm3, %v1447_v30, %v1449_v11 }
 0x23f   : > { %v1572_v50 = vadd.f32 %v1450_v32, %v11563_v47  ;;  %v10457_v47 = vld [vmem:[%s14906_s1 + $0x80] sm:$0xff] }
 0x240   : > { %v2208_v24 = vpop.f32.mrf.mxu0  ;;  %9077 = vmatmul.msk.bf16.gmra.mxu2 %vm636_vm1, %v11586_v4  ;;  %9249 = vmatmul.msk.bf16.gmra.mxu3 %vm636_vm1, %v10397_v31  ;;  %v10453_v4 = vld [vmem:[%s14906_s1 + $0x60] sm:$0xff] }
 0x241   : > { %v2110_v39 = vadd.f32 %v1981_v54, %v1572_v50  ;;  %3767 = vmatpush.bf16.msra.mxu0 %v10457_v47  ;;  %3219 = vmatpush.bf16.msra.mxu2 %v10453_v4  ;;  %v2717_v54 = vsel %vm1435_vm3, %v2714_v16, %v2716_v56 }
 0x242   : > { %v2542_v1 = vpop.f32.mrf.mxu1 }
 0x243   : > { %9295 = vmatmul.msk.bf16.gmra.mxu0 %vm636_vm1, %v10399_v0  ;;  %v1270_v53 = vpop.f32.mrf.mxu2  ;;  %v1985_v55 = vpop.f32.mrf.mxu3  ;;  %v2440_v31 = vadd.f32 %v2343_v35, %v2110_v39 }
 0x245   : > { %v11883_v30 = vadd.f32 %v2712_v51, %v2440_v31  ;;  %9339 = vmatmul.msk.bf16.gmra.mxu1 %vm636_vm1, %v10399_v0 }
 0x248   : > { %v11886_v27 = vpop.f32.mrf.mxu0 }
 0x249   : > { %v2348_v35 = vrot.slane %v11886_v27, 1 }
 0x24a   : > { %v2543_v16 = vpop.f32.mrf.mxu1 }
 0x24b   : > { %v1271_v5 = vpop.f32.mrf.mxu2  ;;  %v1987_v58 = vpop.f32.mrf.mxu3  ;;  %v2718_v4 = vrot.slane %v2543_v16, 2 }
 0x24c   : > { %v1451_v20 = vrot.slane %v1271_v5, 2  ;;  %v10401_v5 = vld [vmem:[#allocation2 + $0xa0] sm:$0xff] }
 0x24e   : > { %v1573_v43 = vadd.f32 %v1451_v20, %v11604_v34 }
 0x250   : > { %v11890_v17 = vpop.f32.mrf.mxu0  ;;  %v2111_v37 = vadd.f32 %v1985_v55, %v1573_v43  ;;  %9078 = vmatmul.msk.bf16.gmra.mxu2 %vm636_vm1, %v11608_v33  ;;  %9250 = vmatmul.msk.bf16.gmra.mxu3 %vm636_vm1, %v10398_v23  ;;  %v10878_v43 = vld [vmem:[#allocation2 + $0x80] sm:$0xff] }
 0x251   : > { %v2349_v51 = vrot.slane %v11890_v17, 1  ;;  %v10881_v17 = vld [vmem:[#allocation2 + $0x98] sm:$0xff] }
 0x252   : > { %v2441_v34 = vadd.f32 %v2345_v2, %v2111_v37  ;;  %v2546_v56 = vpop.f32.mrf.mxu1 }
 0x253   : > { %v11900_v11 = vsel %vm1072_vm2, %v2348_v35, %v2349_v51  ;;  %9296 = vmatmul.msk.bf16.gmra.mxu0 %vm636_vm1, %v10400_v60  ;;  %v1274_v32 = vpop.f32.mrf.mxu2  ;;  %v1990_v50 = vpop.f32.mrf.mxu3  ;;  %v2719_v39 = vrot.slane %v2546_v56, 2  ;;  %v10402_v56 = vld [vmem:[#allocation2 + $0xa8] sm:$0xff] }
 0x254   : > { %v1452_v24 = vrot.slane %v1274_v32, 2  ;;  %v11903_v49 = vadd.f32 %v2713_v59, %v2441_v34 }
 0x255   : > { %9340 = vmatmul.msk.bf16.gmra.mxu1 %vm636_vm1, %v10400_v60  ;;  %v2720_v59 = vsel %vm1435_vm3, %v2718_v4, %v2719_v39 }
 0x256   : > { %v1453_v33 = vsel %vm1435_vm3, %v1451_v20, %v1452_v24 }
 0x257   : > { %v1574_v23 = vadd.f32 %v1453_v33, %v11619_v14 }
 0x258   : > { %v2214_v19 = vpop.f32.mrf.mxu0 }
 0x259   : > { %v2112_v53 = vadd.f32 %v1987_v58, %v1574_v23 }
 0x25a   : > { %v2548_v58 = vpop.f32.mrf.mxu1 }
 0x25b   : > { %v1276_v55 = vpop.f32.mrf.mxu2  ;;  %v1992_v47 = vpop.f32.mrf.mxu3  ;;  %v2442_v2 = vadd.f32 %v11853_v36, %v2112_v53  ;;  %v2721_v37 = vrot.slane %v2548_v58, 2 }
 0x25c   : > { %v1454_v31 = vrot.slane %v1276_v55, 2 }
 0x25d   : > { %v11909_v27 = vadd.f32 %v2715_v41, %v2442_v2 }
 0x25e   : > { %v1455_v1 = vsel %vm1435_vm3, %v1452_v24, %v1454_v31 }
 0x25f   : > { %v1575_v14 = vadd.f32 %v1455_v1, %v11613_v38  ;;  %v2722_v38 = vsel %vm1435_vm3, %v2719_v39, %v2721_v37 }
 0x260   : > { %v2216_v20 = vpop.f32.mrf.mxu0  ;;  %9079 = vmatmul.msk.bf16.gmra.mxu2 %vm636_vm1, %v10878_v43  ;;  %9251 = vmatmul.msk.bf16.gmra.mxu3 %vm636_vm1, %v10399_v0 }
 0x261   : > { %v2113_v16 = vadd.f32 %v1990_v50, %v1575_v14 }
 0x262   : > { %v2551_v33 = vpop.f32.mrf.mxu1 }
 0x263   : > { %9297 = vmatmul.msk.bf16.gmra.mxu0 %vm636_vm1, %v10401_v5  ;;  %v1279_v36 = vpop.f32.mrf.mxu2  ;;  %v1994_v41 = vpop.f32.mrf.mxu3  ;;  %v2443_v34 = vadd.f32 %v2346_v57, %v2113_v16 }
 0x265   : > { %v11919_v32 = vadd.f32 %v2717_v54, %v2443_v34  ;;  %9341 = vmatmul.msk.bf16.gmra.mxu1 %vm636_vm1, %v10401_v5 }
 0x268   : > { %v11922_v24 = vpop.f32.mrf.mxu0 }
 0x269   : > { %v2351_v57 = vrot.slane %v11922_v24, 1 }
 0x26a   : > { %v2552_v39 = vpop.f32.mrf.mxu1 }
 0x26b   : > { %v1280_v0 = vpop.f32.mrf.mxu2  ;;  %v1996_v23 = vpop.f32.mrf.mxu3  ;;  %v2723_v34 = vrot.slane %v2552_v39, 2 }
 0x26c   : > { %v1456_v19 = vrot.slane %v1280_v0, 2 }
 0x26e   : > { %v1576_v50 = vadd.f32 %v1456_v19, %v11642_v45 }
 0x270   : > { %v11926_v53 = vpop.f32.mrf.mxu0  ;;  %v2114_v55 = vadd.f32 %v1994_v41, %v1576_v50  ;;  %9080 = vmatmul.msk.bf16.gmra.mxu2 %vm636_vm1, %v10879_v8  ;;  %9252 = vmatmul.msk.bf16.gmra.mxu3 %vm636_vm1, %v10400_v60 }
 0x271   : > { %v2352_v54 = vrot.slane %v11926_v53, 1  ;;  %v10883_v53 = vld [vmem:[#allocation2 + $0xa8] sm:$0xff] }
 0x272   : > { %v2444_v45 = vadd.f32 %v2348_v35, %v2114_v55  ;;  %v2555_v58 = vpop.f32.mrf.mxu1  ;;  %v10880_v55 = vld [vmem:[#allocation2 + $0x90] sm:$0xff] }
 0x273   : > { %v11935_v47 = vsel %vm1072_vm2, %v2351_v57, %v2352_v54  ;;  %9298 = vmatmul.msk.bf16.gmra.mxu0 %vm636_vm1, %v10402_v56  ;;  %v1283_v2 = vpop.f32.mrf.mxu2  ;;  %v1999_v31 = vpop.f32.mrf.mxu3  ;;  %v2724_v37 = vrot.slane %v2555_v58, 2  ;;  %v10404_v58 = vld [vmem:[#allocation2 + $0xb8] sm:$0xff] }
 0x274   : > { %v1457_v1 = vrot.slane %v1283_v2, 2  ;;  %v11938_v14 = vadd.f32 %v2718_v4, %v2444_v45 }
 0x275   : > { %9342 = vmatmul.msk.bf16.gmra.mxu1 %vm636_vm1, %v10402_v56  ;;  %v2725_v4 = vsel %vm1435_vm3, %v2723_v34, %v2724_v37 }
 0x276   : > { %v1458_v60 = vsel %vm1435_vm3, %v1456_v19, %v1457_v1  ;;  %v10403_v19 = vld [vmem:[#allocation2 + $0xb0] sm:$0xff] }
 0x277   : > { %v1577_v20 = vadd.f32 %v1458_v60, %v11652_v21 }
 0x278   : > { %v2222_v43 = vpop.f32.mrf.mxu0 }
 0x279   : > { %v2115_v16 = vadd.f32 %v1996_v23, %v1577_v20 }
 0x27a   : > { %v2557_v23 = vpop.f32.mrf.mxu1 }
 0x27b   : > { %v1285_v36 = vpop.f32.mrf.mxu2  ;;  %v2001_v41 = vpop.f32.mrf.mxu3  ;;  %v2445_v35 = vadd.f32 %v11900_v11, %v2115_v16  ;;  %v2726_v8 = vrot.slane %v2557_v23, 2 }
 0x27c   : > { %v1459_v24 = vrot.slane %v1285_v36, 2 }
 0x27d   : > { %v11944_v33 = vadd.f32 %v2720_v59, %v2445_v35 }
 0x27e   : > { %v1460_v0 = vsel %vm1435_vm3, %v1457_v1, %v1459_v24 }
 0x27f   : > { %v1578_v21 = vadd.f32 %v1460_v0, %v11649_v10  ;;  %v2727_v10 = vsel %vm1435_vm3, %v2724_v37, %v2726_v8 }
 0x280   : > { %v2224_v50 = vpop.f32.mrf.mxu0  ;;  %9081 = vmatmul.msk.bf16.gmra.mxu2 %vm636_vm1, %v10880_v55  ;;  %9253 = vmatmul.msk.bf16.gmra.mxu3 %vm636_vm1, %v10401_v5 }
 0x281   : > { %v2116_v39 = vadd.f32 %v1999_v31, %v1578_v21 }
 0x282   : > { %v2560_v60 = vpop.f32.mrf.mxu1 }
 0x283   : > { %9299 = vmatmul.msk.bf16.gmra.mxu0 %vm636_vm1, %v10403_v19  ;;  %v1288_v11 = vpop.f32.mrf.mxu2  ;;  %v2003_v59 = vpop.f32.mrf.mxu3  ;;  %v2446_v45 = vadd.f32 %v2349_v51, %v2116_v39 }
 0x285   : > { %v11954_v2 = vadd.f32 %v2722_v38, %v2446_v45  ;;  %9343 = vmatmul.msk.bf16.gmra.mxu1 %vm636_vm1, %v10403_v19 }
 0x288   : > { %v11957_v1 = vpop.f32.mrf.mxu0 }
 0x289   : > { %v2354_v51 = vrot.slane %v11957_v1, 1 }
 0x28a   : > { %v2561_v37 = vpop.f32.mrf.mxu1 }
 0x28b   : > { %v1289_v5 = vpop.f32.mrf.mxu2  ;;  %v2005_v20 = vpop.f32.mrf.mxu3  ;;  %v2728_v45 = vrot.slane %v2561_v37, 2 }
 0x28c   : > { %v1461_v43 = vrot.slane %v1289_v5, 2 }
 0x28e   : > { %v1579_v31 = vadd.f32 %v1461_v43, %v11665_v44 }
 0x290   : > { %v11961_v16 = vpop.f32.mrf.mxu0  ;;  %v2117_v36 = vadd.f32 %v2003_v59, %v1579_v31  ;;  %9082 = vmatmul.msk.bf16.gmra.mxu2 %vm636_vm1, %v10881_v17  ;;  %9254 = vmatmul.msk.bf16.gmra.mxu3 %vm636_vm1, %v10402_v56 }
 0x291   : > { %v2355_v38 = vrot.slane %v11961_v16, 1  ;;  %v10885_v16 = vld [vmem:[#allocation2 + $0xb8] sm:$0xff] }
 0x292   : > { %v2447_v44 = vadd.f32 %v2351_v57, %v2117_v36  ;;  %v2564_v23 = vpop.f32.mrf.mxu1  ;;  %v10882_v36 = vld [vmem:[#allocation2 + $0xa0] sm:$0xff] }
 0x293   : > { %v11970_v41 = vsel %vm1072_vm2, %v2354_v51, %v2355_v38  ;;  %9300 = vmatmul.msk.bf16.gmra.mxu0 %vm636_vm1, %v10404_v58  ;;  %v1292_v35 = vpop.f32.mrf.mxu2  ;;  %v2008_v24 = vpop.f32.mrf.mxu3  ;;  %v2729_v8 = vrot.slane %v2564_v23, 2  ;;  %v10406_v23 = vld [vmem:[#allocation2 + $0xc8] sm:$0xff] }
 0x294   : > { %v1462_v0 = vrot.slane %v1292_v35, 2  ;;  %v11973_v21 = vadd.f32 %v2723_v34, %v2447_v44 }
 0x295   : > { %9344 = vmatmul.msk.bf16.gmra.mxu1 %vm636_vm1, %v10404_v58  ;;  %v2730_v34 = vsel %vm1435_vm3, %v2728_v45, %v2729_v8 }
 0x296   : > { %v1463_v56 = vsel %vm1435_vm3, %v1461_v43, %v1462_v0  ;;  %v10405_v43 = vld [vmem:[#allocation2 + $0xc0] sm:$0xff] }
 0x297   : > { %v1580_v50 = vadd.f32 %v1463_v56, %v11676_v46 }
 0x298   : > { %v2230_v55 = vpop.f32.mrf.mxu0 }
 0x299   : > { %v2118_v39 = vadd.f32 %v2005_v20, %v1580_v50 }
 0x29a   : > { %v2566_v20 = vpop.f32.mrf.mxu1 }
 0x29b   : > { %v1294_v11 = vpop.f32.mrf.mxu2  ;;  %v2010_v59 = vpop.f32.mrf.mxu3  ;;  %v2448_v57 = vadd.f32 %v11935_v47, %v2118_v39  ;;  %v2731_v17 = vrot.slane %v2566_v20, 2 }
 0x29c   : > { %v1464_v1 = vrot.slane %v1294_v11, 2 }
 0x29d   : > { %v11979_v60 = vadd.f32 %v2725_v4, %v2448_v57 }
 0x29e   : > { %v1465_v5 = vsel %vm1435_vm3, %v1462_v0, %v1464_v1 }
 0x29f   : > { %v1581_v46 = vadd.f32 %v1465_v5, %v11673_v29  ;;  %v2732_v29 = vsel %vm1435_vm3, %v2729_v8, %v2731_v17 }
 0x2a0   : > { %v2232_v31 = vpop.f32.mrf.mxu0  ;;  %9083 = vmatmul.msk.bf16.gmra.mxu2 %vm636_vm1, %v10882_v36  ;;  %9255 = vmatmul.msk.bf16.gmra.mxu3 %vm636_vm1, %v10403_v19 }
 0x2a1   : > { %v2119_v37 = vadd.f32 %v2008_v24, %v1581_v46 }
 0x2a2   : > { %v2569_v56 = vpop.f32.mrf.mxu1 }
 0x2a3   : > { %9301 = vmatmul.msk.bf16.gmra.mxu0 %vm636_vm1, %v10405_v43  ;;  %v1297_v47 = vpop.f32.mrf.mxu2  ;;  %v2012_v4 = vpop.f32.mrf.mxu3  ;;  %v2449_v44 = vadd.f32 %v2352_v54, %v2119_v37 }
 0x2a5   : > { %v11989_v35 = vadd.f32 %v2727_v10, %v2449_v44  ;;  %9345 = vmatmul.msk.bf16.gmra.mxu1 %vm636_vm1, %v10405_v43 }
 0x2a8   : > { %v11992_v0 = vpop.f32.mrf.mxu0 }
 0x2a9   : > { %v2357_v54 = vrot.slane %v11992_v0, 1 }
 0x2aa   : > { %v2570_v8 = vpop.f32.mrf.mxu1 }
 0x2ab   : > { %v1298_v19 = vpop.f32.mrf.mxu2  ;;  %v2014_v50 = vpop.f32.mrf.mxu3  ;;  %v2733_v44 = vrot.slane %v2570_v8, 2 }
 0x2ac   : > { %v1466_v55 = vrot.slane %v1298_v19, 2 }
 0x2ae   : > { %v1582_v24 = vadd.f32 %v1466_v55, %v11689_v52 }
 0x2b0   : > { %v11996_v39 = vpop.f32.mrf.mxu0  ;;  %v2120_v11 = vadd.f32 %v2012_v4, %v1582_v24  ;;  %9084 = vmatmul.msk.bf16.gmra.mxu2 %vm636_vm1, %v10883_v53  ;;  %9256 = vmatmul.msk.bf16.gmra.mxu3 %vm636_vm1, %v10404_v58 }
 0x2b1   : > { %v2358_v10 = vrot.slane %v11996_v39, 1  ;;  %v10887_v39 = vld [vmem:[#allocation2 + $0xc8] sm:$0xff] }
 0x2b2   : > { %v2450_v52 = vadd.f32 %v2354_v51, %v2120_v11  ;;  %v2573_v20 = vpop.f32.mrf.mxu1  ;;  %v10884_v11 = vld [vmem:[#allocation2 + $0xb0] sm:$0xff] }
 0x2b3   : > { %v12005_v59 = vsel %vm1072_vm2, %v2357_v54, %v2358_v10  ;;  %9302 = vmatmul.msk.bf16.gmra.mxu0 %vm636_vm1, %v10406_v23  ;;  %v1301_v57 = vpop.f32.mrf.mxu2  ;;  %v2017_v1 = vpop.f32.mrf.mxu3  ;;  %v2734_v17 = vrot.slane %v2573_v20, 2  ;;  %v10408_v20 = vld [vmem:[#allocation2 + $0xd8] sm:$0xff] }
 0x2b4   : > { %v1467_v5 = vrot.slane %v1301_v57, 2  ;;  %v12008_v46 = vadd.f32 %v2728_v45, %v2450_v52 }
 0x2b5   : > { %9346 = vmatmul.msk.bf16.gmra.mxu1 %vm636_vm1, %v10406_v23  ;;  %v2735_v45 = vsel %vm1435_vm3, %v2733_v44, %v2734_v17 }
 0x2b6   : > { %v1468_v58 = vsel %vm1435_vm3, %v1466_v55, %v1467_v5  ;;  %v10407_v55 = vld [vmem:[#allocation2 + $0xd0] sm:$0xff] }
 0x2b7   : > { %v1583_v31 = vadd.f32 %v1468_v58, %v11700_v40 }
 0x2b8   : > { %v2238_v36 = vpop.f32.mrf.mxu0 }
 0x2b9   : > { %v2121_v37 = vadd.f32 %v2014_v50, %v1583_v31 }
 0x2ba   : > { %v2575_v50 = vpop.f32.mrf.mxu1 }
 0x2bb   : > { %v1303_v47 = vpop.f32.mrf.mxu2  ;;  %v2019_v4 = vpop.f32.mrf.mxu3  ;;  %v2451_v51 = vadd.f32 %v11970_v41, %v2121_v37  ;;  %v2736_v53 = vrot.slane %v2575_v50, 2 }
 0x2bc   : > { %v1469_v0 = vrot.slane %v1303_v47, 2 }
 0x2bd   : > { %v12014_v56 = vadd.f32 %v2730_v34, %v2451_v51 }
 0x2be   : > { %v1470_v19 = vsel %vm1435_vm3, %v1467_v5, %v1469_v0 }
 0x2bf   : > { %v1584_v40 = vadd.f32 %v1470_v19, %v11697_v13  ;;  %v2737_v13 = vsel %vm1435_vm3, %v2734_v17, %v2736_v53 }
 0x2c0   : > { %v2240_v24 = vpop.f32.mrf.mxu0  ;;  %9085 = vmatmul.msk.bf16.gmra.mxu2 %vm636_vm1, %v10884_v11  ;;  %9257 = vmatmul.msk.bf16.gmra.mxu3 %vm636_vm1, %v10405_v43 }
 0x2c1   : > { %v2122_v8 = vadd.f32 %v2017_v1, %v1584_v40 }
 0x2c2   : > { %v2578_v58 = vpop.f32.mrf.mxu1 }
 0x2c3   : > { %9303 = vmatmul.msk.bf16.gmra.mxu0 %vm636_vm1, %v10407_v55  ;;  %v1306_v41 = vpop.f32.mrf.mxu2  ;;  %v2021_v34 = vpop.f32.mrf.mxu3  ;;  %v2452_v52 = vadd.f32 %v2355_v38, %v2122_v8 }
 0x2c5   : > { %v12024_v57 = vadd.f32 %v2732_v29, %v2452_v52  ;;  %9347 = vmatmul.msk.bf16.gmra.mxu1 %vm636_vm1, %v10407_v55 }
 0x2c8   : > { %v12027_v5 = vpop.f32.mrf.mxu0 }
 0x2c9   : > { %v2360_v38 = vrot.slane %v12027_v5, 1 }
 0x2ca   : > { %v2579_v17 = vpop.f32.mrf.mxu1 }
 0x2cb   : > { %v1307_v43 = vpop.f32.mrf.mxu2  ;;  %v2023_v31 = vpop.f32.mrf.mxu3  ;;  %v2738_v52 = vrot.slane %v2579_v17, 2 }
 0x2cc   : > { %v1471_v36 = vrot.slane %v1307_v43, 2 }
 0x2ce   : > { %v1585_v1 = vadd.f32 %v1471_v36, %v11713_v6 }
 0x2d0   : > { %v12031_v37 = vpop.f32.mrf.mxu0  ;;  %v2123_v47 = vadd.f32 %v2021_v34, %v1585_v1  ;;  %9086 = vmatmul.msk.bf16.gmra.mxu2 %vm636_vm1, %v10885_v16  ;;  %9258 = vmatmul.msk.bf16.gmra.mxu3 %vm636_vm1, %v10406_v23 }
 0x2d1   : > { %v2361_v29 = vrot.slane %v12031_v37, 1 }
 0x2d2   : > { %v2453_v6 = vadd.f32 %v2357_v54, %v2123_v47  ;;  %v2582_v50 = vpop.f32.mrf.mxu1  ;;  %v10886_v47 = vld [vmem:[#allocation2 + $0xc0] sm:$0xff] }
 0x2d3   : > { %v12040_v4 = vsel %vm1072_vm2, %v2360_v38, %v2361_v29  ;;  %9304 = vmatmul.msk.bf16.gmra.mxu0 %vm636_vm1, %v10408_v20  ;;  %v1310_v51 = vpop.f32.mrf.mxu2  ;;  %v2026_v0 = vpop.f32.mrf.mxu3  ;;  %v2739_v53 = vrot.slane %v2582_v50, 2  ;;  %v10410_v50 = vld [vmem:[#allocation2 + $0xe8] sm:$0xff] }
 0x2d4   : > { %v1472_v19 = vrot.slane %v1310_v51, 2  ;;  %v12043_v40 = vadd.f32 %v2733_v44, %v2453_v6 }
 0x2d5   : > { %9348 = vmatmul.msk.bf16.gmra.mxu1 %vm636_vm1, %v10408_v20  ;;  %v2740_v44 = vsel %vm1435_vm3, %v2738_v52, %v2739_v53 }
 0x2d6   : > { %v1473_v23 = vsel %vm1435_vm3, %v1471_v36, %v1472_v19  ;;  %v10409_v36 = vld [vmem:[#allocation2 + $0xe0] sm:$0xff] }
 0x2d7   : > { %v1586_v24 = vadd.f32 %v1473_v23, %v11724_v61 }
 0x2d8   : > { %v2246_v11 = vpop.f32.mrf.mxu0 }
 0x2d9   : > { %v2124_v8 = vadd.f32 %v2023_v31, %v1586_v24 }
 0x2da   : > { %v2584_v31 = vpop.f32.mrf.mxu1 }
 0x2db   : > { %v1312_v41 = vpop.f32.mrf.mxu2  ;;  %v2028_v34 = vpop.f32.mrf.mxu3  ;;  %v2454_v54 = vadd.f32 %v12005_v59, %v2124_v8  ;;  %v2741_v16 = vrot.slane %v2584_v31, 2 }
 0x2dc   : > { %v1474_v5 = vrot.slane %v1312_v41, 2 }
 0x2dd   : > { %v12049_v58 = vadd.f32 %v2735_v45, %v2454_v54 }
 0x2de   : > { %v1475_v43 = vsel %vm1435_vm3, %v1472_v19, %v1474_v5 }
 0x2df   : > { %v1587_v61 = vadd.f32 %v1475_v43, %v11721_v9  ;;  %v2742_v9 = vsel %vm1435_vm3, %v2739_v53, %v2741_v16 }
 0x2e0   : > { %v2248_v1 = vpop.f32.mrf.mxu0  ;;  %9087 = vmatmul.msk.bf16.gmra.mxu2 %vm636_vm1, %v10886_v47  ;;  %9259 = vmatmul.msk.bf16.gmra.mxu3 %vm636_vm1, %v10407_v55 }
 0x2e1   : > { %v2125_v17 = vadd.f32 %v2026_v0, %v1587_v61 }
 0x2e2   : > { %v2587_v23 = vpop.f32.mrf.mxu1 }
 0x2e3   : > { %9305 = vmatmul.msk.bf16.gmra.mxu0 %vm636_vm1, %v10409_v36  ;;  %v1315_v59 = vpop.f32.mrf.mxu2  ;;  %v2030_v45 = vpop.f32.mrf.mxu3  ;;  %v2455_v6 = vadd.f32 %v2358_v10, %v2125_v17 }
 0x2e5   : > { %v12059_v51 = vadd.f32 %v2737_v13, %v2455_v6  ;;  %9349 = vmatmul.msk.bf16.gmra.mxu1 %vm636_vm1, %v10409_v36 }
 0x2e8   : > { %v12062_v19 = vpop.f32.mrf.mxu0 }
 0x2e9   : > { %v2363_v10 = vrot.slane %v12062_v19, 1 }
 0x2ea   : > { %v2588_v53 = vpop.f32.mrf.mxu1 }
 0x2eb   : > { %v1316_v55 = vpop.f32.mrf.mxu2  ;;  %v2032_v24 = vpop.f32.mrf.mxu3  ;;  %v2743_v6 = vrot.slane %v2588_v53, 2 }
 0x2ec   : > { %v1476_v11 = vrot.slane %v1316_v55, 2 }
 0x2ee   : > { %v1588_v0 = vadd.f32 %v1476_v11, %v11506_v42 }
 0x2f0   : > { %v12066_v8 = vpop.f32.mrf.mxu0  ;;  %v2126_v41 = vadd.f32 %v2030_v45, %v1588_v0  ;;  %9088 = vmatmul.msk.bf16.gmra.mxu2 %vm636_vm1, %v10887_v39  ;;  %9260 = vmatmul.msk.bf16.gmra.mxu3 %vm636_vm1, %v10408_v20 }
 0x2f1   : > { %v2364_v13 = vrot.slane %v12066_v8, 1 }
 0x2f2   : > { %v2456_v42 = vadd.f32 %v2360_v38, %v2126_v41  ;;  %v2591_v31 = vpop.f32.mrf.mxu1  ;;  %v10888_v41 = vld [vmem:[#allocation2 + $0xd0] sm:$0xff] }
 0x2f3   : > { %v12075_v34 = vsel %vm1072_vm2, %v2363_v10, %v2364_v13  ;;  %9306 = vmatmul.msk.bf16.gmra.mxu0 %vm636_vm1, %v10410_v50  ;;  %v1319_v54 = vpop.f32.mrf.mxu2  ;;  %v2035_v5 = vpop.f32.mrf.mxu3  ;;  %v2744_v16 = vrot.slane %v2591_v31, 2  ;;  %v10412_v31 = vld [vmem:[#allocation2 + $0xf8] sm:$0xff] }
 0x2f4   : > { %v1477_v43 = vrot.slane %v1319_v54, 2  ;;  %v12078_v61 = vadd.f32 %v2738_v52, %v2456_v42 }
 0x2f5   : > { %9350 = vmatmul.msk.bf16.gmra.mxu1 %vm636_vm1, %v10410_v50  ;;  %v2745_v52 = vsel %vm1435_vm3, %v2743_v6, %v2744_v16 }
 0x2f6   : > { %v1478_v20 = vsel %vm1435_vm3, %v1476_v11, %v1477_v43  ;;  %v10411_v11 = vld [vmem:[#allocation2 + $0xf0] sm:$0xff] }
 0x2f7   : > { %v1589_v1 = vadd.f32 %v1478_v20, %v11532_v3 }
 0x2f8   : > { %v2254_v47 = vpop.f32.mrf.mxu0 }
 0x2f9   : > { %v2127_v17 = vadd.f32 %v2032_v24, %v1589_v1 }
 0x2fa   : > { %v2593_v24 = vpop.f32.mrf.mxu1 }
 0x2fb   : > { %v1321_v59 = vpop.f32.mrf.mxu2  ;;  %v2037_v45 = vpop.f32.mrf.mxu3  ;;  %v2457_v38 = vadd.f32 %v12040_v4, %v2127_v17  ;;  %v2746_v39 = vrot.slane %v2593_v24, 2 }
 0x2fc   : > { %v1479_v19 = vrot.slane %v1321_v59, 2 }
 0x2fd   : > { %v12084_v23 = vadd.f32 %v2740_v44, %v2457_v38 }
 0x2fe   : > { %v1480_v55 = vsel %vm1435_vm3, %v1477_v43, %v1479_v19 }
 0x2ff   : > { %v1590_v3 = vadd.f32 %v1480_v55, %v11525_v63  ;;  %v2747_v63 = vsel %vm1435_vm3, %v2744_v16, %v2746_v39 }
 0x300   : > { %v2256_v0 = vpop.f32.mrf.mxu0  ;;  %9089 = vmatmul.msk.bf16.gmra.mxu2 %vm636_vm1, %v10888_v41  ;;  %9261 = vmatmul.msk.bf16.gmra.mxu3 %vm636_vm1, %v10409_v36 }
 0x301   : > { %v2128_v53 = vadd.f32 %v2035_v5, %v1590_v3 }
 0x302   : > { %v2596_v20 = vpop.f32.mrf.mxu1 }
 0x303   : > { %9307 = vmatmul.msk.bf16.gmra.mxu0 %vm636_vm1, %v10411_v11  ;;  %v1324_v4 = vpop.f32.mrf.mxu2  ;;  %v2039_v44 = vpop.f32.mrf.mxu3  ;;  %v2458_v42 = vadd.f32 %v2361_v29, %v2128_v53  ;;  %v10889_v29 = vld [vmem:[#allocation2 + $0xd8] sm:$0xff] }
 0x305   : > { %v12094_v54 = vadd.f32 %v2742_v9, %v2458_v42  ;;  %9351 = vmatmul.msk.bf16.gmra.mxu1 %vm636_vm1, %v10411_v11 }
 0x308   : > { %v12097_v43 = vpop.f32.mrf.mxu0 }
 0x309   : > { %v2366_v9 = vrot.slane %v12097_v43, 1 }
 0x30a   : > { %v12107_v59 = vpop.f32.mrf.mxu1 }
 0x30b   : > { %v1325_v36 = vpop.f32.mrf.mxu2  ;;  %v2041_v1 = vpop.f32.mrf.mxu3 }
 0x30c   : > { %v1481_v47 = vrot.slane %v1325_v36, 2  ;;  %v15028_v36 = vld [vmem:[#allocation37_spill] sm:$0xff] }
 0x30e   : > { %v1591_v5 = vadd.f32 %v1481_v47, %v11556_v7 }
 0x310   : > { %v12101_v17 = vpop.f32.mrf.mxu0  ;;  %v2129_v37 = vadd.f32 %v2039_v44, %v1591_v5  ;;  %9090 = vmatmul.msk.bf16.gmra.mxu2 %vm636_vm1, %v10889_v29  ;;  %9262 = vmatmul.msk.bf16.gmra.mxu3 %vm636_vm1, %v10410_v50  ;;  %v12118_v50 = vld [vmem:[%s11184_s25 + $0x78] sm:$0xf]  ;;  %v10890_v5 = vld [vmem:[#allocation2 + $0xe0] sm:$0xff] }
 0x311   : > { %v14946_v16 = vrot.slane %v12101_v17, 1  ;;  %15027 = vst [vmem:[#allocation59_spill] sm:$0xff] %v12118_v50 }
 0x312   : > { %v2459_v45 = vadd.f32 %v2363_v10, %v2129_v37  ;;  %394 = vst.msk [vmem:[#allocation2 + $0x104] sm:$0xf] %vm246_vm0, %v12118_v50  ;;  %v12124_v39 = vpop.f32.mrf.mxu1 }
 0x313   : > { %v12112_v7 = vsel %vm1072_vm2, %v2366_v9, %v14946_v16  ;;  %9308 = vmatmul.msk.bf16.gmra.mxu0 %vm636_vm1, %v10412_v31  ;;  %v1328_v38 = vpop.f32.mrf.mxu2  ;;  %v2044_v19 = vpop.f32.mrf.mxu3  ;;  %v10892_v16 = vld [vmem:[#allocation2 + $0xf0] sm:$0xff] }
 0x314   : > { %v1482_v55 = vrot.slane %v1328_v38, 2  ;;  %v12115_v3 = vadd.f32 %v2743_v6, %v2459_v45  ;;  %v12138_v45 = vld [vmem:[%s11184_s25 + $0x7c] sm:$0xf] }
 0x315   : > { %9352 = vmatmul.msk.bf16.gmra.mxu1 %vm636_vm1, %v10412_v31  ;;  %15029 = vst [vmem:[#allocation37_spill] sm:$0xff] %v12138_v45 }
 0x316   : > { %v1483_v0 = vsel %vm1435_vm3, %v1481_v47, %v1482_v55  ;;  %395 = vst.msk [vmem:[#allocation2 + $0x108] sm:$0xf] %vm246_vm0, %v12138_v45 }
 0x317   : > { %v1592_v41 = vadd.f32 %v1483_v0, %v11582_v22 }
 0x318   : > { %v2262_v24 = vpop.f32.mrf.mxu0 }
 0x319   : > { %v2130_v10 = vadd.f32 %v2041_v1, %v1592_v41  ;;  %v10413_v20 = vld [vmem:[#allocation2 + $0x100] sm:$0xff]  ;;  %v15030_v24 = vld [vmem:[#allocation41_spill] sm:$0xff] }
 0x31a   : > { %v2602_v1 = vpop.f32.mrf.mxu1 }
 0x31b   : > { %v1330_v53 = vpop.f32.mrf.mxu2  ;;  %v2046_v4 = vpop.f32.mrf.mxu3  ;;  %v2460_v6 = vadd.f32 %v12075_v34, %v2130_v10 }
 0x31c   : > { %v1484_v44 = vrot.slane %v1330_v53, 2  ;;  %v10891_v4 = vld [vmem:[#allocation2 + $0xe8] sm:$0xff] }
 0x31d   : > { %v12128_v42 = vadd.f32 %v2745_v52, %v2460_v6  ;;  %v10414_v53 = vld [vmem:[#allocation2 + $0x108] sm:$0xff] }
 0x31e   : > { %v1485_v43 = vsel %vm1435_vm3, %v1482_v55, %v1484_v44 }
 0x31f   : > { %v1593_v47 = vadd.f32 %v1485_v43, %v15028_v36 }
 0x320   : > { %v2264_v22 = vpop.f32.mrf.mxu0  ;;  %9091 = vmatmul.msk.bf16.gmra.mxu2 %vm636_vm1, %v10890_v5  ;;  %9263 = vmatmul.msk.bf16.gmra.mxu3 %vm636_vm1, %v10411_v11 }
 0x321   : > { %v2131_v37 = vadd.f32 %v2044_v19, %v1593_v47 }
 0x322   : > { %v2605_v0 = vpop.f32.mrf.mxu1 }
 0x323   : > { %9309 = vmatmul.msk.bf16.gmra.mxu0 %vm636_vm1, %v10413_v20  ;;  %v1333_v34 = vpop.f32.mrf.mxu2  ;;  %v2048_v29 = vpop.f32.mrf.mxu3  ;;  %v2461_v52 = vadd.f32 %v2364_v13, %v2131_v37  ;;  %v2749_v37 = vrot.slane %v12124_v39, 2 }
 0x324   : > { %v15032_v34 = vld [vmem:[#allocation43_spill] sm:$0xff] }
 0x325   : > { %v12140_v38 = vadd.f32 %v2747_v63, %v2461_v52  ;;  %9353 = vmatmul.msk.bf16.gmra.mxu1 %vm636_vm1, %v10413_v20 }
 0x328   : > { %v12144_v55 = vpop.f32.mrf.mxu0 }
 0x329   : > { %v2369_v63 = vrot.slane %v12144_v55, 1  ;;  %v14947_v55 = vrot.slane %v12107_v59, 2 }
 0x32a   : > { %v12154_v44 = vpop.f32.mrf.mxu1 }
 0x32b   : > { %v1334_v11 = vpop.f32.mrf.mxu2  ;;  %v2050_v19 = vpop.f32.mrf.mxu3  ;;  %15031 = vst [vmem:[#allocation41_spill] sm:$0xff] %v12154_v44 }
 0x32c   : > { %v1486_v41 = vrot.slane %v1334_v11, 2 }
 0x32e   : > { %v1594_v10 = vadd.f32 %v1486_v41, %v15030_v24 }
 0x330   : > { %v12148_v8 = vpop.f32.mrf.mxu0  ;;  %v2132_v13 = vadd.f32 %v2048_v29, %v1594_v10  ;;  %9092 = vmatmul.msk.bf16.gmra.mxu2 %vm636_vm1, %v10891_v4  ;;  %9264 = vmatmul.msk.bf16.gmra.mxu3 %vm636_vm1, %v10412_v31 }
 0x331   : > { %v14945_v6 = vrot.slane %v12148_v8, 1 }
 0x332   : > { %v12162_v36 = vadd.f32 %v2366_v9, %v2132_v13  ;;  %v12168_v0 = vpop.f32.mrf.mxu1  ;;  %v2750_v9 = vsel %vm1435_vm3, %v14947_v55, %v2749_v37 }
 0x333   : > { %v12159_v43 = vsel %vm1072_vm2, %v2369_v63, %v14945_v6  ;;  %9310 = vmatmul.msk.bf16.gmra.mxu0 %vm636_vm1, %v10414_v53  ;;  %v1337_v47 = vpop.f32.mrf.mxu2  ;;  %v2053_v22 = vpop.f32.mrf.mxu3 }
 0x334   : > { %v1487_v5 = vrot.slane %v1337_v47, 2  ;;  %v2751_v47 = vrot.slane %v2602_v1, 2 }
 0x335   : > { %9354 = vmatmul.msk.bf16.gmra.mxu1 %vm636_vm1, %v10414_v53 }
 0x336   : > { %v1488_v31 = vsel %vm1435_vm3, %v1486_v41, %v1487_v5 }
 0x337   : > { %v1595_v29 = vadd.f32 %v1488_v31, %v15032_v34  ;;  %v10421_v31 = vld [vmem:[#allocation2 + $0x20] sm:$0xff] }
 0x338   : > { %v2270_v52 = vpop.f32.mrf.mxu0  ;;  %v15033_v34 = vld [vmem:[#allocation42_spill] sm:$0xff] }
 0x339   : > { %v2133_v11 = vadd.f32 %v2050_v19, %v1595_v29 }
 0x33a   : > { %v2611_v19 = vpop.f32.mrf.mxu1 }
 0x33b   : > { %v1339_v24 = vpop.f32.mrf.mxu2  ;;  %v2055_v10 = vpop.f32.mrf.mxu3  ;;  %v2463_v41 = vadd.f32 %v12112_v7, %v2133_v11  ;;  %v2752_v7 = vsel %vm1435_vm3, %v2749_v37, %v2751_v47  ;;  %v10893_v37 = vld [vmem:[#allocation2 + $0xf8] sm:$0xff] }
 0x33c   : > { %v1489_v13 = vrot.slane %v1339_v24, 2 }
 0x33d   : > { %v12175_v39 = vadd.f32 %v2750_v9, %v2463_v41 }
 0x33e   : > { %v1490_v4 = vsel %vm1435_vm3, %v1487_v5, %v1489_v13  ;;  %v15034_v5 = vrot.slane %v12101_v17, 1 }
 0x33f   : > { %v1596_v52 = vadd.f32 %v1490_v4, %v15033_v34 }
 0x340   : > { %v2272_v6 = vpop.f32.mrf.mxu0  ;;  %9093 = vmatmul.msk.bf16.gmra.mxu2 %vm636_vm1, %v10892_v16  ;;  %9265 = vmatmul.msk.bf16.gmra.mxu3 %vm636_vm1, %v10413_v20  ;;  %v15035_v20 = vld [vmem:[#allocation44_spill] sm:$0xff] }
 0x341   : > { %v2134_v29 = vadd.f32 %v2053_v22, %v1596_v52  ;;  %v10422_v22 = vld [vmem:[#allocation2 + $0x28] sm:$0xff] }
 0x342   : > { %v2614_v6 = vpop.f32.mrf.mxu1 }
 0x343   : > { %9583 = vmatmul.msk.bf16.vlgmr.msra.gmra.mxu0 %vm636_vm1, %v10421_v31  ;;  %v1342_v11 = vpop.f32.mrf.mxu2  ;;  %v2057_v9 = vpop.f32.mrf.mxu3  ;;  %v2464_v1 = vadd.f32 %v15034_v5, %v2134_v29  ;;  %v15038_v6 = vld [vmem:[#allocation46_spill] sm:$0xff] }
 0x345   : > { %v12185_v24 = vadd.f32 %v2752_v7, %v2464_v1 }
 0x348   : > { %v12187_v10 = vpop.f32.mrf.mxu0 }
 0x349   : > { %v2372_v17 = vrot.slane %v12187_v10, 1  ;;  %v2754_v10 = vrot.slane %v12168_v0, 2 }
 0x34a   : > { %v12196_v29 = vpop.f32.mrf.mxu1 }
 0x34b   : > { %v1343_v41 = vpop.f32.mrf.mxu2  ;;  %v2059_v16 = vpop.f32.mrf.mxu3  ;;  %15036 = vst [vmem:[#allocation43_spill] sm:$0xff] %v12196_v29 }
 0x34c   : > { %v1491_v13 = vrot.slane %v1343_v41, 2 }
 0x34e   : > { %v1597_v4 = vadd.f32 %v1491_v13, %v15035_v20 }
 0x350   : > { %v12190_v34 = vpop.f32.mrf.mxu0  ;;  %v2135_v52 = vadd.f32 %v2057_v9, %v1597_v4  ;;  %9094 = vmatmul.msk.bf16.gmra.mxu2 %vm636_vm1, %v10893_v37  ;;  %9266 = vmatmul.msk.bf16.gmra.mxu3 %vm636_vm1, %v10414_v53  ;;  %v14951_v4 = vrot.slane %v12154_v44, 2 }
 0x351   : > { %v14948_v47 = vrot.slane %v12190_v34, 1 }
 0x352   : > { %v12204_v11 = vadd.f32 %v2369_v63, %v2135_v52  ;;  %v12210_v37 = vpop.f32.mrf.mxu1  ;;  %v2755_v63 = vsel %vm1435_vm3, %v14951_v4, %v2754_v10 }
 0x353   : > { %v12201_v7 = vsel %vm1072_vm2, %v2372_v17, %v14948_v47  ;;  %9584 = vmatmul.msk.bf16.gmra.mxu0 %vm636_vm1, %v10422_v22  ;;  %v1346_v9 = vpop.f32.mrf.mxu2  ;;  %v2062_v5 = vpop.f32.mrf.mxu3 }
 0x354   : > { %15037 = vst [vmem:[#allocation42_spill] sm:$0xff] %v12204_v11  ;;  %v1492_v1 = vrot.slane %v1346_v9, 2 }
 0x356   : > { %v1493_v53 = vsel %vm1435_vm3, %v1491_v13, %v1492_v1 }
 0x357   : > { %v1598_v41 = vadd.f32 %v1493_v53, %v15038_v6  ;;  %v2756_v53 = vrot.slane %v2611_v19, 2  ;;  %v10423_v6 = vld [vmem:[#allocation2 + $0x30] sm:$0xff] }
 0x358   : > { %v2278_v20 = vpop.f32.mrf.mxu0 }
 0x359   : > { %v2136_v55 = vadd.f32 %v2059_v16, %v1598_v41  ;;  %v15040_v20 = vld [vmem:[#allocation45_spill] sm:$0xff] }
 0x35a   : > { %v2620_v16 = vpop.f32.mrf.mxu1 }
 0x35b   : > { %v1348_v52 = vpop.f32.mrf.mxu2  ;;  %v2064_v47 = vpop.f32.mrf.mxu3  ;;  %v2466_v9 = vadd.f32 %v12159_v43, %v2136_v55  ;;  %v2757_v43 = vsel %vm1435_vm3, %v2754_v10, %v2756_v53 }
 0x35c   : > { %v1494_v45 = vrot.slane %v1348_v52, 2 }
 0x35d   : > { %v12216_v13 = vadd.f32 %v2755_v63, %v2466_v9  ;;  %v15041_v63 = vrot.slane %v12148_v8, 1 }
 0x35e   : > { %v1495_v0 = vsel %vm1435_vm3, %v1492_v1, %v1494_v45 }
 0x35f   : > { %15039 = vst [vmem:[#allocation44_spill] sm:$0xff] %v12216_v13  ;;  %v1599_v50 = vadd.f32 %v1495_v0, %v15040_v20 }
 0x360   : > { %v2280_v11 = vpop.f32.mrf.mxu0  ;;  %9495 = vmatmul.msk.bf16.vlgmr.msra.gmra.mxu2 %vm636_vm1, %v10421_v31  ;;  %9539 = vmatmul.msk.bf16.vlgmr.msra.gmra.mxu3 %vm636_vm1, %v10421_v31  ;;  %v15043_v31 = vld [vmem:[#allocation47_spill] sm:$0xff] }
 0x361   : > { %v2137_v41 = vadd.f32 %v2062_v5, %v1599_v50  ;;  %v10424_v50 = vld [vmem:[#allocation2 + $0x38] sm:$0xff] }
 0x362   : > { %v2623_v11 = vpop.f32.mrf.mxu1 }
 0x363   : > { %9585 = vmatmul.msk.bf16.gmra.mxu0 %vm636_vm1, %v10423_v6  ;;  %v1351_v55 = vpop.f32.mrf.mxu2  ;;  %v2066_v47 = vpop.f32.mrf.mxu3  ;;  %v2467_v45 = vadd.f32 %v15041_v63, %v2137_v41 }
 0x365   : > { %v12226_v19 = vadd.f32 %v2757_v43, %v2467_v45  ;;  %v2759_v45 = vrot.slane %v12210_v37, 2 }
 0x367   : > { %15042 = vst [vmem:[#allocation46_spill] sm:$0xff] %v12226_v19 }
 0x368   : > { %v12228_v1 = vpop.f32.mrf.mxu0 }
 0x369   : > { %v2375_v8 = vrot.slane %v12228_v1, 1  ;;  %v15045_v1 = vld [vmem:[#allocation49_spill] sm:$0xff] }
 0x36a   : > { %v12237_v53 = vpop.f32.mrf.mxu1 }
 0x36b   : > { %v1352_v52 = vpop.f32.mrf.mxu2  ;;  %v2068_v9 = vpop.f32.mrf.mxu3 }
 0x36c   : > { %v1496_v0 = vrot.slane %v1352_v52, 2 }
 0x36e   : > { %v1600_v20 = vadd.f32 %v1496_v0, %v15043_v31  ;;  %v14954_v31 = vrot.slane %v12196_v29, 2 }
 0x370   : > { %v12231_v5 = vpop.f32.mrf.mxu0  ;;  %v2138_v4 = vadd.f32 %v2066_v47, %v1600_v20  ;;  %9496 = vmatmul.msk.bf16.gmra.mxu2 %vm636_vm1, %v10422_v22  ;;  %9540 = vmatmul.msk.bf16.gmra.mxu3 %vm636_vm1, %v10422_v22 }
 0x371   : > { %v14952_v10 = vrot.slane %v12231_v5, 1 }
 0x372   : > { %v12245_v43 = vadd.f32 %v2372_v17, %v2138_v4  ;;  %v12251_v20 = vpop.f32.mrf.mxu1  ;;  %v2760_v17 = vsel %vm1435_vm3, %v14954_v31, %v2759_v45 }
 0x373   : > { %v12242_v41 = vsel %vm1072_vm2, %v2375_v8, %v14952_v10  ;;  %9586 = vmatmul.msk.bf16.gmra.mxu0 %vm636_vm1, %v10424_v50  ;;  %v1355_v55 = vpop.f32.mrf.mxu2  ;;  %v2071_v47 = vpop.f32.mrf.mxu3 }
 0x374   : > { %15044 = vst [vmem:[#allocation45_spill] sm:$0xff] %v12245_v43  ;;  %v1497_v63 = vrot.slane %v1355_v55, 2 }
 0x376   : > { %v1498_v22 = vsel %vm1435_vm3, %v1496_v0, %v1497_v63 }
 0x377   : > { %v1601_v11 = vadd.f32 %v1498_v22, %v15045_v1  ;;  %v2761_v22 = vrot.slane %v2620_v16, 2  ;;  %v10425_v1 = vld [vmem:[#allocation2 + $0x40] sm:$0xff] }
 0x378   : > { %v2286_v52 = vpop.f32.mrf.mxu0 }
 0x379   : > { %v2139_v10 = vadd.f32 %v2068_v9, %v1601_v11  ;;  %v15047_v52 = vld [vmem:[#allocation48_spill] sm:$0xff] }
 0x37a   : > { %v2629_v9 = vpop.f32.mrf.mxu1 }
 0x37b   : > { %v1357_v4 = vpop.f32.mrf.mxu2  ;;  %v2073_v43 = vpop.f32.mrf.mxu3  ;;  %v2469_v55 = vadd.f32 %v12201_v7, %v2139_v10  ;;  %v2762_v7 = vsel %vm1435_vm3, %v2759_v45, %v2761_v22 }
 0x37c   : > { %v1499_v13 = vrot.slane %v1357_v4, 2 }
 0x37d   : > { %v12257_v0 = vadd.f32 %v2760_v17, %v2469_v55  ;;  %v15048_v17 = vrot.slane %v12190_v34, 1 }
 0x37e   : > { %v1500_v37 = vsel %vm1435_vm3, %v1497_v63, %v1499_v13 }
 0x37f   : > { %15046 = vst [vmem:[#allocation47_spill] sm:$0xff] %v12257_v0  ;;  %v1602_v19 = vadd.f32 %v1500_v37, %v15047_v52 }
 0x380   : > { %v2288_v44 = vpop.f32.mrf.mxu0  ;;  %9497 = vmatmul.msk.bf16.gmra.mxu2 %vm636_vm1, %v10423_v6  ;;  %9541 = vmatmul.msk.bf16.gmra.mxu3 %vm636_vm1, %v10423_v6  ;;  %v15050_v6 = vld [vmem:[#allocation50_spill] sm:$0xff] }
 0x381   : > { %v2140_v11 = vadd.f32 %v2071_v47, %v1602_v19  ;;  %v10426_v19 = vld [vmem:[#allocation2 + $0x48] sm:$0xff] }
 0x382   : > { %v2632_v44 = vpop.f32.mrf.mxu1 }
 0x383   : > { %9587 = vmatmul.msk.bf16.gmra.mxu0 %vm636_vm1, %v10425_v1  ;;  %v1360_v10 = vpop.f32.mrf.mxu2  ;;  %v2075_v43 = vpop.f32.mrf.mxu3  ;;  %v2470_v13 = vadd.f32 %v15048_v17, %v2140_v11 }
 0x385   : > { %v12267_v16 = vadd.f32 %v2762_v7, %v2470_v13 }
 0x387   : > { %15049 = vst [vmem:[#allocation49_spill] sm:$0xff] %v12267_v16 }
 0x388   : > { %v12269_v63 = vpop.f32.mrf.mxu0 }
 0x389   : > { %v2378_v34 = vrot.slane %v12269_v63, 1  ;;  %v15052_v63 = vld [vmem:[#allocation52_spill] sm:$0xff] }
 0x38a   : > { %v12278_v22 = vpop.f32.mrf.mxu1 }
 0x38b   : > { %v1361_v4 = vpop.f32.mrf.mxu2  ;;  %v2077_v55 = vpop.f32.mrf.mxu3 }
 0x38c   : > { %v1501_v37 = vrot.slane %v1361_v4, 2 }
 0x38e   : > { %v1603_v52 = vadd.f32 %v1501_v37, %v15050_v6  ;;  %v14957_v6 = vrot.slane %v12237_v53, 2 }
 0x390   : > { %v12272_v47 = vpop.f32.mrf.mxu0  ;;  %v2141_v31 = vadd.f32 %v2075_v43, %v1603_v52  ;;  %9498 = vmatmul.msk.bf16.gmra.mxu2 %vm636_vm1, %v10424_v50  ;;  %9542 = vmatmul.msk.bf16.gmra.mxu3 %vm636_vm1, %v10424_v50  ;;  %v2764_v50 = vrot.slane %v12251_v20, 2 }
 0x391   : > { %v14955_v45 = vrot.slane %v12272_v47, 1 }
 0x392   : > { %v12284_v7 = vadd.f32 %v2375_v8, %v2141_v31  ;;  %v12290_v52 = vpop.f32.mrf.mxu1  ;;  %v2765_v8 = vsel %vm1435_vm3, %v14957_v6, %v2764_v50 }
 0x393   : > { %v2380_v11 = vsel %vm1072_vm2, %v2378_v34, %v14955_v45  ;;  %9588 = vmatmul.msk.bf16.gmra.mxu0 %vm636_vm1, %v10426_v19  ;;  %v1364_v10 = vpop.f32.mrf.mxu2  ;;  %v2080_v43 = vpop.f32.mrf.mxu3 }
 0x394   : > { %15051 = vst [vmem:[#allocation48_spill] sm:$0xff] %v12284_v7  ;;  %v1502_v17 = vrot.slane %v1364_v10, 2 }
 0x396   : > { %v1503_v13 = vsel %vm1435_vm3, %v1501_v37, %v1502_v17 }
 0x397   : > { %v1604_v44 = vadd.f32 %v1503_v13, %v15052_v63  ;;  %v2766_v13 = vrot.slane %v2629_v9, 2  ;;  %v10427_v63 = vld [vmem:[#allocation2 + $0x50] sm:$0xff] }
 0x398   : > { %v2294_v4 = vpop.f32.mrf.mxu0 }
 0x399   : > { %v2142_v0 = vadd.f32 %v2077_v55, %v1604_v44  ;;  %v15054_v4 = vld [vmem:[#allocation51_spill] sm:$0xff] }
 0x39a   : > { %v2638_v55 = vpop.f32.mrf.mxu1 }
 0x39b   : > { %v1366_v31 = vpop.f32.mrf.mxu2  ;;  %v2082_v45 = vpop.f32.mrf.mxu3  ;;  %v2472_v10 = vadd.f32 %v12242_v41, %v2142_v0  ;;  %v2767_v41 = vsel %vm1435_vm3, %v2764_v50, %v2766_v13 }
 0x39c   : > { %v1504_v7 = vrot.slane %v1366_v31, 2 }
 0x39d   : > { %v12296_v37 = vadd.f32 %v2765_v8, %v2472_v10  ;;  %v15055_v8 = vrot.slane %v12231_v5, 1 }
 0x39e   : > { %v1505_v20 = vsel %vm1435_vm3, %v1502_v17, %v1504_v7 }
 0x39f   : > { %15053 = vst [vmem:[#allocation50_spill] sm:$0xff] %v12296_v37  ;;  %v1605_v16 = vadd.f32 %v1505_v20, %v15054_v4 }
 0x3a0   : > { %v2296_v29 = vpop.f32.mrf.mxu0  ;;  %9499 = vmatmul.msk.bf16.gmra.mxu2 %vm636_vm1, %v10425_v1  ;;  %9543 = vmatmul.msk.bf16.gmra.mxu3 %vm636_vm1, %v10425_v1  ;;  %v15056_v1 = vld [vmem:[#allocation53_spill] sm:$0xff] }
 0x3a1   : > { %v2143_v44 = vadd.f32 %v2080_v43, %v1605_v16  ;;  %v10428_v16 = vld [vmem:[#allocation2 + $0x58] sm:$0xff] }
 0x3a2   : > { %v2641_v29 = vpop.f32.mrf.mxu1 }
 0x3a3   : > { %9589 = vmatmul.msk.bf16.gmra.mxu0 %vm636_vm1, %v10427_v63  ;;  %v1369_v0 = vpop.f32.mrf.mxu2  ;;  %v2084_v45 = vpop.f32.mrf.mxu3  ;;  %v2473_v7 = vadd.f32 %v15055_v8, %v2143_v44 }
 0x3a5   : > { %v12306_v9 = vadd.f32 %v2767_v41, %v2473_v7  ;;  %v15058_v7 = vld [vmem:[#allocation55_spill] sm:$0xff] }
 0x3a8   : > { %v12308_v17 = vpop.f32.mrf.mxu0 }
 0x3a9   : > { %v2381_v5 = vrot.slane %v12308_v17, 1 }
 0x3ab   : > { %v1370_v31 = vpop.f32.mrf.mxu2  ;;  %v2086_v10 = vpop.f32.mrf.mxu3 }
 0x3ac   : > { %v1506_v20 = vrot.slane %v1370_v31, 2  ;;  %v14960_v31 = vrot.slane %v12278_v22, 2 }
 0x3ae   : > { %v1606_v4 = vadd.f32 %v1506_v20, %v15056_v1 }
 0x3b0   : > { %v12311_v43 = vpop.f32.mrf.mxu0  ;;  %v2144_v6 = vadd.f32 %v2084_v45, %v1606_v4  ;;  %9500 = vmatmul.msk.bf16.gmra.mxu2 %vm636_vm1, %v10426_v19  ;;  %9544 = vmatmul.msk.bf16.gmra.mxu3 %vm636_vm1, %v10426_v19  ;;  %v2769_v19 = vrot.slane %v12290_v52, 2  ;;  %v12335_v52 = vld [vmem:[#allocation2 + $0x60] sm:$0xff] }
 0x3b1   : > { %v14958_v50 = vrot.slane %v12311_v43, 1 }
 0x3b2   : > { %v12323_v44 = vadd.f32 %v2378_v34, %v2144_v6  ;;  %v2770_v4 = vsel %vm1435_vm3, %v14960_v31, %v2769_v19 }
 0x3b3   : > { %v12320_v13 = vsel %vm1072_vm2, %v2381_v5, %v14958_v50  ;;  %9590 = vmatmul.msk.bf16.gmra.mxu0 %vm636_vm1, %v10428_v16  ;;  %v1373_v41 = vpop.f32.mrf.mxu2  ;;  %v2089_v0 = vpop.f32.mrf.mxu3 }
 0x3b4   : > { %15057 = vst [vmem:[#allocation52_spill] sm:$0xff] %v12323_v44  ;;  %v1507_v45 = vrot.slane %v1373_v41, 2  ;;  %v2771_v41 = vrot.slane %v2638_v55, 2 }
 0x3b6   : > { %v1508_v8 = vsel %vm1435_vm3, %v1506_v20, %v1507_v45 }
 0x3b7   : > { %v1607_v17 = vadd.f32 %v1508_v8, %v15058_v7  ;;  %v15060_v8 = vld [vmem:[#allocation54_spill] sm:$0xff] }
 0x3b8   : > { %v2302_v29 = vpop.f32.mrf.mxu0 }
 0x3b9   : > { %v2145_v1 = vadd.f32 %v2086_v10, %v1607_v17 }
 0x3bb   : > { %v1375_v50 = vpop.f32.mrf.mxu2  ;;  %v2091_v34 = vpop.f32.mrf.mxu3  ;;  %v2475_v6 = vadd.f32 %v2380_v11, %v2145_v1  ;;  %v2772_v11 = vsel %vm1435_vm3, %v2769_v19, %v2771_v41  ;;  %v15065_v41 = vmov 0  }
 0x3bc   : > { %v1509_v44 = vrot.slane %v1375_v50, 2  ;;  %v12347_v1 = vpop.f32.mrf.mxu1  ;;  %290 = vst.msk [vmem:[#allocation3] sm:$0xf] %vm289_vm4, %v15065_v41 }
 0x3bd   : > { %v12332_v37 = vadd.f32 %v2770_v4, %v2475_v6  ;;  %15063 = vst [vmem:[#allocation55_spill] sm:$0xff] %v12347_v1 }
 0x3be   : > { %v1510_v20 = vsel %vm1435_vm3, %v1507_v45, %v1509_v44  ;;  %v15061_v44 = vrot.slane %v12272_v47, 1  ;;  %291 = vst.msk [vmem:[#allocation3 + $0x4] sm:$0xf] %vm289_vm4, %v15065_v41 }
 0x3bf   : > { %15059 = vst [vmem:[#allocation51_spill] sm:$0xff] %v12332_v37  ;;  %v1608_v7 = vadd.f32 %v1510_v20, %v15060_v8  ;;  %v12352_v8 = vld [vmem:[#allocation2 + $0x68] sm:$0xff] }
 0x3c0   : > { %v3769_v29 = vpop.f32.mrf.mxu0  ;;  %9501 = vmatmul.msk.bf16.gmra.mxu2 %vm636_vm1, %v10427_v63  ;;  %9545 = vmatmul.msk.bf16.gmra.mxu3 %vm636_vm1, %v10427_v63  ;;  %292 = vst.msk [vmem:[#allocation3 + $0x8] sm:$0xf] %vm289_vm4, %v15065_v41 }
 0x3c1   : > { %v2146_v10 = vadd.f32 %v2089_v0, %v1608_v7  ;;  %v15064_v0 = vld [vmem:[#allocation56_spill] sm:$0xff]  ;;  %293 = vst.msk [vmem:[#allocation3 + $0xc] sm:$0xf] %vm289_vm4, %v15065_v41 }
 0x3c2   : > { %295 = vst.msk [vmem:[#allocation3 + $0x110] sm:$0xf] %vm289_vm4, %v15065_v41 }
 0x3c3   : > { %9591 = vmatmul.msk.bf16.gmra.mxu0 %vm636_vm1, %v12335_v52  ;;  %v1378_v50 = vpop.f32.mrf.mxu2  ;;  %v2093_v17 = vpop.f32.mrf.mxu3  ;;  %v2476_v55 = vadd.f32 %v15061_v44, %v2146_v10  ;;  %296 = vst.msk [vmem:[#allocation3 + $0x114] sm:$0xf] %vm289_vm4, %v15065_v41 }
 0x3c4   : > { %v2645_v47 = vpop.f32.mrf.mxu1  ;;  %297 = vst.msk [vmem:[#allocation3 + $0x118] sm:$0xf] %vm289_vm4, %v15065_v41 }
 0x3c5   : > { %v12345_v45 = vadd.f32 %v2772_v11, %v2476_v55  ;;  %298 = vst.msk [vmem:[#allocation3 + $0x11c] sm:$0xf] %vm289_vm4, %v15065_v41 }
 0x3c6   : > { %300 = vst.msk [vmem:[#allocation3 + $0x10] sm:$0xf] %vm289_vm4, %v15065_v41 }
 0x3c7   : > { %15062 = vst [vmem:[#allocation53_spill] sm:$0xff] %v12345_v45 }
 0x3c8   : > { %v12349_v4 = vpop.f32.mrf.mxu0  ;;  %301 = vst.msk [vmem:[#allocation3 + $0x20] sm:$0xf] %vm289_vm4, %v15065_v41 }
 0x3c9   : > { %302 = vst.msk [vmem:[#allocation3 + $0x30] sm:$0xf] %vm289_vm4, %v15065_v41 }
 0x3ca   : > { %303 = vst.msk [vmem:[#allocation3 + $0x40] sm:$0xf] %vm289_vm4, %v15065_v41 }
 0x3cb   : > { %v1379_v34 = vpop.f32.mrf.mxu2  ;;  %v2095_v6 = vpop.f32.mrf.mxu3  ;;  %304 = vst.msk [vmem:[#allocation3 + $0x50] sm:$0xf] %vm289_vm4, %v15065_v41 }
 0x3cc   : > { %v1511_v63 = vrot.slane %v1379_v34, 2  ;;  %v14959_v34 = vrot.slane %v12347_v1, 2  ;;  %305 = vst.msk [vmem:[#allocation3 + $0x60] sm:$0xf] %vm289_vm4, %v15065_v41 }
 0x3cd   : > { %306 = vst.msk [vmem:[#allocation3 + $0x70] sm:$0xf] %vm289_vm4, %v15065_v41 }
 0x3ce   : > { %v1609_v20 = vadd.f32 %v1511_v63, %v15064_v0  ;;  %v10459_v0 = vld [vmem:[#allocation3] sm:$0xff]  ;;  %307 = vst.msk [vmem:[#allocation3 + $0x80] sm:$0xf] %vm289_vm4, %v15065_v41 }
 0x3cf   : > { %9747 = vmatmul.msk.bf16.vlgmr.msra.gmra.mxu1 %vm4822_vm5, %v10459_v0  ;;  %308 = vst.msk [vmem:[#allocation3 + $0x90] sm:$0xf] %vm289_vm4, %v15065_v41 }
 0x3d0   : > { %v12354_v7 = vpop.f32.mrf.mxu0  ;;  %v2147_v19 = vadd.f32 %v2093_v17, %v1609_v20  ;;  %9502 = vmatmul.msk.bf16.gmra.mxu2 %vm636_vm1, %v10428_v16  ;;  %9546 = vmatmul.msk.bf16.gmra.mxu3 %vm636_vm1, %v10428_v16  ;;  %v2774_v17 = vrot.slane %v2645_v47, 2  ;;  %v2647_v20 = vpop.f32.mrf.mxu1  ;;  %309 = vst.msk [vmem:[#allocation3 + $0xa0] sm:$0xf] %vm289_vm4, %v15065_v41 }
 0x3d1   : > { %v2776_v0 = vrot.slane %v2647_v20, 2  ;;  %310 = vst.msk [vmem:[#allocation3 + $0xb0] sm:$0xf] %vm289_vm4, %v15065_v41 }
 0x3d2   : > { %v12366_v29 = vadd.f32 %v2381_v5, %v2147_v19  ;;  %v15067_v5 = vld [vmem:[#allocation58_spill] sm:$0xff]  ;;  %v2775_v19 = vsel %vm1435_vm3, %v14959_v34, %v2774_v17  ;;  %v15069_v34 = vld [vmem:[#allocation57_spill] sm:$0xff]  ;;  %311 = vst.msk [vmem:[#allocation3 + $0xc0] sm:$0xf] %vm289_vm4, %v15065_v41 }
 0x3d3   : > { %9592 = vmatmul.msk.bf16.gmra.mxu0 %vm636_vm1, %v12352_v8  ;;  %v1382_v10 = vpop.f32.mrf.mxu2  ;;  %v2098_v11 = vpop.f32.mrf.mxu3  ;;  %312 = vst.msk [vmem:[#allocation3 + $0xd0] sm:$0xf] %vm289_vm4, %v15065_v41 }
 0x3d4   : > { %15066 = vst [vmem:[#allocation54_spill] sm:$0xff] %v12366_v29  ;;  %v1512_v16 = vrot.slane %v1382_v10, 2 }
 0x3d5   : > { %313 = vst.msk [vmem:[#allocation3 + $0xe0] sm:$0xf] %vm289_vm4, %v15065_v41 }
 0x3d6   : > { %v1513_v50 = vsel %vm1435_vm3, %v1511_v63, %v1512_v16  ;;  %314 = vst.msk [vmem:[#allocation3 + $0xf0] sm:$0xf] %vm289_vm4, %v15065_v41 }
 0x3d7   : > { %v1610_v44 = vadd.f32 %v1513_v50, %v15067_v5  ;;  %315 = vst.msk [vmem:[#allocation3 + $0x100] sm:$0xf] %vm289_vm4, %v15065_v41 }
 0x3d8   : > { %v12380_v55 = vpop.f32.mrf.mxu0  ;;  %316 = vst.msk [vmem:[#allocation3 + $0x1c] sm:$0xf] %vm289_vm4, %v15065_v41 }
 0x3d9   : > { %v2148_v63 = vadd.f32 %v2095_v6, %v1610_v44  ;;  %317 = vst.msk [vmem:[#allocation3 + $0x2c] sm:$0xf] %vm289_vm4, %v15065_v41 }
 0x3da   : > { %318 = vst.msk [vmem:[#allocation3 + $0x3c] sm:$0xf] %vm289_vm4, %v15065_v41 }
 0x3db   : > { %v1384_v47 = vpop.f32.mrf.mxu2  ;;  %v2100_v10 = vpop.f32.mrf.mxu3  ;;  %v2478_v50 = vadd.f32 %v12320_v13, %v2148_v63  ;;  %319 = vst.msk [vmem:[#allocation3 + $0x4c] sm:$0xf] %vm289_vm4, %v15065_v41 }
 0x3dc   : > { %v1514_v5 = vrot.slane %v1384_v47, 2  ;;  %v12405_v10 = vld [vmem:[#allocation2 + $0x70] sm:$0xff]  ;;  %320 = vst.msk [vmem:[#allocation3 + $0x5c] sm:$0xf] %vm289_vm4, %v15065_v41 }
 0x3dd   : > { %v12400_v6 = vadd.f32 %v2775_v19, %v2478_v50  ;;  %321 = vst.msk [vmem:[#allocation3 + $0x6c] sm:$0xf] %vm289_vm4, %v15065_v41  ;;  %v12454_v50 = vld [vmem:[#allocation2 + $0x78] sm:$0xff] }
 0x3de   : > { %v1515_v44 = vsel %vm1435_vm3, %v1512_v16, %v1514_v5  ;;  %322 = vst.msk [vmem:[#allocation3 + $0x7c] sm:$0xf] %vm289_vm4, %v15065_v41 }
 0x3df   : > { %15068 = vst [vmem:[#allocation56_spill] sm:$0xff] %v12400_v6  ;;  %v1611_v31 = vadd.f32 %v1515_v44, %v15069_v34  ;;  %v2777_v34 = vsel %vm1435_vm3, %v2774_v17, %v2776_v0 }
 0x3e0   : > { %v3778_v13 = vpop.f32.mrf.mxu0  ;;  %9503 = vmatmul.msk.bf16.gmra.mxu2 %vm636_vm1, %v12335_v52  ;;  %9547 = vmatmul.msk.bf16.gmra.mxu3 %vm636_vm1, %v12335_v52  ;;  %v15070_v52 = vrot.slane %v12311_v43, 1  ;;  %v10460_v43 = vld [vmem:[#allocation3 + $0x8] sm:$0xff]  ;;  %323 = vst.msk [vmem:[#allocation3 + $0x8c] sm:$0xf] %vm289_vm4, %v15065_v41 }
 0x3e1   : > { %v2149_v16 = vadd.f32 %v2098_v11, %v1611_v31  ;;  %9748 = vmatmul.msk.bf16.gmra.mxu1 %vm4822_vm5, %v10460_v43  ;;  %324 = vst.msk [vmem:[#allocation3 + $0x9c] sm:$0xf] %vm289_vm4, %v15065_v41  ;;  %v3964_v13 = vrot.slane %v12380_v55, 2  ;;  %v3961_v55 = vrot.slane %v12349_v4, 2 }
 0x3e2   : > { %325 = vst.msk [vmem:[#allocation3 + $0xac] sm:$0xf] %vm289_vm4, %v15065_v41 }
 0x3e3   : > { %9593 = vmatmul.msk.bf16.gmra.mxu0 %vm636_vm1, %v12405_v10  ;;  %v3221_v63 = vpop.f32.mrf.mxu2  ;;  %v3439_v20 = vpop.f32.mrf.mxu3  ;;  %v2479_v19 = vadd.f32 %v15070_v52, %v2149_v16  ;;  %326 = vst.msk [vmem:[#allocation3 + $0xbc] sm:$0xf] %vm289_vm4, %v15065_v41 }
 0x3e4   : > { %v3365_v0 = vadd.f32 %v3221_v63, %v11781_v15  ;;  %327 = vst.msk [vmem:[#allocation3 + $0xcc] sm:$0xf] %vm289_vm4, %v15065_v41 }
 0x3e5   : > { %v12431_v31 = vadd.f32 %v2777_v34, %v2479_v19  ;;  %v3962_v34 = vrot.slane %v12354_v7, 2  ;;  %328 = vst.msk [vmem:[#allocation3 + $0xdc] sm:$0xf] %vm289_vm4, %v15065_v41 }
 0x3e6   : > { %329 = vst.msk [vmem:[#allocation3 + $0xec] sm:$0xf] %vm289_vm4, %v15065_v41 }
 0x3e7   : > { %15071 = vst [vmem:[#allocation58_spill] sm:$0xff] %v12431_v31  ;;  %v3965_v7 = vsel %vm1435_vm3, %v3962_v34, %v3964_v13  ;;  %v10492_v13 = vld [vmem:[%s14908_s3 + $0x8] sm:$0xff] }
 0x3e8   : > { %v12437_v11 = vpop.f32.mrf.mxu0  ;;  %330 = vst.msk [vmem:[#allocation3 + $0xfc] sm:$0xf] %vm289_vm4, %v15065_v41  ;;  %5088 = vmatpush.bf16.msrb.mxu2 %v10492_v13 }
 0x3e9   : > { %331 = vst.msk [vmem:[#allocation3 + $0x10c] sm:$0xf] %vm289_vm4, %v15065_v41  ;;  %v12505_v41 = vld [vmem:[%s14907_s2] ss:$0 sm:$0xff] }
 0x3eb   : > { %v3223_v17 = vpop.f32.mrf.mxu2  ;;  %v3440_v47 = vpop.f32.mrf.mxu3 }
 0x3ec   : > { %v3599_v5 = vrot.slane %v3440_v47, 1  ;;  %v3366_v52 = vadd.f32 %v3223_v17, %v11786_v28  ;;  %v3963_v28 = vsel %vm1435_vm3, %v3961_v55, %v3962_v34 }
 0x3ee   : > { %v3695_v16 = vadd.f32 %v3599_v5, %v3365_v0 }
 0x3f0   : > { %v12458_v44 = vpop.f32.mrf.mxu0  ;;  %9504 = vmatmul.msk.bf16.gmra.mxu2 %vm636_vm1, %v12352_v8  ;;  %9548 = vmatmul.msk.bf16.gmra.mxu3 %vm636_vm1, %v12352_v8 }
 0x3f3   : > { %9594 = vmatmul.msk.bf16.gmra.mxu0 %vm636_vm1, %v12454_v50  ;;  %v3226_v8 = vpop.f32.mrf.mxu2  ;;  %v3443_v20 = vpop.f32.mrf.mxu3 }
 0x3f4   : > { %v3367_v15 = vadd.f32 %v3226_v8, %v11797_v12  ;;  %v3600_v63 = vrot.slane %v3443_v20, 1  ;;  %v4089_v12 = vadd.f32 %v3961_v55, %v3695_v16  ;;  %v10493_v16 = vld [vmem:[%s14908_s3 + $0x10] sm:$0xff]  ;;  %v10526_v8 = vld [vmem:[%s14908_s3 + $0x18] sm:$0xff] }
 0x3f5   : > { %5410 = vmatpush.bf16.msrb.mxu3 %v10493_v16  ;;  %6116 = vmatpush.bf16.msrb.mxu0 %v10526_v8 }
 0x3f6   : > { %v3601_v19 = vsel %vm1072_vm2, %v3599_v5, %v3600_v63  ;;  %v3697_v43 = vadd.f32 %v3600_v63, %v3367_v15  ;;  %v10527_v5 = vld [vmem:[%s14908_s3 + $0x20] sm:$0xff]  ;;  %v4186_v20 = vrot.slane %v4089_v12, 7 }
 0x3f7   : > { %v3696_v47 = vadd.f32 %v3601_v19, %v3366_v52  ;;  %6326 = vmatpush.bf16.msrb.mxu1 %v10527_v5 }
 0x3f8   : > { %v12490_v0 = vpop.f32.mrf.mxu0  ;;  %v4091_v4 = vadd.f32 %v3965_v7, %v3697_v43 }
 0x3f9   : > { %v4090_v17 = vadd.f32 %v3963_v28, %v3696_v47  ;;  %v12514_v47 = vld [vmem:[#allocation2 + $0x80] sm:$0xff] }
 0x3fa   : > { %v4189_v34 = vrot.slane %v4091_v4, 7 }
 0x3fb   : > { %v4187_v15 = vrot.slane %v4090_v17, 7  ;;  %v3228_v63 = vpop.f32.mrf.mxu2  ;;  %v3445_v55 = vpop.f32.mrf.mxu3 }
 0x3fd   : > { %v4188_v52 = vsel %vm4185_vm6, %v4186_v20, %v4187_v15  ;;  %v4190_v7 = vsel %vm4185_vm6, %v4187_v15, %v4189_v34 }
 0x3fe   : > { %v4302_v19 = vadd.f32 %v12505_v41, %v4188_v52  ;;  %v4303_v43 = vadd.f32 %v12505_v41, %v4190_v7 }
 0x400   : > { %v3787_v28 = vpop.f32.mrf.mxu0  ;;  %v4334_v4 = vsub.f32 0.0, %v4302_v19  ;;  %v4335_v12 = vsub.f32 0.0, %v4303_v43  ;;  %9505 = vmatmul.msk.bf16.gmra.mxu2 %vm636_vm1, %v12405_v10  ;;  %9549 = vmatmul.msk.bf16.gmra.mxu3 %vm636_vm1, %v12405_v10  ;;  %v12524_v10 = vld [vmem:[#allocation2 + $0x88] sm:$0xff] }
 0x402   : > { %v4366_v17 = vmul.f32 1.442695, %v4334_v4  ;;  %v4368_v13 = vmul.f32 1.442695, %v4335_v12  ;;  %v3969_v12 = vrot.slane %v12490_v0, 2 }
 0x403   : > { %9595 = vmatmul.msk.bf16.gmra.mxu0 %vm636_vm1, %v12514_v47  ;;  %v3230_v5 = vpop.f32.mrf.mxu2  ;;  %v3447_v16 = vpop.f32.mrf.mxu3 }
 0x404   : > { %10622 = vpow2.f32 %v4366_v17  ;;  %v3368_v4 = vadd.f32 %v3230_v5, %v11817_v25  ;;  %v3967_v16 = vrot.slane %v12458_v44, 2 }
 0x405   : > { %10624 = vpow2.f32 %v4368_v13 }
 0x406   : > { %v3970_v0 = vsel %vm1435_vm3, %v3967_v16, %v3969_v12 }
 0x408   : > { %v12522_v34 = vpop.f32.mrf.mxu0 }
 0x40a   : > { %v10623_v8 = vpop.eup %10622 }
 0x40b   : > { %v10625_v20 = vpop.eup %10624  ;;  %v4430_v15 = vadd.f32 1.0, %v10623_v8  ;;  %v3232_v63 = vpop.f32.mrf.mxu2 }
 0x40c   : > { %v3448_v55 = vpop.f32.mrf.mxu3  ;;  %v4431_v52 = vadd.f32 1.0, %v10625_v20  ;;  %v3369_v25 = vadd.f32 %v3232_v63, %v11823_v48 }
 0x40d   : > { %10626 = vrcp.f32 %v4430_v15  ;;  %v3602_v7 = vrot.slane %v3448_v55, 1 }
 0x40e   : > { %10628 = vrcp.f32 %v4431_v52 }
 0x40f   : > { %v3698_v13 = vadd.f32 %v3602_v7, %v3368_v4 }
 0x410   : > { %v12526_v28 = vpop.f32.mrf.mxu0  ;;  %9506 = vmatmul.msk.bf16.gmra.mxu2 %vm636_vm1, %v12454_v50  ;;  %9550 = vmatmul.msk.bf16.gmra.mxu3 %vm636_vm1, %v12454_v50  ;;  %v3966_v50 = vrot.slane %v12437_v11, 2 }
 0x412   : > { %v4092_v44 = vadd.f32 %v3966_v50, %v3698_v13  ;;  %v12551_v13 = vld [vmem:[#allocation2 + $0x90] sm:$0xff] }
 0x413   : > { %9596 = vmatmul.msk.bf16.gmra.mxu0 %vm636_vm1, %v12524_v10  ;;  %v10627_v17 = vpop.eup %10626  ;;  %v3235_v8 = vpop.f32.mrf.mxu2 }
 0x414   : > { %v3451_v20 = vpop.f32.mrf.mxu3  ;;  %v10629_v15 = vpop.eup %10628  ;;  %v4494_v55 = vmul.f32 %v10627_v17, %v4302_v19  ;;  %v3370_v52 = vadd.f32 %v3235_v8, %v11834_v62  ;;  %v3968_v62 = vsel %vm1435_vm3, %v3966_v50, %v3967_v16 }
 0x415   : > { %v3603_v6 = vrot.slane %v3451_v20, 1  ;;  %v4495_v31 = vmul.f32 %v10629_v15, %v4303_v43  ;;  %v4191_v43 = vrot.slane %v4092_v44, 7 }
 0x416   : > { %v4526_v5 = vpack.c.bf16 %v4494_v55, %v4494_v55 }
 0x417   : > { %v3604_v1 = vsel %vm1072_vm2, %v3602_v7, %v3603_v6  ;;  %v3700_v4 = vadd.f32 %v3603_v6, %v3370_v52  ;;  %v4527_v29 = vpack.c.bf16 %v4495_v31, %v4495_v31 }
 0x418   : > { %v3699_v37 = vadd.f32 %v3604_v1, %v3369_v25  ;;  %v12542_v45 = vpop.f32.mrf.mxu0  ;;  %4558 = vst.msk [vmem:[#allocation3 + $0x14] sm:$0xf] %vm289_vm4, %v4526_v5 }
 0x419   : > { %v4094_v19 = vadd.f32 %v3970_v0, %v3700_v4  ;;  %4559 = vst.msk [vmem:[#allocation3 + $0x18] sm:$0xf] %vm289_vm4, %v4527_v29 }
 0x41a   : > { %v4093_v11 = vadd.f32 %v3968_v62, %v3699_v37 }
 0x41b   : > { %v4194_v48 = vrot.slane %v4094_v19, 7  ;;  %v3237_v12 = vpop.f32.mrf.mxu2 }
 0x41c   : > { %v4192_v63 = vrot.slane %v4093_v11, 7  ;;  %v3453_v17 = vpop.f32.mrf.mxu3 }
 0x41e   : > { %v4193_v6 = vsel %vm4185_vm6, %v4191_v43, %v4192_v63  ;;  %v4195_v31 = vsel %vm4185_vm6, %v4192_v63, %v4194_v48  ;;  %v3974_v63 = vrot.slane %v12542_v45, 2 }
 0x41f   : > { %v4304_v1 = vadd.f32 %v12505_v41, %v4193_v6  ;;  %v4305_v7 = vadd.f32 %v12505_v41, %v4195_v31  ;;  %v10461_v16 = vld [vmem:[#allocation3 + $0x10] sm:$0xff]  ;;  %v3972_v6 = vrot.slane %v12526_v28, 2 }
 0x420   : > { %v3796_v8 = vpop.f32.mrf.mxu0  ;;  %9507 = vmatmul.msk.bf16.gmra.mxu2 %vm636_vm1, %v12514_v47  ;;  %9551 = vmatmul.msk.bf16.gmra.mxu3 %vm636_vm1, %v12514_v47  ;;  %v12562_v47 = vld [vmem:[#allocation2 + $0x98] sm:$0xff] }
 0x421   : > { %v4336_v20 = vsub.f32 0.0, %v4304_v1  ;;  %v4337_v29 = vsub.f32 0.0, %v4305_v7  ;;  %9749 = vmatmul.msk.bf16.gmra.mxu1 %vm4822_vm5, %v10461_v16  ;;  %v10462_v11 = vld [vmem:[#allocation3 + $0x18] sm:$0xff]  ;;  %v3975_v45 = vsel %vm1435_vm3, %v3972_v6, %v3974_v63 }
 0x423   : > { %v4370_v37 = vmul.f32 1.442695, %v4336_v20  ;;  %v4372_v15 = vmul.f32 1.442695, %v4337_v29  ;;  %9597 = vmatmul.msk.bf16.gmra.mxu0 %vm636_vm1, %v12551_v13  ;;  %v3239_v55 = vpop.f32.mrf.mxu2 }
 0x424   : > { %v3455_v52 = vpop.f32.mrf.mxu3  ;;  %v3371_v43 = vadd.f32 %v3239_v55, %v11856_v18  ;;  %v3971_v18 = vrot.slane %v12522_v34, 2 }
 0x425   : > { %10630 = vpow2.f32 %v4370_v37 }
 0x426   : > { %10632 = vpow2.f32 %v4372_v15 }
 0x428   : > { %v12560_v50 = vpop.f32.mrf.mxu0 }
 0x42b   : > { %v10631_v25 = vpop.eup %10630  ;;  %v3241_v4 = vpop.f32.mrf.mxu2 }
 0x42c   : > { %v10633_v0 = vpop.eup %10632  ;;  %v4432_v5 = vadd.f32 1.0, %v10631_v25  ;;  %v3456_v44 = vpop.f32.mrf.mxu3  ;;  %v3372_v15 = vadd.f32 %v3241_v4, %v11863_v26 }
 0x42d   : > { %v4433_v62 = vadd.f32 1.0, %v10633_v0  ;;  %v3605_v19 = vrot.slane %v3456_v44, 1 }
 0x42e   : > { %10634 = vrcp.f32 %v4432_v5 }
 0x42f   : > { %10636 = vrcp.f32 %v4433_v62  ;;  %v3701_v17 = vadd.f32 %v3605_v19, %v3371_v43 }
 0x430   : > { %v12564_v48 = vpop.f32.mrf.mxu0  ;;  %9508 = vmatmul.msk.bf16.gmra.mxu2 %vm636_vm1, %v12524_v10  ;;  %9552 = vmatmul.msk.bf16.gmra.mxu3 %vm636_vm1, %v12524_v10 }
 0x431   : > { %9750 = vmatmul.msk.bf16.gmra.mxu1 %vm4822_vm5, %v10462_v11  ;;  %v4095_v28 = vadd.f32 %v3971_v18, %v3701_v17  ;;  %v12590_v17 = vld [vmem:[#allocation2 + $0xa0] sm:$0xff] }
 0x433   : > { %9598 = vmatmul.msk.bf16.gmra.mxu0 %vm636_vm1, %v12562_v47  ;;  %v3244_v31 = vpop.f32.mrf.mxu2 }
 0x434   : > { %v10635_v12 = vpop.eup %10634  ;;  %v3459_v16 = vpop.f32.mrf.mxu3  ;;  %v3373_v29 = vadd.f32 %v3244_v31, %v11883_v30  ;;  %v3973_v30 = vsel %vm1435_vm3, %v3971_v18, %v3972_v6 }
 0x435   : > { %v10637_v8 = vpop.eup %10636  ;;  %v4496_v20 = vmul.f32 %v10635_v12, %v4304_v1  ;;  %v3606_v10 = vrot.slane %v3459_v16, 1 }
 0x436   : > { %v4497_v37 = vmul.f32 %v10637_v8, %v4305_v7  ;;  %v4196_v7 = vrot.slane %v4095_v28, 7 }
 0x437   : > { %v4528_v55 = vpack.c.bf16 %v4496_v20, %v4496_v20  ;;  %v3607_v52 = vsel %vm1072_vm2, %v3605_v19, %v3606_v10  ;;  %v3703_v25 = vadd.f32 %v3606_v10, %v3373_v29 }
 0x438   : > { %v4529_v0 = vpack.c.bf16 %v4497_v37, %v4497_v37  ;;  %v3702_v5 = vadd.f32 %v3607_v52, %v3372_v15  ;;  %v12581_v44 = vpop.f32.mrf.mxu0 }
 0x439   : > { %4560 = vst.msk [vmem:[#allocation3 + $0x24] sm:$0xf] %vm289_vm4, %v4528_v55  ;;  %v4097_v1 = vadd.f32 %v3975_v45, %v3703_v25 }
 0x43a   : > { %4561 = vst.msk [vmem:[#allocation3 + $0x28] sm:$0xf] %vm289_vm4, %v4529_v0  ;;  %v4096_v34 = vadd.f32 %v3973_v30, %v3702_v5 }
 0x43b   : > { %v4199_v26 = vrot.slane %v4097_v1, 7  ;;  %v3246_v62 = vpop.f32.mrf.mxu2 }
 0x43c   : > { %v4197_v4 = vrot.slane %v4096_v34, 7  ;;  %v3461_v11 = vpop.f32.mrf.mxu3  ;;  %v3979_v34 = vrot.slane %v12581_v44, 2 }
 0x43e   : > { %v4198_v19 = vsel %vm4185_vm6, %v4196_v7, %v4197_v4  ;;  %v4200_v43 = vsel %vm4185_vm6, %v4197_v4, %v4199_v26  ;;  %v3977_v4 = vrot.slane %v12564_v48, 2 }
 0x43f   : > { %v4306_v63 = vadd.f32 %v12505_v41, %v4198_v19  ;;  %v4307_v12 = vadd.f32 %v12505_v41, %v4200_v43 }
 0x440   : > { %v10463_v6 = vld [vmem:[#allocation3 + $0x20] sm:$0xff]  ;;  %v3805_v31 = vpop.f32.mrf.mxu0  ;;  %9509 = vmatmul.msk.bf16.gmra.mxu2 %vm636_vm1, %v12551_v13  ;;  %9553 = vmatmul.msk.bf16.gmra.mxu3 %vm636_vm1, %v12551_v13  ;;  %v12601_v13 = vld [vmem:[#allocation2 + $0xa8] sm:$0xff]  ;;  %v3980_v44 = vsel %vm1435_vm3, %v3977_v4, %v3979_v34  ;;  %v12631_v34 = vld [vmem:[#allocation2 + $0xb0] sm:$0xff] }
 0x441   : > { %v4338_v16 = vsub.f32 0.0, %v4306_v63  ;;  %v4339_v8 = vsub.f32 0.0, %v4307_v12  ;;  %9751 = vmatmul.msk.bf16.gmra.mxu1 %vm4822_vm5, %v10463_v6  ;;  %v10464_v5 = vld [vmem:[#allocation3 + $0x28] sm:$0xff] }
 0x443   : > { %v4374_v20 = vmul.f32 1.442695, %v4338_v16  ;;  %v4376_v29 = vmul.f32 1.442695, %v4339_v8  ;;  %9599 = vmatmul.msk.bf16.gmra.mxu0 %vm636_vm1, %v12590_v17  ;;  %v3248_v10 = vpop.f32.mrf.mxu2 }
 0x444   : > { %v3463_v37 = vpop.f32.mrf.mxu3  ;;  %v3374_v1 = vadd.f32 %v3248_v10, %v11903_v49  ;;  %v3976_v49 = vrot.slane %v12560_v50, 2 }
 0x445   : > { %10638 = vpow2.f32 %v4374_v20 }
 0x446   : > { %10640 = vpow2.f32 %v4376_v29 }
 0x448   : > { %v12599_v18 = vpop.f32.mrf.mxu0 }
 0x44b   : > { %v10639_v15 = vpop.eup %10638  ;;  %v3250_v52 = vpop.f32.mrf.mxu2 }
 0x44c   : > { %v10641_v45 = vpop.eup %10640  ;;  %v4434_v55 = vadd.f32 1.0, %v10639_v15  ;;  %v3464_v25 = vpop.f32.mrf.mxu3  ;;  %v3375_v16 = vadd.f32 %v3250_v52, %v11909_v27 }
 0x44d   : > { %v4435_v0 = vadd.f32 1.0, %v10641_v45  ;;  %v3608_v28 = vrot.slane %v3464_v25, 1 }
 0x44e   : > { %10642 = vrcp.f32 %v4434_v55 }
 0x44f   : > { %10644 = vrcp.f32 %v4435_v0  ;;  %v3704_v7 = vadd.f32 %v3608_v28, %v3374_v1 }
 0x450   : > { %v12603_v30 = vpop.f32.mrf.mxu0  ;;  %9510 = vmatmul.msk.bf16.gmra.mxu2 %vm636_vm1, %v12562_v47  ;;  %9554 = vmatmul.msk.bf16.gmra.mxu3 %vm636_vm1, %v12562_v47 }
 0x451   : > { %9752 = vmatmul.msk.bf16.gmra.mxu1 %vm4822_vm5, %v10464_v5  ;;  %v4098_v48 = vadd.f32 %v3976_v49, %v3704_v7 }
 0x453   : > { %9600 = vmatmul.msk.bf16.gmra.mxu0 %vm636_vm1, %v12601_v13  ;;  %v3253_v62 = vpop.f32.mrf.mxu2  ;;  %v4201_v45 = vrot.slane %v4098_v48, 7 }
 0x454   : > { %v10643_v26 = vpop.eup %10642  ;;  %v3467_v11 = vpop.f32.mrf.mxu3  ;;  %v3376_v6 = vadd.f32 %v3253_v62, %v11919_v32  ;;  %v3978_v32 = vsel %vm1435_vm3, %v3976_v49, %v3977_v4 }
 0x455   : > { %v10645_v19 = vpop.eup %10644  ;;  %v4498_v43 = vmul.f32 %v10643_v26, %v4306_v63  ;;  %v3609_v47 = vrot.slane %v3467_v11, 1  ;;  %v12622_v63 = vpop.f32.mrf.mxu1 }
 0x456   : > { %v4499_v31 = vmul.f32 %v10645_v19, %v4307_v12 }
 0x457   : > { %v4530_v8 = vpack.c.bf16 %v4498_v43, %v4498_v43  ;;  %v3610_v20 = vsel %vm1072_vm2, %v3608_v28, %v3609_v47  ;;  %v3706_v29 = vadd.f32 %v3609_v47, %v3376_v6 }
 0x458   : > { %v4531_v10 = vpack.c.bf16 %v4499_v31, %v4499_v31  ;;  %v3705_v37 = vadd.f32 %v3610_v20, %v3375_v16  ;;  %v12620_v15 = vpop.f32.mrf.mxu0 }
 0x459   : > { %4562 = vst.msk [vmem:[#allocation3 + $0x34] sm:$0xf] %vm289_vm4, %v4530_v8  ;;  %v4100_v50 = vadd.f32 %v3980_v44, %v3706_v29 }
 0x45a   : > { %4563 = vst.msk [vmem:[#allocation3 + $0x38] sm:$0xf] %vm289_vm4, %v4531_v10  ;;  %v4099_v27 = vadd.f32 %v3978_v32, %v3705_v37  ;;  %v12646_v10 = vld [vmem:[#allocation2 + $0xb8] sm:$0xff] }
 0x45b   : > { %v4204_v12 = vrot.slane %v4100_v50, 7  ;;  %v3255_v52 = vpop.f32.mrf.mxu2 }
 0x45c   : > { %v4202_v55 = vrot.slane %v4099_v27, 7  ;;  %v3469_v25 = vpop.f32.mrf.mxu3  ;;  %v3982_v52 = vrot.slane %v12603_v30, 2 }
 0x45d   : > { %v12633_v4 = vpop.f32.mrf.mxu1 }
 0x45e   : > { %v4203_v0 = vsel %vm4185_vm6, %v4201_v45, %v4202_v55  ;;  %v4205_v28 = vsel %vm4185_vm6, %v4202_v55, %v4204_v12  ;;  %v3984_v12 = vrot.slane %v12620_v15, 2 }
 0x45f   : > { %v4308_v5 = vadd.f32 %v12505_v41, %v4203_v0  ;;  %v4309_v1 = vadd.f32 %v12505_v41, %v4205_v28 }
 0x460   : > { %v10465_v26 = vld [vmem:[#allocation3 + $0x30] sm:$0xff]  ;;  %v3814_v7 = vpop.f32.mrf.mxu0  ;;  %9511 = vmatmul.msk.bf16.gmra.mxu2 %vm636_vm1, %v12590_v17  ;;  %9555 = vmatmul.msk.bf16.gmra.mxu3 %vm636_vm1, %v12590_v17  ;;  %v3985_v15 = vsel %vm1435_vm3, %v3982_v52, %v3984_v12 }
 0x461   : > { %v4340_v62 = vsub.f32 0.0, %v4308_v5  ;;  %v4341_v11 = vsub.f32 0.0, %v4309_v1  ;;  %9753 = vmatmul.msk.bf16.gmra.mxu1 %vm4822_vm5, %v10465_v26  ;;  %v10466_v37 = vld [vmem:[#allocation3 + $0x38] sm:$0xff] }
 0x463   : > { %v4378_v19 = vmul.f32 1.442695, %v4340_v62  ;;  %v4380_v43 = vmul.f32 1.442695, %v4341_v11  ;;  %9601 = vmatmul.msk.bf16.gmra.mxu0 %vm636_vm1, %v12631_v34  ;;  %v3257_v6 = vpop.f32.mrf.mxu2 }
 0x464   : > { %v3471_v47 = vpop.f32.mrf.mxu3  ;;  %v3377_v27 = vadd.f32 %v3257_v6, %v11938_v14  ;;  %v3981_v14 = vrot.slane %v12599_v18, 2 }
 0x465   : > { %10646 = vpow2.f32 %v4378_v19  ;;  %v12644_v49 = vpop.f32.mrf.mxu1 }
 0x466   : > { %10648 = vpow2.f32 %v4380_v43 }
 0x468   : > { %v12642_v31 = vpop.f32.mrf.mxu0 }
 0x46b   : > { %v10647_v16 = vpop.eup %10646  ;;  %v3259_v20 = vpop.f32.mrf.mxu2 }
 0x46c   : > { %v10649_v44 = vpop.eup %10648  ;;  %v4436_v8 = vadd.f32 1.0, %v10647_v16  ;;  %v3472_v17 = vpop.f32.mrf.mxu3  ;;  %v3378_v11 = vadd.f32 %v3259_v20, %v11944_v33 }
 0x46d   : > { %v4437_v29 = vadd.f32 1.0, %v10649_v44  ;;  %v3611_v48 = vrot.slane %v3472_v17, 1  ;;  %v4935_v50 = vpop.f32.mrf.mxu1 }
 0x46e   : > { %10650 = vrcp.f32 %v4436_v8 }
 0x46f   : > { %10652 = vrcp.f32 %v4437_v29  ;;  %v3707_v55 = vadd.f32 %v3611_v48, %v3377_v27  ;;  %v12674_v27 = vld [vmem:[#allocation2 + $0xc0] sm:$0xff] }
 0x470   : > { %v12648_v32 = vpop.f32.mrf.mxu0  ;;  %9512 = vmatmul.msk.bf16.gmra.mxu2 %vm636_vm1, %v12601_v13  ;;  %9556 = vmatmul.msk.bf16.gmra.mxu3 %vm636_vm1, %v12601_v13 }
 0x471   : > { %9754 = vmatmul.msk.bf16.gmra.mxu1 %vm4822_vm5, %v10466_v37  ;;  %v4101_v30 = vadd.f32 %v3981_v14, %v3707_v55 }
 0x473   : > { %9602 = vmatmul.msk.bf16.gmra.mxu0 %vm636_vm1, %v12646_v10  ;;  %v3262_v25 = vpop.f32.mrf.mxu2 }
 0x474   : > { %v10651_v45 = vpop.eup %10650  ;;  %v3475_v0 = vpop.f32.mrf.mxu3  ;;  %v3379_v7 = vadd.f32 %v3262_v25, %v11954_v2  ;;  %v3983_v2 = vsel %vm1435_vm3, %v3981_v14, %v3982_v52 }
 0x475   : > { %v10653_v28 = vpop.eup %10652  ;;  %v4500_v26 = vmul.f32 %v10651_v45, %v4308_v5  ;;  %v3612_v13 = vrot.slane %v3475_v0, 1 }
 0x476   : > { %v4501_v62 = vmul.f32 %v10653_v28, %v4309_v1  ;;  %v4206_v1 = vrot.slane %v4101_v30, 7 }
 0x477   : > { %v4532_v19 = vpack.c.bf16 %v4500_v26, %v4500_v26  ;;  %v3613_v43 = vsel %vm1072_vm2, %v3611_v48, %v3612_v13  ;;  %v3709_v6 = vadd.f32 %v3612_v13, %v3379_v7 }
 0x478   : > { %v4533_v47 = vpack.c.bf16 %v4501_v62, %v4501_v62  ;;  %v3708_v16 = vadd.f32 %v3613_v43, %v3378_v11  ;;  %v12665_v44 = vpop.f32.mrf.mxu0 }
 0x479   : > { %4564 = vst.msk [vmem:[#allocation3 + $0x44] sm:$0xf] %vm289_vm4, %v4532_v19  ;;  %v4103_v5 = vadd.f32 %v3985_v15, %v3709_v6 }
 0x47a   : > { %4565 = vst.msk [vmem:[#allocation3 + $0x48] sm:$0xf] %vm289_vm4, %v4533_v47  ;;  %v4102_v18 = vadd.f32 %v3983_v2, %v3708_v16  ;;  %v3989_v16 = vrot.slane %v12665_v44, 2 }
 0x47b   : > { %v4209_v33 = vrot.slane %v4103_v5, 7  ;;  %v3264_v20 = vpop.f32.mrf.mxu2 }
 0x47c   : > { %v4207_v8 = vrot.slane %v4102_v18, 7  ;;  %v3477_v17 = vpop.f32.mrf.mxu3  ;;  %v3987_v18 = vrot.slane %v12648_v32, 2 }
 0x47e   : > { %v4208_v29 = vsel %vm4185_vm6, %v4206_v1, %v4207_v8  ;;  %v4210_v48 = vsel %vm4185_vm6, %v4207_v8, %v4209_v33  ;;  %v3990_v44 = vsel %vm1435_vm3, %v3987_v18, %v3989_v16 }
 0x47f   : > { %v4310_v37 = vadd.f32 %v12505_v41, %v4208_v29  ;;  %v4311_v50 = vadd.f32 %v12505_v41, %v4210_v48 }
 0x480   : > { %v10467_v12 = vld [vmem:[#allocation3 + $0x40] sm:$0xff]  ;;  %v3823_v45 = vpop.f32.mrf.mxu0  ;;  %9513 = vmatmul.msk.bf16.gmra.mxu2 %vm636_vm1, %v12631_v34  ;;  %9557 = vmatmul.msk.bf16.gmra.mxu3 %vm636_vm1, %v12631_v34  ;;  %v12685_v34 = vld [vmem:[#allocation2 + $0xc8] sm:$0xff] }
 0x481   : > { %v4342_v55 = vsub.f32 0.0, %v4310_v37  ;;  %v4343_v52 = vsub.f32 0.0, %v4311_v50  ;;  %9755 = vmatmul.msk.bf16.gmra.mxu1 %vm4822_vm5, %v10467_v12  ;;  %v10468_v6 = vld [vmem:[#allocation3 + $0x48] sm:$0xff] }
 0x483   : > { %v4382_v25 = vmul.f32 1.442695, %v4342_v55  ;;  %v4384_v0 = vmul.f32 1.442695, %v4343_v52  ;;  %9603 = vmatmul.msk.bf16.gmra.mxu0 %vm636_vm1, %v12674_v27  ;;  %v3266_v28 = vpop.f32.mrf.mxu2 }
 0x484   : > { %v3479_v26 = vpop.f32.mrf.mxu3  ;;  %v3380_v30 = vadd.f32 %v3266_v28, %v11973_v21  ;;  %v3986_v21 = vrot.slane %v12642_v31, 2 }
 0x485   : > { %10654 = vpow2.f32 %v4382_v25 }
 0x486   : > { %10656 = vpow2.f32 %v4384_v0 }
 0x488   : > { %v12683_v7 = vpop.f32.mrf.mxu0 }
 0x48b   : > { %v10655_v13 = vpop.eup %10654  ;;  %v3268_v11 = vpop.f32.mrf.mxu2 }
 0x48c   : > { %v10657_v62 = vpop.eup %10656  ;;  %v4438_v14 = vadd.f32 1.0, %v10655_v13  ;;  %v3480_v15 = vpop.f32.mrf.mxu3  ;;  %v3381_v48 = vadd.f32 %v3268_v11, %v11979_v60 }
 0x48d   : > { %v4439_v19 = vadd.f32 1.0, %v10657_v62  ;;  %v3614_v43 = vrot.slane %v3480_v15, 1 }
 0x48e   : > { %10658 = vrcp.f32 %v4438_v14 }
 0x48f   : > { %10660 = vrcp.f32 %v4439_v19  ;;  %v3710_v5 = vadd.f32 %v3614_v43, %v3380_v30 }
 0x490   : > { %v12687_v47 = vpop.f32.mrf.mxu0  ;;  %9514 = vmatmul.msk.bf16.gmra.mxu2 %vm636_vm1, %v12646_v10  ;;  %9558 = vmatmul.msk.bf16.gmra.mxu3 %vm636_vm1, %v12646_v10 }
 0x491   : > { %9756 = vmatmul.msk.bf16.gmra.mxu1 %vm4822_vm5, %v10468_v6  ;;  %v4104_v32 = vadd.f32 %v3986_v21, %v3710_v5 }
 0x493   : > { %9604 = vmatmul.msk.bf16.gmra.mxu0 %vm636_vm1, %v12685_v34  ;;  %v3271_v33 = vpop.f32.mrf.mxu2 }
 0x494   : > { %v10659_v2 = vpop.eup %10658  ;;  %v3483_v1 = vpop.f32.mrf.mxu3  ;;  %v3382_v17 = vadd.f32 %v3271_v33, %v11989_v35  ;;  %v3988_v35 = vsel %vm1435_vm3, %v3986_v21, %v3987_v18 }
 0x495   : > { %v10661_v8 = vpop.eup %10660  ;;  %v4502_v20 = vmul.f32 %v10659_v2, %v4310_v37  ;;  %v3615_v10 = vrot.slane %v3483_v1, 1 }
 0x496   : > { %v4503_v29 = vmul.f32 %v10661_v8, %v4311_v50  ;;  %v4211_v50 = vrot.slane %v4104_v32, 7 }
 0x497   : > { %v4534_v12 = vpack.c.bf16 %v4502_v20, %v4502_v20  ;;  %v3616_v45 = vsel %vm1072_vm2, %v3614_v43, %v3615_v10  ;;  %v3712_v55 = vadd.f32 %v3615_v10, %v3382_v17  ;;  %v12715_v43 = vld [vmem:[#allocation2 + $0xd0] sm:$0xff] }
 0x498   : > { %v4535_v52 = vpack.c.bf16 %v4503_v29, %v4503_v29  ;;  %v3711_v25 = vadd.f32 %v3616_v45, %v3381_v48  ;;  %v12704_v0 = vpop.f32.mrf.mxu0 }
 0x499   : > { %4566 = vst.msk [vmem:[#allocation3 + $0x54] sm:$0xf] %vm289_vm4, %v4534_v12  ;;  %v4106_v37 = vadd.f32 %v3990_v44, %v3712_v55  ;;  %v12730_v12 = vld [vmem:[#allocation2 + $0xd8] sm:$0xff] }
 0x49a   : > { %4567 = vst.msk [vmem:[#allocation3 + $0x58] sm:$0xf] %vm289_vm4, %v4535_v52  ;;  %v4105_v31 = vadd.f32 %v3988_v35, %v3711_v25  ;;  %v3994_v25 = vrot.slane %v12704_v0, 2 }
 0x49b   : > { %v4214_v60 = vrot.slane %v4106_v37, 7  ;;  %v3273_v26 = vpop.f32.mrf.mxu2 }
 0x49c   : > { %v4212_v28 = vrot.slane %v4105_v31, 7  ;;  %v3485_v13 = vpop.f32.mrf.mxu3  ;;  %v3992_v31 = vrot.slane %v12687_v47, 2 }
 0x49e   : > { %v4213_v62 = vsel %vm4185_vm6, %v4211_v50, %v4212_v28  ;;  %v4215_v14 = vsel %vm4185_vm6, %v4212_v28, %v4214_v60  ;;  %v12713_v19 = vpop.f32.mrf.mxu1  ;;  %v3995_v0 = vsel %vm1435_vm3, %v3992_v31, %v3994_v25 }
 0x49f   : > { %v4312_v11 = vadd.f32 %v12505_v41, %v4213_v62  ;;  %v4313_v15 = vadd.f32 %v12505_v41, %v4215_v14 }
 0x4a0   : > { %v10469_v6 = vld [vmem:[#allocation3 + $0x50] sm:$0xff]  ;;  %v3832_v30 = vpop.f32.mrf.mxu0  ;;  %9515 = vmatmul.msk.bf16.gmra.mxu2 %vm636_vm1, %v12674_v27  ;;  %9559 = vmatmul.msk.bf16.gmra.mxu3 %vm636_vm1, %v12674_v27 }
 0x4a1   : > { %v4344_v16 = vsub.f32 0.0, %v4312_v11  ;;  %v4345_v2 = vsub.f32 0.0, %v4313_v15  ;;  %9757 = vmatmul.msk.bf16.gmra.mxu1 %vm4822_vm5, %v10469_v6  ;;  %v10470_v55 = vld [vmem:[#allocation3 + $0x58] sm:$0xff] }
 0x4a3   : > { %v4386_v5 = vmul.f32 1.442695, %v4344_v16  ;;  %v4388_v18 = vmul.f32 1.442695, %v4345_v2  ;;  %9605 = vmatmul.msk.bf16.gmra.mxu0 %vm636_vm1, %v12715_v43  ;;  %v3275_v33 = vpop.f32.mrf.mxu2 }
 0x4a4   : > { %v3487_v1 = vpop.f32.mrf.mxu3  ;;  %v3383_v32 = vadd.f32 %v3275_v33, %v12008_v46  ;;  %v3991_v46 = vrot.slane %v12683_v7, 2 }
 0x4a5   : > { %10662 = vpow2.f32 %v4386_v5 }
 0x4a6   : > { %10664 = vpow2.f32 %v4388_v18  ;;  %v12724_v8 = vpop.f32.mrf.mxu1 }
 0x4a8   : > { %v12726_v20 = vpop.f32.mrf.mxu0 }
 0x4ab   : > { %v10663_v17 = vpop.eup %10662  ;;  %v3277_v21 = vpop.f32.mrf.mxu2 }
 0x4ac   : > { %v10665_v10 = vpop.eup %10664  ;;  %v4440_v29 = vadd.f32 1.0, %v10663_v17  ;;  %v3488_v27 = vpop.f32.mrf.mxu3  ;;  %v3384_v14 = vadd.f32 %v3277_v21, %v12014_v56 }
 0x4ad   : > { %v4441_v48 = vadd.f32 1.0, %v10665_v10  ;;  %v3617_v45 = vrot.slane %v3488_v27, 1 }
 0x4ae   : > { %10666 = vrcp.f32 %v4440_v29  ;;  %v12728_v44 = vpop.f32.mrf.mxu1 }
 0x4af   : > { %10668 = vrcp.f32 %v4441_v48  ;;  %v3713_v37 = vadd.f32 %v3617_v45, %v3383_v32 }
 0x4b0   : > { %v12732_v52 = vpop.f32.mrf.mxu0  ;;  %9516 = vmatmul.msk.bf16.gmra.mxu2 %vm636_vm1, %v12685_v34  ;;  %9560 = vmatmul.msk.bf16.gmra.mxu3 %vm636_vm1, %v12685_v34 }
 0x4b1   : > { %9758 = vmatmul.msk.bf16.gmra.mxu1 %vm4822_vm5, %v10470_v55  ;;  %v4107_v5 = vadd.f32 %v3991_v46, %v3713_v37  ;;  %v12760_v55 = vld [vmem:[#allocation2 + $0xe0] sm:$0xff] }
 0x4b3   : > { %9606 = vmatmul.msk.bf16.gmra.mxu0 %vm636_vm1, %v12730_v12  ;;  %v3280_v60 = vpop.f32.mrf.mxu2 }
 0x4b4   : > { %v10667_v35 = vpop.eup %10666  ;;  %v3491_v50 = vpop.f32.mrf.mxu3  ;;  %v3385_v13 = vadd.f32 %v3280_v60, %v12024_v57  ;;  %v3993_v57 = vsel %vm1435_vm3, %v3991_v46, %v3992_v31 }
 0x4b5   : > { %v10669_v28 = vpop.eup %10668  ;;  %v4504_v26 = vmul.f32 %v10667_v35, %v4312_v11  ;;  %v3618_v34 = vrot.slane %v3491_v50, 1 }
 0x4b6   : > { %v4505_v62 = vmul.f32 %v10669_v28, %v4313_v15  ;;  %v4944_v2 = vpop.f32.mrf.mxu1  ;;  %v4216_v15 = vrot.slane %v4107_v5, 7 }
 0x4b7   : > { %v4536_v6 = vpack.c.bf16 %v4504_v26, %v4504_v26  ;;  %v3619_v30 = vsel %vm1072_vm2, %v3617_v45, %v3618_v34  ;;  %v3715_v16 = vadd.f32 %v3618_v34, %v3385_v13 }
 0x4b8   : > { %v4537_v47 = vpack.c.bf16 %v4505_v62, %v4505_v62  ;;  %v3714_v18 = vadd.f32 %v3619_v30, %v3384_v14  ;;  %v12749_v33 = vpop.f32.mrf.mxu0  ;;  %v12775_v30 = vld [vmem:[#allocation2 + $0xe8] sm:$0xff] }
 0x4b9   : > { %4568 = vst.msk [vmem:[#allocation3 + $0x64] sm:$0xf] %vm289_vm4, %v4536_v6  ;;  %v4109_v11 = vadd.f32 %v3995_v0, %v3715_v16 }
 0x4ba   : > { %4569 = vst.msk [vmem:[#allocation3 + $0x68] sm:$0xf] %vm289_vm4, %v4537_v47  ;;  %v4108_v56 = vadd.f32 %v3993_v57, %v3714_v18  ;;  %v3999_v18 = vrot.slane %v12749_v33, 2 }
 0x4bb   : > { %v4219_v7 = vrot.slane %v4109_v11, 7  ;;  %v3282_v17 = vpop.f32.mrf.mxu2 }
 0x4bc   : > { %v4217_v1 = vrot.slane %v4108_v56, 7  ;;  %v3493_v10 = vpop.f32.mrf.mxu3  ;;  %v3997_v56 = vrot.slane %v12732_v52, 2 }
 0x4be   : > { %v4218_v29 = vsel %vm4185_vm6, %v4216_v15, %v4217_v1  ;;  %v4220_v21 = vsel %vm4185_vm6, %v4217_v1, %v4219_v7  ;;  %v12758_v45 = vpop.f32.mrf.mxu1  ;;  %v4000_v33 = vsel %vm1435_vm3, %v3997_v56, %v3999_v18 }
 0x4bf   : > { %v4314_v27 = vadd.f32 %v12505_v41, %v4218_v29  ;;  %v4315_v48 = vadd.f32 %v12505_v41, %v4220_v21 }
 0x4c0   : > { %v10471_v32 = vld [vmem:[#allocation3 + $0x60] sm:$0xff]  ;;  %v3841_v25 = vpop.f32.mrf.mxu0  ;;  %9517 = vmatmul.msk.bf16.gmra.mxu2 %vm636_vm1, %v12715_v43  ;;  %9561 = vmatmul.msk.bf16.gmra.mxu3 %vm636_vm1, %v12715_v43 }
 0x4c1   : > { %v4346_v35 = vsub.f32 0.0, %v4314_v27  ;;  %v4347_v37 = vsub.f32 0.0, %v4315_v48  ;;  %9759 = vmatmul.msk.bf16.gmra.mxu1 %vm4822_vm5, %v10471_v32  ;;  %v10472_v2 = vld [vmem:[#allocation3 + $0x68] sm:$0xff] }
 0x4c3   : > { %v4390_v31 = vmul.f32 1.442695, %v4346_v35  ;;  %v4392_v60 = vmul.f32 1.442695, %v4347_v37  ;;  %9607 = vmatmul.msk.bf16.gmra.mxu0 %vm636_vm1, %v12760_v55  ;;  %v3284_v50 = vpop.f32.mrf.mxu2 }
 0x4c4   : > { %v3495_v28 = vpop.f32.mrf.mxu3  ;;  %v3386_v5 = vadd.f32 %v3284_v50, %v12043_v40  ;;  %v3996_v40 = vrot.slane %v12726_v20, 2 }
 0x4c5   : > { %10670 = vpow2.f32 %v4390_v31 }
 0x4c6   : > { %10672 = vpow2.f32 %v4392_v60  ;;  %v12769_v26 = vpop.f32.mrf.mxu1 }
 0x4c8   : > { %v12771_v13 = vpop.f32.mrf.mxu0 }
 0x4cb   : > { %v10671_v34 = vpop.eup %10670  ;;  %v3286_v14 = vpop.f32.mrf.mxu2 }
 0x4cc   : > { %v10673_v62 = vpop.eup %10672  ;;  %v4442_v46 = vadd.f32 1.0, %v10671_v34  ;;  %v3496_v43 = vpop.f32.mrf.mxu3  ;;  %v3387_v21 = vadd.f32 %v3286_v14, %v12049_v58 }
 0x4cd   : > { %v4443_v0 = vadd.f32 1.0, %v10673_v62  ;;  %v3620_v16 = vrot.slane %v3496_v43, 1 }
 0x4ce   : > { %10674 = vrcp.f32 %v4442_v46  ;;  %v12773_v6 = vpop.f32.mrf.mxu1 }
 0x4cf   : > { %10676 = vrcp.f32 %v4443_v0  ;;  %v3716_v11 = vadd.f32 %v3620_v16, %v3386_v5 }
 0x4d0   : > { %v12777_v47 = vpop.f32.mrf.mxu0  ;;  %9518 = vmatmul.msk.bf16.gmra.mxu2 %vm636_vm1, %v12730_v12  ;;  %9562 = vmatmul.msk.bf16.gmra.mxu3 %vm636_vm1, %v12730_v12 }
 0x4d1   : > { %9760 = vmatmul.msk.bf16.gmra.mxu1 %vm4822_vm5, %v10472_v2  ;;  %v4110_v31 = vadd.f32 %v3996_v40, %v3716_v11  ;;  %v12805_v2 = vld [vmem:[#allocation2 + $0xf0] sm:$0xff] }
 0x4d3   : > { %9608 = vmatmul.msk.bf16.gmra.mxu0 %vm636_vm1, %v12775_v30  ;;  %v3289_v7 = vpop.f32.mrf.mxu2 }
 0x4d4   : > { %v10675_v57 = vpop.eup %10674  ;;  %v3499_v15 = vpop.f32.mrf.mxu3  ;;  %v3388_v10 = vadd.f32 %v3289_v7, %v12059_v51  ;;  %v3998_v51 = vsel %vm1435_vm3, %v3996_v40, %v3997_v56 }
 0x4d5   : > { %v10677_v1 = vpop.eup %10676  ;;  %v4506_v17 = vmul.f32 %v10675_v57, %v4314_v27  ;;  %v3621_v12 = vrot.slane %v3499_v15, 1 }
 0x4d6   : > { %v4507_v29 = vmul.f32 %v10677_v1, %v4315_v48  ;;  %v4953_v37 = vpop.f32.mrf.mxu1  ;;  %v4221_v48 = vrot.slane %v4110_v31, 7 }
 0x4d7   : > { %v4538_v32 = vpack.c.bf16 %v4506_v17, %v4506_v17  ;;  %v3622_v25 = vsel %vm1072_vm2, %v3620_v16, %v3621_v12  ;;  %v3718_v35 = vadd.f32 %v3621_v12, %v3388_v10 }
 0x4d8   : > { %v4539_v52 = vpack.c.bf16 %v4507_v29, %v4507_v29  ;;  %v3717_v60 = vadd.f32 %v3622_v25, %v3387_v21  ;;  %v12794_v50 = vpop.f32.mrf.mxu0 }
 0x4d9   : > { %4570 = vst.msk [vmem:[#allocation3 + $0x74] sm:$0xf] %vm289_vm4, %v4538_v32  ;;  %v4112_v27 = vadd.f32 %v4000_v33, %v3718_v35  ;;  %v12820_v32 = vld [vmem:[#allocation2 + $0xf8] sm:$0xff]  ;;  %v4004_v31 = vrot.slane %v12794_v50, 2 }
 0x4da   : > { %4571 = vst.msk [vmem:[#allocation3 + $0x78] sm:$0xf] %vm289_vm4, %v4539_v52  ;;  %v4111_v58 = vadd.f32 %v3998_v51, %v3717_v60 }
 0x4db   : > { %v4224_v20 = vrot.slane %v4112_v27, 7  ;;  %v3291_v34 = vpop.f32.mrf.mxu2  ;;  %v4002_v27 = vrot.slane %v12777_v47, 2 }
 0x4dc   : > { %v4222_v28 = vrot.slane %v4111_v58, 7  ;;  %v3501_v62 = vpop.f32.mrf.mxu3 }
 0x4dd   : > { %v4005_v50 = vsel %vm1435_vm3, %v4002_v27, %v4004_v31 }
 0x4de   : > { %v4223_v46 = vsel %vm4185_vm6, %v4221_v48, %v4222_v28  ;;  %v4225_v14 = vsel %vm4185_vm6, %v4222_v28, %v4224_v20  ;;  %v12803_v16 = vpop.f32.mrf.mxu1 }
 0x4df   : > { %v4316_v43 = vadd.f32 %v12505_v41, %v4223_v46  ;;  %v4317_v0 = vadd.f32 %v12505_v41, %v4225_v14 }
 0x4e0   : > { %v10473_v5 = vld [vmem:[#allocation3 + $0x70] sm:$0xff]  ;;  %v3850_v18 = vpop.f32.mrf.mxu0  ;;  %9519 = vmatmul.msk.bf16.gmra.mxu2 %vm636_vm1, %v12760_v55  ;;  %9563 = vmatmul.msk.bf16.gmra.mxu3 %vm636_vm1, %v12760_v55 }
 0x4e1   : > { %v4348_v57 = vsub.f32 0.0, %v4316_v43  ;;  %v4349_v11 = vsub.f32 0.0, %v4317_v0  ;;  %9761 = vmatmul.msk.bf16.gmra.mxu1 %vm4822_vm5, %v10473_v5  ;;  %v10474_v35 = vld [vmem:[#allocation3 + $0x78] sm:$0xff] }
 0x4e3   : > { %v4394_v56 = vmul.f32 1.442695, %v4348_v57  ;;  %v4396_v7 = vmul.f32 1.442695, %v4349_v11  ;;  %9609 = vmatmul.msk.bf16.gmra.mxu0 %vm636_vm1, %v12805_v2  ;;  %v3293_v41 = vpop.f32.mrf.mxu2 }
 0x4e4   : > { %v3503_v15 = vpop.f32.mrf.mxu3  ;;  %v3389_v52 = vadd.f32 %v3293_v41, %v12078_v61  ;;  %v4001_v61 = vrot.slane %v12771_v13, 2 }
 0x4e5   : > { %10678 = vpow2.f32 %v4394_v56 }
 0x4e6   : > { %10680 = vpow2.f32 %v4396_v7  ;;  %v12814_v1 = vpop.f32.mrf.mxu1 }
 0x4e8   : > { %v12816_v17 = vpop.f32.mrf.mxu0 }
 0x4eb   : > { %v10679_v10 = vpop.eup %10678  ;;  %v3295_v40 = vpop.f32.mrf.mxu2 }
 0x4ec   : > { %v10681_v12 = vpop.eup %10680  ;;  %v4444_v29 = vadd.f32 1.0, %v10679_v10  ;;  %v3504_v55 = vpop.f32.mrf.mxu3  ;;  %v3390_v46 = vadd.f32 %v3295_v40, %v12084_v23  ;;  %v12849_v40 = vld [vmem:[%s14907_s2] ss:$0 sm:$0xff] }
 0x4ed   : > { %v4445_v21 = vadd.f32 1.0, %v10681_v12  ;;  %v3623_v25 = vrot.slane %v3504_v55, 1 }
 0x4ee   : > { %10682 = vrcp.f32 %v4444_v29  ;;  %v12818_v33 = vpop.f32.mrf.mxu1 }
 0x4ef   : > { %10684 = vrcp.f32 %v4445_v21  ;;  %v3719_v51 = vadd.f32 %v3623_v25, %v3389_v52 }
 0x4f0   : > { %v12822_v37 = vpop.f32.mrf.mxu0  ;;  %9520 = vmatmul.msk.bf16.gmra.mxu2 %vm636_vm1, %v12775_v30  ;;  %9564 = vmatmul.msk.bf16.gmra.mxu3 %vm636_vm1, %v12775_v30 }
 0x4f1   : > { %9762 = vmatmul.msk.bf16.gmra.mxu1 %vm4822_vm5, %v10474_v35  ;;  %v4113_v11 = vadd.f32 %v4001_v61, %v3719_v51  ;;  %v12855_v35 = vld [vmem:[#allocation2 + $0x100] sm:$0xff] }
 0x4f3   : > { %9610 = vmatmul.msk.bf16.gmra.mxu0 %vm636_vm1, %v12820_v32  ;;  %v3298_v58 = vpop.f32.mrf.mxu2 }
 0x4f4   : > { %v10683_v60 = vpop.eup %10682  ;;  %v3507_v20 = vpop.f32.mrf.mxu3  ;;  %v3391_v34 = vadd.f32 %v3298_v58, %v12094_v54  ;;  %v4003_v54 = vsel %vm1435_vm3, %v4001_v61, %v4002_v27 }
 0x4f5   : > { %v10685_v48 = vpop.eup %10684  ;;  %v4508_v28 = vmul.f32 %v10683_v60, %v4316_v43  ;;  %v3624_v30 = vrot.slane %v3507_v20, 1 }
 0x4f6   : > { %v4509_v62 = vmul.f32 %v10685_v48, %v4317_v0  ;;  %v4962_v57 = vpop.f32.mrf.mxu1  ;;  %v4226_v0 = vrot.slane %v4113_v11, 7 }
 0x4f7   : > { %v4540_v14 = vpack.c.bf16 %v4508_v28, %v4508_v28  ;;  %v3625_v5 = vsel %vm1072_vm2, %v3623_v25, %v3624_v30  ;;  %v3721_v18 = vadd.f32 %v3624_v30, %v3391_v34 }
 0x4f8   : > { %v4541_v47 = vpack.c.bf16 %v4509_v62, %v4509_v62  ;;  %v3720_v56 = vadd.f32 %v3625_v5, %v3390_v46  ;;  %v12839_v7 = vpop.f32.mrf.mxu0  ;;  %v12870_v5 = vld [vmem:[#allocation2 + $0x108] sm:$0xff] }
 0x4f9   : > { %4572 = vst.msk [vmem:[#allocation3 + $0x84] sm:$0xf] %vm289_vm4, %v4540_v14  ;;  %v4115_v43 = vadd.f32 %v4005_v50, %v3721_v18 }
 0x4fa   : > { %4573 = vst.msk [vmem:[#allocation3 + $0x88] sm:$0xf] %vm289_vm4, %v4541_v47  ;;  %v4114_v23 = vadd.f32 %v4003_v54, %v3720_v56  ;;  %v4009_v56 = vrot.slane %v12839_v7, 2 }
 0x4fb   : > { %v4229_v13 = vrot.slane %v4115_v43, 7  ;;  %v3300_v15 = vpop.f32.mrf.mxu2 }
 0x4fc   : > { %v4227_v41 = vrot.slane %v4114_v23, 7  ;;  %v3509_v10 = vpop.f32.mrf.mxu3  ;;  %v4007_v23 = vrot.slane %v12822_v37, 2 }
 0x4fe   : > { %v4228_v12 = vsel %vm4185_vm6, %v4226_v0, %v4227_v41  ;;  %v4230_v29 = vsel %vm4185_vm6, %v4227_v41, %v4229_v13  ;;  %v12853_v25 = vpop.f32.mrf.mxu1  ;;  %v4010_v7 = vsel %vm1435_vm3, %v4007_v23, %v4009_v56 }
 0x4ff   : > { %v4318_v55 = vadd.f32 %v12849_v40, %v4228_v12  ;;  %v4319_v21 = vadd.f32 %v12849_v40, %v4230_v29 }
 0x500   : > { %v10475_v52 = vld [vmem:[#allocation3 + $0x80] sm:$0xff]  ;;  %v3859_v31 = vpop.f32.mrf.mxu0  ;;  %9521 = vmatmul.msk.bf16.gmra.mxu2 %vm636_vm1, %v12805_v2  ;;  %9565 = vmatmul.msk.bf16.gmra.mxu3 %vm636_vm1, %v12805_v2 }
 0x501   : > { %v4350_v60 = vsub.f32 0.0, %v4318_v55  ;;  %v4351_v51 = vsub.f32 0.0, %v4319_v21  ;;  %9763 = vmatmul.msk.bf16.gmra.mxu1 %vm4822_vm5, %v10475_v52  ;;  %v10476_v57 = vld [vmem:[#allocation3 + $0x88] sm:$0xff] }
 0x503   : > { %v4398_v27 = vmul.f32 1.442695, %v4350_v60  ;;  %v4400_v58 = vmul.f32 1.442695, %v4351_v51  ;;  %9611 = vmatmul.msk.bf16.gmra.mxu0 %vm636_vm1, %v12855_v35  ;;  %v3302_v20 = vpop.f32.mrf.mxu2 }
 0x504   : > { %v3511_v48 = vpop.f32.mrf.mxu3  ;;  %v3392_v11 = vadd.f32 %v3302_v20, %v12115_v3  ;;  %v4006_v3 = vrot.slane %v12816_v17, 2 }
 0x505   : > { %10686 = vpow2.f32 %v4398_v27 }
 0x506   : > { %10688 = vpow2.f32 %v4400_v58  ;;  %v12864_v28 = vpop.f32.mrf.mxu1 }
 0x508   : > { %v12866_v34 = vpop.f32.mrf.mxu0 }
 0x50b   : > { %v10687_v30 = vpop.eup %10686  ;;  %v3304_v46 = vpop.f32.mrf.mxu2 }
 0x50c   : > { %v10689_v62 = vpop.eup %10688  ;;  %v4446_v61 = vadd.f32 1.0, %v10687_v30  ;;  %v3512_v2 = vpop.f32.mrf.mxu3  ;;  %v3393_v29 = vadd.f32 %v3304_v46, %v12128_v42 }
 0x50d   : > { %v4447_v50 = vadd.f32 1.0, %v10689_v62  ;;  %v3626_v18 = vrot.slane %v3512_v2, 1 }
 0x50e   : > { %10690 = vrcp.f32 %v4446_v61  ;;  %v12868_v14 = vpop.f32.mrf.mxu1 }
 0x50f   : > { %10692 = vrcp.f32 %v4447_v50  ;;  %v3722_v43 = vadd.f32 %v3626_v18, %v3392_v11 }
 0x510   : > { %v12872_v47 = vpop.f32.mrf.mxu0  ;;  %9522 = vmatmul.msk.bf16.gmra.mxu2 %vm636_vm1, %v12820_v32  ;;  %9566 = vmatmul.msk.bf16.gmra.mxu3 %vm636_vm1, %v12820_v32 }
 0x511   : > { %9764 = vmatmul.msk.bf16.gmra.mxu1 %vm4822_vm5, %v10476_v57  ;;  %v4116_v27 = vadd.f32 %v4006_v3, %v3722_v43  ;;  %v12900_v57 = vld [vmem:[#allocation2 + $0x110] sm:$0xff] }
 0x513   : > { %9612 = vmatmul.msk.bf16.gmra.mxu0 %vm636_vm1, %v12870_v5  ;;  %v3307_v13 = vpop.f32.mrf.mxu2 }
 0x514   : > { %v10691_v54 = vpop.eup %10690  ;;  %v3515_v0 = vpop.f32.mrf.mxu3  ;;  %v3394_v10 = vadd.f32 %v3307_v13, %v12140_v38  ;;  %v4008_v38 = vsel %vm1435_vm3, %v4006_v3, %v4007_v23 }
 0x515   : > { %v10693_v41 = vpop.eup %10692  ;;  %v4510_v15 = vmul.f32 %v10691_v54, %v4318_v55  ;;  %v3627_v32 = vrot.slane %v3515_v0, 1 }
 0x516   : > { %v4511_v12 = vmul.f32 %v10693_v41, %v4319_v21  ;;  %v4971_v51 = vpop.f32.mrf.mxu1  ;;  %v4231_v21 = vrot.slane %v4116_v27, 7 }
 0x517   : > { %v4542_v52 = vpack.c.bf16 %v4510_v15, %v4510_v15  ;;  %v3628_v31 = vsel %vm1072_vm2, %v3626_v18, %v3627_v32  ;;  %v3724_v60 = vadd.f32 %v3627_v32, %v3394_v10 }
 0x518   : > { %v4543_v37 = vpack.c.bf16 %v4511_v12, %v4511_v12  ;;  %v3723_v58 = vadd.f32 %v3628_v31, %v3393_v29  ;;  %v12889_v20 = vpop.f32.mrf.mxu0  ;;  %v12915_v31 = vld [vmem:[#allocation2 + $0x118] sm:$0xff] }
 0x519   : > { %4574 = vst.msk [vmem:[#allocation3 + $0x94] sm:$0xf] %vm289_vm4, %v4542_v52  ;;  %v4118_v55 = vadd.f32 %v4010_v7, %v3724_v60  ;;  %v15072_v60 = vrot.slane %v12107_v59, 2 }
 0x51a   : > { %4575 = vst.msk [vmem:[#allocation3 + $0x98] sm:$0xf] %vm289_vm4, %v4543_v37  ;;  %v4117_v42 = vadd.f32 %v4008_v38, %v3723_v58 }
 0x51b   : > { %v4234_v17 = vrot.slane %v4118_v55, 7  ;;  %v3309_v30 = vpop.f32.mrf.mxu2  ;;  %v2856_v51 = vadd.f32 %v15072_v60, %v12162_v36  ;;  %v4014_v55 = vrot.slane %v12889_v20, 2 }
 0x51c   : > { %v4232_v48 = vrot.slane %v4117_v42, 7  ;;  %v3517_v62 = vpop.f32.mrf.mxu3  ;;  %v4012_v42 = vrot.slane %v12872_v47, 2 }
 0x51e   : > { %v4233_v61 = vsel %vm4185_vm6, %v4231_v21, %v4232_v48  ;;  %v4235_v46 = vsel %vm4185_vm6, %v4232_v48, %v4234_v17  ;;  %v12898_v18 = vpop.f32.mrf.mxu1  ;;  %v4015_v20 = vsel %vm1435_vm3, %v4012_v42, %v4014_v55 }
 0x51f   : > { %v4320_v2 = vadd.f32 %v12849_v40, %v4233_v61  ;;  %v4321_v50 = vadd.f32 %v12849_v40, %v4235_v46  ;;  %v4011_v46 = vrot.slane %v12866_v34, 2 }
 0x520   : > { %v10477_v11 = vld [vmem:[#allocation3 + $0x90] sm:$0xff]  ;;  %v3868_v56 = vpop.f32.mrf.mxu0  ;;  %9523 = vmatmul.msk.bf16.gmra.mxu2 %vm636_vm1, %v12855_v35  ;;  %9567 = vmatmul.msk.bf16.gmra.mxu3 %vm636_vm1, %v12855_v35 }
 0x521   : > { %v4352_v54 = vsub.f32 0.0, %v4320_v2  ;;  %v4353_v43 = vsub.f32 0.0, %v4321_v50  ;;  %9765 = vmatmul.msk.bf16.gmra.mxu1 %vm4822_vm5, %v10477_v11  ;;  %v10478_v27 = vld [vmem:[#allocation3 + $0x98] sm:$0xff] }
 0x523   : > { %v4402_v23 = vmul.f32 1.442695, %v4352_v54  ;;  %v4404_v13 = vmul.f32 1.442695, %v4353_v43  ;;  %9613 = vmatmul.msk.bf16.gmra.mxu0 %vm636_vm1, %v12900_v57  ;;  %v3311_v0 = vpop.f32.mrf.mxu2 }
 0x524   : > { %v3519_v41 = vpop.f32.mrf.mxu3  ;;  %v3395_v38 = vadd.f32 %v3311_v0, %v2856_v51 }
 0x525   : > { %10694 = vpow2.f32 %v4402_v23 }
 0x526   : > { %10696 = vpow2.f32 %v4404_v13  ;;  %v12909_v15 = vpop.f32.mrf.mxu1 }
 0x528   : > { %v12911_v10 = vpop.f32.mrf.mxu0 }
 0x52b   : > { %v10695_v32 = vpop.eup %10694  ;;  %v3313_v29 = vpop.f32.mrf.mxu2 }
 0x52c   : > { %v10697_v12 = vpop.eup %10696  ;;  %v4448_v3 = vadd.f32 1.0, %v10695_v32  ;;  %v3520_v35 = vpop.f32.mrf.mxu3  ;;  %v3396_v11 = vadd.f32 %v3313_v29, %v12175_v39 }
 0x52d   : > { %v4449_v7 = vadd.f32 1.0, %v10697_v12  ;;  %v3629_v37 = vrot.slane %v3520_v35, 1 }
 0x52e   : > { %10698 = vrcp.f32 %v4448_v3  ;;  %v12913_v52 = vpop.f32.mrf.mxu1 }
 0x52f   : > { %10700 = vrcp.f32 %v4449_v7  ;;  %v3725_v36 = vadd.f32 %v3629_v37, %v3395_v38 }
 0x530   : > { %v12920_v58 = vpop.f32.mrf.mxu0  ;;  %9524 = vmatmul.msk.bf16.gmra.mxu2 %vm636_vm1, %v12870_v5  ;;  %9568 = vmatmul.msk.bf16.gmra.mxu3 %vm636_vm1, %v12870_v5 }
 0x531   : > { %9766 = vmatmul.msk.bf16.gmra.mxu1 %vm4822_vm5, %v10478_v27  ;;  %v4119_v13 = vadd.f32 %v4011_v46, %v3725_v36 }
 0x533   : > { %9614 = vmatmul.msk.bf16.gmra.mxu0 %vm636_vm1, %v12915_v31  ;;  %v3316_v17 = vpop.f32.mrf.mxu2 }
 0x534   : > { %v10699_v59 = vpop.eup %10698  ;;  %v3523_v21 = vpop.f32.mrf.mxu3  ;;  %v3397_v62 = vadd.f32 %v3316_v17, %v12185_v24  ;;  %v4013_v24 = vsel %vm1435_vm3, %v4011_v46, %v4012_v42 }
 0x535   : > { %v10701_v48 = vpop.eup %10700  ;;  %v4512_v30 = vmul.f32 %v10699_v59, %v4320_v2  ;;  %v3630_v61 = vrot.slane %v3523_v21, 1  ;;  %v12951_v59 = vld [vmem:[#allocation3 + $0x10] sm:$0xff] }
 0x536   : > { %v4513_v5 = vmul.f32 %v10701_v48, %v4321_v50  ;;  %v4980_v23 = vpop.f32.mrf.mxu1  ;;  %v4236_v50 = vrot.slane %v4119_v13, 7 }
 0x537   : > { %v4544_v56 = vpack.c.bf16 %v4512_v30, %v4512_v30  ;;  %v3631_v54 = vsel %vm1072_vm2, %v3629_v37, %v3630_v61  ;;  %v3727_v43 = vadd.f32 %v3630_v61, %v3397_v62 }
 0x538   : > { %v4545_v47 = vpack.c.bf16 %v4513_v5, %v4513_v5  ;;  %v3726_v0 = vadd.f32 %v3631_v54, %v3396_v11  ;;  %v12936_v41 = vpop.f32.mrf.mxu0  ;;  %v15074_v54 = vld [vmem:[#allocation41_spill] sm:$0xff] }
 0x539   : > { %4576 = vst.msk [vmem:[#allocation3 + $0xa4] sm:$0xf] %vm289_vm4, %v4544_v56  ;;  %v4121_v2 = vadd.f32 %v4015_v20, %v3727_v43  ;;  %v15073_v56 = vld [vmem:[#allocation42_spill] sm:$0xff]  ;;  %v15075_v43 = vrot.slane %v15074_v54, 2 }
 0x53a   : > { %4577 = vst.msk [vmem:[#allocation3 + $0xa8] sm:$0xf] %vm289_vm4, %v4545_v47  ;;  %v4120_v39 = vadd.f32 %v4013_v24, %v3726_v0  ;;  %v12971_v24 = vld [vmem:[#allocation3 + $0x18] sm:$0xff] }
 0x53b   : > { %v4239_v34 = vrot.slane %v4121_v2, 7  ;;  %v3318_v12 = vpop.f32.mrf.mxu2  ;;  %v2859_v23 = vadd.f32 %v15075_v43, %v15073_v56 }
 0x53c   : > { %v4237_v32 = vrot.slane %v4120_v39, 7  ;;  %v3525_v3 = vpop.f32.mrf.mxu3  ;;  %v4019_v39 = vrot.slane %v12936_v41, 2 }
 0x53e   : > { %v4238_v29 = vsel %vm4185_vm6, %v4236_v50, %v4237_v32  ;;  %v4240_v35 = vsel %vm4185_vm6, %v4237_v32, %v4239_v34  ;;  %v12945_v51 = vpop.f32.mrf.mxu1  ;;  %v4017_v32 = vrot.slane %v12920_v58, 2 }
 0x53f   : > { %v4322_v7 = vadd.f32 %v12849_v40, %v4238_v29  ;;  %v4323_v60 = vadd.f32 %v12849_v40, %v4240_v35 }
 0x540   : > { %v10479_v37 = vld [vmem:[#allocation3 + $0xa0] sm:$0xff]  ;;  %v3877_v27 = vpop.f32.mrf.mxu0  ;;  %9525 = vmatmul.msk.bf16.gmra.mxu2 %vm636_vm1, %v12900_v57  ;;  %9569 = vmatmul.msk.bf16.gmra.mxu3 %vm636_vm1, %v12900_v57  ;;  %v4020_v41 = vsel %vm1435_vm3, %v4017_v32, %v4019_v39 }
 0x541   : > { %v4354_v38 = vsub.f32 0.0, %v4322_v7  ;;  %v4355_v55 = vsub.f32 0.0, %v4323_v60  ;;  %9767 = vmatmul.msk.bf16.gmra.mxu1 %vm4822_vm5, %v10479_v37  ;;  %v10480_v13 = vld [vmem:[#allocation3 + $0xa8] sm:$0xff]  ;;  %v15076_v37 = vld [vmem:[#allocation46_spill] sm:$0xff] }
 0x543   : > { %v4406_v36 = vmul.f32 1.442695, %v4354_v38  ;;  %v4408_v42 = vmul.f32 1.442695, %v4355_v55  ;;  %9989 = vmatmul.msk.bf16.vlgmr.msrb.gmra.mxu0 %vm4822_vm5, %v12951_v59  ;;  %v3320_v17 = vpop.f32.mrf.mxu2  ;;  %v4016_v55 = vrot.slane %v12911_v10, 2 }
 0x544   : > { %v3527_v21 = vpop.f32.mrf.mxu3  ;;  %v3398_v2 = vadd.f32 %v3320_v17, %v2859_v23 }
 0x545   : > { %10702 = vpow2.f32 %v4406_v36  ;;  %v15077_v36 = vld [vmem:[#allocation44_spill] sm:$0xff] }
 0x546   : > { %10704 = vpow2.f32 %v4408_v42  ;;  %v12956_v48 = vpop.f32.mrf.mxu1 }
 0x548   : > { %v12958_v30 = vpop.f32.mrf.mxu0 }
 0x54b   : > { %v10703_v62 = vpop.eup %10702  ;;  %v3322_v5 = vpop.f32.mrf.mxu2 }
 0x54c   : > { %v10705_v61 = vpop.eup %10704  ;;  %v4450_v57 = vadd.f32 1.0, %v10703_v62  ;;  %v3528_v46 = vpop.f32.mrf.mxu3  ;;  %v3399_v42 = vadd.f32 %v3322_v5, %v15077_v36 }
 0x54d   : > { %v4451_v11 = vadd.f32 1.0, %v10705_v61  ;;  %v3632_v47 = vrot.slane %v3528_v46, 1 }
 0x54e   : > { %10706 = vrcp.f32 %v4450_v57  ;;  %v12960_v20 = vpop.f32.mrf.mxu1 }
 0x54f   : > { %10708 = vrcp.f32 %v4451_v11  ;;  %v3728_v50 = vadd.f32 %v3632_v47, %v3398_v2 }
 0x550   : > { %v12965_v0 = vpop.f32.mrf.mxu0  ;;  %9526 = vmatmul.msk.bf16.gmra.mxu2 %vm636_vm1, %v12915_v31  ;;  %9570 = vmatmul.msk.bf16.gmra.mxu3 %vm636_vm1, %v12915_v31 }
 0x551   : > { %9768 = vmatmul.msk.bf16.gmra.mxu1 %vm4822_vm5, %v10480_v13  ;;  %v4122_v57 = vadd.f32 %v4016_v55, %v3728_v50 }
 0x553   : > { %9990 = vmatmul.msk.bf16.gmra.mxu0 %vm4822_vm5, %v12971_v24  ;;  %v3325_v12 = vpop.f32.mrf.mxu2  ;;  %v4241_v56 = vrot.slane %v4122_v57, 7  ;;  %v15080_v57 = vld [vmem:[#allocation45_spill] sm:$0xff] }
 0x554   : > { %v10707_v34 = vpop.eup %10706  ;;  %v3531_v3 = vpop.f32.mrf.mxu3  ;;  %v3400_v31 = vadd.f32 %v3325_v12, %v15076_v37 }
 0x555   : > { %v10709_v29 = vpop.eup %10708  ;;  %v4514_v35 = vmul.f32 %v10707_v34, %v4322_v7  ;;  %v3633_v27 = vrot.slane %v3531_v3, 1  ;;  %v4018_v7 = vsel %vm1435_vm3, %v4016_v55, %v4017_v32 }
 0x556   : > { %v4515_v38 = vmul.f32 %v10709_v29, %v4323_v60  ;;  %v4989_v61 = vpop.f32.mrf.mxu1  ;;  %v10895_v29 = vld [vmem:[#allocation3] sm:$0xff] }
 0x557   : > { %v4546_v17 = vpack.c.bf16 %v4514_v35, %v4514_v35  ;;  %v3634_v21 = vsel %vm1072_vm2, %v3632_v47, %v3633_v27  ;;  %v3730_v62 = vadd.f32 %v3633_v27, %v3400_v31  ;;  %v12996_v35 = vld [vmem:[#allocation3 + $0x20] sm:$0xff] }
 0x558   : > { %v4547_v58 = vpack.c.bf16 %v4515_v38, %v4515_v38  ;;  %v3729_v46 = vadd.f32 %v3634_v21, %v3399_v42  ;;  %v12983_v11 = vpop.f32.mrf.mxu0 }
 0x559   : > { %4578 = vst.msk [vmem:[#allocation3 + $0xb4] sm:$0xf] %vm289_vm4, %v4546_v17  ;;  %v4124_v60 = vadd.f32 %v4020_v41, %v3730_v62 }
 0x55a   : > { %4579 = vst.msk [vmem:[#allocation3 + $0xb8] sm:$0xf] %vm289_vm4, %v4547_v58  ;;  %v4123_v10 = vadd.f32 %v4018_v7, %v3729_v46  ;;  %v15081_v46 = vld [vmem:[#allocation43_spill] sm:$0xff] }
 0x55b   : > { %v4244_v5 = vrot.slane %v4124_v60, 7  ;;  %v3327_v43 = vpop.f32.mrf.mxu2  ;;  %v15082_v7 = vrot.slane %v15081_v46, 2 }
 0x55c   : > { %v4242_v54 = vrot.slane %v4123_v10, 7  ;;  %v3533_v23 = vpop.f32.mrf.mxu3  ;;  %v13014_v43 = vld [vmem:[#allocation3 + $0x28] sm:$0xff] }
 0x55d   : > { %v2862_v60 = vadd.f32 %v15082_v7, %v15080_v57 }
 0x55e   : > { %v4243_v47 = vsel %vm4185_vm6, %v4241_v56, %v4242_v54  ;;  %v4245_v13 = vsel %vm4185_vm6, %v4242_v54, %v4244_v5  ;;  %v12992_v34 = vpop.f32.mrf.mxu1  ;;  %v10896_v54 = vld [vmem:[#allocation3 + $0x8] sm:$0xff] }
 0x55f   : > { %v4324_v2 = vadd.f32 %v12849_v40, %v4243_v47  ;;  %v4325_v39 = vadd.f32 %v12849_v40, %v4245_v13  ;;  %v4024_v47 = vrot.slane %v12983_v11, 2 }
 0x560   : > { %v10481_v50 = vld [vmem:[#allocation3 + $0xb0] sm:$0xff]  ;;  %v3886_v32 = vpop.f32.mrf.mxu0  ;;  %9785 = vmatmul.msk.bf16.vlgmr.msrb.gmra.mxu2 %vm4822_vm5, %v10895_v29  ;;  %9823 = vmatmul.msk.bf16.vlgmr.msrb.gmra.mxu3 %vm4822_vm5, %v10895_v29 }
 0x561   : > { %v4356_v12 = vsub.f32 0.0, %v4324_v2  ;;  %v4357_v3 = vsub.f32 0.0, %v4325_v39  ;;  %9769 = vmatmul.msk.bf16.gmra.mxu1 %vm4822_vm5, %v10481_v50  ;;  %v10482_v5 = vld [vmem:[#allocation3 + $0xb8] sm:$0xff]  ;;  %v4022_v32 = vrot.slane %v12965_v0, 2 }
 0x563   : > { %v4410_v37 = vmul.f32 1.442695, %v4356_v12  ;;  %v4412_v31 = vmul.f32 1.442695, %v4357_v3  ;;  %9991 = vmatmul.msk.bf16.gmra.mxu0 %vm4822_vm5, %v12996_v35  ;;  %v3329_v27 = vpop.f32.mrf.mxu2  ;;  %v4025_v11 = vsel %vm1435_vm3, %v4022_v32, %v4024_v47 }
 0x564   : > { %v3535_v38 = vpop.f32.mrf.mxu3  ;;  %v3401_v23 = vadd.f32 %v3329_v27, %v2862_v60  ;;  %v4021_v27 = vrot.slane %v12958_v30, 2 }
 0x565   : > { %10710 = vpow2.f32 %v4410_v37 }
 0x566   : > { %10712 = vpow2.f32 %v4412_v31  ;;  %v13001_v55 = vpop.f32.mrf.mxu1  ;;  %v15083_v31 = vld [vmem:[#allocation49_spill] sm:$0xff] }
 0x567   : > { %15078 = vst [vmem:[#allocation57_spill] sm:$0xff] %v13001_v55 }
 0x568   : > { %v13003_v36 = vpop.f32.mrf.mxu0 }
 0x56b   : > { %v10711_v42 = vpop.eup %10710  ;;  %v3331_v21 = vpop.f32.mrf.mxu2 }
 0x56c   : > { %v10713_v41 = vpop.eup %10712  ;;  %v4452_v17 = vadd.f32 1.0, %v10711_v42  ;;  %v3536_v62 = vpop.f32.mrf.mxu3 }
 0x56d   : > { %v4453_v61 = vadd.f32 1.0, %v10713_v41  ;;  %v3635_v10 = vrot.slane %v3536_v62, 1 }
 0x56e   : > { %10714 = vrcp.f32 %v4452_v17  ;;  %v13005_v58 = vpop.f32.mrf.mxu1  ;;  %v15084_v17 = vld [vmem:[#allocation47_spill] sm:$0xff] }
 0x56f   : > { %10716 = vrcp.f32 %v4453_v61  ;;  %15079 = vst [vmem:[#allocation42_spill] sm:$0xff] %v13005_v58  ;;  %v3731_v50 = vadd.f32 %v3635_v10, %v3401_v23  ;;  %v3402_v62 = vadd.f32 %v3331_v21, %v15084_v17 }
 0x570   : > { %v13010_v56 = vpop.f32.mrf.mxu0  ;;  %9786 = vmatmul.msk.bf16.gmra.mxu2 %vm4822_vm5, %v10896_v54  ;;  %9824 = vmatmul.msk.bf16.gmra.mxu3 %vm4822_vm5, %v10896_v54 }
 0x571   : > { %9770 = vmatmul.msk.bf16.gmra.mxu1 %vm4822_vm5, %v10482_v5  ;;  %v4125_v60 = vadd.f32 %v4021_v27, %v3731_v50 }
 0x573   : > { %9992 = vmatmul.msk.bf16.gmra.mxu0 %vm4822_vm5, %v13014_v43  ;;  %v3334_v12 = vpop.f32.mrf.mxu2  ;;  %v4246_v23 = vrot.slane %v4125_v60, 7 }
 0x574   : > { %v10715_v13 = vpop.eup %10714  ;;  %v3539_v3 = vpop.f32.mrf.mxu3  ;;  %v3403_v38 = vadd.f32 %v3334_v12, %v15083_v31 }
 0x575   : > { %v10717_v29 = vpop.eup %10716  ;;  %v4516_v37 = vmul.f32 %v10715_v13, %v4324_v2  ;;  %v3636_v42 = vrot.slane %v3539_v3, 1  ;;  %v4023_v2 = vsel %vm1435_vm3, %v4021_v27, %v4022_v32  ;;  %v13039_v27 = vld [vmem:[#allocation3 + $0x30] sm:$0xff] }
 0x576   : > { %v4517_v41 = vmul.f32 %v10717_v29, %v4325_v39  ;;  %v4998_v7 = vpop.f32.mrf.mxu1 }
 0x577   : > { %v4548_v61 = vpack.c.bf16 %v4516_v37, %v4516_v37  ;;  %v3637_v57 = vsel %vm1072_vm2, %v3635_v10, %v3636_v42  ;;  %v3733_v46 = vadd.f32 %v3636_v42, %v3403_v38 }
 0x578   : > { %v4549_v0 = vpack.c.bf16 %v4517_v41, %v4517_v41  ;;  %v3732_v5 = vadd.f32 %v3637_v57, %v3402_v62  ;;  %v13026_v54 = vpop.f32.mrf.mxu0  ;;  %v10897_v41 = vld [vmem:[#allocation3 + $0x10] sm:$0xff] }
 0x579   : > { %4580 = vst.msk [vmem:[#allocation3 + $0xc4] sm:$0xf] %vm289_vm4, %v4548_v61  ;;  %v4127_v39 = vadd.f32 %v4025_v11, %v3733_v46 }
 0x57a   : > { %4581 = vst.msk [vmem:[#allocation3 + $0xc8] sm:$0xf] %vm289_vm4, %v4549_v0  ;;  %v4126_v30 = vadd.f32 %v4023_v2, %v3732_v5 }
 0x57b   : > { %v4249_v21 = vrot.slane %v4127_v39, 7  ;;  %v3336_v13 = vpop.f32.mrf.mxu2 }
 0x57c   : > { %v4247_v47 = vrot.slane %v4126_v30, 7  ;;  %v3541_v10 = vpop.f32.mrf.mxu3 }
 0x57e   : > { %v4248_v12 = vsel %vm4185_vm6, %v4246_v23, %v4247_v47  ;;  %v4250_v50 = vsel %vm4185_vm6, %v4247_v47, %v4249_v21  ;;  %v13035_v37 = vpop.f32.mrf.mxu1  ;;  %v15088_v21 = vld [vmem:[#allocation48_spill] sm:$0xff]  ;;  %v15089_v23 = vrot.slane %v12237_v53, 2 }
 0x57f   : > { %v4326_v3 = vadd.f32 %v12849_v40, %v4248_v12  ;;  %v4327_v29 = vadd.f32 %v12849_v40, %v4250_v50  ;;  %15085 = vst [vmem:[#allocation41_spill] sm:$0xff] %v13035_v37  ;;  %v10898_v50 = vld [vmem:[#allocation3 + $0x18] sm:$0xff] }
 0x580   : > { %v10483_v32 = vld [vmem:[#allocation3 + $0xc0] sm:$0xff]  ;;  %v3895_v31 = vpop.f32.mrf.mxu0  ;;  %9787 = vmatmul.msk.bf16.gmra.mxu2 %vm4822_vm5, %v10897_v41  ;;  %9825 = vmatmul.msk.bf16.gmra.mxu3 %vm4822_vm5, %v10897_v41  ;;  %v2865_v47 = vadd.f32 %v15089_v23, %v15088_v21  ;;  %v4027_v41 = vrot.slane %v13010_v56, 2 }
 0x581   : > { %v4358_v38 = vsub.f32 0.0, %v4326_v3  ;;  %v4359_v42 = vsub.f32 0.0, %v4327_v29  ;;  %9771 = vmatmul.msk.bf16.gmra.mxu1 %vm4822_vm5, %v10483_v32  ;;  %v10484_v10 = vld [vmem:[#allocation3 + $0xc8] sm:$0xff]  ;;  %v13057_v32 = vld [vmem:[#allocation3 + $0x38] sm:$0xff] }
 0x583   : > { %v4414_v17 = vmul.f32 1.442695, %v4358_v38  ;;  %v4416_v62 = vmul.f32 1.442695, %v4359_v42  ;;  %9993 = vmatmul.msk.bf16.gmra.mxu0 %vm4822_vm5, %v13039_v27  ;;  %v3338_v11 = vpop.f32.mrf.mxu2  ;;  %v4029_v38 = vrot.slane %v13026_v54, 2 }
 0x584   : > { %v3543_v61 = vpop.f32.mrf.mxu3  ;;  %v3404_v31 = vadd.f32 %v3338_v11, %v2865_v47  ;;  %v4026_v11 = vrot.slane %v13003_v36, 2 }
 0x585   : > { %10718 = vpow2.f32 %v4414_v17  ;;  %v4030_v54 = vsel %vm1435_vm3, %v4027_v41, %v4029_v38 }
 0x586   : > { %10720 = vpow2.f32 %v4416_v62  ;;  %v13044_v57 = vpop.f32.mrf.mxu1 }
 0x587   : > { %15086 = vst [vmem:[#allocation46_spill] sm:$0xff] %v13044_v57 }
 0x588   : > { %v13046_v46 = vpop.f32.mrf.mxu0 }
 0x58b   : > { %v10719_v7 = vpop.eup %10718  ;;  %v3340_v5 = vpop.f32.mrf.mxu2 }
 0x58c   : > { %v10721_v0 = vpop.eup %10720  ;;  %v4454_v60 = vadd.f32 1.0, %v10719_v7  ;;  %v3544_v2 = vpop.f32.mrf.mxu3 }
 0x58d   : > { %v4455_v39 = vadd.f32 1.0, %v10721_v0  ;;  %v3638_v13 = vrot.slane %v3544_v2, 1 }
 0x58e   : > { %10722 = vrcp.f32 %v4454_v60  ;;  %v13048_v30 = vpop.f32.mrf.mxu1 }
 0x58f   : > { %10724 = vrcp.f32 %v4455_v39  ;;  %15087 = vst [vmem:[#allocation44_spill] sm:$0xff] %v13048_v30  ;;  %v3734_v42 = vadd.f32 %v3638_v13, %v3404_v31  ;;  %v15090_v39 = vld [vmem:[#allocation50_spill] sm:$0xff] }
 0x590   : > { %v13053_v12 = vpop.f32.mrf.mxu0  ;;  %9788 = vmatmul.msk.bf16.gmra.mxu2 %vm4822_vm5, %v10898_v50  ;;  %9826 = vmatmul.msk.bf16.gmra.mxu3 %vm4822_vm5, %v10898_v50  ;;  %v3405_v21 = vadd.f32 %v3340_v5, %v15090_v39 }
 0x591   : > { %9772 = vmatmul.msk.bf16.gmra.mxu1 %vm4822_vm5, %v10484_v10  ;;  %v4128_v31 = vadd.f32 %v4026_v11, %v3734_v42 }
 0x593   : > { %9994 = vmatmul.msk.bf16.gmra.mxu0 %vm4822_vm5, %v13057_v32  ;;  %v3343_v17 = vpop.f32.mrf.mxu2  ;;  %v4251_v5 = vrot.slane %v4128_v31, 7 }
 0x594   : > { %v10723_v53 = vpop.eup %10722  ;;  %v3547_v62 = vpop.f32.mrf.mxu3  ;;  %v3406_v0 = vadd.f32 %v3343_v17, %v12306_v9  ;;  %v4028_v9 = vsel %vm1435_vm3, %v4026_v11, %v4027_v41  ;;  %v13082_v11 = vld [vmem:[#allocation3 + $0x40] sm:$0xff] }
 0x595   : > { %v10725_v61 = vpop.eup %10724  ;;  %v4518_v7 = vmul.f32 %v10723_v53, %v4326_v3  ;;  %v3639_v60 = vrot.slane %v3547_v62, 1 }
 0x596   : > { %v4519_v2 = vmul.f32 %v10725_v61, %v4327_v29  ;;  %v5007_v50 = vpop.f32.mrf.mxu1 }
 0x597   : > { %v4550_v23 = vpack.c.bf16 %v4518_v7, %v4518_v7  ;;  %v3640_v47 = vsel %vm1072_vm2, %v3638_v13, %v3639_v60  ;;  %v3736_v10 = vadd.f32 %v3639_v60, %v3406_v0 }
 0x598   : > { %v4551_v56 = vpack.c.bf16 %v4519_v2, %v4519_v2  ;;  %v3735_v30 = vadd.f32 %v3640_v47, %v3405_v21  ;;  %v13069_v57 = vpop.f32.mrf.mxu0 }
 0x599   : > { %4582 = vst.msk [vmem:[#allocation3 + $0xd4] sm:$0xf] %vm289_vm4, %v4550_v23  ;;  %v4130_v3 = vadd.f32 %v4030_v54, %v3736_v10 }
 0x59a   : > { %4583 = vst.msk [vmem:[#allocation3 + $0xd8] sm:$0xf] %vm289_vm4, %v4551_v56  ;;  %v4129_v36 = vadd.f32 %v4028_v9, %v3735_v30  ;;  %v10899_v30 = vld [vmem:[#allocation3 + $0x20] sm:$0xff] }
 0x59b   : > { %v4254_v29 = vrot.slane %v4130_v3, 7  ;;  %v3345_v53 = vpop.f32.mrf.mxu2 }
 0x59c   : > { %v4252_v38 = vrot.slane %v4129_v36, 7  ;;  %v3549_v13 = vpop.f32.mrf.mxu3 }
 0x59e   : > { %v4253_v17 = vsel %vm4185_vm6, %v4251_v5, %v4252_v38  ;;  %v4255_v42 = vsel %vm4185_vm6, %v4252_v38, %v4254_v29  ;;  %v13078_v7 = vpop.f32.mrf.mxu1  ;;  %v15094_v5 = vld [vmem:[#allocation52_spill] sm:$0xff]  ;;  %v15095_v38 = vrot.slane %v12278_v22, 2 }
 0x59f   : > { %v4328_v62 = vadd.f32 %v12849_v40, %v4253_v17  ;;  %v4329_v61 = vadd.f32 %v12849_v40, %v4255_v42  ;;  %15091 = vst [vmem:[#allocation45_spill] sm:$0xff] %v13078_v7 }
 0x5a0   : > { %v10485_v41 = vld [vmem:[#allocation3 + $0xd0] sm:$0xff]  ;;  %v3904_v0 = vpop.f32.mrf.mxu0  ;;  %9789 = vmatmul.msk.bf16.gmra.mxu2 %vm4822_vm5, %v10899_v30  ;;  %9827 = vmatmul.msk.bf16.gmra.mxu3 %vm4822_vm5, %v10899_v30  ;;  %v2868_v53 = vadd.f32 %v15095_v38, %v15094_v5  ;;  %v15097_v38 = vld [vmem:[#allocation51_spill] sm:$0xff] }
 0x5a1   : > { %v4360_v60 = vsub.f32 0.0, %v4328_v62  ;;  %v4361_v2 = vsub.f32 0.0, %v4329_v61  ;;  %9773 = vmatmul.msk.bf16.gmra.mxu1 %vm4822_vm5, %v10485_v41  ;;  %v10486_v17 = vld [vmem:[#allocation3 + $0xd8] sm:$0xff]  ;;  %v10900_v41 = vld [vmem:[#allocation3 + $0x28] sm:$0xff] }
 0x5a2   : > { %v13100_v0 = vld [vmem:[#allocation3 + $0x48] sm:$0xff] }
 0x5a3   : > { %v4418_v39 = vmul.f32 1.442695, %v4360_v60  ;;  %v4420_v21 = vmul.f32 1.442695, %v4361_v2  ;;  %9995 = vmatmul.msk.bf16.gmra.mxu0 %vm4822_vm5, %v13082_v11  ;;  %v3347_v54 = vpop.f32.mrf.mxu2  ;;  %v4034_v2 = vrot.slane %v13069_v57, 2 }
 0x5a4   : > { %v3551_v23 = vpop.f32.mrf.mxu3  ;;  %v3407_v60 = vadd.f32 %v3347_v54, %v2868_v53  ;;  %v4031_v54 = vrot.slane %v13046_v46, 2 }
 0x5a5   : > { %10726 = vpow2.f32 %v4418_v39  ;;  %v4032_v39 = vrot.slane %v13053_v12, 2 }
 0x5a6   : > { %10728 = vpow2.f32 %v4420_v21  ;;  %v13087_v47 = vpop.f32.mrf.mxu1 }
 0x5a7   : > { %15092 = vst [vmem:[#allocation43_spill] sm:$0xff] %v13087_v47  ;;  %v4035_v57 = vsel %vm1435_vm3, %v4032_v39, %v4034_v2 }
 0x5a8   : > { %v13089_v10 = vpop.f32.mrf.mxu0 }
 0x5ab   : > { %v10727_v50 = vpop.eup %10726  ;;  %v3349_v9 = vpop.f32.mrf.mxu2 }
 0x5ac   : > { %v10729_v56 = vpop.eup %10728  ;;  %v4456_v31 = vadd.f32 1.0, %v10727_v50  ;;  %v3552_v3 = vpop.f32.mrf.mxu3  ;;  %v3408_v53 = vadd.f32 %v3349_v9, %v15097_v38 }
 0x5ad   : > { %v4457_v36 = vadd.f32 1.0, %v10729_v56  ;;  %v3641_v13 = vrot.slane %v3552_v3, 1 }
 0x5ae   : > { %10730 = vrcp.f32 %v4456_v31  ;;  %v13091_v29 = vpop.f32.mrf.mxu1  ;;  %v15096_v31 = vld [vmem:[#allocation53_spill] sm:$0xff] }
 0x5af   : > { %10732 = vrcp.f32 %v4457_v36  ;;  %15093 = vst [vmem:[#allocation49_spill] sm:$0xff] %v13091_v29  ;;  %v3737_v30 = vadd.f32 %v3641_v13, %v3407_v60 }
 0x5b0   : > { %v13096_v42 = vpop.f32.mrf.mxu0  ;;  %9790 = vmatmul.msk.bf16.gmra.mxu2 %vm4822_vm5, %v10900_v41  ;;  %9828 = vmatmul.msk.bf16.gmra.mxu3 %vm4822_vm5, %v10900_v41 }
 0x5b1   : > { %9774 = vmatmul.msk.bf16.gmra.mxu1 %vm4822_vm5, %v10486_v17  ;;  %v4131_v47 = vadd.f32 %v4031_v54, %v3737_v30 }
 0x5b3   : > { %9996 = vmatmul.msk.bf16.gmra.mxu0 %vm4822_vm5, %v13100_v0  ;;  %v3352_v21 = vpop.f32.mrf.mxu2  ;;  %v4256_v2 = vrot.slane %v4131_v47, 7  ;;  %v13127_v47 = vld [vmem:[#allocation3 + $0x50] sm:$0xff] }
 0x5b4   : > { %v10731_v22 = vpop.eup %10730  ;;  %v3555_v23 = vpop.f32.mrf.mxu3  ;;  %v3409_v3 = vadd.f32 %v3352_v21, %v15096_v31 }
 0x5b5   : > { %v10733_v50 = vpop.eup %10732  ;;  %v4520_v56 = vmul.f32 %v10731_v22, %v4328_v62  ;;  %v3642_v36 = vrot.slane %v3555_v23, 1  ;;  %v4033_v62 = vsel %vm1435_vm3, %v4031_v54, %v4032_v39 }
 0x5b6   : > { %v4521_v5 = vmul.f32 %v10733_v50, %v4329_v61  ;;  %v5016_v29 = vpop.f32.mrf.mxu1 }
 0x5b7   : > { %v4552_v17 = vpack.c.bf16 %v4520_v56, %v4520_v56  ;;  %v3643_v41 = vsel %vm1072_vm2, %v3641_v13, %v3642_v36  ;;  %v3739_v60 = vadd.f32 %v3642_v36, %v3409_v3  ;;  %v10901_v36 = vld [vmem:[#allocation3 + $0x30] sm:$0xff] }
 0x5b8   : > { %v4553_v12 = vpack.c.bf16 %v4521_v5, %v4521_v5  ;;  %v3738_v7 = vadd.f32 %v3643_v41, %v3408_v53  ;;  %v13112_v37 = vpop.f32.mrf.mxu0 }
 0x5b9   : > { %4584 = vst.msk [vmem:[#allocation3 + $0xe4] sm:$0xf] %vm289_vm4, %v4552_v17  ;;  %v4133_v61 = vadd.f32 %v4035_v57, %v3739_v60 }
 0x5ba   : > { %4585 = vst.msk [vmem:[#allocation3 + $0xe8] sm:$0xf] %vm289_vm4, %v4553_v12  ;;  %v4132_v46 = vadd.f32 %v4033_v62, %v3738_v7 }
 0x5bb   : > { %v4259_v9 = vrot.slane %v4133_v61, 7  ;;  %v3354_v21 = vpop.f32.mrf.mxu2 }
 0x5bc   : > { %v4257_v22 = vrot.slane %v4132_v46, 7  ;;  %v3557_v13 = vpop.f32.mrf.mxu3 }
 0x5be   : > { %v4258_v29 = vsel %vm4185_vm6, %v4256_v2, %v4257_v22  ;;  %v4260_v30 = vsel %vm4185_vm6, %v4257_v22, %v4259_v9  ;;  %v13121_v56 = vpop.f32.mrf.mxu1  ;;  %v15101_v9 = vld [vmem:[#allocation54_spill] sm:$0xff]  ;;  %v15102_v2 = vld [vmem:[#allocation55_spill] sm:$0xff] }
 0x5bf   : > { %v4330_v23 = vadd.f32 %v12849_v40, %v4258_v29  ;;  %v4331_v50 = vadd.f32 %v12849_v40, %v4260_v30  ;;  %15098 = vst [vmem:[#allocation47_spill] sm:$0xff] %v13121_v56  ;;  %v15103_v22 = vrot.slane %v15102_v2, 2 }
 0x5c0   : > { %v10487_v39 = vld [vmem:[#allocation3 + $0xe0] sm:$0xff]  ;;  %v13123_v31 = vpop.f32.mrf.mxu0  ;;  %9791 = vmatmul.msk.bf16.gmra.mxu2 %vm4822_vm5, %v10901_v36  ;;  %9829 = vmatmul.msk.bf16.gmra.mxu3 %vm4822_vm5, %v10901_v36  ;;  %v4037_v36 = vrot.slane %v13096_v42, 2  ;;  %v15105_v42 = vld [vmem:[#allocation56_spill] sm:$0xff] }
 0x5c1   : > { %v4362_v3 = vsub.f32 0.0, %v4330_v23  ;;  %v4363_v7 = vsub.f32 0.0, %v4331_v50  ;;  %9775 = vmatmul.msk.bf16.gmra.mxu1 %vm4822_vm5, %v10487_v39  ;;  %v2871_v21 = vadd.f32 %v15103_v22, %v15101_v9  ;;  %v10488_v29 = vld [vmem:[#allocation3 + $0xe8] sm:$0xff]  ;;  %v10902_v39 = vld [vmem:[#allocation3 + $0x38] sm:$0xff]  ;;  %v15104_v9 = vld [vmem:[#allocation58_spill] sm:$0xff] }
 0x5c3   : > { %v4422_v5 = vmul.f32 1.442695, %v4362_v3  ;;  %v4424_v54 = vmul.f32 1.442695, %v4363_v7  ;;  %9997 = vmatmul.msk.bf16.gmra.mxu0 %vm4822_vm5, %v13127_v47  ;;  %v3356_v40 = vpop.f32.mrf.mxu2  ;;  %v13145_v3 = vld [vmem:[#allocation3 + $0x58] sm:$0xff] }
 0x5c4   : > { %v3559_v38 = vpop.f32.mrf.mxu3  ;;  %v3410_v7 = vadd.f32 %v3356_v40, %v2871_v21 }
 0x5c5   : > { %10734 = vpow2.f32 %v4422_v5  ;;  %v4039_v5 = vrot.slane %v13112_v37, 2  ;;  %v4036_v38 = vrot.slane %v13089_v10, 2 }
 0x5c6   : > { %10736 = vpow2.f32 %v4424_v54  ;;  %v13132_v53 = vpop.f32.mrf.mxu1 }
 0x5c7   : > { %15099 = vst [vmem:[#allocation48_spill] sm:$0xff] %v13132_v53 }
 0x5c8   : > { %v13134_v57 = vpop.f32.mrf.mxu0 }
 0x5cb   : > { %v10735_v17 = vpop.eup %10734  ;;  %v3358_v12 = vpop.f32.mrf.mxu2 }
 0x5cc   : > { %v10737_v41 = vpop.eup %10736  ;;  %v4458_v60 = vadd.f32 1.0, %v10735_v17  ;;  %v3560_v62 = vpop.f32.mrf.mxu3  ;;  %v3411_v21 = vadd.f32 %v3358_v12, %v15105_v42  ;;  %v10528_v12 = vld [vmem:[%s14908_s3 + $0x28] sm:$0xff] }
 0x5cd   : > { %v4459_v61 = vadd.f32 1.0, %v10737_v41  ;;  %v3644_v13 = vrot.slane %v3560_v62, 1  ;;  %6648 = vmatpush.bf16.msra.mxu2 %v10528_v12 }
 0x5ce   : > { %10738 = vrcp.f32 %v4458_v60  ;;  %v13136_v46 = vpop.f32.mrf.mxu1 }
 0x5cf   : > { %10740 = vrcp.f32 %v4459_v61  ;;  %15100 = vst [vmem:[#allocation50_spill] sm:$0xff] %v13136_v46  ;;  %v3740_v17 = vadd.f32 %v3644_v13, %v3410_v7 }
 0x5d0   : > { %v13141_v30 = vpop.f32.mrf.mxu0  ;;  %9792 = vmatmul.msk.bf16.gmra.mxu2 %vm4822_vm5, %v10902_v39  ;;  %9830 = vmatmul.msk.bf16.gmra.mxu3 %vm4822_vm5, %v10902_v39  ;;  %v4038_v39 = vsel %vm1435_vm3, %v4036_v38, %v4037_v36 }
 0x5d1   : > { %9776 = vmatmul.msk.bf16.gmra.mxu1 %vm4822_vm5, %v10488_v29  ;;  %v4040_v29 = vsel %vm1435_vm3, %v4037_v36, %v4039_v5  ;;  %v4134_v56 = vadd.f32 %v4036_v38, %v3740_v17 }
 0x5d3   : > { %9998 = vmatmul.msk.bf16.gmra.mxu0 %vm4822_vm5, %v13145_v3  ;;  %v3361_v41 = vpop.f32.mrf.mxu2  ;;  %v4261_v36 = vrot.slane %v4134_v56, 7 }
 0x5d4   : > { %v10739_v54 = vpop.eup %10738  ;;  %v3563_v60 = vpop.f32.mrf.mxu3  ;;  %v3412_v2 = vadd.f32 %v3361_v41, %v15104_v9  ;;  %v10904_v9 = vld [vmem:[#allocation3 + $0x40] sm:$0xff] }
 0x5d5   : > { %v10741_v62 = vpop.eup %10740  ;;  %v4522_v61 = vmul.f32 %v10739_v54, %v4330_v23  ;;  %v3645_v40 = vrot.slane %v3563_v60, 1 }
 0x5d6   : > { %v4523_v22 = vmul.f32 %v10741_v62, %v4331_v50  ;;  %v5025_v10 = vpop.f32.mrf.mxu1 }
 0x5d7   : > { %v4554_v37 = vpack.c.bf16 %v4522_v61, %v4522_v61  ;;  %v3646_v46 = vsel %vm1072_vm2, %v3644_v13, %v3645_v40  ;;  %v3742_v53 = vadd.f32 %v3645_v40, %v3412_v2  ;;  %v13174_v2 = vld [vmem:[#allocation3 + $0x60] sm:$0xff]  ;;  %v10562_v10 = vld [vmem:[%s14908_s3 + $0x38] sm:$0xff] }
 0x5d8   : > { %v4555_v7 = vpack.c.bf16 %v4523_v22, %v4523_v22  ;;  %v3741_v58 = vadd.f32 %v3646_v46, %v3411_v21  ;;  %v6125_v55 = vpop.f32.mrf.mxu0  ;;  %v10563_v40 = vld [vmem:[%s14908_s3 + $0x40] sm:$0xff]  ;;  %7565 = vmatpush.bf16.msra.mxu0 %v10562_v10 }
 0x5d9   : > { %4586 = vst.msk [vmem:[#allocation3 + $0xf4] sm:$0xf] %vm289_vm4, %v4554_v37  ;;  %v4136_v23 = vadd.f32 %v4040_v29, %v3742_v53  ;;  %v10903_v53 = vld [vmem:[%s14907_s2] ss:$0 sm:$0xff]  ;;  %7887 = vmatpush.bf16.msra.mxu1 %v10563_v40  ;;  %v10561_v37 = vld [vmem:[%s14908_s3 + $0x30] sm:$0xff] }
 0x5da   : > { %4587 = vst.msk [vmem:[#allocation3 + $0xf8] sm:$0xf] %vm289_vm4, %v4555_v7  ;;  %v4135_v50 = vadd.f32 %v4038_v39, %v3741_v58  ;;  %7355 = vmatpush.bf16.msra.mxu3 %v10561_v37 }
 0x5db   : > { %v4264_v5 = vrot.slane %v4136_v23, 7  ;;  %v3363_v13 = vpop.f32.mrf.mxu2 }
 0x5dc   : > { %v4262_v54 = vrot.slane %v4135_v50, 7  ;;  %v3565_v41 = vpop.f32.mrf.mxu3 }
 0x5de   : > { %v4263_v38 = vsel %vm4185_vm6, %v4261_v36, %v4262_v54  ;;  %v4265_v55 = vsel %vm4185_vm6, %v4262_v54, %v4264_v5  ;;  %v13168_v17 = vpop.f32.mrf.mxu1 }
 0x5df   : > { %v4332_v46 = vadd.f32 %v10903_v53, %v4263_v38  ;;  %v4333_v58 = vadd.f32 %v10903_v53, %v4265_v55 }
 0x5e0   : > { %v10489_v60 = vld [vmem:[#allocation3 + $0xf0] sm:$0xff]  ;;  %v13170_v62 = vpop.f32.mrf.mxu0  ;;  %9793 = vmatmul.msk.bf16.gmra.mxu2 %vm4822_vm5, %v10904_v9  ;;  %9831 = vmatmul.msk.bf16.gmra.mxu3 %vm4822_vm5, %v10904_v9  ;;  %v13199_v9 = vld [vmem:[#allocation3 + $0x68] sm:$0xff] }
 0x5e1   : > { %v4364_v56 = vsub.f32 0.0, %v4332_v46  ;;  %v4365_v61 = vsub.f32 0.0, %v4333_v58  ;;  %9777 = vmatmul.msk.bf16.gmra.mxu1 %vm4822_vm5, %v10489_v60  ;;  %v10490_v53 = vld [vmem:[#allocation3 + $0xf8] sm:$0xff] }
 0x5e3   : > { %v4426_v22 = vmul.f32 1.442695, %v4364_v56  ;;  %v4428_v42 = vmul.f32 1.442695, %v4365_v61  ;;  %9999 = vmatmul.msk.bf16.gmra.mxu0 %vm4822_vm5, %v13174_v2  ;;  %v5090_v21 = vpop.f32.mrf.mxu2  ;;  %v10905_v61 = vld [vmem:[#allocation3 + $0x48] sm:$0xff] }
 0x5e4   : > { %v5412_v29 = vpop.f32.mrf.mxu3 }
 0x5e5   : > { %10742 = vpow2.f32 %v4426_v22 }
 0x5e6   : > { %10744 = vpow2.f32 %v4428_v42  ;;  %v13185_v39 = vpop.f32.mrf.mxu1 }
 0x5e8   : > { %v13190_v7 = vpop.f32.mrf.mxu0 }
 0x5eb   : > { %v10743_v23 = vpop.eup %10742  ;;  %v5091_v5 = vpop.f32.mrf.mxu2 }
 0x5ec   : > { %v10745_v50 = vpop.eup %10744  ;;  %v4460_v12 = vadd.f32 1.0, %v10743_v23  ;;  %v5413_v36 = vpop.f32.mrf.mxu3  ;;  %v5250_v13 = vrot.slane %v5091_v5, 1 }
 0x5ed   : > { %v4461_v54 = vadd.f32 1.0, %v10745_v50  ;;  %v5604_v41 = vrot.slane %v5413_v36, 2 }
 0x5ee   : > { %10746 = vrcp.f32 %v4460_v12  ;;  %v5346_v38 = vadd.f32 %v5250_v13, %v12622_v63  ;;  %v13193_v55 = vpop.f32.mrf.mxu1 }
 0x5ef   : > { %10748 = vrcp.f32 %v4461_v54 }
 0x5f0   : > { %v13195_v60 = vpop.f32.mrf.mxu0  ;;  %v5732_v56 = vadd.f32 %v5604_v41, %v5346_v38  ;;  %9794 = vmatmul.msk.bf16.gmra.mxu2 %vm4822_vm5, %v10905_v61  ;;  %9832 = vmatmul.msk.bf16.gmra.mxu3 %vm4822_vm5, %v10905_v61 }
 0x5f1   : > { %9778 = vmatmul.msk.bf16.gmra.mxu1 %vm4822_vm5, %v10490_v53 }
 0x5f2   : > { %v13205_v63 = vadd.f32 %v13123_v31, %v5732_v56 }
 0x5f3   : > { %10000 = vmatmul.msk.bf16.gmra.mxu0 %vm4822_vm5, %v13199_v9  ;;  %v5094_v22 = vpop.f32.mrf.mxu2 }
 0x5f4   : > { %v10747_v40 = vpop.eup %10746  ;;  %v5416_v42 = vpop.f32.mrf.mxu3  ;;  %v5251_v37 = vrot.slane %v5094_v22, 1 }
 0x5f5   : > { %v10749_v21 = vpop.eup %10748  ;;  %v4524_v29 = vmul.f32 %v10747_v40, %v4332_v46  ;;  %v5605_v10 = vrot.slane %v5416_v42, 2  ;;  %v10906_v42 = vld [vmem:[#allocation3 + $0x50] sm:$0xff] }
 0x5f6   : > { %v4525_v23 = vmul.f32 %v10749_v21, %v4333_v58  ;;  %v5252_v12 = vsel %vm1072_vm2, %v5250_v13, %v5251_v37  ;;  %v5034_v36 = vpop.f32.mrf.mxu1  ;;  %v5348_v13 = vadd.f32 %v5251_v37, %v12644_v49  ;;  %v13223_v21 = vld [vmem:[#allocation3 + $0x70] sm:$0xff] }
 0x5f7   : > { %v4556_v50 = vpack.c.bf16 %v4524_v29, %v4524_v29  ;;  %v5606_v5 = vsel %vm1435_vm3, %v5604_v41, %v5605_v10  ;;  %v5347_v38 = vadd.f32 %v5252_v12, %v12633_v4 }
 0x5f8   : > { %v4557_v54 = vpack.c.bf16 %v4525_v23, %v4525_v23  ;;  %v6134_v53 = vpop.f32.mrf.mxu0 }
 0x5f9   : > { %4588 = vst.msk [vmem:[#allocation3 + $0x104] sm:$0xf] %vm289_vm4, %v4556_v50  ;;  %v5733_v31 = vadd.f32 %v5606_v5, %v5347_v38  ;;  %v10907_v38 = vld [vmem:[#allocation3 + $0x58] sm:$0xff] }
 0x5fa   : > { %4589 = vst.msk [vmem:[#allocation3 + $0x108] sm:$0xf] %vm289_vm4, %v4557_v54  ;;  %v13243_v53 = vld [vmem:[#allocation3 + $0x78] sm:$0xff] }
 0x5fb   : > { %v5096_v56 = vpop.f32.mrf.mxu2  ;;  %v13213_v61 = vadd.f32 %v13134_v57, %v5733_v31 }
 0x5fc   : > { %v5418_v46 = vpop.f32.mrf.mxu3 }
 0x5fd   : > { %v5607_v58 = vrot.slane %v5418_v46, 2 }
 0x5fe   : > { %v13217_v40 = vpop.f32.mrf.mxu1 }
 0x5ff   : > { %v5608_v41 = vsel %vm1435_vm3, %v5605_v10, %v5607_v58 }
 0x600   : > { %v13219_v22 = vpop.f32.mrf.mxu0  ;;  %v5734_v4 = vadd.f32 %v5608_v41, %v5348_v13  ;;  %9795 = vmatmul.msk.bf16.gmra.mxu2 %vm4822_vm5, %v10906_v42  ;;  %9833 = vmatmul.msk.bf16.gmra.mxu3 %vm4822_vm5, %v10906_v42 }
 0x601   : > { %10027 = vmatmul.msk.bf16.vlgmr.msrb.gmra.mxu1 %vm4822_vm5, %v12951_v59 }
 0x602   : > { %v13228_v57 = vadd.f32 %v13141_v30, %v5734_v4 }
 0x603   : > { %10001 = vmatmul.msk.bf16.gmra.mxu0 %vm4822_vm5, %v13223_v21  ;;  %v5098_v49 = vpop.f32.mrf.mxu2 }
 0x604   : > { %v5421_v29 = vpop.f32.mrf.mxu3 }
 0x606   : > { %v13232_v37 = vpop.f32.mrf.mxu1 }
 0x608   : > { %v13234_v10 = vpop.f32.mrf.mxu0 }
 0x60b   : > { %v5099_v23 = vpop.f32.mrf.mxu2 }
 0x60c   : > { %v5422_v50 = vpop.f32.mrf.mxu3  ;;  %v5253_v12 = vrot.slane %v5099_v23, 1 }
 0x60d   : > { %v5609_v36 = vrot.slane %v5422_v50, 2 }
 0x60e   : > { %v5349_v5 = vadd.f32 %v5253_v12, %v12713_v19  ;;  %v13237_v54 = vpop.f32.mrf.mxu1 }
 0x610   : > { %v13239_v59 = vpop.f32.mrf.mxu0  ;;  %v5735_v30 = vadd.f32 %v5609_v36, %v5349_v5  ;;  %9796 = vmatmul.msk.bf16.gmra.mxu2 %vm4822_vm5, %v10907_v38  ;;  %9834 = vmatmul.msk.bf16.gmra.mxu3 %vm4822_vm5, %v10907_v38 }
 0x611   : > { %10028 = vmatmul.msk.bf16.gmra.mxu1 %vm4822_vm5, %v12971_v24 }
 0x612   : > { %v13250_v19 = vadd.f32 %v13170_v62, %v5735_v30 }
 0x613   : > { %10002 = vmatmul.msk.bf16.gmra.mxu0 %vm4822_vm5, %v13243_v53  ;;  %v5102_v31 = vpop.f32.mrf.mxu2 }
 0x614   : > { %v5425_v56 = vpop.f32.mrf.mxu3  ;;  %v5254_v46 = vrot.slane %v5102_v31, 1  ;;  %v10908_v31 = vld [vmem:[#allocation3 + $0x60] sm:$0xff] }
 0x615   : > { %v5610_v58 = vrot.slane %v5425_v56, 2 }
 0x616   : > { %v5255_v13 = vsel %vm1072_vm2, %v5253_v12, %v5254_v46  ;;  %v5043_v4 = vpop.f32.mrf.mxu1  ;;  %v5351_v5 = vadd.f32 %v5254_v46, %v12728_v44 }
 0x617   : > { %v5611_v41 = vsel %vm1435_vm3, %v5609_v36, %v5610_v58  ;;  %v5350_v42 = vadd.f32 %v5255_v13, %v12724_v8  ;;  %v13266_v8 = vld [vmem:[#allocation3 + $0x80] sm:$0xff] }
 0x618   : > { %v6143_v49 = vpop.f32.mrf.mxu0 }
 0x619   : > { %v5736_v29 = vadd.f32 %v5611_v41, %v5350_v42 }
 0x61b   : > { %v5104_v24 = vpop.f32.mrf.mxu2  ;;  %v13256_v50 = vadd.f32 %v13190_v7, %v5736_v29 }
 0x61c   : > { %v5427_v23 = vpop.f32.mrf.mxu3  ;;  %v10909_v24 = vld [vmem:[#allocation3 + $0x68] sm:$0xff] }
 0x61d   : > { %v5612_v62 = vrot.slane %v5427_v23, 2  ;;  %v13286_v23 = vld [vmem:[#allocation3 + $0x88] sm:$0xff] }
 0x61e   : > { %v13260_v38 = vpop.f32.mrf.mxu1 }
 0x61f   : > { %v5613_v30 = vsel %vm1435_vm3, %v5610_v58, %v5612_v62 }
 0x620   : > { %v13262_v12 = vpop.f32.mrf.mxu0  ;;  %v5737_v36 = vadd.f32 %v5613_v30, %v5351_v5  ;;  %9797 = vmatmul.msk.bf16.gmra.mxu2 %vm4822_vm5, %v10908_v31  ;;  %9835 = vmatmul.msk.bf16.gmra.mxu3 %vm4822_vm5, %v10908_v31 }
 0x621   : > { %10029 = vmatmul.msk.bf16.gmra.mxu1 %vm4822_vm5, %v12996_v35 }
 0x622   : > { %v13271_v7 = vadd.f32 %v13195_v60, %v5737_v36 }
 0x623   : > { %10003 = vmatmul.msk.bf16.gmra.mxu0 %vm4822_vm5, %v13266_v8  ;;  %v5106_v44 = vpop.f32.mrf.mxu2 }
 0x624   : > { %v5430_v56 = vpop.f32.mrf.mxu3 }
 0x626   : > { %v13275_v46 = vpop.f32.mrf.mxu1 }
 0x627   : > { %15106 = vst [vmem:[#allocation52_spill] sm:$0xff] %v13275_v46 }
 0x628   : > { %v13277_v58 = vpop.f32.mrf.mxu0 }
 0x62b   : > { %v5107_v13 = vpop.f32.mrf.mxu2 }
 0x62c   : > { %v5431_v41 = vpop.f32.mrf.mxu3  ;;  %v5256_v4 = vrot.slane %v5107_v13, 1 }
 0x62d   : > { %v5614_v49 = vrot.slane %v5431_v41, 2 }
 0x62e   : > { %v5352_v42 = vadd.f32 %v5256_v4, %v12758_v45  ;;  %v13280_v29 = vpop.f32.mrf.mxu1 }
 0x62f   : > { %15107 = vst [vmem:[#allocation53_spill] sm:$0xff] %v13280_v29 }
 0x630   : > { %v13282_v35 = vpop.f32.mrf.mxu0  ;;  %v5738_v60 = vadd.f32 %v5614_v49, %v5352_v42  ;;  %9798 = vmatmul.msk.bf16.gmra.mxu2 %vm4822_vm5, %v10909_v24  ;;  %9836 = vmatmul.msk.bf16.gmra.mxu3 %vm4822_vm5, %v10909_v24 }
 0x631   : > { %10030 = vmatmul.msk.bf16.gmra.mxu1 %vm4822_vm5, %v13014_v43 }
 0x632   : > { %v13293_v45 = vadd.f32 %v13219_v22, %v5738_v60 }
 0x633   : > { %10004 = vmatmul.msk.bf16.gmra.mxu0 %vm4822_vm5, %v13286_v23  ;;  %v5110_v62 = vpop.f32.mrf.mxu2 }
 0x634   : > { %v5434_v5 = vpop.f32.mrf.mxu3  ;;  %v5257_v30 = vrot.slane %v5110_v62, 1 }
 0x635   : > { %v5615_v36 = vrot.slane %v5434_v5, 2 }
 0x636   : > { %v5258_v31 = vsel %vm1072_vm2, %v5256_v4, %v5257_v30  ;;  %v5052_v56 = vpop.f32.mrf.mxu1  ;;  %v5354_v60 = vadd.f32 %v5257_v30, %v12773_v6 }
 0x637   : > { %v5616_v44 = vsel %vm1435_vm3, %v5614_v49, %v5615_v36  ;;  %v5353_v13 = vadd.f32 %v5258_v31, %v12769_v26  ;;  %v10910_v56 = vld [vmem:[#allocation3 + $0x70] sm:$0xff] }
 0x638   : > { %v6152_v41 = vpop.f32.mrf.mxu0  ;;  %v13309_v26 = vld [vmem:[#allocation3 + $0x90] sm:$0xff] }
 0x639   : > { %v5739_v42 = vadd.f32 %v5616_v44, %v5353_v13 }
 0x63b   : > { %v5112_v43 = vpop.f32.mrf.mxu2  ;;  %v13299_v29 = vadd.f32 %v13234_v10, %v5739_v42 }
 0x63c   : > { %v5436_v24 = vpop.f32.mrf.mxu3 }
 0x63d   : > { %v5617_v22 = vrot.slane %v5436_v24, 2 }
 0x63e   : > { %v13303_v5 = vpop.f32.mrf.mxu1 }
 0x63f   : > { %v5618_v62 = vsel %vm1435_vm3, %v5615_v36, %v5617_v22  ;;  %15108 = vst [vmem:[#allocation51_spill] sm:$0xff] %v13303_v5  ;;  %v10911_v22 = vld [vmem:[#allocation3 + $0x78] sm:$0xff] }
 0x640   : > { %v13305_v4 = vpop.f32.mrf.mxu0  ;;  %v5740_v49 = vadd.f32 %v5618_v62, %v5354_v60  ;;  %9799 = vmatmul.msk.bf16.gmra.mxu2 %vm4822_vm5, %v10910_v56  ;;  %9837 = vmatmul.msk.bf16.gmra.mxu3 %vm4822_vm5, %v10910_v56  ;;  %v13329_v60 = vld [vmem:[#allocation3 + $0x98] sm:$0xff] }
 0x641   : > { %10031 = vmatmul.msk.bf16.gmra.mxu1 %vm4822_vm5, %v13039_v27 }
 0x642   : > { %v13314_v10 = vadd.f32 %v13239_v59, %v5740_v49 }
 0x643   : > { %10005 = vmatmul.msk.bf16.gmra.mxu0 %vm4822_vm5, %v13309_v26  ;;  %v5114_v6 = vpop.f32.mrf.mxu2 }
 0x644   : > { %v5439_v30 = vpop.f32.mrf.mxu3 }
 0x646   : > { %v13318_v36 = vpop.f32.mrf.mxu1 }
 0x647   : > { %15109 = vst [vmem:[#allocation54_spill] sm:$0xff] %v13318_v36 }
 0x648   : > { %v13320_v31 = vpop.f32.mrf.mxu0 }
 0x64b   : > { %v5115_v44 = vpop.f32.mrf.mxu2 }
 0x64c   : > { %v5440_v13 = vpop.f32.mrf.mxu3  ;;  %v5259_v41 = vrot.slane %v5115_v44, 1 }
 0x64d   : > { %v5619_v43 = vrot.slane %v5440_v13, 2 }
 0x64e   : > { %v5355_v42 = vadd.f32 %v5259_v41, %v12803_v16  ;;  %v13323_v24 = vpop.f32.mrf.mxu1 }
 0x64f   : > { %15110 = vst [vmem:[#allocation55_spill] sm:$0xff] %v13323_v24 }
 0x650   : > { %v13325_v27 = vpop.f32.mrf.mxu0  ;;  %v5741_v59 = vadd.f32 %v5619_v43, %v5355_v42  ;;  %9800 = vmatmul.msk.bf16.gmra.mxu2 %vm4822_vm5, %v10911_v22  ;;  %9838 = vmatmul.msk.bf16.gmra.mxu3 %vm4822_vm5, %v10911_v22 }
 0x651   : > { %10032 = vmatmul.msk.bf16.gmra.mxu1 %vm4822_vm5, %v13057_v32 }
 0x652   : > { %v13336_v16 = vadd.f32 %v13262_v12, %v5741_v59 }
 0x653   : > { %10006 = vmatmul.msk.bf16.gmra.mxu0 %vm4822_vm5, %v13329_v60  ;;  %v5118_v62 = vpop.f32.mrf.mxu2 }
 0x654   : > { %v5443_v49 = vpop.f32.mrf.mxu3  ;;  %v5260_v56 = vrot.slane %v5118_v62, 1 }
 0x655   : > { %v5620_v6 = vrot.slane %v5443_v49, 2 }
 0x656   : > { %v5261_v30 = vsel %vm1072_vm2, %v5259_v41, %v5260_v56  ;;  %v5061_v13 = vpop.f32.mrf.mxu1  ;;  %v5357_v59 = vadd.f32 %v5260_v56, %v12818_v33 }
 0x657   : > { %v5621_v44 = vsel %vm1435_vm3, %v5619_v43, %v5620_v6  ;;  %v5356_v42 = vadd.f32 %v5261_v30, %v12814_v1  ;;  %v10912_v13 = vld [vmem:[#allocation3 + $0x80] sm:$0xff] }
 0x658   : > { %v6161_v22 = vpop.f32.mrf.mxu0  ;;  %v13352_v1 = vld [vmem:[#allocation3 + $0xa0] sm:$0xff] }
 0x659   : > { %v5742_v24 = vadd.f32 %v5621_v44, %v5356_v42 }
 0x65b   : > { %v5120_v32 = vpop.f32.mrf.mxu2  ;;  %v13342_v5 = vadd.f32 %v13277_v58, %v5742_v24 }
 0x65c   : > { %v5445_v36 = vpop.f32.mrf.mxu3 }
 0x65d   : > { %v5622_v12 = vrot.slane %v5445_v36, 2 }
 0x65e   : > { %v13346_v49 = vpop.f32.mrf.mxu1 }
 0x65f   : > { %v5623_v62 = vsel %vm1435_vm3, %v5620_v6, %v5622_v12  ;;  %15111 = vst [vmem:[#allocation58_spill] sm:$0xff] %v13346_v49  ;;  %v10913_v12 = vld [vmem:[#allocation3 + $0x88] sm:$0xff] }
 0x660   : > { %v13348_v41 = vpop.f32.mrf.mxu0  ;;  %v5743_v43 = vadd.f32 %v5623_v62, %v5357_v59  ;;  %9801 = vmatmul.msk.bf16.gmra.mxu2 %vm4822_vm5, %v10912_v13  ;;  %9839 = vmatmul.msk.bf16.gmra.mxu3 %vm4822_vm5, %v10912_v13  ;;  %v13372_v59 = vld [vmem:[#allocation3 + $0xa8] sm:$0xff] }
 0x661   : > { %10033 = vmatmul.msk.bf16.gmra.mxu1 %vm4822_vm5, %v13082_v11 }
 0x662   : > { %v13357_v58 = vadd.f32 %v13282_v35, %v5743_v43 }
 0x663   : > { %10007 = vmatmul.msk.bf16.gmra.mxu0 %vm4822_vm5, %v13352_v1  ;;  %v5122_v33 = vpop.f32.mrf.mxu2 }
 0x664   : > { %v5448_v36 = vpop.f32.mrf.mxu3 }
 0x666   : > { %v13361_v24 = vpop.f32.mrf.mxu1 }
 0x667   : > { %15112 = vst [vmem:[#allocation56_spill] sm:$0xff] %v13361_v24 }
 0x668   : > { %v13363_v56 = vpop.f32.mrf.mxu0 }
 0x66b   : > { %v5123_v6 = vpop.f32.mrf.mxu2 }
 0x66c   : > { %v5449_v30 = vpop.f32.mrf.mxu3  ;;  %v5262_v44 = vrot.slane %v5123_v6, 1 }
 0x66d   : > { %v5624_v22 = vrot.slane %v5449_v30, 2 }
 0x66e   : > { %v5358_v42 = vadd.f32 %v5262_v44, %v12853_v25  ;;  %v13366_v32 = vpop.f32.mrf.mxu1 }
 0x66f   : > { %15113 = vst [vmem:[#allocation60_spill] sm:$0xff] %v13366_v32 }
 0x670   : > { %v13368_v11 = vpop.f32.mrf.mxu0  ;;  %v5744_v35 = vadd.f32 %v5624_v22, %v5358_v42  ;;  %9802 = vmatmul.msk.bf16.gmra.mxu2 %vm4822_vm5, %v10913_v12  ;;  %9840 = vmatmul.msk.bf16.gmra.mxu3 %vm4822_vm5, %v10913_v12 }
 0x671   : > { %10034 = vmatmul.msk.bf16.gmra.mxu1 %vm4822_vm5, %v13100_v0 }
 0x672   : > { %v13379_v25 = vadd.f32 %v13305_v4, %v5744_v35 }
 0x673   : > { %10008 = vmatmul.msk.bf16.gmra.mxu0 %vm4822_vm5, %v13372_v59  ;;  %v5126_v62 = vpop.f32.mrf.mxu2 }
 0x674   : > { %v5452_v43 = vpop.f32.mrf.mxu3  ;;  %v5263_v13 = vrot.slane %v5126_v62, 1 }
 0x675   : > { %v5625_v33 = vrot.slane %v5452_v43, 2 }
 0x676   : > { %v5264_v36 = vsel %vm1072_vm2, %v5262_v44, %v5263_v13  ;;  %v5070_v30 = vpop.f32.mrf.mxu1  ;;  %v5360_v35 = vadd.f32 %v5263_v13, %v12868_v14 }
 0x677   : > { %v5626_v6 = vsel %vm1435_vm3, %v5624_v22, %v5625_v33  ;;  %v5359_v42 = vadd.f32 %v5264_v36, %v12864_v28  ;;  %v10914_v22 = vld [vmem:[#allocation3 + $0x90] sm:$0xff] }
 0x678   : > { %v6170_v12 = vpop.f32.mrf.mxu0  ;;  %v13393_v28 = vld [vmem:[#allocation3 + $0xb0] sm:$0xff] }
 0x679   : > { %v5745_v32 = vadd.f32 %v5626_v6, %v5359_v42 }
 0x67b   : > { %v5128_v0 = vpop.f32.mrf.mxu2  ;;  %v13385_v49 = vadd.f32 %v13320_v31, %v5745_v32 }
 0x67c   : > { %v5454_v24 = vpop.f32.mrf.mxu3 }
 0x67d   : > { %v5627_v4 = vrot.slane %v5454_v24, 2 }
 0x67e   : > { %v6328_v43 = vpop.f32.mrf.mxu1 }
 0x67f   : > { %v5628_v62 = vsel %vm1435_vm3, %v5625_v33, %v5627_v4  ;;  %v13412_v43 = vld [vmem:[#allocation3 + $0xb8] sm:$0xff] }
 0x680   : > { %v13389_v46 = vpop.f32.mrf.mxu0  ;;  %v5746_v44 = vadd.f32 %v5628_v62, %v5360_v35  ;;  %9803 = vmatmul.msk.bf16.gmra.mxu2 %vm4822_vm5, %v10914_v22  ;;  %9841 = vmatmul.msk.bf16.gmra.mxu3 %vm4822_vm5, %v10914_v22  ;;  %v10915_v62 = vld [vmem:[#allocation3 + $0x98] sm:$0xff] }
 0x681   : > { %10035 = vmatmul.msk.bf16.gmra.mxu1 %vm4822_vm5, %v13127_v47 }
 0x682   : > { %v13398_v31 = vadd.f32 %v13325_v27, %v5746_v44 }
 0x683   : > { %10009 = vmatmul.msk.bf16.gmra.mxu0 %vm4822_vm5, %v13393_v28  ;;  %v5130_v14 = vpop.f32.mrf.mxu2 }
 0x684   : > { %v5457_v24 = vpop.f32.mrf.mxu3 }
 0x686   : > { %v6329_v32 = vpop.f32.mrf.mxu1 }
 0x687   : > { %v6488_v13 = vrot.slane %v6329_v32, 1 }
 0x688   : > { %v13402_v33 = vpop.f32.mrf.mxu0 }
 0x689   : > { %v13405_v36 = vadd.f32 %v6488_v13, %v13205_v63 }
 0x68b   : > { %v5131_v6 = vpop.f32.mrf.mxu2 }
 0x68c   : > { %v5458_v30 = vpop.f32.mrf.mxu3  ;;  %v5265_v42 = vrot.slane %v5131_v6, 1 }
 0x68d   : > { %v5629_v12 = vrot.slane %v5458_v30, 2 }
 0x68e   : > { %v5361_v47 = vadd.f32 %v5265_v42, %v12898_v18  ;;  %v6332_v27 = vpop.f32.mrf.mxu1 }
 0x68f   : > { %v6489_v0 = vrot.slane %v6332_v27, 1 }
 0x690   : > { %v13408_v4 = vpop.f32.mrf.mxu0  ;;  %v5747_v35 = vadd.f32 %v5629_v12, %v5361_v47  ;;  %9804 = vmatmul.msk.bf16.gmra.mxu2 %vm4822_vm5, %v10915_v62  ;;  %9842 = vmatmul.msk.bf16.gmra.mxu3 %vm4822_vm5, %v10915_v62 }
 0x691   : > { %v6490_v63 = vsel %vm1072_vm2, %v6488_v13, %v6489_v0  ;;  %v13416_v44 = vadd.f32 %v6489_v0, %v13228_v57  ;;  %10036 = vmatmul.msk.bf16.gmra.mxu1 %vm4822_vm5, %v13145_v3 }
 0x692   : > { %v13421_v18 = vadd.f32 %v6490_v63, %v13213_v61  ;;  %v13426_v22 = vadd.f32 %v13348_v41, %v5747_v35 }
 0x693   : > { %10010 = vmatmul.msk.bf16.gmra.mxu0 %vm4822_vm5, %v13412_v43  ;;  %v5134_v14 = vpop.f32.mrf.mxu2 }
 0x694   : > { %v5461_v24 = vpop.f32.mrf.mxu3  ;;  %v5266_v32 = vrot.slane %v5134_v14, 1 }
 0x695   : > { %v5630_v6 = vrot.slane %v5461_v24, 2 }
 0x696   : > { %v5267_v13 = vsel %vm1072_vm2, %v5265_v42, %v5266_v32  ;;  %v6334_v30 = vpop.f32.mrf.mxu1  ;;  %v5363_v35 = vadd.f32 %v5266_v32, %v12913_v52 }
 0x697   : > { %v5631_v57 = vsel %vm1435_vm3, %v5629_v12, %v5630_v6  ;;  %v5362_v3 = vadd.f32 %v5267_v13, %v12909_v15  ;;  %v10916_v12 = vld [vmem:[#allocation3 + $0xa0] sm:$0xff] }
 0x698   : > { %v6179_v47 = vpop.f32.mrf.mxu0  ;;  %v13440_v15 = vld [vmem:[#allocation3 + $0xc0] sm:$0xff] }
 0x699   : > { %v5748_v61 = vadd.f32 %v5631_v57, %v5362_v3 }
 0x69b   : > { %v5136_v27 = vpop.f32.mrf.mxu2  ;;  %v13432_v62 = vadd.f32 %v13363_v56, %v5748_v61 }
 0x69c   : > { %v5463_v0 = vpop.f32.mrf.mxu3 }
 0x69d   : > { %v5632_v41 = vrot.slane %v5463_v0, 2 }
 0x69e   : > { %v6336_v14 = vpop.f32.mrf.mxu1 }
 0x69f   : > { %v5633_v63 = vsel %vm1435_vm3, %v5630_v6, %v5632_v41  ;;  %v13459_v14 = vld [vmem:[#allocation3 + $0xc8] sm:$0xff] }
 0x6a0   : > { %v13436_v24 = vpop.f32.mrf.mxu0  ;;  %v5749_v42 = vadd.f32 %v5633_v63, %v5363_v35  ;;  %9805 = vmatmul.msk.bf16.gmra.mxu2 %vm4822_vm5, %v10916_v12  ;;  %9843 = vmatmul.msk.bf16.gmra.mxu3 %vm4822_vm5, %v10916_v12  ;;  %v10917_v63 = vld [vmem:[#allocation3 + $0xa8] sm:$0xff] }
 0x6a1   : > { %10037 = vmatmul.msk.bf16.gmra.mxu1 %vm4822_vm5, %v13174_v2 }
 0x6a2   : > { %v13445_v56 = vadd.f32 %v13368_v11, %v5749_v42 }
 0x6a3   : > { %10011 = vmatmul.msk.bf16.gmra.mxu0 %vm4822_vm5, %v13440_v15  ;;  %v5138_v52 = vpop.f32.mrf.mxu2 }
 0x6a4   : > { %v5466_v32 = vpop.f32.mrf.mxu3 }
 0x6a6   : > { %v6337_v6 = vpop.f32.mrf.mxu1 }
 0x6a7   : > { %v6491_v13 = vrot.slane %v6337_v6, 1 }
 0x6a8   : > { %v13449_v57 = vpop.f32.mrf.mxu0 }
 0x6a9   : > { %v13452_v30 = vadd.f32 %v6491_v13, %v13250_v19 }
 0x6ab   : > { %v5139_v3 = vpop.f32.mrf.mxu2 }
 0x6ac   : > { %v5467_v47 = vpop.f32.mrf.mxu3  ;;  %v5268_v61 = vrot.slane %v5139_v3, 1 }
 0x6ad   : > { %v5634_v27 = vrot.slane %v5467_v47, 2 }
 0x6ae   : > { %v5364_v2 = vadd.f32 %v5268_v61, %v12945_v51  ;;  %v6340_v11 = vpop.f32.mrf.mxu1 }
 0x6af   : > { %v6492_v0 = vrot.slane %v6340_v11, 1 }
 0x6b0   : > { %v13455_v41 = vpop.f32.mrf.mxu0  ;;  %v5750_v35 = vadd.f32 %v5634_v27, %v5364_v2  ;;  %9806 = vmatmul.msk.bf16.gmra.mxu2 %vm4822_vm5, %v10917_v63  ;;  %9844 = vmatmul.msk.bf16.gmra.mxu3 %vm4822_vm5, %v10917_v63 }
 0x6b1   : > { %v6493_v19 = vsel %vm1072_vm2, %v6491_v13, %v6492_v0  ;;  %v13463_v42 = vadd.f32 %v6492_v0, %v13271_v7  ;;  %10038 = vmatmul.msk.bf16.gmra.mxu1 %vm4822_vm5, %v13199_v9 }
 0x6b2   : > { %v13468_v51 = vadd.f32 %v6493_v19, %v13256_v50  ;;  %v13473_v12 = vadd.f32 %v13389_v46, %v5750_v35 }
 0x6b3   : > { %10012 = vmatmul.msk.bf16.gmra.mxu0 %vm4822_vm5, %v13459_v14  ;;  %v5142_v52 = vpop.f32.mrf.mxu2 }
 0x6b4   : > { %v5470_v32 = vpop.f32.mrf.mxu3  ;;  %v5269_v6 = vrot.slane %v5142_v52, 1 }
 0x6b5   : > { %v5635_v3 = vrot.slane %v5470_v32, 2 }
 0x6b6   : > { %v5270_v13 = vsel %vm1072_vm2, %v5268_v61, %v5269_v6  ;;  %v6342_v47 = vpop.f32.mrf.mxu1  ;;  %v5366_v35 = vadd.f32 %v5269_v6, %v12960_v20 }
 0x6b7   : > { %v5636_v7 = vsel %vm1435_vm3, %v5634_v27, %v5635_v3  ;;  %v5365_v9 = vadd.f32 %v5270_v13, %v12956_v48  ;;  %v10918_v27 = vld [vmem:[#allocation3 + $0xb0] sm:$0xff] }
 0x6b8   : > { %v6188_v2 = vpop.f32.mrf.mxu0  ;;  %v13487_v48 = vld [vmem:[#allocation3 + $0xd0] sm:$0xff] }
 0x6b9   : > { %v5751_v50 = vadd.f32 %v5636_v7, %v5365_v9 }
 0x6bb   : > { %v5144_v11 = vpop.f32.mrf.mxu2  ;;  %v13479_v63 = vadd.f32 %v13402_v33, %v5751_v50 }
 0x6bc   : > { %v5472_v0 = vpop.f32.mrf.mxu3 }
 0x6bd   : > { %v5637_v46 = vrot.slane %v5472_v0, 2 }
 0x6be   : > { %v6344_v52 = vpop.f32.mrf.mxu1 }
 0x6bf   : > { %v5638_v19 = vsel %vm1435_vm3, %v5635_v3, %v5637_v46  ;;  %v13506_v52 = vld [vmem:[#allocation3 + $0xd8] sm:$0xff] }
 0x6c0   : > { %v13483_v32 = vpop.f32.mrf.mxu0  ;;  %v5752_v61 = vadd.f32 %v5638_v19, %v5366_v35  ;;  %9807 = vmatmul.msk.bf16.gmra.mxu2 %vm4822_vm5, %v10918_v27  ;;  %9845 = vmatmul.msk.bf16.gmra.mxu3 %vm4822_vm5, %v10918_v27  ;;  %v10919_v19 = vld [vmem:[#allocation3 + $0xb8] sm:$0xff] }
 0x6c1   : > { %10039 = vmatmul.msk.bf16.gmra.mxu1 %vm4822_vm5, %v13223_v21 }
 0x6c2   : > { %v13492_v33 = vadd.f32 %v13408_v4, %v5752_v61 }
 0x6c3   : > { %10013 = vmatmul.msk.bf16.gmra.mxu0 %vm4822_vm5, %v13487_v48  ;;  %v5146_v20 = vpop.f32.mrf.mxu2 }
 0x6c4   : > { %v5475_v6 = vpop.f32.mrf.mxu3 }
 0x6c6   : > { %v6345_v3 = vpop.f32.mrf.mxu1 }
 0x6c7   : > { %v6494_v13 = vrot.slane %v6345_v3, 1 }
 0x6c8   : > { %v13496_v7 = vpop.f32.mrf.mxu0 }
 0x6c9   : > { %v13499_v47 = vadd.f32 %v6494_v13, %v13293_v45 }
 0x6cb   : > { %v5147_v9 = vpop.f32.mrf.mxu2 }
 0x6cc   : > { %v5476_v2 = vpop.f32.mrf.mxu3  ;;  %v5271_v50 = vrot.slane %v5147_v9, 1 }
 0x6cd   : > { %v5639_v11 = vrot.slane %v5476_v2, 2 }
 0x6ce   : > { %v5367_v21 = vadd.f32 %v5271_v50, %v12992_v34  ;;  %v6348_v4 = vpop.f32.mrf.mxu1 }
 0x6cf   : > { %v6495_v0 = vrot.slane %v6348_v4, 1 }
 0x6d0   : > { %v13502_v46 = vpop.f32.mrf.mxu0  ;;  %v5753_v35 = vadd.f32 %v5639_v11, %v5367_v21  ;;  %9808 = vmatmul.msk.bf16.gmra.mxu2 %vm4822_vm5, %v10919_v19  ;;  %9846 = vmatmul.msk.bf16.gmra.mxu3 %vm4822_vm5, %v10919_v19  ;;  %v15116_v21 = vld [vmem:[#allocation57_spill] sm:$0xff] }
 0x6d1   : > { %v6496_v45 = vsel %vm1072_vm2, %v6494_v13, %v6495_v0  ;;  %v13510_v61 = vadd.f32 %v6495_v0, %v13314_v10  ;;  %10040 = vmatmul.msk.bf16.gmra.mxu1 %vm4822_vm5, %v13243_v53 }
 0x6d2   : > { %v13515_v34 = vadd.f32 %v6496_v45, %v13299_v29  ;;  %v13520_v27 = vadd.f32 %v13436_v24, %v5753_v35  ;;  %v15117_v35 = vld [vmem:[#allocation42_spill] sm:$0xff] }
 0x6d3   : > { %15114 = vst [vmem:[#allocation61_spill] sm:$0xff] %v13510_v61  ;;  %10014 = vmatmul.msk.bf16.gmra.mxu0 %vm4822_vm5, %v13506_v52  ;;  %v5150_v20 = vpop.f32.mrf.mxu2 }
 0x6d4   : > { %15115 = vst [vmem:[#allocation62_spill] sm:$0xff] %v13515_v34  ;;  %v5479_v6 = vpop.f32.mrf.mxu3  ;;  %v5272_v3 = vrot.slane %v5150_v20, 1 }
 0x6d5   : > { %v5640_v9 = vrot.slane %v5479_v6, 2 }
 0x6d6   : > { %v5273_v13 = vsel %vm1072_vm2, %v5271_v50, %v5272_v3  ;;  %v6350_v2 = vpop.f32.mrf.mxu1  ;;  %v5369_v61 = vadd.f32 %v5272_v3, %v15117_v35 }
 0x6d7   : > { %v5641_v10 = vsel %vm1435_vm3, %v5639_v11, %v5640_v9  ;;  %v5368_v53 = vadd.f32 %v5273_v13, %v15116_v21  ;;  %v10920_v11 = vld [vmem:[#allocation3 + $0xc0] sm:$0xff] }
 0x6d8   : > { %v6197_v4 = vpop.f32.mrf.mxu0  ;;  %v13534_v13 = vld [vmem:[#allocation3 + $0xe0] sm:$0xff] }
 0x6d9   : > { %v5754_v29 = vadd.f32 %v5641_v10, %v5368_v53 }
 0x6db   : > { %v5152_v0 = vpop.f32.mrf.mxu2  ;;  %v13526_v45 = vadd.f32 %v13449_v57, %v5754_v29 }
 0x6dc   : > { %v5481_v19 = vpop.f32.mrf.mxu3  ;;  %v15119_v0 = vld [vmem:[#allocation41_spill] sm:$0xff] }
 0x6dd   : > { %v5642_v24 = vrot.slane %v5481_v19, 2 }
 0x6de   : > { %v6352_v6 = vpop.f32.mrf.mxu1 }
 0x6df   : > { %v5643_v20 = vsel %vm1435_vm3, %v5640_v9, %v5642_v24  ;;  %v10921_v6 = vld [vmem:[#allocation3 + $0xc8] sm:$0xff] }
 0x6e0   : > { %v13530_v34 = vpop.f32.mrf.mxu0  ;;  %v5755_v50 = vadd.f32 %v5643_v20, %v5369_v61  ;;  %9809 = vmatmul.msk.bf16.gmra.mxu2 %vm4822_vm5, %v10920_v11  ;;  %9847 = vmatmul.msk.bf16.gmra.mxu3 %vm4822_vm5, %v10920_v11 }
 0x6e1   : > { %10041 = vmatmul.msk.bf16.gmra.mxu1 %vm4822_vm5, %v13266_v8 }
 0x6e2   : > { %v13539_v57 = vadd.f32 %v13455_v41, %v5755_v50  ;;  %v13553_v50 = vld [vmem:[#allocation3 + $0xe8] sm:$0xff] }
 0x6e3   : > { %10015 = vmatmul.msk.bf16.gmra.mxu0 %vm4822_vm5, %v13534_v13  ;;  %v5154_v3 = vpop.f32.mrf.mxu2 }
 0x6e4   : > { %v5484_v9 = vpop.f32.mrf.mxu3 }
 0x6e6   : > { %v6353_v10 = vpop.f32.mrf.mxu1 }
 0x6e7   : > { %v6497_v61 = vrot.slane %v6353_v10, 1 }
 0x6e8   : > { %v13543_v2 = vpop.f32.mrf.mxu0 }
 0x6e9   : > { %v13546_v21 = vadd.f32 %v6497_v61, %v13336_v16 }
 0x6eb   : > { %15118 = vst [vmem:[#allocation57_spill] sm:$0xff] %v13546_v21  ;;  %v5155_v53 = vpop.f32.mrf.mxu2 }
 0x6ec   : > { %v5485_v4 = vpop.f32.mrf.mxu3  ;;  %v5274_v29 = vrot.slane %v5155_v53, 1 }
 0x6ed   : > { %v5644_v19 = vrot.slane %v5485_v4, 2 }
 0x6ee   : > { %v5370_v8 = vadd.f32 %v5274_v29, %v15119_v0  ;;  %v6356_v41 = vpop.f32.mrf.mxu1 }
 0x6ef   : > { %v6498_v24 = vrot.slane %v6356_v41, 1  ;;  %v15122_v41 = vld [vmem:[#allocation46_spill] sm:$0xff] }
 0x6f0   : > { %v13549_v35 = vpop.f32.mrf.mxu0  ;;  %v5756_v20 = vadd.f32 %v5644_v19, %v5370_v8  ;;  %9810 = vmatmul.msk.bf16.gmra.mxu2 %vm4822_vm5, %v10921_v6  ;;  %9848 = vmatmul.msk.bf16.gmra.mxu3 %vm4822_vm5, %v10921_v6 }
 0x6f1   : > { %v6499_v16 = vsel %vm1072_vm2, %v6497_v61, %v6498_v24  ;;  %v13557_v11 = vadd.f32 %v6498_v24, %v13357_v58  ;;  %10042 = vmatmul.msk.bf16.gmra.mxu1 %vm4822_vm5, %v13286_v23 }
 0x6f2   : > { %v13562_v3 = vadd.f32 %v6499_v16, %v13342_v5  ;;  %v13567_v9 = vadd.f32 %v13483_v32, %v5756_v20  ;;  %v15123_v20 = vld [vmem:[#allocation44_spill] sm:$0xff] }
 0x6f3   : > { %15120 = vst [vmem:[#allocation42_spill] sm:$0xff] %v13557_v11  ;;  %10016 = vmatmul.msk.bf16.gmra.mxu0 %vm4822_vm5, %v13553_v50  ;;  %v5158_v10 = vpop.f32.mrf.mxu2 }
 0x6f4   : > { %15121 = vst [vmem:[#allocation41_spill] sm:$0xff] %v13562_v3  ;;  %v5488_v53 = vpop.f32.mrf.mxu3  ;;  %v5275_v4 = vrot.slane %v5158_v10, 1 }
 0x6f5   : > { %v5645_v0 = vrot.slane %v5488_v53, 2 }
 0x6f6   : > { %v5276_v61 = vsel %vm1072_vm2, %v5274_v29, %v5275_v4  ;;  %v6358_v8 = vpop.f32.mrf.mxu1  ;;  %v5372_v3 = vadd.f32 %v5275_v4, %v15123_v20 }
 0x6f7   : > { %v5646_v58 = vsel %vm1435_vm3, %v5644_v19, %v5645_v0  ;;  %v5371_v23 = vadd.f32 %v5276_v61, %v15122_v41  ;;  %v10922_v19 = vld [vmem:[#allocation3 + $0xd0] sm:$0xff] }
 0x6f8   : > { %v6206_v24 = vpop.f32.mrf.mxu0  ;;  %v13581_v61 = vld [vmem:[#allocation3 + $0xf0] sm:$0xff] }
 0x6f9   : > { %v5757_v5 = vadd.f32 %v5646_v58, %v5371_v23 }
 0x6fb   : > { %v5160_v6 = vpop.f32.mrf.mxu2  ;;  %v13573_v11 = vadd.f32 %v13496_v7, %v5757_v5 }
 0x6fc   : > { %v5490_v16 = vpop.f32.mrf.mxu3  ;;  %v15125_v6 = vld [vmem:[#allocation45_spill] sm:$0xff] }
 0x6fd   : > { %v5647_v32 = vrot.slane %v5490_v16, 2 }
 0x6fe   : > { %v6360_v53 = vpop.f32.mrf.mxu1 }
 0x6ff   : > { %v5648_v10 = vsel %vm1435_vm3, %v5645_v0, %v5647_v32  ;;  %v10923_v53 = vld [vmem:[#allocation3 + $0xd8] sm:$0xff] }
 0x700   : > { %v13577_v21 = vpop.f32.mrf.mxu0  ;;  %v5758_v29 = vadd.f32 %v5648_v10, %v5372_v3  ;;  %9811 = vmatmul.msk.bf16.gmra.mxu2 %vm4822_vm5, %v10922_v19  ;;  %9849 = vmatmul.msk.bf16.gmra.mxu3 %vm4822_vm5, %v10922_v19 }
 0x701   : > { %10043 = vmatmul.msk.bf16.gmra.mxu1 %vm4822_vm5, %v13309_v26 }
 0x702   : > { %v13586_v7 = vadd.f32 %v13502_v46, %v5758_v29  ;;  %v13600_v29 = vld [vmem:[#allocation3 + $0xf8] sm:$0xff] }
 0x703   : > { %10017 = vmatmul.msk.bf16.gmra.mxu0 %vm4822_vm5, %v13581_v61  ;;  %v5162_v4 = vpop.f32.mrf.mxu2 }
 0x704   : > { %v5493_v0 = vpop.f32.mrf.mxu3 }
 0x706   : > { %v6361_v58 = vpop.f32.mrf.mxu1 }
 0x707   : > { %v6500_v3 = vrot.slane %v6361_v58, 1 }
 0x708   : > { %v13590_v8 = vpop.f32.mrf.mxu0 }
 0x709   : > { %v13593_v41 = vadd.f32 %v6500_v3, %v13379_v25 }
 0x70b   : > { %15124 = vst [vmem:[#allocation46_spill] sm:$0xff] %v13593_v41  ;;  %v5163_v23 = vpop.f32.mrf.mxu2 }
 0x70c   : > { %v5494_v24 = vpop.f32.mrf.mxu3  ;;  %v5277_v5 = vrot.slane %v5163_v23, 1 }
 0x70d   : > { %v5649_v16 = vrot.slane %v5494_v24, 2 }
 0x70e   : > { %v5373_v26 = vadd.f32 %v5277_v5, %v15125_v6  ;;  %v6364_v46 = vpop.f32.mrf.mxu1 }
 0x70f   : > { %v6501_v32 = vrot.slane %v6364_v46, 1  ;;  %v15128_v46 = vld [vmem:[#allocation43_spill] sm:$0xff] }
 0x710   : > { %v13596_v20 = vpop.f32.mrf.mxu0  ;;  %v5759_v10 = vadd.f32 %v5649_v16, %v5373_v26  ;;  %9812 = vmatmul.msk.bf16.gmra.mxu2 %vm4822_vm5, %v10923_v53  ;;  %9850 = vmatmul.msk.bf16.gmra.mxu3 %vm4822_vm5, %v10923_v53 }
 0x711   : > { %v6502_v25 = vsel %vm1072_vm2, %v6500_v3, %v6501_v32  ;;  %v13604_v19 = vadd.f32 %v6501_v32, %v13398_v31  ;;  %10044 = vmatmul.msk.bf16.gmra.mxu1 %vm4822_vm5, %v13329_v60 }
 0x712   : > { %v13609_v4 = vadd.f32 %v6502_v25, %v13385_v49  ;;  %v13614_v0 = vadd.f32 %v13530_v34, %v5759_v10  ;;  %v15129_v10 = vld [vmem:[#allocation49_spill] sm:$0xff] }
 0x713   : > { %15126 = vst [vmem:[#allocation44_spill] sm:$0xff] %v13604_v19  ;;  %10018 = vmatmul.msk.bf16.gmra.mxu0 %vm4822_vm5, %v13600_v29  ;;  %v5166_v58 = vpop.f32.mrf.mxu2 }
 0x714   : > { %15127 = vst [vmem:[#allocation45_spill] sm:$0xff] %v13609_v4  ;;  %v5497_v23 = vpop.f32.mrf.mxu3  ;;  %v5278_v24 = vrot.slane %v5166_v58, 1 }
 0x715   : > { %v5650_v6 = vrot.slane %v5497_v23, 2 }
 0x716   : > { %v5279_v3 = vsel %vm1072_vm2, %v5277_v5, %v5278_v24  ;;  %v6366_v26 = vpop.f32.mrf.mxu1  ;;  %v5375_v4 = vadd.f32 %v5278_v24, %v15129_v10 }
 0x717   : > { %v5651_v31 = vsel %vm1435_vm3, %v5649_v16, %v5650_v6  ;;  %v5374_v60 = vadd.f32 %v5279_v3, %v15128_v46  ;;  %v10924_v16 = vld [vmem:[#allocation3 + $0xe0] sm:$0xff] }
 0x718   : > { %v6215_v32 = vpop.f32.mrf.mxu0  ;;  %v13628_v3 = vld [vmem:[#allocation3 + $0x100] sm:$0xff] }
 0x719   : > { %v5760_v49 = vadd.f32 %v5651_v31, %v5374_v60 }
 0x71b   : > { %v5168_v53 = vpop.f32.mrf.mxu2  ;;  %v13620_v19 = vadd.f32 %v13543_v2, %v5760_v49 }
 0x71c   : > { %v5499_v25 = vpop.f32.mrf.mxu3  ;;  %v15131_v53 = vld [vmem:[#allocation47_spill] sm:$0xff] }
 0x71d   : > { %v5652_v34 = vrot.slane %v5499_v25, 2 }
 0x71e   : > { %v6368_v23 = vpop.f32.mrf.mxu1 }
 0x71f   : > { %v5653_v58 = vsel %vm1435_vm3, %v5650_v6, %v5652_v34  ;;  %v10925_v23 = vld [vmem:[#allocation3 + $0xe8] sm:$0xff] }
 0x720   : > { %v13624_v41 = vpop.f32.mrf.mxu0  ;;  %v5761_v5 = vadd.f32 %v5653_v58, %v5375_v4  ;;  %9813 = vmatmul.msk.bf16.gmra.mxu2 %vm4822_vm5, %v10924_v16  ;;  %9851 = vmatmul.msk.bf16.gmra.mxu3 %vm4822_vm5, %v10924_v16 }
 0x721   : > { %10045 = vmatmul.msk.bf16.gmra.mxu1 %vm4822_vm5, %v13352_v1 }
 0x722   : > { %v13633_v2 = vadd.f32 %v13549_v35, %v5761_v5  ;;  %v13647_v5 = vld [vmem:[#allocation3 + $0x108] sm:$0xff] }
 0x723   : > { %10019 = vmatmul.msk.bf16.gmra.mxu0 %vm4822_vm5, %v13628_v3  ;;  %v5170_v24 = vpop.f32.mrf.mxu2 }
 0x724   : > { %v5502_v6 = vpop.f32.mrf.mxu3 }
 0x726   : > { %v6369_v31 = vpop.f32.mrf.mxu1 }
 0x727   : > { %v6503_v4 = vrot.slane %v6369_v31, 1 }
 0x728   : > { %v13637_v26 = vpop.f32.mrf.mxu0 }
 0x729   : > { %v13640_v46 = vadd.f32 %v6503_v4, %v13426_v22 }
 0x72b   : > { %15130 = vst [vmem:[#allocation43_spill] sm:$0xff] %v13640_v46  ;;  %v5171_v60 = vpop.f32.mrf.mxu2 }
 0x72c   : > { %v5503_v32 = vpop.f32.mrf.mxu3  ;;  %v5280_v49 = vrot.slane %v5171_v60, 1 }
 0x72d   : > { %v5654_v25 = vrot.slane %v5503_v32, 2 }
 0x72e   : > { %v5376_v1 = vadd.f32 %v5280_v49, %v15131_v53  ;;  %v6372_v35 = vpop.f32.mrf.mxu1 }
 0x72f   : > { %v6504_v34 = vrot.slane %v6372_v35, 1  ;;  %v15134_v35 = vld [vmem:[#allocation48_spill] sm:$0xff] }
 0x730   : > { %v13643_v10 = vpop.f32.mrf.mxu0  ;;  %v5762_v58 = vadd.f32 %v5654_v25, %v5376_v1  ;;  %9814 = vmatmul.msk.bf16.gmra.mxu2 %vm4822_vm5, %v10925_v23  ;;  %9852 = vmatmul.msk.bf16.gmra.mxu3 %vm4822_vm5, %v10925_v23 }
 0x731   : > { %v6505_v22 = vsel %vm1072_vm2, %v6503_v4, %v6504_v34  ;;  %v13651_v16 = vadd.f32 %v6504_v34, %v13445_v56  ;;  %10046 = vmatmul.msk.bf16.gmra.mxu1 %vm4822_vm5, %v13372_v59 }
 0x732   : > { %v13656_v24 = vadd.f32 %v6505_v22, %v13432_v62  ;;  %v13661_v6 = vadd.f32 %v13577_v21, %v5762_v58  ;;  %v15135_v58 = vld [vmem:[#allocation50_spill] sm:$0xff] }
 0x733   : > { %15132 = vst [vmem:[#allocation49_spill] sm:$0xff] %v13651_v16  ;;  %10020 = vmatmul.msk.bf16.gmra.mxu0 %vm4822_vm5, %v13647_v5  ;;  %v5174_v31 = vpop.f32.mrf.mxu2 }
 0x734   : > { %15133 = vst [vmem:[#allocation47_spill] sm:$0xff] %v13656_v24  ;;  %v5506_v60 = vpop.f32.mrf.mxu3  ;;  %v5281_v32 = vrot.slane %v5174_v31, 1 }
 0x735   : > { %v5655_v53 = vrot.slane %v5506_v60, 2 }
 0x736   : > { %v5282_v4 = vsel %vm1072_vm2, %v5280_v49, %v5281_v32  ;;  %v6374_v1 = vpop.f32.mrf.mxu1  ;;  %v5378_v24 = vadd.f32 %v5281_v32, %v15135_v58 }
 0x737   : > { %v5656_v56 = vsel %vm1435_vm3, %v5654_v25, %v5655_v53  ;;  %v5377_v59 = vadd.f32 %v5282_v4, %v15134_v35  ;;  %v10926_v25 = vld [vmem:[#allocation3 + $0xf0] sm:$0xff]  ;;  %v13675_v4 = vld [vmem:[#allocation3 + $0x20] sm:$0xff] }
 0x738   : > { %v6224_v34 = vpop.f32.mrf.mxu0 }
 0x739   : > { %v5763_v62 = vadd.f32 %v5656_v56, %v5377_v59 }
 0x73b   : > { %v5176_v23 = vpop.f32.mrf.mxu2  ;;  %v13667_v16 = vadd.f32 %v13590_v8, %v5763_v62 }
 0x73c   : > { %v5508_v22 = vpop.f32.mrf.mxu3 }
 0x73d   : > { %v5657_v21 = vrot.slane %v5508_v22, 2 }
 0x73e   : > { %v6376_v60 = vpop.f32.mrf.mxu1 }
 0x73f   : > { %v5658_v31 = vsel %vm1435_vm3, %v5655_v53, %v5657_v21  ;;  %v13694_v60 = vld [vmem:[#allocation3 + $0x28] sm:$0xff] }
 0x740   : > { %v13671_v46 = vpop.f32.mrf.mxu0  ;;  %v5764_v49 = vadd.f32 %v5658_v31, %v5378_v24  ;;  %9815 = vmatmul.msk.bf16.gmra.mxu2 %vm4822_vm5, %v10926_v25  ;;  %9853 = vmatmul.msk.bf16.gmra.mxu3 %vm4822_vm5, %v10926_v25  ;;  %v10927_v31 = vld [vmem:[#allocation3 + $0xf8] sm:$0xff] }
 0x741   : > { %10047 = vmatmul.msk.bf16.gmra.mxu1 %vm4822_vm5, %v13393_v28 }
 0x742   : > { %v13680_v8 = vadd.f32 %v13596_v20, %v5764_v49 }
 0x743   : > { %10269 = vmatmul.msk.bf16.vlgmr.msra.gmra.mxu0 %vm4822_vm5, %v13675_v4  ;;  %v5178_v32 = vpop.f32.mrf.mxu2 }
 0x744   : > { %v5511_v53 = vpop.f32.mrf.mxu3 }
 0x746   : > { %v6377_v56 = vpop.f32.mrf.mxu1 }
 0x747   : > { %v6506_v24 = vrot.slane %v6377_v56, 1 }
 0x748   : > { %v13684_v1 = vpop.f32.mrf.mxu0 }
 0x749   : > { %v13687_v35 = vadd.f32 %v6506_v24, %v13473_v12 }
 0x74b   : > { %v5179_v59 = vpop.f32.mrf.mxu2 }
 0x74c   : > { %v5512_v34 = vpop.f32.mrf.mxu3  ;;  %v5283_v62 = vrot.slane %v5179_v59, 1 }
 0x74d   : > { %v5659_v23 = vrot.slane %v5512_v34, 2 }
 0x74e   : > { %v5379_v28 = vadd.f32 %v5283_v62, %v13168_v17  ;;  %v6380_v20 = vpop.f32.mrf.mxu1 }
 0x74f   : > { %v6507_v22 = vrot.slane %v6380_v20, 1 }
 0x750   : > { %v13690_v21 = vpop.f32.mrf.mxu0  ;;  %v5765_v58 = vadd.f32 %v5659_v23, %v5379_v28  ;;  %9816 = vmatmul.msk.bf16.gmra.mxu2 %vm4822_vm5, %v10927_v31  ;;  %9854 = vmatmul.msk.bf16.gmra.mxu3 %vm4822_vm5, %v10927_v31 }
 0x751   : > { %v6508_v12 = vsel %vm1072_vm2, %v6506_v24, %v6507_v22  ;;  %v13698_v49 = vadd.f32 %v6507_v22, %v13492_v33  ;;  %10048 = vmatmul.msk.bf16.gmra.mxu1 %vm4822_vm5, %v13412_v43 }
 0x752   : > { %v13703_v17 = vadd.f32 %v6508_v12, %v13479_v63  ;;  %v13708_v25 = vadd.f32 %v13624_v41, %v5765_v58 }
 0x753   : > { %10270 = vmatmul.msk.bf16.gmra.mxu0 %vm4822_vm5, %v13694_v60  ;;  %v5182_v32 = vpop.f32.mrf.mxu2 }
 0x754   : > { %v5515_v53 = vpop.f32.mrf.mxu3  ;;  %v5284_v56 = vrot.slane %v5182_v32, 1 }
 0x755   : > { %v5660_v59 = vrot.slane %v5515_v53, 2 }
 0x756   : > { %v5285_v24 = vsel %vm1072_vm2, %v5283_v62, %v5284_v56  ;;  %v6382_v34 = vpop.f32.mrf.mxu1  ;;  %v5381_v58 = vadd.f32 %v5284_v56, %v13193_v55 }
 0x757   : > { %v5661_v33 = vsel %vm1435_vm3, %v5659_v23, %v5660_v59  ;;  %v5380_v43 = vadd.f32 %v5285_v24, %v13185_v39  ;;  %v10928_v23 = vld [vmem:[#allocation3 + $0x10] sm:$0xff] }
 0x758   : > { %v6233_v28 = vpop.f32.mrf.mxu0  ;;  %v13723_v39 = vld [vmem:[#allocation3 + $0x30] sm:$0xff] }
 0x759   : > { %v5766_v63 = vadd.f32 %v5661_v33, %v5380_v43 }
 0x75b   : > { %v5184_v20 = vpop.f32.mrf.mxu2  ;;  %v13714_v31 = vadd.f32 %v13637_v26, %v5766_v63 }
 0x75c   : > { %v5517_v22 = vpop.f32.mrf.mxu3 }
 0x75d   : > { %v5662_v41 = vrot.slane %v5517_v22, 2 }
 0x75e   : > { %v6384_v32 = vpop.f32.mrf.mxu1 }
 0x75f   : > { %v5663_v12 = vsel %vm1435_vm3, %v5660_v59, %v5662_v41  ;;  %v13743_v32 = vld [vmem:[#allocation3 + $0x38] sm:$0xff] }
 0x760   : > { %v13718_v53 = vpop.f32.mrf.mxu0  ;;  %v5767_v62 = vadd.f32 %v5663_v12, %v5381_v58  ;;  %10065 = vmatmul.msk.bf16.vlgmr.msra.gmra.mxu2 %vm4822_vm5, %v10928_v23  ;;  %10231 = vmatmul.msk.bf16.vlgmr.msra.gmra.mxu3 %vm4822_vm5, %v13675_v4  ;;  %v10929_v12 = vld [vmem:[#allocation3 + $0x18] sm:$0xff] }
 0x761   : > { %10049 = vmatmul.msk.bf16.gmra.mxu1 %vm4822_vm5, %v13440_v15 }
 0x762   : > { %v13728_v26 = vadd.f32 %v13643_v10, %v5767_v62 }
 0x763   : > { %10271 = vmatmul.msk.bf16.gmra.mxu0 %vm4822_vm5, %v13723_v39  ;;  %v5186_v55 = vpop.f32.mrf.mxu2 }
 0x764   : > { %v5520_v56 = vpop.f32.mrf.mxu3 }
 0x766   : > { %v6385_v59 = vpop.f32.mrf.mxu1 }
 0x767   : > { %v6509_v24 = vrot.slane %v6385_v59, 1 }
 0x768   : > { %v13732_v33 = vpop.f32.mrf.mxu0 }
 0x769   : > { %v13735_v34 = vadd.f32 %v6509_v24, %v13520_v27 }
 0x76b   : > { %v5187_v43 = vpop.f32.mrf.mxu2 }
 0x76c   : > { %v5521_v28 = vpop.f32.mrf.mxu3  ;;  %v5286_v63 = vrot.slane %v5187_v43, 1 }
 0x76d   : > { %v5664_v20 = vrot.slane %v5521_v28, 2 }
 0x76e   : > { %v5382_v15 = vadd.f32 %v5286_v63, %v13217_v40  ;;  %v6388_v10 = vpop.f32.mrf.mxu1 }
 0x76f   : > { %v6510_v22 = vrot.slane %v6388_v10, 1 }
 0x770   : > { %v13738_v41 = vpop.f32.mrf.mxu0  ;;  %v5768_v58 = vadd.f32 %v5664_v20, %v5382_v15  ;;  %10066 = vmatmul.msk.bf16.gmra.mxu2 %vm4822_vm5, %v10929_v12  ;;  %10232 = vmatmul.msk.bf16.gmra.mxu3 %vm4822_vm5, %v13694_v60 }
 0x771   : > { %v6511_v27 = vsel %vm1072_vm2, %v6509_v24, %v6510_v22  ;;  %v13747_v62 = vadd.f32 %v6510_v22, %v13539_v57  ;;  %10050 = vmatmul.msk.bf16.gmra.mxu1 %vm4822_vm5, %v13459_v14 }
 0x772   : > { %v13752_v40 = vadd.f32 %v6511_v27, %v13526_v45  ;;  %v13757_v23 = vadd.f32 %v13671_v46, %v5768_v58 }
 0x773   : > { %10272 = vmatmul.msk.bf16.gmra.mxu0 %vm4822_vm5, %v13743_v32  ;;  %v5190_v55 = vpop.f32.mrf.mxu2 }
 0x774   : > { %v5524_v56 = vpop.f32.mrf.mxu3  ;;  %v5287_v59 = vrot.slane %v5190_v55, 1 }
 0x775   : > { %v5665_v43 = vrot.slane %v5524_v56, 2 }
 0x776   : > { %v5288_v24 = vsel %vm1072_vm2, %v5286_v63, %v5287_v59  ;;  %v6390_v28 = vpop.f32.mrf.mxu1  ;;  %v5384_v58 = vadd.f32 %v5287_v59, %v13237_v54 }
 0x777   : > { %v5666_v57 = vsel %vm1435_vm3, %v5664_v20, %v5665_v43  ;;  %v5383_v14 = vadd.f32 %v5288_v24, %v13232_v37  ;;  %v10930_v20 = vld [vmem:[#allocation3 + $0x20] sm:$0xff] }
 0x778   : > { %v6242_v15 = vpop.f32.mrf.mxu0  ;;  %v13772_v37 = vld [vmem:[#allocation3 + $0x40] sm:$0xff] }
 0x779   : > { %v5769_v45 = vadd.f32 %v5666_v57, %v5383_v14 }
 0x77b   : > { %v5192_v10 = vpop.f32.mrf.mxu2  ;;  %v13763_v12 = vadd.f32 %v13684_v1, %v5769_v45 }
 0x77c   : > { %v5526_v22 = vpop.f32.mrf.mxu3 }
 0x77d   : > { %v5667_v46 = vrot.slane %v5526_v22, 2 }
 0x77e   : > { %v6392_v55 = vpop.f32.mrf.mxu1 }
 0x77f   : > { %v5668_v27 = vsel %vm1435_vm3, %v5665_v43, %v5667_v46  ;;  %v13792_v55 = vld [vmem:[#allocation3 + $0x48] sm:$0xff] }
 0x780   : > { %v13767_v56 = vpop.f32.mrf.mxu0  ;;  %v5770_v63 = vadd.f32 %v5668_v27, %v5384_v58  ;;  %10067 = vmatmul.msk.bf16.gmra.mxu2 %vm4822_vm5, %v10930_v20  ;;  %10233 = vmatmul.msk.bf16.gmra.mxu3 %vm4822_vm5, %v13723_v39  ;;  %v10931_v27 = vld [vmem:[#allocation3 + $0x28] sm:$0xff] }
 0x781   : > { %10051 = vmatmul.msk.bf16.gmra.mxu1 %vm4822_vm5, %v13487_v48 }
 0x782   : > { %v13777_v1 = vadd.f32 %v13690_v21, %v5770_v63 }
 0x783   : > { %10273 = vmatmul.msk.bf16.gmra.mxu0 %vm4822_vm5, %v13772_v37  ;;  %v5194_v54 = vpop.f32.mrf.mxu2 }
 0x784   : > { %v5529_v59 = vpop.f32.mrf.mxu3 }
 0x786   : > { %v6393_v43 = vpop.f32.mrf.mxu1 }
 0x787   : > { %v6512_v24 = vrot.slane %v6393_v43, 1 }
 0x788   : > { %v13781_v57 = vpop.f32.mrf.mxu0 }
 0x789   : > { %v13784_v28 = vadd.f32 %v6512_v24, %v13567_v9 }
 0x78b   : > { %15136 = vst [vmem:[#allocation48_spill] sm:$0xff] %v13784_v28  ;;  %v5195_v14 = vpop.f32.mrf.mxu2  ;;  %v10934_v28 = vld [vmem:[#allocation3 + $0x40] sm:$0xff] }
 0x78c   : > { %v5530_v15 = vpop.f32.mrf.mxu3  ;;  %v5289_v45 = vrot.slane %v5195_v14, 1 }
 0x78d   : > { %v5669_v10 = vrot.slane %v5530_v15, 2 }
 0x78e   : > { %v5385_v48 = vadd.f32 %v5289_v45, %v13260_v38  ;;  %v6396_v21 = vpop.f32.mrf.mxu1 }
 0x78f   : > { %v6513_v22 = vrot.slane %v6396_v21, 1 }
 0x790   : > { %v13787_v46 = vpop.f32.mrf.mxu0  ;;  %v5771_v58 = vadd.f32 %v5669_v10, %v5385_v48  ;;  %10068 = vmatmul.msk.bf16.gmra.mxu2 %vm4822_vm5, %v10931_v27  ;;  %10234 = vmatmul.msk.bf16.gmra.mxu3 %vm4822_vm5, %v13743_v32  ;;  %v15139_v48 = vld [vmem:[#allocation52_spill] sm:$0xff] }
 0x791   : > { %v6514_v9 = vsel %vm1072_vm2, %v6512_v24, %v6513_v22  ;;  %v13796_v63 = vadd.f32 %v6513_v22, %v13586_v7  ;;  %10052 = vmatmul.msk.bf16.gmra.mxu1 %vm4822_vm5, %v13506_v52 }
 0x792   : > { %v13801_v38 = vadd.f32 %v6514_v9, %v13573_v11  ;;  %v13806_v20 = vadd.f32 %v13718_v53, %v5771_v58  ;;  %v15140_v58 = vld [vmem:[#allocation53_spill] sm:$0xff] }
 0x793   : > { %15137 = vst [vmem:[#allocation50_spill] sm:$0xff] %v13796_v63  ;;  %10274 = vmatmul.msk.bf16.gmra.mxu0 %vm4822_vm5, %v13792_v55  ;;  %v5198_v54 = vpop.f32.mrf.mxu2 }
 0x794   : > { %15138 = vst [vmem:[#allocation63_spill] sm:$0xff] %v13801_v38  ;;  %v5533_v59 = vpop.f32.mrf.mxu3  ;;  %v5290_v43 = vrot.slane %v5198_v54, 1 }
 0x795   : > { %v5670_v14 = vrot.slane %v5533_v59, 2 }
 0x796   : > { %v5291_v24 = vsel %vm1072_vm2, %v5289_v45, %v5290_v43  ;;  %v6398_v15 = vpop.f32.mrf.mxu1  ;;  %v5387_v63 = vadd.f32 %v5290_v43, %v15140_v58 }
 0x797   : > { %v5671_v7 = vsel %vm1435_vm3, %v5669_v10, %v5670_v14  ;;  %v5386_v52 = vadd.f32 %v5291_v24, %v15139_v48  ;;  %v10932_v10 = vld [vmem:[#allocation3 + $0x30] sm:$0xff] }
 0x798   : > { %v6251_v21 = vpop.f32.mrf.mxu0  ;;  %v13821_v24 = vld [vmem:[#allocation3 + $0x50] sm:$0xff] }
 0x799   : > { %v5772_v11 = vadd.f32 %v5671_v7, %v5386_v52 }
 0x79b   : > { %v5200_v22 = vpop.f32.mrf.mxu2  ;;  %v13812_v9 = vadd.f32 %v13732_v33, %v5772_v11 }
 0x79c   : > { %v5535_v27 = vpop.f32.mrf.mxu3  ;;  %v15142_v22 = vld [vmem:[#allocation51_spill] sm:$0xff] }
 0x79d   : > { %v5672_v53 = vrot.slane %v5535_v27, 2 }
 0x79e   : > { %v6400_v59 = vpop.f32.mrf.mxu1 }
 0x79f   : > { %v5673_v54 = vsel %vm1435_vm3, %v5670_v14, %v5672_v53  ;;  %v10933_v59 = vld [vmem:[#allocation3 + $0x38] sm:$0xff] }
 0x7a0   : > { %v13816_v38 = vpop.f32.mrf.mxu0  ;;  %v5773_v45 = vadd.f32 %v5673_v54, %v5387_v63  ;;  %10069 = vmatmul.msk.bf16.gmra.mxu2 %vm4822_vm5, %v10932_v10  ;;  %10235 = vmatmul.msk.bf16.gmra.mxu3 %vm4822_vm5, %v13772_v37 }
 0x7a1   : > { %10053 = vmatmul.msk.bf16.gmra.mxu1 %vm4822_vm5, %v13534_v13 }
 0x7a2   : > { %v13826_v33 = vadd.f32 %v13738_v41, %v5773_v45  ;;  %v13841_v45 = vld [vmem:[#allocation3 + $0x58] sm:$0xff] }
 0x7a3   : > { %10275 = vmatmul.msk.bf16.gmra.mxu0 %vm4822_vm5, %v13821_v24  ;;  %v5202_v43 = vpop.f32.mrf.mxu2 }
 0x7a4   : > { %v5538_v14 = vpop.f32.mrf.mxu3 }
 0x7a6   : > { %v6401_v63 = vpop.f32.mrf.mxu1 }
 0x7a7   : > { %v6515_v7 = vrot.slane %v6401_v63, 1 }
 0x7a8   : > { %v13830_v15 = vpop.f32.mrf.mxu0 }
 0x7a9   : > { %v13833_v48 = vadd.f32 %v6515_v7, %v13614_v0 }
 0x7ab   : > { %15141 = vst [vmem:[#allocation52_spill] sm:$0xff] %v13833_v48  ;;  %v5203_v52 = vpop.f32.mrf.mxu2 }
 0x7ac   : > { %v5539_v21 = vpop.f32.mrf.mxu3  ;;  %v5292_v11 = vrot.slane %v5203_v52, 1 }
 0x7ad   : > { %v5674_v27 = vrot.slane %v5539_v21, 2 }
 0x7ae   : > { %v5388_v13 = vadd.f32 %v5292_v11, %v15142_v22  ;;  %v6404_v41 = vpop.f32.mrf.mxu1 }
 0x7af   : > { %v6516_v53 = vrot.slane %v6404_v41, 1  ;;  %v15145_v41 = vld [vmem:[#allocation54_spill] sm:$0xff] }
 0x7b0   : > { %v13836_v58 = vpop.f32.mrf.mxu0  ;;  %v5774_v54 = vadd.f32 %v5674_v27, %v5388_v13  ;;  %10070 = vmatmul.msk.bf16.gmra.mxu2 %vm4822_vm5, %v10933_v59  ;;  %10236 = vmatmul.msk.bf16.gmra.mxu3 %vm4822_vm5, %v13792_v55 }
 0x7b1   : > { %v6517_v0 = vsel %vm1072_vm2, %v6515_v7, %v6516_v53  ;;  %v13845_v10 = vadd.f32 %v6516_v53, %v13633_v2  ;;  %10054 = vmatmul.msk.bf16.gmra.mxu1 %vm4822_vm5, %v13553_v50 }
 0x7b2   : > { %v13850_v43 = vadd.f32 %v6517_v0, %v13620_v19  ;;  %v13855_v14 = vadd.f32 %v13767_v56, %v5774_v54  ;;  %v15146_v54 = vld [vmem:[#allocation55_spill] sm:$0xff] }
 0x7b3   : > { %15143 = vst [vmem:[#allocation53_spill] sm:$0xff] %v13845_v10  ;;  %10276 = vmatmul.msk.bf16.gmra.mxu0 %vm4822_vm5, %v13841_v45  ;;  %v5206_v63 = vpop.f32.mrf.mxu2 }
 0x7b4   : > { %15144 = vst [vmem:[#allocation51_spill] sm:$0xff] %v13850_v43  ;;  %v5542_v52 = vpop.f32.mrf.mxu3  ;;  %v5293_v21 = vrot.slane %v5206_v63, 1 }
 0x7b5   : > { %v5675_v22 = vrot.slane %v5542_v52, 2 }
 0x7b6   : > { %v5294_v7 = vsel %vm1072_vm2, %v5292_v11, %v5293_v21  ;;  %v6406_v13 = vpop.f32.mrf.mxu1  ;;  %v5390_v43 = vadd.f32 %v5293_v21, %v15146_v54 }
 0x7b7   : > { %v5676_v2 = vsel %vm1435_vm3, %v5674_v27, %v5675_v22  ;;  %v5389_v50 = vadd.f32 %v5294_v7, %v15145_v41  ;;  %v13868_v27 = vld [vmem:[#allocation3 + $0x60] sm:$0xff] }
 0x7b8   : > { %v6260_v53 = vpop.f32.mrf.mxu0 }
 0x7b9   : > { %v5775_v19 = vadd.f32 %v5676_v2, %v5389_v50  ;;  %v15148_v50 = vld [vmem:[#allocation58_spill] sm:$0xff] }
 0x7bb   : > { %v5208_v59 = vpop.f32.mrf.mxu2  ;;  %v13861_v10 = vadd.f32 %v13781_v57, %v5775_v19 }
 0x7bc   : > { %v5544_v0 = vpop.f32.mrf.mxu3 }
 0x7bd   : > { %v5677_v56 = vrot.slane %v5544_v0, 2 }
 0x7be   : > { %v6408_v52 = vpop.f32.mrf.mxu1 }
 0x7bf   : > { %v5678_v63 = vsel %vm1435_vm3, %v5675_v22, %v5677_v56  ;;  %v10935_v56 = vld [vmem:[#allocation3 + $0x48] sm:$0xff] }
 0x7c0   : > { %v7567_v48 = vpop.f32.mrf.mxu0  ;;  %v5776_v11 = vadd.f32 %v5678_v63, %v5390_v43  ;;  %10071 = vmatmul.msk.bf16.gmra.mxu2 %vm4822_vm5, %v10934_v28  ;;  %10237 = vmatmul.msk.bf16.gmra.mxu3 %vm4822_vm5, %v13821_v24  ;;  %v13890_v63 = vld [vmem:[#allocation3 + $0x68] sm:$0xff] }
 0x7c1   : > { %10055 = vmatmul.msk.bf16.gmra.mxu1 %vm4822_vm5, %v13581_v61 }
 0x7c2   : > { %v13873_v57 = vadd.f32 %v13787_v46, %v5776_v11 }
 0x7c3   : > { %10277 = vmatmul.msk.bf16.gmra.mxu0 %vm4822_vm5, %v13868_v27  ;;  %v5210_v21 = vpop.f32.mrf.mxu2 }
 0x7c4   : > { %v5547_v48 = vpop.f32.mrf.mxu3 }
 0x7c6   : > { %v6409_v43 = vpop.f32.mrf.mxu1 }
 0x7c7   : > { %v6518_v22 = vrot.slane %v6409_v43, 1 }
 0x7c8   : > { %v13877_v7 = vpop.f32.mrf.mxu0 }
 0x7c9   : > { %v13880_v28 = vadd.f32 %v6518_v22, %v13661_v6  ;;  %v7727_v6 = vrot.slane %v13877_v7, 1 }
 0x7cb   : > { %15147 = vst [vmem:[#allocation54_spill] sm:$0xff] %v13880_v28  ;;  %v5211_v2 = vpop.f32.mrf.mxu2  ;;  %v10936_v28 = vld [vmem:[#allocation3 + $0x50] sm:$0xff] }
 0x7cc   : > { %v5548_v13 = vpop.f32.mrf.mxu3  ;;  %v5295_v41 = vrot.slane %v5211_v2, 1 }
 0x7cd   : > { %v5679_v53 = vrot.slane %v5548_v13, 2 }
 0x7ce   : > { %v5391_v61 = vadd.f32 %v5295_v41, %v15148_v50  ;;  %v6412_v46 = vpop.f32.mrf.mxu1  ;;  %v15151_v50 = vld [vmem:[#allocation56_spill] sm:$0xff] }
 0x7cf   : > { %v6519_v19 = vrot.slane %v6412_v46, 1 }
 0x7d0   : > { %v13883_v59 = vpop.f32.mrf.mxu0  ;;  %v5777_v0 = vadd.f32 %v5679_v53, %v5391_v61  ;;  %10072 = vmatmul.msk.bf16.gmra.mxu2 %vm4822_vm5, %v10935_v56  ;;  %10238 = vmatmul.msk.bf16.gmra.mxu3 %vm4822_vm5, %v13841_v45 }
 0x7d1   : > { %v14962_v54 = vrot.slane %v13883_v59, 1  ;;  %v6520_v52 = vsel %vm1072_vm2, %v6518_v22, %v6519_v19  ;;  %v13894_v11 = vadd.f32 %v6519_v19, %v13680_v8  ;;  %10056 = vmatmul.msk.bf16.gmra.mxu1 %vm4822_vm5, %v13600_v29 }
 0x7d2   : > { %v13899_v21 = vadd.f32 %v6520_v52, %v13667_v16  ;;  %v13909_v43 = vadd.f32 %v13816_v38, %v5777_v0  ;;  %v15152_v0 = vld [vmem:[#allocation60_spill] sm:$0xff] }
 0x7d3   : > { %15149 = vst [vmem:[#allocation55_spill] sm:$0xff] %v13894_v11  ;;  %v13904_v48 = vsel %vm1072_vm2, %v7727_v6, %v14962_v54  ;;  %10278 = vmatmul.msk.bf16.gmra.mxu0 %vm4822_vm5, %v13890_v63  ;;  %v5214_v22 = vpop.f32.mrf.mxu2 }
 0x7d4   : > { %15150 = vst [vmem:[#allocation58_spill] sm:$0xff] %v13899_v21  ;;  %v5551_v8 = vpop.f32.mrf.mxu3  ;;  %v5296_v7 = vrot.slane %v5214_v22, 1 }
 0x7d5   : > { %v5680_v2 = vrot.slane %v5551_v8, 2 }
 0x7d6   : > { %v5297_v29 = vsel %vm1072_vm2, %v5295_v41, %v5296_v7  ;;  %v6414_v13 = vpop.f32.mrf.mxu1  ;;  %v5393_v11 = vadd.f32 %v5296_v7, %v15152_v0 }
 0x7d7   : > { %v5681_v16 = vsel %vm1435_vm3, %v5679_v53, %v5680_v2  ;;  %v5392_v61 = vadd.f32 %v5297_v29, %v15151_v50  ;;  %v13922_v53 = vld [vmem:[#allocation3 + $0x70] sm:$0xff] }
 0x7d8   : > { %v7573_v46 = vpop.f32.mrf.mxu0 }
 0x7d9   : > { %v5778_v19 = vadd.f32 %v5681_v16, %v5392_v61 }
 0x7db   : > { %v5216_v56 = vpop.f32.mrf.mxu2  ;;  %v13915_v54 = vadd.f32 %v13830_v15, %v5778_v19 }
 0x7dc   : > { %v5553_v52 = vpop.f32.mrf.mxu3  ;;  %v10937_v56 = vld [vmem:[#allocation3 + $0x58] sm:$0xff] }
 0x7dd   : > { %v5682_v38 = vrot.slane %v5553_v52, 2 }
 0x7de   : > { %v6416_v8 = vpop.f32.mrf.mxu1 }
 0x7df   : > { %v5683_v22 = vsel %vm1435_vm3, %v5680_v2, %v5682_v38  ;;  %v13944_v38 = vld [vmem:[#allocation3 + $0x78] sm:$0xff] }
 0x7e0   : > { %v7575_v21 = vpop.f32.mrf.mxu0  ;;  %v5779_v41 = vadd.f32 %v5683_v22, %v5393_v11  ;;  %10073 = vmatmul.msk.bf16.gmra.mxu2 %vm4822_vm5, %v10936_v28  ;;  %10239 = vmatmul.msk.bf16.gmra.mxu3 %vm4822_vm5, %v13868_v27 }
 0x7e1   : > { %10057 = vmatmul.msk.bf16.gmra.mxu1 %vm4822_vm5, %v13628_v3 }
 0x7e2   : > { %v13927_v15 = vadd.f32 %v13836_v58, %v5779_v41 }
 0x7e3   : > { %10279 = vmatmul.msk.bf16.gmra.mxu0 %vm4822_vm5, %v13922_v53  ;;  %v6650_v7 = vpop.f32.mrf.mxu2 }
 0x7e4   : > { %v7357_v21 = vpop.f32.mrf.mxu3 }
 0x7e6   : > { %v6417_v11 = vpop.f32.mrf.mxu1 }
 0x7e7   : > { %v6521_v2 = vrot.slane %v6417_v11, 1 }
 0x7e8   : > { %v13931_v29 = vpop.f32.mrf.mxu0 }
 0x7e9   : > { %v13934_v28 = vadd.f32 %v6521_v2, %v13708_v25  ;;  %v7730_v52 = vrot.slane %v13931_v29, 1 }
 0x7eb   : > { %v6651_v16 = vpop.f32.mrf.mxu2 }
 0x7ec   : > { %v7359_v13 = vpop.f32.mrf.mxu3  ;;  %v6842_v50 = vrot.slane %v6651_v16, 2 }
 0x7ee   : > { %v6970_v3 = vadd.f32 %v6842_v50, %v13405_v36  ;;  %v6420_v61 = vpop.f32.mrf.mxu1 }
 0x7ef   : > { %v6522_v58 = vrot.slane %v6420_v61, 1 }
 0x7f0   : > { %v13937_v46 = vpop.f32.mrf.mxu0  ;;  %v7501_v19 = vadd.f32 %v7357_v21, %v6970_v3  ;;  %10074 = vmatmul.msk.bf16.gmra.mxu2 %vm4822_vm5, %v10937_v56  ;;  %10240 = vmatmul.msk.bf16.gmra.mxu3 %vm4822_vm5, %v13890_v63 }
 0x7f1   : > { %v7731_v25 = vrot.slane %v13937_v46, 1  ;;  %v6523_v0 = vsel %vm1072_vm2, %v6521_v2, %v6522_v58  ;;  %v13948_v36 = vadd.f32 %v6522_v58, %v13728_v26  ;;  %10058 = vmatmul.msk.bf16.gmra.mxu1 %vm4822_vm5, %v13647_v5  ;;  %v10941_v46 = vld [vmem:[#allocation3 + $0x78] sm:$0xff] }
 0x7f2   : > { %v13953_v22 = vadd.f32 %v6523_v0, %v13714_v31  ;;  %v13962_v41 = vadd.f32 %v7727_v6, %v7501_v19 }
 0x7f3   : > { %v13958_v8 = vsel %vm1072_vm2, %v7730_v52, %v7731_v25  ;;  %10280 = vmatmul.msk.bf16.gmra.mxu0 %vm4822_vm5, %v13944_v38  ;;  %v6654_v7 = vpop.f32.mrf.mxu2 }
 0x7f4   : > { %v7362_v21 = vpop.f32.mrf.mxu3  ;;  %v6843_v26 = vrot.slane %v6654_v7, 2  ;;  %v10938_v7 = vld [vmem:[#allocation3 + $0x60] sm:$0xff] }
 0x7f6   : > { %v6844_v11 = vsel %vm1435_vm3, %v6842_v50, %v6843_v26  ;;  %v6422_v2 = vpop.f32.mrf.mxu1 }
 0x7f7   : > { %v6971_v5 = vadd.f32 %v6844_v11, %v13421_v18  ;;  %v13974_v18 = vld [vmem:[#allocation3 + $0x80] sm:$0xff] }
 0x7f8   : > { %v7581_v31 = vpop.f32.mrf.mxu0 }
 0x7f9   : > { %v7502_v29 = vadd.f32 %v7359_v13, %v6971_v5 }
 0x7fb   : > { %v6656_v16 = vpop.f32.mrf.mxu2  ;;  %v13967_v61 = vadd.f32 %v13904_v48, %v7502_v29 }
 0x7fc   : > { %v7364_v3 = vpop.f32.mrf.mxu3  ;;  %v6845_v58 = vrot.slane %v6656_v16, 2 }
 0x7fe   : > { %v6846_v56 = vsel %vm1435_vm3, %v6843_v26, %v6845_v58  ;;  %v6424_v6 = vpop.f32.mrf.mxu1 }
 0x7ff   : > { %v6972_v19 = vadd.f32 %v6846_v56, %v13416_v44  ;;  %v15153_v44 = vrot.slane %v13883_v59, 1  ;;  %v10939_v59 = vld [vmem:[#allocation3 + $0x68] sm:$0xff] }
 0x800   : > { %v7583_v0 = vpop.f32.mrf.mxu0  ;;  %10075 = vmatmul.msk.bf16.gmra.mxu2 %vm4822_vm5, %v10938_v7  ;;  %10241 = vmatmul.msk.bf16.gmra.mxu3 %vm4822_vm5, %v13922_v53 }
 0x801   : > { %v7503_v13 = vadd.f32 %v7362_v21, %v6972_v19  ;;  %10307 = vmatmul.msk.bf16.vlgmr.msra.gmra.mxu1 %vm4822_vm5, %v13675_v4  ;;  %v13997_v0 = vld [vmem:[#allocation3 + $0x88] sm:$0xff] }
 0x803   : > { %10281 = vmatmul.msk.bf16.gmra.mxu0 %vm4822_vm5, %v13974_v18  ;;  %v6659_v48 = vpop.f32.mrf.mxu2  ;;  %v13982_v26 = vadd.f32 %v15153_v44, %v7503_v13 }
 0x804   : > { %v7366_v50 = vpop.f32.mrf.mxu3 }
 0x806   : > { %v6425_v11 = vpop.f32.mrf.mxu1 }
 0x807   : > { %v6524_v2 = vrot.slane %v6425_v11, 1 }
 0x808   : > { %v13984_v5 = vpop.f32.mrf.mxu0 }
 0x809   : > { %v13987_v31 = vadd.f32 %v6524_v2, %v13757_v23  ;;  %v7733_v19 = vrot.slane %v13984_v5, 1 }
 0x80b   : > { %15154 = vst [vmem:[#allocation56_spill] sm:$0xff] %v13987_v31  ;;  %v6660_v21 = vpop.f32.mrf.mxu2 }
 0x80c   : > { %v7368_v29 = vpop.f32.mrf.mxu3  ;;  %v6847_v16 = vrot.slane %v6660_v21, 2 }
 0x80e   : > { %v6973_v4 = vadd.f32 %v6847_v16, %v13452_v30  ;;  %v6428_v3 = vpop.f32.mrf.mxu1 }
 0x80f   : > { %v6525_v58 = vrot.slane %v6428_v3, 1 }
 0x810   : > { %v13990_v56 = vpop.f32.mrf.mxu0  ;;  %v7504_v6 = vadd.f32 %v7366_v50, %v6973_v4  ;;  %10076 = vmatmul.msk.bf16.gmra.mxu2 %vm4822_vm5, %v10939_v59  ;;  %10242 = vmatmul.msk.bf16.gmra.mxu3 %vm4822_vm5, %v13944_v38 }
 0x811   : > { %v14963_v23 = vrot.slane %v13990_v56, 1  ;;  %v6526_v7 = vsel %vm1072_vm2, %v6524_v2, %v6525_v58  ;;  %v14001_v30 = vadd.f32 %v6525_v58, %v13777_v1  ;;  %10308 = vmatmul.msk.bf16.gmra.mxu1 %vm4822_vm5, %v13694_v60 }
 0x812   : > { %v14006_v13 = vadd.f32 %v6526_v7, %v13763_v12  ;;  %v14015_v50 = vadd.f32 %v7730_v52, %v7504_v6 }
 0x813   : > { %15155 = vst [vmem:[#allocation60_spill] sm:$0xff] %v14001_v30  ;;  %v14011_v48 = vsel %vm1072_vm2, %v7733_v19, %v14963_v23  ;;  %10282 = vmatmul.msk.bf16.gmra.mxu0 %vm4822_vm5, %v13997_v0  ;;  %v6663_v44 = vpop.f32.mrf.mxu2 }
 0x814   : > { %15156 = vst [vmem:[#allocation64_spill] sm:$0xff] %v14006_v13  ;;  %v7371_v11 = vpop.f32.mrf.mxu3  ;;  %v6848_v1 = vrot.slane %v6663_v44, 2  ;;  %v10940_v44 = vld [vmem:[#allocation3 + $0x70] sm:$0xff] }
 0x816   : > { %v6849_v2 = vsel %vm1435_vm3, %v6847_v16, %v6848_v1  ;;  %v6430_v5 = vpop.f32.mrf.mxu1 }
 0x817   : > { %v6974_v60 = vadd.f32 %v6849_v2, %v13468_v51  ;;  %v14027_v51 = vld [vmem:[#allocation3 + $0x90] sm:$0xff] }
 0x818   : > { %v7589_v12 = vpop.f32.mrf.mxu0 }
 0x819   : > { %v7505_v21 = vadd.f32 %v7368_v29, %v6974_v60 }
 0x81b   : > { %v6665_v4 = vpop.f32.mrf.mxu2  ;;  %v14020_v58 = vadd.f32 %v13958_v8, %v7505_v21 }
 0x81c   : > { %v7373_v3 = vpop.f32.mrf.mxu3  ;;  %v6850_v59 = vrot.slane %v6665_v4, 2 }
 0x81e   : > { %v6851_v7 = vsel %vm1435_vm3, %v6848_v1, %v6850_v59  ;;  %v6432_v52 = vpop.f32.mrf.mxu1 }
 0x81f   : > { %v6975_v6 = vadd.f32 %v6851_v7, %v13463_v42  ;;  %v14050_v7 = vld [vmem:[#allocation3 + $0x98] sm:$0xff] }
 0x820   : > { %v7591_v23 = vpop.f32.mrf.mxu0  ;;  %10077 = vmatmul.msk.bf16.gmra.mxu2 %vm4822_vm5, %v10940_v44  ;;  %10243 = vmatmul.msk.bf16.gmra.mxu3 %vm4822_vm5, %v13974_v18 }
 0x821   : > { %v7506_v29 = vadd.f32 %v7371_v11, %v6975_v6  ;;  %10309 = vmatmul.msk.bf16.gmra.mxu1 %vm4822_vm5, %v13723_v39 }
 0x823   : > { %10283 = vmatmul.msk.bf16.gmra.mxu0 %vm4822_vm5, %v14027_v51  ;;  %v6668_v8 = vpop.f32.mrf.mxu2  ;;  %v14035_v42 = vadd.f32 %v7731_v25, %v7506_v29 }
 0x824   : > { %v7375_v16 = vpop.f32.mrf.mxu3 }
 0x826   : > { %v6433_v23 = vpop.f32.mrf.mxu1 }
 0x827   : > { %v6527_v1 = vrot.slane %v6433_v23, 1 }
 0x828   : > { %v14037_v2 = vpop.f32.mrf.mxu0 }
 0x829   : > { %v14040_v5 = vadd.f32 %v6527_v1, %v13806_v20  ;;  %v7736_v25 = vrot.slane %v14037_v2, 1 }
 0x82b   : > { %15157 = vst [vmem:[#allocation65_spill] sm:$0xff] %v14040_v5  ;;  %v6669_v11 = vpop.f32.mrf.mxu2 }
 0x82c   : > { %v7377_v60 = vpop.f32.mrf.mxu3  ;;  %v6852_v12 = vrot.slane %v6669_v11, 2 }
 0x82e   : > { %v6976_v39 = vadd.f32 %v6852_v12, %v13499_v47  ;;  %v6436_v21 = vpop.f32.mrf.mxu1 }
 0x82f   : > { %v6528_v4 = vrot.slane %v6436_v21, 1 }
 0x830   : > { %v14043_v3 = vpop.f32.mrf.mxu0  ;;  %v7507_v59 = vadd.f32 %v7375_v16, %v6976_v39  ;;  %10078 = vmatmul.msk.bf16.gmra.mxu2 %vm4822_vm5, %v10941_v46  ;;  %10244 = vmatmul.msk.bf16.gmra.mxu3 %vm4822_vm5, %v13997_v0 }
 0x831   : > { %v14964_v20 = vrot.slane %v14043_v3, 1  ;;  %v6529_v52 = vsel %vm1072_vm2, %v6527_v1, %v6528_v4  ;;  %v14054_v47 = vadd.f32 %v6528_v4, %v13826_v33  ;;  %10310 = vmatmul.msk.bf16.gmra.mxu1 %vm4822_vm5, %v13743_v32  ;;  %v15160_v32 = vld [vmem:[#allocation62_spill] sm:$0xff] }
 0x832   : > { %v14059_v6 = vadd.f32 %v6529_v52, %v13812_v9  ;;  %v14068_v29 = vadd.f32 %v7733_v19, %v7507_v59  ;;  %v15161_v59 = vld [vmem:[#allocation61_spill] sm:$0xff] }
 0x833   : > { %15158 = vst [vmem:[#allocation66_spill] sm:$0xff] %v14054_v47  ;;  %v14064_v44 = vsel %vm1072_vm2, %v7736_v25, %v14964_v20  ;;  %10284 = vmatmul.msk.bf16.gmra.mxu0 %vm4822_vm5, %v14050_v7  ;;  %v6672_v8 = vpop.f32.mrf.mxu2 }
 0x834   : > { %15159 = vst [vmem:[#allocation67_spill] sm:$0xff] %v14059_v6  ;;  %v7380_v16 = vpop.f32.mrf.mxu3  ;;  %v6853_v33 = vrot.slane %v6672_v8, 2  ;;  %v10942_v8 = vld [vmem:[#allocation3 + $0x80] sm:$0xff] }
 0x836   : > { %v6854_v23 = vsel %vm1435_vm3, %v6852_v12, %v6853_v33  ;;  %v6438_v1 = vpop.f32.mrf.mxu1  ;;  %v14080_v12 = vld [vmem:[#allocation3 + $0xa0] sm:$0xff] }
 0x837   : > { %v6977_v2 = vadd.f32 %v6854_v23, %v15160_v32  ;;  %v15162_v23 = vrot.slane %v13990_v56, 1  ;;  %v10943_v56 = vld [vmem:[#allocation3 + $0x88] sm:$0xff] }
 0x838   : > { %v7597_v9 = vpop.f32.mrf.mxu0 }
 0x839   : > { %v7508_v11 = vadd.f32 %v7377_v60, %v6977_v2 }
 0x83b   : > { %v6674_v39 = vpop.f32.mrf.mxu2  ;;  %v14073_v4 = vadd.f32 %v14011_v48, %v7508_v11 }
 0x83c   : > { %v7382_v21 = vpop.f32.mrf.mxu3  ;;  %v6855_v46 = vrot.slane %v6674_v39, 2 }
 0x83e   : > { %v6856_v52 = vsel %vm1435_vm3, %v6853_v33, %v6855_v46  ;;  %v6440_v19 = vpop.f32.mrf.mxu1 }
 0x83f   : > { %v6978_v20 = vadd.f32 %v6856_v52, %v15161_v59 }
 0x840   : > { %v7599_v47 = vpop.f32.mrf.mxu0  ;;  %10079 = vmatmul.msk.bf16.gmra.mxu2 %vm4822_vm5, %v10942_v8  ;;  %10245 = vmatmul.msk.bf16.gmra.mxu3 %vm4822_vm5, %v14027_v51  ;;  %v14103_v8 = vld [vmem:[#allocation3 + $0xa8] sm:$0xff] }
 0x841   : > { %v7509_v60 = vadd.f32 %v7380_v16, %v6978_v20  ;;  %10311 = vmatmul.msk.bf16.gmra.mxu1 %vm4822_vm5, %v13772_v37  ;;  %v15164_v37 = vld [vmem:[#allocation57_spill] sm:$0xff] }
 0x843   : > { %10285 = vmatmul.msk.bf16.gmra.mxu0 %vm4822_vm5, %v14080_v12  ;;  %v6677_v48 = vpop.f32.mrf.mxu2  ;;  %v14088_v47 = vadd.f32 %v15162_v23, %v7509_v60 }
 0x844   : > { %v7384_v33 = vpop.f32.mrf.mxu3 }
 0x846   : > { %v6441_v1 = vpop.f32.mrf.mxu1 }
 0x847   : > { %v6530_v32 = vrot.slane %v6441_v1, 1 }
 0x848   : > { %v14090_v2 = vpop.f32.mrf.mxu0 }
 0x849   : > { %v14093_v9 = vadd.f32 %v6530_v32, %v13855_v14  ;;  %v7739_v59 = vrot.slane %v14090_v2, 1 }
 0x84b   : > { %15163 = vst [vmem:[#allocation62_spill] sm:$0xff] %v14093_v9  ;;  %v6678_v20 = vpop.f32.mrf.mxu2 }
 0x84c   : > { %v7386_v16 = vpop.f32.mrf.mxu3  ;;  %v6857_v11 = vrot.slane %v6678_v20, 2 }
 0x84e   : > { %v6979_v39 = vadd.f32 %v6857_v11, %v15164_v37  ;;  %v6444_v21 = vpop.f32.mrf.mxu1 }
 0x84f   : > { %v6531_v46 = vrot.slane %v6444_v21, 1 }
 0x850   : > { %v14096_v52 = vpop.f32.mrf.mxu0  ;;  %v7510_v19 = vadd.f32 %v7384_v33, %v6979_v39  ;;  %10080 = vmatmul.msk.bf16.gmra.mxu2 %vm4822_vm5, %v10943_v56  ;;  %10246 = vmatmul.msk.bf16.gmra.mxu3 %vm4822_vm5, %v14050_v7 }
 0x851   : > { %v14965_v14 = vrot.slane %v14096_v52, 1  ;;  %v6532_v60 = vsel %vm1072_vm2, %v6530_v32, %v6531_v46  ;;  %v14107_v48 = vadd.f32 %v6531_v46, %v13873_v57  ;;  %10312 = vmatmul.msk.bf16.gmra.mxu1 %vm4822_vm5, %v13792_v55  ;;  %v15167_v55 = vld [vmem:[#allocation41_spill] sm:$0xff] }
 0x852   : > { %v14112_v33 = vadd.f32 %v6532_v60, %v13861_v10  ;;  %v14121_v1 = vadd.f32 %v7736_v25, %v7510_v19  ;;  %v15168_v19 = vld [vmem:[#allocation42_spill] sm:$0xff] }
 0x853   : > { %15165 = vst [vmem:[#allocation61_spill] sm:$0xff] %v14107_v48  ;;  %v14117_v23 = vsel %vm1072_vm2, %v7739_v59, %v14965_v14  ;;  %10286 = vmatmul.msk.bf16.gmra.mxu0 %vm4822_vm5, %v14103_v8  ;;  %v6681_v32 = vpop.f32.mrf.mxu2 }
 0x854   : > { %15166 = vst [vmem:[#allocation57_spill] sm:$0xff] %v14112_v33  ;;  %v7389_v2 = vpop.f32.mrf.mxu3  ;;  %v6858_v57 = vrot.slane %v6681_v32, 2  ;;  %v10944_v32 = vld [vmem:[#allocation3 + $0x90] sm:$0xff] }
 0x856   : > { %v6859_v20 = vsel %vm1435_vm3, %v6857_v11, %v6858_v57  ;;  %v6446_v37 = vpop.f32.mrf.mxu1  ;;  %v14133_v11 = vld [vmem:[#allocation3 + $0xb0] sm:$0xff] }
 0x857   : > { %v6980_v39 = vadd.f32 %v6859_v20, %v15167_v55 }
 0x858   : > { %v7605_v10 = vpop.f32.mrf.mxu0 }
 0x859   : > { %v7511_v21 = vadd.f32 %v7386_v16, %v6980_v39 }
 0x85b   : > { %v6683_v46 = vpop.f32.mrf.mxu2  ;;  %v14126_v60 = vadd.f32 %v14064_v44, %v7511_v21 }
 0x85c   : > { %v7391_v56 = vpop.f32.mrf.mxu3  ;;  %v6860_v14 = vrot.slane %v6683_v46, 2 }
 0x85e   : > { %v6861_v48 = vsel %vm1435_vm3, %v6858_v57, %v6860_v14  ;;  %v6448_v25 = vpop.f32.mrf.mxu1 }
 0x85f   : > { %v6981_v33 = vadd.f32 %v6861_v48, %v15168_v19  ;;  %v15169_v48 = vrot.slane %v14043_v3, 1  ;;  %v10945_v3 = vld [vmem:[#allocation3 + $0x98] sm:$0xff] }
 0x860   : > { %v7607_v9 = vpop.f32.mrf.mxu0  ;;  %10081 = vmatmul.msk.bf16.gmra.mxu2 %vm4822_vm5, %v10944_v32  ;;  %10247 = vmatmul.msk.bf16.gmra.mxu3 %vm4822_vm5, %v14080_v12  ;;  %v14156_v32 = vld [vmem:[#allocation3 + $0xb8] sm:$0xff] }
 0x861   : > { %v7512_v16 = vadd.f32 %v7389_v2, %v6981_v33  ;;  %10313 = vmatmul.msk.bf16.gmra.mxu1 %vm4822_vm5, %v13821_v24  ;;  %v15171_v24 = vld [vmem:[#allocation46_spill] sm:$0xff] }
 0x863   : > { %10287 = vmatmul.msk.bf16.gmra.mxu0 %vm4822_vm5, %v14133_v11  ;;  %v6686_v44 = vpop.f32.mrf.mxu2  ;;  %v14141_v9 = vadd.f32 %v15169_v48, %v7512_v16 }
 0x864   : > { %v7393_v14 = vpop.f32.mrf.mxu3 }
 0x866   : > { %v6449_v57 = vpop.f32.mrf.mxu1 }
 0x867   : > { %v6533_v20 = vrot.slane %v6449_v57, 1 }
 0x868   : > { %v14143_v37 = vpop.f32.mrf.mxu0 }
 0x869   : > { %v14146_v55 = vadd.f32 %v6533_v20, %v13909_v43  ;;  %v7742_v19 = vrot.slane %v14143_v37, 1 }
 0x86b   : > { %15170 = vst [vmem:[#allocation41_spill] sm:$0xff] %v14146_v55  ;;  %v6687_v33 = vpop.f32.mrf.mxu2 }
 0x86c   : > { %v7395_v2 = vpop.f32.mrf.mxu3  ;;  %v6862_v39 = vrot.slane %v6687_v33, 2 }
 0x86e   : > { %v6982_v10 = vadd.f32 %v6862_v39, %v15171_v24  ;;  %v6452_v21 = vpop.f32.mrf.mxu1 }
 0x86f   : > { %v6534_v46 = vrot.slane %v6452_v21, 1 }
 0x870   : > { %v14149_v56 = vpop.f32.mrf.mxu0  ;;  %v7513_v25 = vadd.f32 %v7393_v14, %v6982_v10  ;;  %10082 = vmatmul.msk.bf16.gmra.mxu2 %vm4822_vm5, %v10945_v3  ;;  %10248 = vmatmul.msk.bf16.gmra.mxu3 %vm4822_vm5, %v14103_v8 }
 0x871   : > { %v14966_v43 = vrot.slane %v14149_v56, 1  ;;  %v6535_v16 = vsel %vm1072_vm2, %v6533_v20, %v6534_v46  ;;  %v14160_v44 = vadd.f32 %v6534_v46, %v13927_v15  ;;  %10314 = vmatmul.msk.bf16.gmra.mxu1 %vm4822_vm5, %v13841_v45  ;;  %v15174_v45 = vld [vmem:[#allocation45_spill] sm:$0xff] }
 0x872   : > { %v14171_v48 = vadd.f32 %v7739_v59, %v7513_v25  ;;  %v14174_v57 = vadd.f32 %v6535_v16, %v13915_v54  ;;  %v15175_v16 = vld [vmem:[#allocation44_spill] sm:$0xff] }
 0x873   : > { %15172 = vst [vmem:[#allocation42_spill] sm:$0xff] %v14160_v44  ;;  %v14167_v14 = vsel %vm1072_vm2, %v7742_v19, %v14966_v43  ;;  %10288 = vmatmul.msk.bf16.gmra.mxu0 %vm4822_vm5, %v14156_v32  ;;  %v6690_v20 = vpop.f32.mrf.mxu2 }
 0x874   : > { %15173 = vst [vmem:[#allocation46_spill] sm:$0xff] %v14174_v57  ;;  %v7398_v37 = vpop.f32.mrf.mxu3  ;;  %v6863_v15 = vrot.slane %v6690_v20, 2  ;;  %v10946_v20 = vld [vmem:[#allocation3 + $0xa0] sm:$0xff] }
 0x876   : > { %v6864_v33 = vsel %vm1435_vm3, %v6862_v39, %v6863_v15  ;;  %v6454_v24 = vpop.f32.mrf.mxu1  ;;  %v14186_v39 = vld [vmem:[#allocation3 + $0xc0] sm:$0xff] }
 0x877   : > { %v6983_v10 = vadd.f32 %v6864_v33, %v15174_v45 }
 0x878   : > { %v7613_v21 = vpop.f32.mrf.mxu0 }
 0x879   : > { %v7514_v46 = vadd.f32 %v7395_v2, %v6983_v10 }
 0x87b   : > { %v6692_v3 = vpop.f32.mrf.mxu2  ;;  %v14179_v44 = vadd.f32 %v14117_v23, %v7514_v46 }
 0x87c   : > { %v7400_v43 = vpop.f32.mrf.mxu3  ;;  %v6865_v59 = vrot.slane %v6692_v3, 2 }
 0x87e   : > { %v6866_v25 = vsel %vm1435_vm3, %v6863_v15, %v6865_v59  ;;  %v7889_v54 = vpop.f32.mrf.mxu1  ;;  %v15176_v15 = vrot.slane %v14096_v52, 1 }
 0x87f   : > { %v6984_v57 = vadd.f32 %v6866_v25, %v15175_v16  ;;  %v10947_v16 = vld [vmem:[#allocation3 + $0xa8] sm:$0xff] }
 0x880   : > { %v7615_v55 = vpop.f32.mrf.mxu0  ;;  %10083 = vmatmul.msk.bf16.gmra.mxu2 %vm4822_vm5, %v10946_v20  ;;  %10249 = vmatmul.msk.bf16.gmra.mxu3 %vm4822_vm5, %v14133_v11 }
 0x881   : > { %v7515_v2 = vadd.f32 %v7398_v37, %v6984_v57  ;;  %10315 = vmatmul.msk.bf16.gmra.mxu1 %vm4822_vm5, %v13868_v27  ;;  %v15177_v57 = vld [vmem:[#allocation43_spill] sm:$0xff] }
 0x883   : > { %10289 = vmatmul.msk.bf16.gmra.mxu0 %vm4822_vm5, %v14186_v39  ;;  %v6695_v23 = vpop.f32.mrf.mxu2  ;;  %v14194_v55 = vadd.f32 %v15176_v15, %v7515_v2  ;;  %v14207_v2 = vld [vmem:[#allocation3 + $0xc8] sm:$0xff] }
 0x884   : > { %v7402_v43 = vpop.f32.mrf.mxu3 }
 0x886   : > { %v7890_v33 = vpop.f32.mrf.mxu1 }
 0x887   : > { %v8081_v21 = vrot.slane %v7890_v33, 2  ;;  %v14227_v33 = vld [vmem:[%s14909_s4] ss:$0 sm:$0xff] }
 0x888   : > { %v14196_v24 = vpop.f32.mrf.mxu0 }
 0x889   : > { %v8209_v25 = vadd.f32 %v8081_v21, %v13962_v41  ;;  %v14968_v52 = vrot.slane %v14196_v24, 1 }
 0x88b   : > { %v6696_v45 = vpop.f32.mrf.mxu2 }
 0x88c   : > { %v7404_v10 = vpop.f32.mrf.mxu3  ;;  %v6867_v46 = vrot.slane %v6696_v45, 2 }
 0x88e   : > { %v6985_v37 = vadd.f32 %v6867_v46, %v15177_v57  ;;  %v7893_v3 = vpop.f32.mrf.mxu1 }
 0x88f   : > { %v8082_v27 = vrot.slane %v7893_v3, 2 }
 0x890   : > { %v14199_v59 = vpop.f32.mrf.mxu0  ;;  %v7516_v54 = vadd.f32 %v7402_v43, %v6985_v37  ;;  %10084 = vmatmul.msk.bf16.gmra.mxu2 %vm4822_vm5, %v10947_v16  ;;  %10250 = vmatmul.msk.bf16.gmra.mxu3 %vm4822_vm5, %v14156_v32 }
 0x891   : > { %v14967_v20 = vrot.slane %v14199_v59, 1  ;;  %v8083_v23 = vsel %vm1435_vm3, %v8081_v21, %v8082_v27  ;;  %10316 = vmatmul.msk.bf16.gmra.mxu1 %vm4822_vm5, %v13890_v63 }
 0x892   : > { %v8210_v41 = vadd.f32 %v8083_v23, %v13967_v61  ;;  %v14222_v15 = vadd.f32 %v7742_v19, %v7516_v54  ;;  %v8305_v61 = vrot.slane %v8209_v25, 7 }
 0x893   : > { %v14218_v43 = vsel %vm1072_vm2, %v14968_v52, %v14967_v20  ;;  %10290 = vmatmul.msk.bf16.gmra.mxu0 %vm4822_vm5, %v14207_v2  ;;  %v6699_v63 = vpop.f32.mrf.mxu2  ;;  %v15178_v20 = vld [vmem:[#allocation47_spill] sm:$0xff] }
 0x894   : > { %v7407_v45 = vpop.f32.mrf.mxu3  ;;  %v8306_v21 = vrot.slane %v8210_v41, 7  ;;  %v6868_v57 = vrot.slane %v6699_v63, 2 }
 0x896   : > { %v8307_v37 = vsel %vm4185_vm6, %v8305_v61, %v8306_v21  ;;  %v6869_v3 = vsel %vm1435_vm3, %v6867_v46, %v6868_v57  ;;  %v7895_v16 = vpop.f32.mrf.mxu1 }
 0x897   : > { %v8421_v23 = vadd.f32 %v14227_v33, %v8307_v37  ;;  %v6986_v19 = vadd.f32 %v6869_v3, %v15178_v20  ;;  %v8084_v54 = vrot.slane %v7895_v16, 2  ;;  %v15179_v3 = vld [vmem:[#allocation49_spill] sm:$0xff] }
 0x898   : > { %v7621_v52 = vpop.f32.mrf.mxu0 }
 0x899   : > { %v8453_v6 = vsub.f32 0.0, %v8421_v23  ;;  %v7517_v5 = vadd.f32 %v7404_v10, %v6986_v19  ;;  %v8085_v30 = vsel %vm1435_vm3, %v8082_v27, %v8084_v54 }
 0x89a   : > { %v8211_v13 = vadd.f32 %v8085_v30, %v13982_v26  ;;  %v10948_v26 = vld [vmem:[#allocation3 + $0xb0] sm:$0xff] }
 0x89b   : > { %v8485_v25 = vmul.f32 1.442695, %v8453_v6  ;;  %v6701_v41 = vpop.f32.mrf.mxu2  ;;  %v14236_v61 = vadd.f32 %v14167_v14, %v7517_v5  ;;  %v14245_v30 = vld [vmem:[#allocation3 + $0xd0] sm:$0xff] }
 0x89c   : > { %v7409_v63 = vpop.f32.mrf.mxu3  ;;  %v8308_v46 = vrot.slane %v8211_v13, 7  ;;  %v6870_v31 = vrot.slane %v6701_v41, 2 }
 0x89d   : > { %10750 = vpow2.f32 %v8485_v25 }
 0x89e   : > { %v8309_v37 = vsel %vm4185_vm6, %v8306_v21, %v8308_v46  ;;  %v6871_v20 = vsel %vm1435_vm3, %v6868_v57, %v6870_v31  ;;  %v7898_v52 = vpop.f32.mrf.mxu1  ;;  %v15180_v57 = vrot.slane %v14149_v56, 1 }
 0x89f   : > { %v8422_v10 = vadd.f32 %v14227_v33, %v8309_v37  ;;  %v6987_v27 = vadd.f32 %v6871_v20, %v15179_v3 }
 0x8a0   : > { %v7623_v16 = vpop.f32.mrf.mxu0  ;;  %10085 = vmatmul.msk.bf16.gmra.mxu2 %vm4822_vm5, %v10948_v26  ;;  %10251 = vmatmul.msk.bf16.gmra.mxu3 %vm4822_vm5, %v14186_v39 }
 0x8a1   : > { %v8454_v13 = vsub.f32 0.0, %v8422_v10  ;;  %v7518_v5 = vadd.f32 %v7407_v45, %v6987_v27  ;;  %10317 = vmatmul.msk.bf16.gmra.mxu1 %vm4822_vm5, %v13922_v53  ;;  %v15181_v53 = vld [vmem:[#allocation12_spill] sm:$0xff] }
 0x8a2   : > { %v8645_v63 = vunpack.c.l.bf16 %v15181_v53 }
 0x8a3   : > { %10291 = vmatmul.msk.bf16.gmra.mxu0 %vm4822_vm5, %v14245_v30  ;;  %v10751_v31 = vpop.eup %10750  ;;  %v8487_v6 = vmul.f32 1.442695, %v8454_v13  ;;  %v6704_v14 = vpop.f32.mrf.mxu2  ;;  %v14253_v19 = vadd.f32 %v15180_v57, %v7518_v5  ;;  %v10949_v57 = vld [vmem:[#allocation3 + $0xb8] sm:$0xff] }
 0x8a4   : > { %v7411_v21 = vpop.f32.mrf.mxu3  ;;  %v8549_v54 = vadd.f32 1.0, %v10751_v31 }
 0x8a5   : > { %10752 = vpow2.f32 %v8487_v6 }
 0x8a6   : > { %10754 = vrcp.f32 %v8549_v54  ;;  %v7899_v25 = vpop.f32.mrf.mxu1 }
 0x8a7   : > { %v8086_v3 = vrot.slane %v7899_v25, 2  ;;  %v14268_v25 = vld [vmem:[#allocation3 + $0xd8] sm:$0xff] }
 0x8a8   : > { %v14255_v41 = vpop.f32.mrf.mxu0 }
 0x8a9   : > { %v8212_v6 = vadd.f32 %v8086_v3, %v14015_v50  ;;  %v14970_v54 = vrot.slane %v14255_v41, 1 }
 0x8ab   : > { %v10753_v45 = vpop.eup %10752  ;;  %v6705_v46 = vpop.f32.mrf.mxu2 }
 0x8ac   : > { %v7413_v37 = vpop.f32.mrf.mxu3  ;;  %v10755_v20 = vpop.eup %10754  ;;  %v8550_v52 = vadd.f32 1.0, %v10753_v45  ;;  %v6872_v27 = vrot.slane %v6705_v46, 2  ;;  %v15182_v45 = vrot.slane %v14196_v24, 1 }
 0x8ad   : > { %v8613_v16 = vmul.f32 %v10755_v20, %v8421_v23 }
 0x8ae   : > { %10756 = vrcp.f32 %v8550_v52  ;;  %v6988_v56 = vadd.f32 %v6872_v27, %v13687_v35  ;;  %v7902_v26 = vpop.f32.mrf.mxu1  ;;  %v8310_v52 = vrot.slane %v8212_v6, 7 }
 0x8af   : > { %v8677_v13 = vadd.f32 %v8645_v63, %v8613_v16  ;;  %v8087_v5 = vrot.slane %v7902_v26, 2  ;;  %v15183_v63 = vld [vmem:[#allocation14_spill] sm:$0xff] }
 0x8b0   : > { %v14260_v31 = vpop.f32.mrf.mxu0  ;;  %v7519_v14 = vadd.f32 %v7411_v21, %v6988_v56  ;;  %10086 = vmatmul.msk.bf16.gmra.mxu2 %vm4822_vm5, %v10949_v57  ;;  %10252 = vmatmul.msk.bf16.gmra.mxu3 %vm4822_vm5, %v14207_v2  ;;  %v8646_v46 = vunpack.c.l.bf16 %v15183_v63 }
 0x8b1   : > { %v14969_v23 = vrot.slane %v14260_v31, 1  ;;  %8709 = vst.msk [vmem:[%s14270_s26] sm:$0xff] %vm636_vm1, %v8677_v13  ;;  %v8088_v35 = vsel %vm1435_vm3, %v8086_v3, %v8087_v5  ;;  %10318 = vmatmul.msk.bf16.gmra.mxu1 %vm4822_vm5, %v13944_v38 }
 0x8b2   : > { %v8213_v50 = vadd.f32 %v8088_v35, %v14020_v58  ;;  %v14289_v53 = vadd.f32 %v15182_v45, %v7519_v14 }
 0x8b3   : > { %v14283_v21 = vsel %vm1072_vm2, %v14970_v54, %v14969_v23  ;;  %10292 = vmatmul.msk.bf16.gmra.mxu0 %vm4822_vm5, %v14268_v25  ;;  %v6708_v38 = vpop.f32.mrf.mxu2 }
 0x8b4   : > { %v7416_v20 = vpop.f32.mrf.mxu3  ;;  %v10757_v58 = vpop.eup %10756  ;;  %v8311_v3 = vrot.slane %v8213_v50, 7  ;;  %v6873_v16 = vrot.slane %v6708_v38, 2 }
 0x8b5   : > { %v8614_v56 = vmul.f32 %v10757_v58, %v8422_v10 }
 0x8b6   : > { %v8312_v26 = vsel %vm4185_vm6, %v8310_v52, %v8311_v3  ;;  %v6874_v13 = vsel %vm1435_vm3, %v6872_v27, %v6873_v16  ;;  %v7904_v57 = vpop.f32.mrf.mxu1 }
 0x8b7   : > { %v8678_v35 = vadd.f32 %v8646_v46, %v8614_v56  ;;  %v8423_v24 = vadd.f32 %v14227_v33, %v8312_v26  ;;  %v6989_v14 = vadd.f32 %v6874_v13, %v13703_v17  ;;  %v8089_v45 = vrot.slane %v7904_v57, 2 }
 0x8b8   : > { %v7629_v63 = vpop.f32.mrf.mxu0 }
 0x8b9   : > { %8710 = vst.msk [vmem:[%s14270_s26 + $0x8] sm:$0xff] %vm636_vm1, %v8678_v35  ;;  %v8455_v23 = vsub.f32 0.0, %v8423_v24  ;;  %v7520_v54 = vadd.f32 %v7413_v37, %v6989_v14  ;;  %v8090_v6 = vsel %vm1435_vm3, %v8087_v5, %v8089_v45  ;;  %v15184_v35 = vrot.slane %v14199_v59, 1 }
 0x8ba   : > { %v8214_v10 = vadd.f32 %v8090_v6, %v14035_v42  ;;  %v10950_v42 = vld [vmem:[#allocation3 + $0xc0] sm:$0xff] }
 0x8bb   : > { %v8489_v50 = vmul.f32 1.442695, %v8455_v23  ;;  %v6710_v38 = vpop.f32.mrf.mxu2  ;;  %v14301_v27 = vadd.f32 %v14218_v43, %v7520_v54  ;;  %v14310_v43 = vld [vmem:[#allocation3 + $0xe0] sm:$0xff] }
 0x8bc   : > { %v7418_v58 = vpop.f32.mrf.mxu3  ;;  %v8313_v46 = vrot.slane %v8214_v10, 7  ;;  %v6875_v52 = vrot.slane %v6710_v38, 2  ;;  %v15185_v10 = vld [vmem:[#allocation16_spill] sm:$0xff] }
 0x8bd   : > { %10758 = vpow2.f32 %v8489_v50 }
 0x8be   : > { %v8314_v17 = vsel %vm4185_vm6, %v8311_v3, %v8313_v46  ;;  %v6876_v56 = vsel %vm1435_vm3, %v6873_v16, %v6875_v52  ;;  %v7907_v26 = vpop.f32.mrf.mxu1 }
 0x8bf   : > { %v8424_v37 = vadd.f32 %v14227_v33, %v8314_v17  ;;  %v6990_v5 = vadd.f32 %v6876_v56, %v13698_v49 }
 0x8c0   : > { %v7631_v13 = vpop.f32.mrf.mxu0  ;;  %10087 = vmatmul.msk.bf16.gmra.mxu2 %vm4822_vm5, %v10950_v42  ;;  %10253 = vmatmul.msk.bf16.gmra.mxu3 %vm4822_vm5, %v14245_v30 }
 0x8c1   : > { %v8456_v54 = vsub.f32 0.0, %v8424_v37  ;;  %v7521_v23 = vadd.f32 %v7416_v20, %v6990_v5  ;;  %10319 = vmatmul.msk.bf16.gmra.mxu1 %vm4822_vm5, %v13974_v18  ;;  %v8647_v18 = vunpack.c.l.bf16 %v15185_v10 }
 0x8c3   : > { %10293 = vmatmul.msk.bf16.gmra.mxu0 %vm4822_vm5, %v14310_v43  ;;  %v10759_v3 = vpop.eup %10758  ;;  %v8491_v16 = vmul.f32 1.442695, %v8456_v54  ;;  %v6713_v49 = vpop.f32.mrf.mxu2  ;;  %v14318_v14 = vadd.f32 %v15184_v35, %v7521_v23  ;;  %v15186_v35 = vrot.slane %v14255_v41, 1 }
 0x8c4   : > { %v7420_v57 = vpop.f32.mrf.mxu3  ;;  %v8551_v45 = vadd.f32 1.0, %v10759_v3  ;;  %v10951_v3 = vld [vmem:[#allocation3 + $0xc8] sm:$0xff] }
 0x8c5   : > { %10760 = vpow2.f32 %v8491_v16  ;;  %v14332_v49 = vld [vmem:[#allocation3 + $0xe8] sm:$0xff] }
 0x8c6   : > { %10762 = vrcp.f32 %v8551_v45  ;;  %v7908_v63 = vpop.f32.mrf.mxu1 }
 0x8c7   : > { %v8091_v52 = vrot.slane %v7908_v63, 2  ;;  %v15187_v63 = vld [vmem:[#allocation18_spill] sm:$0xff] }
 0x8c8   : > { %v14320_v6 = vpop.f32.mrf.mxu0 }
 0x8c9   : > { %v8215_v54 = vadd.f32 %v8091_v52, %v14068_v29  ;;  %v7751_v16 = vrot.slane %v14320_v6, 1 }
 0x8cb   : > { %v10761_v20 = vpop.eup %10760  ;;  %v6714_v50 = vpop.f32.mrf.mxu2 }
 0x8cc   : > { %v7422_v38 = vpop.f32.mrf.mxu3  ;;  %v10763_v58 = vpop.eup %10762  ;;  %v8552_v46 = vadd.f32 1.0, %v10761_v20  ;;  %v6877_v17 = vrot.slane %v6714_v50, 2  ;;  %v8648_v20 = vunpack.c.l.bf16 %v15187_v63 }
 0x8cd   : > { %v8615_v56 = vmul.f32 %v10763_v58, %v8423_v24 }
 0x8ce   : > { %10764 = vrcp.f32 %v8552_v46  ;;  %v6991_v59 = vadd.f32 %v6877_v17, %v13735_v34  ;;  %v7911_v26 = vpop.f32.mrf.mxu1 }
 0x8cf   : > { %v8679_v5 = vadd.f32 %v8647_v18, %v8615_v56  ;;  %v8092_v13 = vrot.slane %v7911_v26, 2  ;;  %v8315_v18 = vrot.slane %v8215_v54, 7 }
 0x8d0   : > { %v14324_v42 = vpop.f32.mrf.mxu0  ;;  %v7522_v23 = vadd.f32 %v7420_v57, %v6991_v59  ;;  %10088 = vmatmul.msk.bf16.gmra.mxu2 %vm4822_vm5, %v10951_v3  ;;  %10254 = vmatmul.msk.bf16.gmra.mxu3 %vm4822_vm5, %v14268_v25 }
 0x8d1   : > { %v7752_v24 = vrot.slane %v14324_v42, 1  ;;  %8711 = vst.msk [vmem:[%s14270_s26 + $0x10] sm:$0xff] %vm636_vm1, %v8679_v5  ;;  %v8093_v34 = vsel %vm1435_vm3, %v8091_v52, %v8092_v13  ;;  %10320 = vmatmul.msk.bf16.gmra.mxu1 %vm4822_vm5, %v13997_v0  ;;  %v15195_v42 = vld [vmem:[#allocation52_spill] sm:$0xff] }
 0x8d2   : > { %v8216_v29 = vadd.f32 %v8093_v34, %v14073_v4  ;;  %v14351_v45 = vadd.f32 %v15186_v35, %v7522_v23 }
 0x8d3   : > { %v14345_v57 = vsel %vm1072_vm2, %v7751_v16, %v7752_v24  ;;  %10294 = vmatmul.msk.bf16.gmra.mxu0 %vm4822_vm5, %v14332_v49  ;;  %v6717_v0 = vpop.f32.mrf.mxu2 }
 0x8d4   : > { %v7425_v10 = vpop.f32.mrf.mxu3  ;;  %v10765_v4 = vpop.eup %10764  ;;  %v8316_v50 = vrot.slane %v8216_v29, 7  ;;  %v6878_v58 = vrot.slane %v6717_v0, 2 }
 0x8d5   : > { %v8616_v46 = vmul.f32 %v10765_v4, %v8424_v37 }
 0x8d6   : > { %v8317_v52 = vsel %vm4185_vm6, %v8315_v18, %v8316_v50  ;;  %v6879_v56 = vsel %vm1435_vm3, %v6877_v17, %v6878_v58  ;;  %v7913_v59 = vpop.f32.mrf.mxu1 }
 0x8d7   : > { %v8680_v26 = vadd.f32 %v8648_v20, %v8616_v46  ;;  %v8425_v41 = vadd.f32 %v14227_v33, %v8317_v52  ;;  %v6992_v5 = vadd.f32 %v6879_v56, %v13752_v40  ;;  %v8094_v23 = vrot.slane %v7913_v59, 2 }
 0x8d8   : > { %v7637_v3 = vpop.f32.mrf.mxu0 }
 0x8d9   : > { %8712 = vst.msk [vmem:[%s14270_s26 + $0x18] sm:$0xff] %vm636_vm1, %v8680_v26  ;;  %v8457_v34 = vsub.f32 0.0, %v8425_v41  ;;  %v7523_v35 = vadd.f32 %v7422_v38, %v6992_v5  ;;  %v8095_v54 = vsel %vm1435_vm3, %v8092_v13, %v8094_v23  ;;  %v15188_v5 = vrot.slane %v14260_v31, 1  ;;  %v15190_v31 = vld [vmem:[#allocation48_spill] sm:$0xff] }
 0x8da   : > { %v8217_v37 = vadd.f32 %v8095_v54, %v14088_v47  ;;  %v10952_v47 = vld [vmem:[#allocation3 + $0xd0] sm:$0xff] }
 0x8db   : > { %v8493_v29 = vmul.f32 1.442695, %v8457_v34  ;;  %v6719_v63 = vpop.f32.mrf.mxu2  ;;  %v14363_v17 = vadd.f32 %v14283_v21, %v7523_v35  ;;  %v14372_v21 = vld [vmem:[#allocation3 + $0xf0] sm:$0xff] }
 0x8dc   : > { %v7427_v0 = vpop.f32.mrf.mxu3  ;;  %v8318_v20 = vrot.slane %v8217_v37, 7  ;;  %v6880_v4 = vrot.slane %v6719_v63, 2  ;;  %v15189_v54 = vld [vmem:[#allocation20_spill] sm:$0xff] }
 0x8dd   : > { %10766 = vpow2.f32 %v8493_v29 }
 0x8de   : > { %v8319_v40 = vsel %vm4185_vm6, %v8316_v50, %v8318_v20  ;;  %v6881_v18 = vsel %vm1435_vm3, %v6878_v58, %v6880_v4  ;;  %v7916_v46 = vpop.f32.mrf.mxu1 }
 0x8df   : > { %v8426_v38 = vadd.f32 %v14227_v33, %v8319_v40  ;;  %v6993_v13 = vadd.f32 %v6881_v18, %v13747_v62 }
 0x8e0   : > { %v7639_v52 = vpop.f32.mrf.mxu0  ;;  %10089 = vmatmul.msk.bf16.gmra.mxu2 %vm4822_vm5, %v10952_v47  ;;  %10255 = vmatmul.msk.bf16.gmra.mxu3 %vm4822_vm5, %v14310_v43 }
 0x8e1   : > { %v8458_v56 = vsub.f32 0.0, %v8426_v38  ;;  %v7524_v59 = vadd.f32 %v7425_v10, %v6993_v13  ;;  %10321 = vmatmul.msk.bf16.gmra.mxu1 %vm4822_vm5, %v14027_v51  ;;  %v8649_v51 = vunpack.c.l.bf16 %v15189_v54 }
 0x8e3   : > { %10295 = vmatmul.msk.bf16.gmra.mxu0 %vm4822_vm5, %v14372_v21  ;;  %v10767_v50 = vpop.eup %10766  ;;  %v8495_v58 = vmul.f32 1.442695, %v8458_v56  ;;  %v6722_v62 = vpop.f32.mrf.mxu2  ;;  %v14380_v23 = vadd.f32 %v15188_v5, %v7524_v59 }
 0x8e4   : > { %v7429_v26 = vpop.f32.mrf.mxu3  ;;  %v8553_v3 = vadd.f32 1.0, %v10767_v50  ;;  %v10953_v50 = vld [vmem:[#allocation3 + $0xd8] sm:$0xff] }
 0x8e5   : > { %10768 = vpow2.f32 %v8495_v58  ;;  %v14392_v58 = vld [vmem:[#allocation3 + $0xf8] sm:$0xff] }
 0x8e6   : > { %10770 = vrcp.f32 %v8553_v3  ;;  %v7917_v34 = vpop.f32.mrf.mxu1 }
 0x8e7   : > { %v8096_v20 = vrot.slane %v7917_v34, 2 }
 0x8e8   : > { %v14382_v35 = vpop.f32.mrf.mxu0 }
 0x8e9   : > { %v8218_v56 = vadd.f32 %v8096_v20, %v14121_v1 }
 0x8eb   : > { %v10769_v10 = vpop.eup %10768  ;;  %v6723_v37 = vpop.f32.mrf.mxu2  ;;  %v8320_v54 = vrot.slane %v8218_v56, 7 }
 0x8ec   : > { %v7431_v29 = vpop.f32.mrf.mxu3  ;;  %v10771_v63 = vpop.eup %10770  ;;  %v8554_v0 = vadd.f32 1.0, %v10769_v10  ;;  %v6882_v4 = vrot.slane %v6723_v37, 2 }
 0x8ed   : > { %v8617_v40 = vmul.f32 %v10771_v63, %v8425_v41 }
 0x8ee   : > { %10772 = vrcp.f32 %v8554_v0  ;;  %v6994_v18 = vadd.f32 %v6882_v4, %v15190_v31  ;;  %v7920_v46 = vpop.f32.mrf.mxu1 }
 0x8ef   : > { %v8681_v13 = vadd.f32 %v8649_v51, %v8617_v40  ;;  %v8097_v52 = vrot.slane %v7920_v46, 2 }
 0x8f0   : > { %v14386_v47 = vpop.f32.mrf.mxu0  ;;  %v7525_v59 = vadd.f32 %v7429_v26, %v6994_v18  ;;  %10090 = vmatmul.msk.bf16.gmra.mxu2 %vm4822_vm5, %v10953_v50  ;;  %10256 = vmatmul.msk.bf16.gmra.mxu3 %vm4822_vm5, %v14332_v49  ;;  %v15191_v26 = vld [vmem:[#allocation22_spill] sm:$0xff] }
 0x8f1   : > { %8713 = vst.msk [vmem:[%s14270_s26 + $0x20] sm:$0xff] %vm636_vm1, %v8681_v13  ;;  %v8098_v41 = vsel %vm1435_vm3, %v8096_v20, %v8097_v52  ;;  %10322 = vmatmul.msk.bf16.gmra.mxu1 %vm4822_vm5, %v14050_v7  ;;  %v8650_v5 = vunpack.c.l.bf16 %v15191_v26 }
 0x8f2   : > { %v8219_v62 = vadd.f32 %v8098_v41, %v14126_v60  ;;  %v14404_v1 = vadd.f32 %v7751_v16, %v7525_v59  ;;  %v15192_v16 = vld [vmem:[#allocation63_spill] sm:$0xff] }
 0x8f3   : > { %10296 = vmatmul.msk.bf16.gmra.mxu0 %vm4822_vm5, %v14392_v58  ;;  %v6726_v3 = vpop.f32.mrf.mxu2 }
 0x8f4   : > { %v7434_v34 = vpop.f32.mrf.mxu3  ;;  %v10773_v10 = vpop.eup %10772  ;;  %v8321_v51 = vrot.slane %v8219_v62, 7  ;;  %v6883_v37 = vrot.slane %v6726_v3, 2 }
 0x8f5   : > { %v8618_v63 = vmul.f32 %v10773_v10, %v8426_v38 }
 0x8f6   : > { %v8322_v7 = vsel %vm4185_vm6, %v8320_v54, %v8321_v51  ;;  %v6884_v60 = vsel %vm1435_vm3, %v6882_v4, %v6883_v37  ;;  %v7922_v0 = vpop.f32.mrf.mxu1  ;;  %v15193_v54 = vld [vmem:[#allocation50_spill] sm:$0xff] }
 0x8f7   : > { %v8682_v20 = vadd.f32 %v8650_v5, %v8618_v63  ;;  %v8427_v6 = vadd.f32 %v14227_v33, %v8322_v7  ;;  %v6995_v40 = vadd.f32 %v6884_v60, %v15192_v16  ;;  %v8099_v31 = vrot.slane %v7922_v0, 2 }
 0x8f8   : > { %v7645_v18 = vpop.f32.mrf.mxu0 }
 0x8f9   : > { %8714 = vst.msk [vmem:[%s14270_s26 + $0x28] sm:$0xff] %vm636_vm1, %v8682_v20  ;;  %v8459_v46 = vsub.f32 0.0, %v8427_v6  ;;  %v7526_v13 = vadd.f32 %v7431_v29, %v6995_v40  ;;  %v8100_v56 = vsel %vm1435_vm3, %v8097_v52, %v8099_v31 }
 0x8fa   : > { %v8220_v38 = vadd.f32 %v8100_v56, %v14141_v9  ;;  %v10954_v9 = vld [vmem:[#allocation3 + $0xe0] sm:$0xff] }
 0x8fb   : > { %v8497_v59 = vmul.f32 1.442695, %v8459_v46  ;;  %v6728_v50 = vpop.f32.mrf.mxu2  ;;  %v14416_v4 = vadd.f32 %v14345_v57, %v7526_v13  ;;  %v14425_v57 = vld [vmem:[#allocation3 + $0x100] sm:$0xff]  ;;  %v15194_v46 = vld [vmem:[#allocation24_spill] sm:$0xff] }
 0x8fc   : > { %v7436_v41 = vpop.f32.mrf.mxu3  ;;  %v8323_v62 = vrot.slane %v8220_v38, 7  ;;  %v6885_v26 = vrot.slane %v6728_v50, 2 }
 0x8fd   : > { %10774 = vpow2.f32 %v8497_v59 }
 0x8fe   : > { %v8324_v5 = vsel %vm4185_vm6, %v8321_v51, %v8323_v62  ;;  %v6886_v3 = vsel %vm1435_vm3, %v6883_v37, %v6885_v26  ;;  %v7925_v10 = vpop.f32.mrf.mxu1 }
 0x8ff   : > { %v8428_v29 = vadd.f32 %v14227_v33, %v8324_v5  ;;  %v6996_v52 = vadd.f32 %v6886_v3, %v15193_v54 }
 0x900   : > { %v7647_v63 = vpop.f32.mrf.mxu0  ;;  %10091 = vmatmul.msk.bf16.gmra.mxu2 %vm4822_vm5, %v10954_v9  ;;  %10257 = vmatmul.msk.bf16.gmra.mxu3 %vm4822_vm5, %v14372_v21 }
 0x901   : > { %v8460_v7 = vsub.f32 0.0, %v8428_v29  ;;  %v7527_v60 = vadd.f32 %v7434_v34, %v6996_v52  ;;  %10323 = vmatmul.msk.bf16.gmra.mxu1 %vm4822_vm5, %v14080_v12  ;;  %v8651_v12 = vunpack.c.l.bf16 %v15194_v46  ;;  %v10955_v63 = vld [vmem:[#allocation3 + $0xe8] sm:$0xff] }
 0x903   : > { %10297 = vmatmul.msk.bf16.gmra.mxu0 %vm4822_vm5, %v14425_v57  ;;  %v10775_v51 = vpop.eup %10774  ;;  %v8499_v37 = vmul.f32 1.442695, %v8460_v7  ;;  %v6731_v0 = vpop.f32.mrf.mxu2  ;;  %v14433_v16 = vadd.f32 %v7752_v24, %v7527_v60  ;;  %v14449_v7 = vld [vmem:[#allocation3 + $0x108] sm:$0xff] }
 0x904   : > { %v7438_v20 = vpop.f32.mrf.mxu3  ;;  %v8555_v40 = vadd.f32 1.0, %v10775_v51 }
 0x905   : > { %10776 = vpow2.f32 %v8499_v37  ;;  %v15196_v37 = vld [vmem:[#allocation26_spill] sm:$0xff] }
 0x906   : > { %10778 = vrcp.f32 %v8555_v40  ;;  %v7926_v31 = vpop.f32.mrf.mxu1  ;;  %v8652_v0 = vunpack.c.l.bf16 %v15196_v37 }
 0x907   : > { %v8101_v50 = vrot.slane %v7926_v31, 2 }
 0x908   : > { %v14435_v18 = vpop.f32.mrf.mxu0 }
 0x909   : > { %v8221_v54 = vadd.f32 %v8101_v50, %v14171_v48 }
 0x90b   : > { %v10777_v34 = vpop.eup %10776  ;;  %v6732_v13 = vpop.f32.mrf.mxu2 }
 0x90c   : > { %v7440_v56 = vpop.f32.mrf.mxu3  ;;  %v10779_v38 = vpop.eup %10778  ;;  %v8556_v59 = vadd.f32 1.0, %v10777_v34  ;;  %v6887_v41 = vrot.slane %v6732_v13, 2  ;;  %v8325_v34 = vrot.slane %v8221_v54, 7 }
 0x90d   : > { %v8619_v62 = vmul.f32 %v10779_v38, %v8427_v6  ;;  %v7757_v6 = vrot.slane %v14435_v18, 1 }
 0x90e   : > { %10780 = vrcp.f32 %v8556_v59  ;;  %v6997_v24 = vadd.f32 %v6887_v41, %v15195_v42  ;;  %v7929_v26 = vpop.f32.mrf.mxu1  ;;  %v15197_v42 = vld [vmem:[#allocation51_spill] sm:$0xff] }
 0x90f   : > { %v8683_v5 = vadd.f32 %v8651_v12, %v8619_v62  ;;  %v8102_v3 = vrot.slane %v7929_v26, 2  ;;  %v7755_v12 = vrot.slane %v14386_v47, 1 }
 0x910   : > { %v14439_v10 = vpop.f32.mrf.mxu0  ;;  %v14442_v52 = vadd.f32 %v7438_v20, %v6997_v24  ;;  %10092 = vmatmul.msk.bf16.gmra.mxu2 %vm4822_vm5, %v10955_v63  ;;  %10258 = vmatmul.msk.bf16.gmra.mxu3 %vm4822_vm5, %v14392_v58  ;;  %v7754_v63 = vrot.slane %v14382_v35, 1 }
 0x911   : > { %v7758_v9 = vrot.slane %v14439_v10, 1  ;;  %8715 = vst.msk [vmem:[%s14270_s26 + $0x30] sm:$0xff] %vm636_vm1, %v8683_v5  ;;  %v8103_v60 = vsel %vm1435_vm3, %v8101_v50, %v8102_v3  ;;  %10324 = vmatmul.msk.bf16.gmra.mxu1 %vm4822_vm5, %v14103_v8 }
 0x912   : > { %v8222_v48 = vadd.f32 %v8103_v60, %v14179_v44 }
 0x913   : > { %v14462_v51 = vsel %vm1072_vm2, %v7757_v6, %v7758_v9  ;;  %10298 = vmatmul.msk.bf16.gmra.mxu0 %vm4822_vm5, %v14449_v7  ;;  %v6735_v20 = vpop.f32.mrf.mxu2 }
 0x914   : > { %v7443_v40 = vpop.f32.mrf.mxu3  ;;  %v10781_v31 = vpop.eup %10780  ;;  %v8326_v8 = vrot.slane %v8222_v48, 7  ;;  %v6888_v46 = vrot.slane %v6735_v20, 2 }
 0x915   : > { %v8620_v44 = vmul.f32 %v10781_v31, %v8428_v29 }
 0x916   : > { %v8327_v13 = vsel %vm4185_vm6, %v8325_v34, %v8326_v8  ;;  %v6889_v38 = vsel %vm1435_vm3, %v6887_v41, %v6888_v46  ;;  %v7931_v59 = vpop.f32.mrf.mxu1  ;;  %v7756_v41 = vsel %vm1072_vm2, %v7754_v63, %v7755_v12 }
 0x917   : > { %v8684_v50 = vadd.f32 %v8652_v0, %v8620_v44  ;;  %v8429_v62 = vadd.f32 %v14227_v33, %v8327_v13  ;;  %v6998_v24 = vadd.f32 %v6889_v38, %v15197_v42  ;;  %v8104_v26 = vrot.slane %v7931_v59, 2  ;;  %v15198_v38 = vld [vmem:[#allocation53_spill] sm:$0xff]  ;;  %v10956_v42 = vld [vmem:[#allocation3 + $0xf0] sm:$0xff] }
 0x918   : > { %v7653_v5 = vpop.f32.mrf.mxu0 }
 0x919   : > { %8716 = vst.msk [vmem:[%s14270_s26 + $0x38] sm:$0xff] %vm636_vm1, %v8684_v50  ;;  %v8461_v54 = vsub.f32 0.0, %v8429_v62  ;;  %v7529_v29 = vadd.f32 %v7440_v56, %v6998_v24  ;;  %v8105_v47 = vsel %vm1435_vm3, %v8102_v3, %v8104_v26 }
 0x91a   : > { %v8223_v60 = vadd.f32 %v8105_v47, %v14194_v55 }
 0x91b   : > { %v8501_v48 = vmul.f32 1.442695, %v8461_v54  ;;  %v6737_v37 = vpop.f32.mrf.mxu2  ;;  %v14480_v20 = vadd.f32 %v7756_v41, %v7529_v29 }
 0x91c   : > { %v7445_v0 = vpop.f32.mrf.mxu3  ;;  %v8328_v31 = vrot.slane %v8223_v60, 7  ;;  %v6890_v34 = vrot.slane %v6737_v37, 2  ;;  %v14495_v60 = vld [vmem:[#allocation3 + $0x110] sm:$0xff] }
 0x91d   : > { %10782 = vpow2.f32 %v8501_v48  ;;  %v15199_v37 = vld [vmem:[#allocation28_spill] sm:$0xff] }
 0x91e   : > { %v8329_v44 = vsel %vm4185_vm6, %v8326_v8, %v8328_v31  ;;  %v6891_v56 = vsel %vm1435_vm3, %v6888_v46, %v6890_v34  ;;  %v7934_v13 = vpop.f32.mrf.mxu1 }
 0x91f   : > { %v8430_v3 = vadd.f32 %v14227_v33, %v8329_v44  ;;  %v6999_v59 = vadd.f32 %v6891_v56, %v15198_v38  ;;  %v15200_v13 = vld [vmem:[#allocation54_spill] sm:$0xff] }
 0x920   : > { %v7655_v50 = vpop.f32.mrf.mxu0  ;;  %10093 = vmatmul.msk.bf16.gmra.mxu2 %vm4822_vm5, %v10956_v42  ;;  %10259 = vmatmul.msk.bf16.gmra.mxu3 %vm4822_vm5, %v14425_v57 }
 0x921   : > { %v8462_v55 = vsub.f32 0.0, %v8430_v3  ;;  %v7530_v24 = vadd.f32 %v7443_v40, %v6999_v59  ;;  %10325 = vmatmul.msk.bf16.gmra.mxu1 %vm4822_vm5, %v14133_v11  ;;  %v8653_v40 = vunpack.c.l.bf16 %v15199_v37 }
 0x923   : > { %v10783_v8 = vpop.eup %10782  ;;  %v8503_v26 = vmul.f32 1.442695, %v8462_v55  ;;  %v6740_v46 = vpop.f32.mrf.mxu2  ;;  %v14491_v54 = vadd.f32 %v7755_v12, %v7530_v24  ;;  %10299 = vmatmul.msk.bf16.gmra.mxu0 %vm4822_vm5, %v14495_v60 }
 0x924   : > { %v7447_v5 = vpop.f32.mrf.mxu3  ;;  %v8557_v29 = vadd.f32 1.0, %v10783_v8 }
 0x925   : > { %10784 = vpow2.f32 %v8503_v26  ;;  %v10957_v26 = vld [vmem:[#allocation3 + $0xf8] sm:$0xff] }
 0x926   : > { %10786 = vrcp.f32 %v8557_v29  ;;  %v7935_v47 = vpop.f32.mrf.mxu1 }
 0x927   : > { %v8106_v12 = vrot.slane %v7935_v47, 2 }
 0x928   : > { %v14493_v41 = vpop.f32.mrf.mxu0 }
 0x929   : > { %v8224_v24 = vadd.f32 %v8106_v12, %v14222_v15  ;;  %v7760_v46 = vrot.slane %v14493_v41, 1 }
 0x92b   : > { %v10785_v48 = vpop.eup %10784  ;;  %v6741_v0 = vpop.f32.mrf.mxu2 }
 0x92c   : > { %v7449_v31 = vpop.f32.mrf.mxu3  ;;  %v10787_v11 = vpop.eup %10786  ;;  %v8558_v34 = vadd.f32 1.0, %v10785_v48  ;;  %v6892_v44 = vrot.slane %v6741_v0, 2  ;;  %v15201_v48 = vld [vmem:[#allocation30_spill] sm:$0xff] }
 0x92d   : > { %v8621_v56 = vmul.f32 %v10787_v11, %v8429_v62  ;;  %v8654_v37 = vunpack.c.l.bf16 %v15201_v48 }
 0x92e   : > { %10788 = vrcp.f32 %v8558_v34  ;;  %v7000_v38 = vadd.f32 %v6892_v44, %v15200_v13  ;;  %v7938_v59 = vpop.f32.mrf.mxu1 }
 0x92f   : > { %v8685_v50 = vadd.f32 %v8653_v40, %v8621_v56  ;;  %v8107_v42 = vrot.slane %v7938_v59, 2 }
 0x930   : > { %v14501_v55 = vpop.f32.mrf.mxu0  ;;  %v7531_v8 = vadd.f32 %v7447_v5, %v7000_v38  ;;  %10094 = vmatmul.msk.bf16.gmra.mxu2 %vm4822_vm5, %v10957_v26  ;;  %10260 = vmatmul.msk.bf16.gmra.mxu3 %vm4822_vm5, %v14449_v7 }
 0x931   : > { %v7761_v62 = vrot.slane %v14501_v55, 1  ;;  %8717 = vst.msk [vmem:[%s14270_s26 + $0x40] sm:$0xff] %vm636_vm1, %v8685_v50  ;;  %v8108_v29 = vsel %vm1435_vm3, %v8106_v12, %v8107_v42  ;;  %10326 = vmatmul.msk.bf16.gmra.mxu1 %vm4822_vm5, %v14156_v32  ;;  %v8330_v32 = vrot.slane %v8224_v24, 7  ;;  %v15207_v55 = vld [vmem:[#allocation56_spill] sm:$0xff] }
 0x932   : > { %v8225_v15 = vadd.f32 %v8108_v29, %v14236_v61  ;;  %v14524_v47 = vadd.f32 %v7757_v6, %v7531_v8  ;;  %v15202_v6 = vld [vmem:[#allocation58_spill] sm:$0xff] }
 0x933   : > { %v14520_v5 = vsel %vm1072_vm2, %v7760_v46, %v7761_v62  ;;  %v6744_v40 = vpop.f32.mrf.mxu2 }
 0x934   : > { %v7452_v0 = vpop.f32.mrf.mxu3  ;;  %v10789_v11 = vpop.eup %10788  ;;  %v8331_v34 = vrot.slane %v8225_v15, 7  ;;  %v6893_v61 = vrot.slane %v6744_v40, 2  ;;  %v14534_v15 = vld [vmem:[#allocation3 + $0x118] sm:$0xff] }
 0x935   : > { %v8622_v12 = vmul.f32 %v10789_v11, %v8430_v3  ;;  %10300 = vmatmul.msk.bf16.gmra.mxu0 %vm4822_vm5, %v14534_v15 }
 0x936   : > { %v8332_v56 = vsel %vm4185_vm6, %v8330_v32, %v8331_v34  ;;  %v6894_v13 = vsel %vm1435_vm3, %v6892_v44, %v6893_v61  ;;  %v7940_v38 = vpop.f32.mrf.mxu1 }
 0x937   : > { %v8686_v59 = vadd.f32 %v8654_v37, %v8622_v12  ;;  %v8431_v18 = vadd.f32 %v14227_v33, %v8332_v56  ;;  %v7001_v50 = vadd.f32 %v6894_v13, %v15202_v6  ;;  %v8109_v8 = vrot.slane %v7940_v38, 2  ;;  %v10958_v6 = vld [vmem:[#allocation3 + $0x100] sm:$0xff] }
 0x938   : > { %v7661_v26 = vpop.f32.mrf.mxu0 }
 0x939   : > { %8718 = vst.msk [vmem:[%s14270_s26 + $0x48] sm:$0xff] %vm636_vm1, %v8686_v59  ;;  %v8463_v29 = vsub.f32 0.0, %v8431_v18  ;;  %v7532_v48 = vadd.f32 %v7449_v31, %v7001_v50  ;;  %v8110_v24 = vsel %vm1435_vm3, %v8107_v42, %v8109_v8 }
 0x93a   : > { %v8226_v3 = vadd.f32 %v8110_v24, %v14253_v19  ;;  %v15203_v19 = vld [vmem:[#allocation55_spill] sm:$0xff] }
 0x93b   : > { %v8505_v40 = vmul.f32 1.442695, %v8463_v29  ;;  %v6746_v44 = vpop.f32.mrf.mxu2  ;;  %v14540_v37 = vadd.f32 %v14462_v51, %v7532_v48 }
 0x93c   : > { %v7454_v11 = vpop.f32.mrf.mxu3  ;;  %v8333_v32 = vrot.slane %v8226_v3, 7  ;;  %v6895_v12 = vrot.slane %v6746_v44, 2  ;;  %v15204_v44 = vld [vmem:[#allocation32_spill] sm:$0xff] }
 0x93d   : > { %10790 = vpow2.f32 %v8505_v40 }
 0x93e   : > { %v8334_v31 = vsel %vm4185_vm6, %v8331_v34, %v8333_v32  ;;  %v6896_v42 = vsel %vm1435_vm3, %v6893_v61, %v6895_v12  ;;  %v7943_v56 = vpop.f32.mrf.mxu1 }
 0x93f   : > { %v8432_v13 = vadd.f32 %v14227_v33, %v8334_v31  ;;  %v7002_v38 = vadd.f32 %v6896_v42, %v15203_v19 }
 0x940   : > { %v7663_v59 = vpop.f32.mrf.mxu0  ;;  %10095 = vmatmul.msk.bf16.gmra.mxu2 %vm4822_vm5, %v10958_v6  ;;  %10261 = vmatmul.msk.bf16.gmra.mxu3 %vm4822_vm5, %v14495_v60 }
 0x941   : > { %v8464_v51 = vsub.f32 0.0, %v8432_v13  ;;  %v7533_v50 = vadd.f32 %v7452_v0, %v7002_v38  ;;  %10327 = vmatmul.msk.bf16.gmra.mxu1 %vm4822_vm5, %v14186_v39  ;;  %v8655_v0 = vunpack.c.l.bf16 %v15204_v44 }
 0x943   : > { %v10791_v34 = vpop.eup %10790  ;;  %v8507_v8 = vmul.f32 1.442695, %v8464_v51  ;;  %v6749_v61 = vpop.f32.mrf.mxu2  ;;  %v14553_v29 = vadd.f32 %v7758_v9, %v7533_v50  ;;  %v10959_v50 = vld [vmem:[#allocation3 + $0x108] sm:$0xff] }
 0x944   : > { %v7456_v26 = vpop.f32.mrf.mxu3  ;;  %v8559_v48 = vadd.f32 1.0, %v10791_v34 }
 0x945   : > { %10792 = vpow2.f32 %v8507_v8 }
 0x946   : > { %10794 = vrcp.f32 %v8559_v48  ;;  %v7944_v24 = vpop.f32.mrf.mxu1 }
 0x947   : > { %v8111_v31 = vrot.slane %v7944_v24, 2 }
 0x948   : > { %v14555_v3 = vpop.f32.mrf.mxu0 }
 0x949   : > { %v8227_v6 = vadd.f32 %v8111_v31, %v14289_v53  ;;  %v7763_v34 = vrot.slane %v14555_v3, 1  ;;  %v14638_v3 = vld [vmem:[%s14909_s4] ss:$0 sm:$0xff] }
 0x94b   : > { %v10793_v40 = vpop.eup %10792  ;;  %v6750_v11 = vpop.f32.mrf.mxu2 }
 0x94c   : > { %v7458_v32 = vpop.f32.mrf.mxu3  ;;  %v10795_v39 = vpop.eup %10794  ;;  %v8560_v12 = vadd.f32 1.0, %v10793_v40  ;;  %v6897_v42 = vrot.slane %v6750_v11, 2 }
 0x94d   : > { %v8623_v56 = vmul.f32 %v10795_v39, %v8431_v18 }
 0x94e   : > { %10796 = vrcp.f32 %v8560_v12  ;;  %v7003_v10 = vadd.f32 %v6897_v42, %v13934_v28  ;;  %v7947_v9 = vpop.f32.mrf.mxu1 }
 0x94f   : > { %v8687_v19 = vadd.f32 %v8655_v0, %v8623_v56  ;;  %v8112_v38 = vrot.slane %v7947_v9, 2 }
 0x950   : > { %v14559_v59 = vpop.f32.mrf.mxu0  ;;  %v7534_v51 = vadd.f32 %v7456_v26, %v7003_v10  ;;  %10096 = vmatmul.msk.bf16.gmra.mxu2 %vm4822_vm5, %v10959_v50  ;;  %10262 = vmatmul.msk.bf16.gmra.mxu3 %vm4822_vm5, %v14534_v15  ;;  %v15205_v26 = vld [vmem:[#allocation34_spill] sm:$0xff] }
 0x951   : > { %v7764_v18 = vrot.slane %v14559_v59, 1  ;;  %8719 = vst.msk [vmem:[%s14270_s26 + $0x50] sm:$0xff] %vm636_vm1, %v8687_v19  ;;  %v8113_v28 = vsel %vm1435_vm3, %v8111_v31, %v8112_v38  ;;  %10328 = vmatmul.msk.bf16.gmra.mxu1 %vm4822_vm5, %v14207_v2  ;;  %v8656_v48 = vunpack.c.l.bf16 %v15205_v26  ;;  %v8335_v2 = vrot.slane %v8227_v6, 7  ;;  %v15212_v59 = vld [vmem:[#allocation65_spill] sm:$0xff] }
 0x952   : > { %v8228_v53 = vadd.f32 %v8113_v28, %v14301_v27  ;;  %v14582_v61 = vadd.f32 %v7760_v46, %v7534_v51 }
 0x953   : > { %v14578_v8 = vsel %vm1072_vm2, %v7763_v34, %v7764_v18  ;;  %v6753_v24 = vpop.f32.mrf.mxu2 }
 0x954   : > { %v7461_v40 = vpop.f32.mrf.mxu3  ;;  %v10797_v44 = vpop.eup %10796  ;;  %v8336_v0 = vrot.slane %v8228_v53, 7  ;;  %v6898_v27 = vrot.slane %v6753_v24, 2 }
 0x955   : > { %v8624_v11 = vmul.f32 %v10797_v44, %v8432_v13 }
 0x956   : > { %v8337_v39 = vsel %vm4185_vm6, %v8335_v2, %v8336_v0  ;;  %v6899_v12 = vsel %vm1435_vm3, %v6897_v42, %v6898_v27  ;;  %v7949_v31 = vpop.f32.mrf.mxu1 }
 0x957   : > { %v8688_v56 = vadd.f32 %v8656_v48, %v8624_v11  ;;  %v8433_v41 = vadd.f32 %v14227_v33, %v8337_v39  ;;  %v7004_v46 = vadd.f32 %v6899_v12, %v13953_v22  ;;  %v8114_v10 = vrot.slane %v7949_v31, 2 }
 0x958   : > { %v7669_v9 = vpop.f32.mrf.mxu0 }
 0x959   : > { %8720 = vst.msk [vmem:[%s14270_s26 + $0x58] sm:$0xff] %vm636_vm1, %v8688_v56  ;;  %v8465_v19 = vsub.f32 0.0, %v8433_v41  ;;  %v7535_v51 = vadd.f32 %v7458_v32, %v7004_v46  ;;  %v8115_v6 = vsel %vm1435_vm3, %v8112_v38, %v8114_v10  ;;  %v15206_v46 = vld [vmem:[#allocation36_spill] sm:$0xff] }
 0x95a   : > { %v8229_v13 = vadd.f32 %v8115_v6, %v14318_v14 }
 0x95b   : > { %v8509_v50 = vmul.f32 1.442695, %v8465_v19  ;;  %v6755_v28 = vpop.f32.mrf.mxu2  ;;  %v14594_v42 = vadd.f32 %v14520_v5, %v7535_v51 }
 0x95c   : > { %v7463_v53 = vpop.f32.mrf.mxu3  ;;  %v8338_v26 = vrot.slane %v8229_v13, 7  ;;  %v6900_v48 = vrot.slane %v6755_v28, 2 }
 0x95d   : > { %10798 = vpow2.f32 %v8509_v50 }
 0x95e   : > { %v8339_v22 = vsel %vm4185_vm6, %v8336_v0, %v8338_v26  ;;  %v6901_v24 = vsel %vm1435_vm3, %v6898_v27, %v6900_v48  ;;  %v7952_v44 = vpop.f32.mrf.mxu1 }
 0x95f   : > { %v8434_v32 = vadd.f32 %v14227_v33, %v8339_v22  ;;  %v7005_v38 = vadd.f32 %v6901_v24, %v13948_v36 }
 0x960   : > { %v7671_v2 = vpop.f32.mrf.mxu0 }
 0x961   : > { %v8466_v14 = vsub.f32 0.0, %v8434_v32  ;;  %v7536_v11 = vadd.f32 %v7461_v40, %v7005_v38  ;;  %10329 = vmatmul.msk.bf16.gmra.mxu1 %vm4822_vm5, %v14245_v30  ;;  %v8657_v40 = vunpack.c.l.bf16 %v15206_v46 }
 0x963   : > { %v10799_v5 = vpop.eup %10798  ;;  %v8511_v39 = vmul.f32 1.442695, %v8466_v14  ;;  %v6758_v12 = vpop.f32.mrf.mxu2  ;;  %v14604_v0 = vadd.f32 %v7761_v62, %v7536_v11  ;;  %v15208_v14 = vld [vmem:[#allocation39_spill] sm:$0xff] }
 0x964   : > { %v7465_v31 = vpop.f32.mrf.mxu3  ;;  %v8561_v27 = vadd.f32 1.0, %v10799_v5  ;;  %v8658_v11 = vunpack.c.l.bf16 %v15208_v14 }
 0x965   : > { %10800 = vpow2.f32 %v8511_v39 }
 0x966   : > { %10802 = vrcp.f32 %v8561_v27  ;;  %v7953_v33 = vpop.f32.mrf.mxu1 }
 0x967   : > { %v8116_v51 = vrot.slane %v7953_v33, 2 }
 0x968   : > { %v14606_v56 = vpop.f32.mrf.mxu0 }
 0x969   : > { %v8230_v48 = vadd.f32 %v8116_v51, %v14351_v45  ;;  %v7766_v24 = vrot.slane %v14606_v56, 1 }
 0x96b   : > { %v10801_v36 = vpop.eup %10800  ;;  %v6759_v10 = vpop.f32.mrf.mxu2 }
 0x96c   : > { %v7467_v9 = vpop.f32.mrf.mxu3  ;;  %v10803_v30 = vpop.eup %10802  ;;  %v8562_v19 = vadd.f32 1.0, %v10801_v36  ;;  %v6902_v6 = vrot.slane %v6759_v10, 2  ;;  %v15209_v10 = vld [vmem:[#allocation64_spill] sm:$0xff] }
 0x96d   : > { %v8625_v13 = vmul.f32 %v10803_v30, %v8433_v41 }
 0x96e   : > { %10804 = vrcp.f32 %v8562_v19  ;;  %v7006_v62 = vadd.f32 %v6902_v6, %v15207_v55  ;;  %v7956_v50 = vpop.f32.mrf.mxu1 }
 0x96f   : > { %v8689_v28 = vadd.f32 %v8657_v40, %v8625_v13  ;;  %v8117_v53 = vrot.slane %v7956_v50, 2 }
 0x970   : > { %v14610_v26 = vpop.f32.mrf.mxu0  ;;  %v7537_v22 = vadd.f32 %v7465_v31, %v7006_v62 }
 0x971   : > { %v7767_v44 = vrot.slane %v14610_v26, 1  ;;  %8721 = vst.msk [vmem:[%s14270_s26 + $0x60] sm:$0xff] %vm636_vm1, %v8689_v28  ;;  %v8118_v38 = vsel %vm1435_vm3, %v8116_v51, %v8117_v53  ;;  %10330 = vmatmul.msk.bf16.gmra.mxu1 %vm4822_vm5, %v14268_v25  ;;  %v8340_v25 = vrot.slane %v8230_v48, 7  ;;  %v7850_v26 = vadd.f32 %v7754_v63, %v14442_v52  ;;  %v15218_v52 = vld [vmem:[#allocation15_spill] sm:$0xff] }
 0x972   : > { %v8231_v41 = vadd.f32 %v8118_v38, %v14363_v17  ;;  %v14630_v2 = vadd.f32 %v7763_v34, %v7537_v22  ;;  %v8662_v63 = vunpack.c.l.bf16 %v15218_v52 }
 0x973   : > { %v14626_v45 = vsel %vm1072_vm2, %v7766_v24, %v7767_v44  ;;  %v6762_v5 = vpop.f32.mrf.mxu2 }
 0x974   : > { %v7470_v39 = vpop.f32.mrf.mxu3  ;;  %v10805_v12 = vpop.eup %10804  ;;  %v8341_v31 = vrot.slane %v8231_v41, 7  ;;  %v6903_v17 = vrot.slane %v6762_v5, 2  ;;  %v15210_v5 = vld [vmem:[#allocation60_spill] sm:$0xff] }
 0x975   : > { %v8626_v27 = vmul.f32 %v10805_v12, %v8434_v32 }
 0x976   : > { %v8342_v33 = vsel %vm4185_vm6, %v8340_v25, %v8341_v31  ;;  %v6904_v36 = vsel %vm1435_vm3, %v6902_v6, %v6903_v17  ;;  %v7958_v46 = vpop.f32.mrf.mxu1 }
 0x977   : > { %v8690_v40 = vadd.f32 %v8658_v11, %v8626_v27  ;;  %v8435_v34 = vadd.f32 %v14638_v3, %v8342_v33  ;;  %v7007_v30 = vadd.f32 %v6904_v36, %v15209_v10  ;;  %v8119_v19 = vrot.slane %v7958_v46, 2 }
 0x978   : > { %v7677_v51 = vpop.f32.mrf.mxu0 }
 0x979   : > { %8722 = vst.msk [vmem:[%s14270_s26 + $0x68] sm:$0xff] %vm636_vm1, %v8690_v40  ;;  %v8467_v32 = vsub.f32 0.0, %v8435_v34  ;;  %v7538_v13 = vadd.f32 %v7467_v9, %v7007_v30  ;;  %v8120_v55 = vsel %vm1435_vm3, %v8117_v53, %v8119_v19  ;;  %v15211_v30 = vld [vmem:[#allocation10_spill] sm:$0xff] }
 0x97a   : > { %v8232_v6 = vadd.f32 %v8120_v55, %v14380_v23 }
 0x97b   : > { %v8513_v62 = vmul.f32 1.442695, %v8467_v32  ;;  %v6764_v50 = vpop.f32.mrf.mxu2  ;;  %v14647_v48 = vadd.f32 %v14578_v8, %v7538_v13 }
 0x97c   : > { %v7472_v28 = vpop.f32.mrf.mxu3  ;;  %v8343_v22 = vrot.slane %v8232_v6, 7  ;;  %v6905_v38 = vrot.slane %v6764_v50, 2 }
 0x97d   : > { %10806 = vpow2.f32 %v8513_v62 }
 0x97e   : > { %v8344_v41 = vsel %vm4185_vm6, %v8341_v31, %v8343_v22  ;;  %v6906_v14 = vsel %vm1435_vm3, %v6903_v17, %v6905_v38  ;;  %v7961_v11 = vpop.f32.mrf.mxu1 }
 0x97f   : > { %v8436_v9 = vadd.f32 %v14638_v3, %v8344_v41  ;;  %v7008_v53 = vadd.f32 %v6906_v14, %v15210_v5 }
 0x980   : > { %v7679_v12 = vpop.f32.mrf.mxu0 }
 0x981   : > { %v8468_v23 = vsub.f32 0.0, %v8436_v9  ;;  %v7539_v25 = vadd.f32 %v7470_v39, %v7008_v53  ;;  %10331 = vmatmul.msk.bf16.gmra.mxu1 %vm4822_vm5, %v14310_v43  ;;  %v8659_v39 = vunpack.c.l.bf16 %v15211_v30  ;;  %v15213_v12 = vld [vmem:[#allocation11_spill] sm:$0xff] }
 0x983   : > { %v10807_v8 = vpop.eup %10806  ;;  %v8515_v27 = vmul.f32 1.442695, %v8468_v23  ;;  %v6767_v33 = vpop.f32.mrf.mxu2  ;;  %v14657_v31 = vadd.f32 %v7764_v18, %v7539_v25  ;;  %v8660_v23 = vunpack.c.l.bf16 %v15213_v12  ;;  %v15215_v12 = vld [vmem:[#allocation66_spill] sm:$0xff] }
 0x984   : > { %v7474_v36 = vpop.f32.mrf.mxu3  ;;  %v8563_v17 = vadd.f32 1.0, %v10807_v8 }
 0x985   : > { %10808 = vpow2.f32 %v8515_v27 }
 0x986   : > { %10810 = vrcp.f32 %v8563_v17  ;;  %v7962_v46 = vpop.f32.mrf.mxu1 }
 0x987   : > { %v8121_v13 = vrot.slane %v7962_v46, 2 }
 0x988   : > { %v14659_v40 = vpop.f32.mrf.mxu0 }
 0x989   : > { %v8233_v38 = vadd.f32 %v8121_v13, %v14404_v1  ;;  %v7769_v14 = vrot.slane %v14659_v40, 1 }
 0x98b   : > { %v10809_v10 = vpop.eup %10808  ;;  %v6768_v19 = vpop.f32.mrf.mxu2 }
 0x98c   : > { %v7476_v51 = vpop.f32.mrf.mxu3  ;;  %v10811_v43 = vpop.eup %10810  ;;  %v8564_v32 = vadd.f32 1.0, %v10809_v10  ;;  %v6907_v55 = vrot.slane %v6768_v19, 2 }
 0x98d   : > { %v8627_v6 = vmul.f32 %v10811_v43, %v8435_v34 }
 0x98e   : > { %10812 = vrcp.f32 %v8564_v32  ;;  %v7009_v18 = vadd.f32 %v6907_v55, %v15212_v59  ;;  %v7965_v62 = vpop.f32.mrf.mxu1 }
 0x98f   : > { %v8691_v50 = vadd.f32 %v8659_v39, %v8627_v6  ;;  %v8122_v28 = vrot.slane %v7965_v62, 2 }
 0x990   : > { %v14663_v22 = vpop.f32.mrf.mxu0  ;;  %v7540_v41 = vadd.f32 %v7474_v36, %v7009_v18 }
 0x991   : > { %v7770_v11 = vrot.slane %v14663_v22, 1  ;;  %8723 = vst.msk [vmem:[%s14270_s26 + $0x70] sm:$0xff] %vm636_vm1, %v8691_v50  ;;  %v8123_v5 = vsel %vm1435_vm3, %v8121_v13, %v8122_v28  ;;  %10332 = vmatmul.msk.bf16.gmra.mxu1 %vm4822_vm5, %v14332_v49  ;;  %v8345_v49 = vrot.slane %v8233_v38, 7 }
 0x992   : > { %v8234_v34 = vadd.f32 %v8123_v5, %v14416_v4  ;;  %v14683_v53 = vadd.f32 %v7766_v24, %v7540_v41  ;;  %v15214_v24 = vld [vmem:[#allocation67_spill] sm:$0xff] }
 0x993   : > { %v14679_v1 = vsel %vm1072_vm2, %v7769_v14, %v7770_v11  ;;  %v6771_v25 = vpop.f32.mrf.mxu2 }
 0x994   : > { %v7479_v8 = vpop.f32.mrf.mxu3  ;;  %v10813_v27 = vpop.eup %10812  ;;  %v8346_v33 = vrot.slane %v8234_v34, 7  ;;  %v6908_v4 = vrot.slane %v6771_v25, 2 }
 0x995   : > { %v8628_v36 = vmul.f32 %v10813_v27, %v8436_v9 }
 0x996   : > { %v8347_v17 = vsel %vm4185_vm6, %v8345_v49, %v8346_v33  ;;  %v6909_v46 = vsel %vm1435_vm3, %v6907_v55, %v6908_v4  ;;  %v7967_v10 = vpop.f32.mrf.mxu1 }
 0x997   : > { %v8692_v30 = vadd.f32 %v8660_v23, %v8628_v36  ;;  %v8437_v56 = vadd.f32 %v14638_v3, %v8347_v17  ;;  %v7010_v39 = vadd.f32 %v6909_v46, %v15214_v24  ;;  %v8124_v19 = vrot.slane %v7967_v10, 2  ;;  %v15216_v10 = vld [vmem:[#allocation13_spill] sm:$0xff] }
 0x998   : > { %v7685_v43 = vpop.f32.mrf.mxu0 }
 0x999   : > { %8724 = vst.msk [vmem:[%s14270_s26 + $0x78] sm:$0xff] %vm636_vm1, %v8692_v30  ;;  %v8469_v32 = vsub.f32 0.0, %v8437_v56  ;;  %v7541_v13 = vadd.f32 %v7476_v51, %v7010_v39  ;;  %v8125_v6 = vsel %vm1435_vm3, %v8122_v28, %v8124_v19  ;;  %v8661_v30 = vunpack.c.l.bf16 %v15216_v10 }
 0x99a   : > { %v8235_v9 = vadd.f32 %v8125_v6, %v14433_v16 }
 0x99b   : > { %v8517_v59 = vmul.f32 1.442695, %v8469_v32  ;;  %v6773_v18 = vpop.f32.mrf.mxu2  ;;  %v14695_v55 = vadd.f32 %v14626_v45, %v7541_v13 }
 0x99c   : > { %v7481_v62 = vpop.f32.mrf.mxu3  ;;  %v8348_v50 = vrot.slane %v8235_v9, 7  ;;  %v6910_v38 = vrot.slane %v6773_v18, 2 }
 0x99d   : > { %10814 = vpow2.f32 %v8517_v59 }
 0x99e   : > { %v8349_v41 = vsel %vm4185_vm6, %v8346_v33, %v8348_v50  ;;  %v6911_v5 = vsel %vm1435_vm3, %v6908_v4, %v6910_v38  ;;  %v7970_v34 = vpop.f32.mrf.mxu1 }
 0x99f   : > { %v8438_v51 = vadd.f32 %v14638_v3, %v8349_v41  ;;  %v7011_v28 = vadd.f32 %v6911_v5, %v15215_v12 }
 0x9a0   : > { %v7687_v17 = vpop.f32.mrf.mxu0 }
 0x9a1   : > { %v8470_v23 = vsub.f32 0.0, %v8438_v51  ;;  %v7542_v16 = vadd.f32 %v7479_v8, %v7011_v28  ;;  %10333 = vmatmul.msk.bf16.gmra.mxu1 %vm4822_vm5, %v14372_v21 }
 0x9a3   : > { %v10815_v25 = vpop.eup %10814  ;;  %v8519_v45 = vmul.f32 1.442695, %v8470_v23  ;;  %v6776_v27 = vpop.f32.mrf.mxu2  ;;  %v14705_v36 = vadd.f32 %v7767_v44, %v7542_v16  ;;  %v15217_v44 = vld [vmem:[#allocation62_spill] sm:$0xff] }
 0x9a4   : > { %v7483_v49 = vpop.f32.mrf.mxu3  ;;  %v8565_v33 = vadd.f32 1.0, %v10815_v25 }
 0x9a5   : > { %10816 = vpow2.f32 %v8519_v45 }
 0x9a6   : > { %10818 = vrcp.f32 %v8565_v33  ;;  %v7971_v4 = vpop.f32.mrf.mxu1 }
 0x9a7   : > { %v8126_v19 = vrot.slane %v7971_v4, 2 }
 0x9a8   : > { %v14712_v50 = vpop.f32.mrf.mxu0 }
 0x9a9   : > { %v8236_v18 = vadd.f32 %v8126_v19, %v7850_v26  ;;  %v7772_v33 = vrot.slane %v14712_v50, 1 }
 0x9ab   : > { %v10817_v46 = vpop.eup %10816  ;;  %v6777_v8 = vpop.f32.mrf.mxu2  ;;  %v8350_v12 = vrot.slane %v8236_v18, 7 }
 0x9ac   : > { %v7485_v24 = vpop.f32.mrf.mxu3  ;;  %v10819_v21 = vpop.eup %10818  ;;  %v8566_v39 = vadd.f32 1.0, %v10817_v46  ;;  %v6912_v43 = vrot.slane %v6777_v8, 2 }
 0x9ad   : > { %v8629_v32 = vmul.f32 %v10819_v21, %v8437_v56 }
 0x9ae   : > { %10820 = vrcp.f32 %v8566_v39  ;;  %v7012_v13 = vadd.f32 %v6912_v43, %v15217_v44  ;;  %v7974_v6 = vpop.f32.mrf.mxu1 }
 0x9af   : > { %v8693_v9 = vadd.f32 %v8661_v30, %v8629_v32  ;;  %v8127_v59 = vrot.slane %v7974_v6, 2  ;;  %v15220_v6 = vld [vmem:[#allocation61_spill] sm:$0xff] }
 0x9b0   : > { %v7543_v62 = vadd.f32 %v7483_v49, %v7012_v13 }
 0x9b1   : > { %8725 = vst.msk [vmem:[%s14270_s26 + $0x80] sm:$0xff] %vm636_vm1, %v8693_v9  ;;  %v8128_v38 = vsel %vm1435_vm3, %v8126_v19, %v8127_v59  ;;  %10334 = vmatmul.msk.bf16.gmra.mxu1 %vm4822_vm5, %v14392_v58 }
 0x9b2   : > { %v8237_v56 = vadd.f32 %v8128_v38, %v14480_v20  ;;  %v14722_v35 = vadd.f32 %v7769_v14, %v7543_v62  ;;  %v15219_v14 = vld [vmem:[#allocation57_spill] sm:$0xff]  ;;  %v14730_v4 = vpop.f32.mrf.mxu0 }
 0x9b3   : > { %v6780_v41 = vpop.f32.mrf.mxu2  ;;  %v7773_v10 = vrot.slane %v14730_v4, 1 }
 0x9b4   : > { %v7488_v5 = vpop.f32.mrf.mxu3  ;;  %v10821_v34 = vpop.eup %10820  ;;  %v8351_v28 = vrot.slane %v8237_v56, 7  ;;  %v6913_v23 = vrot.slane %v6780_v41, 2 }
 0x9b5   : > { %v8630_v16 = vmul.f32 %v10821_v34, %v8438_v51  ;;  %v14740_v19 = vsel %vm1072_vm2, %v7772_v33, %v7773_v10 }
 0x9b6   : > { %v8352_v25 = vsel %vm4185_vm6, %v8350_v12, %v8351_v28  ;;  %v6914_v58 = vsel %vm1435_vm3, %v6912_v43, %v6913_v23  ;;  %v7976_v45 = vpop.f32.mrf.mxu1  ;;  %v15221_v12 = vld [vmem:[#allocation17_spill] sm:$0xff] }
 0x9b7   : > { %v8694_v20 = vadd.f32 %v8662_v63, %v8630_v16  ;;  %v8439_v40 = vadd.f32 %v14638_v3, %v8352_v25  ;;  %v7013_v27 = vadd.f32 %v6914_v58, %v15219_v14  ;;  %v8129_v49 = vrot.slane %v7976_v45, 2 }
 0x9b9   : > { %8726 = vst.msk [vmem:[%s14270_s26 + $0x88] sm:$0xff] %vm636_vm1, %v8694_v20  ;;  %v8471_v17 = vsub.f32 0.0, %v8439_v40  ;;  %v7544_v46 = vadd.f32 %v7485_v24, %v7013_v27  ;;  %v8130_v51 = vsel %vm1435_vm3, %v8127_v59, %v8129_v49  ;;  %v15222_v20 = vld [vmem:[#allocation41_spill] sm:$0xff] }
 0x9ba   : > { %v8238_v30 = vadd.f32 %v8130_v51, %v14491_v54  ;;  %v7693_v59 = vpop.f32.mrf.mxu0 }
 0x9bb   : > { %v8521_v8 = vmul.f32 1.442695, %v8471_v17  ;;  %v6782_v21 = vpop.f32.mrf.mxu2  ;;  %v14743_v43 = vadd.f32 %v14679_v1, %v7544_v46 }
 0x9bc   : > { %v7490_v39 = vpop.f32.mrf.mxu3  ;;  %v8353_v32 = vrot.slane %v8238_v30, 7  ;;  %v6915_v26 = vrot.slane %v6782_v21, 2  ;;  %v15223_v30 = vld [vmem:[#allocation19_spill] sm:$0xff] }
 0x9bd   : > { %10822 = vpow2.f32 %v8521_v8  ;;  %v8664_v8 = vunpack.c.l.bf16 %v15223_v30 }
 0x9be   : > { %v8354_v24 = vsel %vm4185_vm6, %v8351_v28, %v8353_v32  ;;  %v6916_v44 = vsel %vm1435_vm3, %v6913_v23, %v6915_v26  ;;  %v7979_v13 = vpop.f32.mrf.mxu1  ;;  %v8663_v28 = vunpack.c.l.bf16 %v15221_v12 }
 0x9bf   : > { %v8440_v54 = vadd.f32 %v14638_v3, %v8354_v24  ;;  %v7014_v9 = vadd.f32 %v6916_v44, %v15220_v6 }
 0x9c1   : > { %v8472_v18 = vsub.f32 0.0, %v8440_v54  ;;  %v7545_v62 = vadd.f32 %v7488_v5, %v7014_v9  ;;  %10335 = vmatmul.msk.bf16.gmra.mxu1 %vm4822_vm5, %v14425_v57 }
 0x9c3   : > { %v10823_v1 = vpop.eup %10822  ;;  %v8523_v50 = vmul.f32 1.442695, %v8472_v18  ;;  %v6785_v38 = vpop.f32.mrf.mxu2  ;;  %v14753_v52 = vadd.f32 %v7770_v11, %v7545_v62 }
 0x9c4   : > { %v7492_v56 = vpop.f32.mrf.mxu3  ;;  %v8567_v63 = vadd.f32 1.0, %v10823_v1 }
 0x9c5   : > { %10824 = vpow2.f32 %v8523_v50 }
 0x9c6   : > { %10826 = vrcp.f32 %v8567_v63  ;;  %v7980_v41 = vpop.f32.mrf.mxu1 }
 0x9c7   : > { %v8131_v25 = vrot.slane %v7980_v41, 2 }
 0x9c9   : > { %v8239_v49 = vadd.f32 %v8131_v25, %v14524_v47 }
 0x9cb   : > { %v10825_v34 = vpop.eup %10824  ;;  %v6786_v5 = vpop.f32.mrf.mxu2  ;;  %v8355_v26 = vrot.slane %v8239_v49, 7 }
 0x9cc   : > { %v7494_v23 = vpop.f32.mrf.mxu3  ;;  %v10827_v16 = vpop.eup %10826  ;;  %v8568_v57 = vadd.f32 1.0, %v10825_v34  ;;  %v6917_v58 = vrot.slane %v6786_v5, 2 }
 0x9cd   : > { %v8631_v45 = vmul.f32 %v10827_v16, %v8439_v40 }
 0x9ce   : > { %10828 = vrcp.f32 %v8568_v57  ;;  %v7015_v22 = vadd.f32 %v6917_v58, %v15222_v20  ;;  %v7983_v11 = vpop.f32.mrf.mxu1 }
 0x9cf   : > { %v8695_v14 = vadd.f32 %v8663_v28, %v8631_v45  ;;  %v8132_v27 = vrot.slane %v7983_v11, 2 }
 0x9d0   : > { %v7546_v17 = vadd.f32 %v7492_v56, %v7015_v22 }
 0x9d1   : > { %8727 = vst.msk [vmem:[%s14270_s26 + $0x90] sm:$0xff] %vm636_vm1, %v8695_v14  ;;  %v8133_v46 = vsel %vm1435_vm3, %v8131_v25, %v8132_v27  ;;  %10336 = vmatmul.msk.bf16.gmra.mxu1 %vm4822_vm5, %v14449_v7  ;;  %v15225_v25 = vld [vmem:[#allocation42_spill] sm:$0xff] }
 0x9d2   : > { %v14763_v51 = vadd.f32 %v7772_v33, %v7546_v17  ;;  %v8240_v40 = vadd.f32 %v8133_v46, %v14540_v37  ;;  %v15224_v37 = vld [vmem:[#allocation46_spill] sm:$0xff] }
 0x9d3   : > { %v6789_v21 = vpop.f32.mrf.mxu2 }
 0x9d4   : > { %v7497_v39 = vpop.f32.mrf.mxu3  ;;  %v10829_v32 = vpop.eup %10828  ;;  %v8356_v47 = vrot.slane %v8240_v40, 7  ;;  %v6918_v24 = vrot.slane %v6789_v21, 2 }
 0x9d5   : > { %v8632_v44 = vmul.f32 %v10829_v32, %v8440_v54  ;;  %v15227_v32 = vld [vmem:[#allocation23_spill] sm:$0xff] }
 0x9d6   : > { %v8357_v13 = vsel %vm4185_vm6, %v8355_v26, %v8356_v47  ;;  %v7985_v6 = vpop.f32.mrf.mxu1  ;;  %v6919_v9 = vsel %vm1435_vm3, %v6917_v58, %v6918_v24  ;;  %v8666_v26 = vunpack.c.l.bf16 %v15227_v32 }
 0x9d7   : > { %v8696_v7 = vadd.f32 %v8664_v8, %v8632_v44  ;;  %v8441_v33 = vadd.f32 %v14638_v3, %v8357_v13  ;;  %v8134_v59 = vrot.slane %v7985_v6, 2  ;;  %v7016_v18 = vadd.f32 %v6919_v9, %v15224_v37 }
 0x9d9   : > { %8728 = vst.msk [vmem:[%s14270_s26 + $0x98] sm:$0xff] %vm636_vm1, %v8696_v7  ;;  %v8473_v62 = vsub.f32 0.0, %v8441_v33  ;;  %v8135_v1 = vsel %vm1435_vm3, %v8132_v27, %v8134_v59  ;;  %v7547_v50 = vadd.f32 %v7494_v23, %v7016_v18  ;;  %v15226_v27 = vld [vmem:[#allocation21_spill] sm:$0xff] }
 0x9da   : > { %v8241_v38 = vadd.f32 %v8135_v1, %v14553_v29  ;;  %v8665_v49 = vunpack.c.l.bf16 %v15226_v27 }
 0x9db   : > { %v8525_v54 = vmul.f32 1.442695, %v8473_v62  ;;  %v14776_v56 = vadd.f32 %v14740_v19, %v7547_v50  ;;  %v6791_v63 = vpop.f32.mrf.mxu2 }
 0x9dc   : > { %v7499_v41 = vpop.f32.mrf.mxu3  ;;  %v8358_v34 = vrot.slane %v8241_v38, 7  ;;  %v6920_v12 = vrot.slane %v6791_v63, 2 }
 0x9dd   : > { %10830 = vpow2.f32 %v8525_v54 }
 0x9de   : > { %v8359_v28 = vsel %vm4185_vm6, %v8356_v47, %v8358_v34  ;;  %v7988_v5 = vpop.f32.mrf.mxu1  ;;  %v6921_v16 = vsel %vm1435_vm3, %v6918_v24, %v6920_v12 }
 0x9df   : > { %v8442_v57 = vadd.f32 %v14638_v3, %v8359_v28  ;;  %v7017_v23 = vadd.f32 %v6921_v16, %v15225_v25  ;;  %v15228_v28 = vld [vmem:[#allocation25_spill] sm:$0xff] }
 0x9e0   : > { %v8667_v5 = vunpack.c.l.bf16 %v15228_v28 }
 0x9e1   : > { %v8474_v58 = vsub.f32 0.0, %v8442_v57  ;;  %v7548_v29 = vadd.f32 %v7497_v39, %v7017_v23  ;;  %10337 = vmatmul.msk.bf16.gmra.mxu1 %vm4822_vm5, %v14495_v60 }
 0x9e3   : > { %v10831_v19 = vpop.eup %10830  ;;  %v8527_v45 = vmul.f32 1.442695, %v8474_v58  ;;  %v14786_v20 = vadd.f32 %v7773_v10, %v7548_v29 }
 0x9e4   : > { %v8569_v22 = vadd.f32 1.0, %v10831_v19 }
 0x9e5   : > { %10832 = vpow2.f32 %v8527_v45 }
 0x9e6   : > { %10834 = vrcp.f32 %v8569_v22  ;;  %v7989_v11 = vpop.f32.mrf.mxu1 }
 0x9e7   : > { %v8136_v40 = vrot.slane %v7989_v11, 2  ;;  %v15229_v11 = vld [vmem:[#allocation27_spill] sm:$0xff] }
 0x9e9   : > { %v8242_v4 = vadd.f32 %v8136_v40, %v14582_v61 }
 0x9eb   : > { %v10833_v14 = vpop.eup %10832  ;;  %v8360_v24 = vrot.slane %v8242_v4, 7 }
 0x9ec   : > { %v10835_v17 = vpop.eup %10834  ;;  %v8570_v46 = vadd.f32 1.0, %v10833_v14  ;;  %v8668_v14 = vunpack.c.l.bf16 %v15229_v11 }
 0x9ed   : > { %v8633_v30 = vmul.f32 %v10835_v17, %v8441_v33 }
 0x9ee   : > { %10836 = vrcp.f32 %v8570_v46  ;;  %v7992_v60 = vpop.f32.mrf.mxu1 }
 0x9ef   : > { %v8697_v8 = vadd.f32 %v8665_v49, %v8633_v30  ;;  %v8137_v21 = vrot.slane %v7992_v60, 2 }
 0x9f1   : > { %8729 = vst.msk [vmem:[%s14270_s26 + $0xa0] sm:$0xff] %vm636_vm1, %v8697_v8  ;;  %v8138_v10 = vsel %vm1435_vm3, %v8136_v40, %v8137_v21  ;;  %10338 = vmatmul.msk.bf16.gmra.mxu1 %vm4822_vm5, %v14534_v15 }
 0x9f2   : > { %v8243_v39 = vadd.f32 %v8138_v10, %v14594_v42 }
 0x9f4   : > { %v10837_v47 = vpop.eup %10836  ;;  %v8361_v44 = vrot.slane %v8243_v39, 7 }
 0x9f5   : > { %v8634_v13 = vmul.f32 %v10837_v47, %v8442_v57 }
 0x9f6   : > { %v8362_v6 = vsel %vm4185_vm6, %v8360_v24, %v8361_v44  ;;  %v7994_v9 = vpop.f32.mrf.mxu1 }
 0x9f7   : > { %v8698_v7 = vadd.f32 %v8666_v26, %v8634_v13  ;;  %v8443_v61 = vadd.f32 %v14638_v3, %v8362_v6  ;;  %v8139_v33 = vrot.slane %v7994_v9, 2 }
 0x9f9   : > { %8730 = vst.msk [vmem:[%s14270_s26 + $0xa8] sm:$0xff] %vm636_vm1, %v8698_v7  ;;  %v8475_v59 = vsub.f32 0.0, %v8443_v61  ;;  %v8140_v15 = vsel %vm1435_vm3, %v8137_v21, %v8139_v33 }
 0x9fa   : > { %v8244_v42 = vadd.f32 %v8140_v15, %v14604_v0 }
 0x9fb   : > { %v8529_v37 = vmul.f32 1.442695, %v8475_v59 }
 0x9fc   : > { %v8363_v18 = vrot.slane %v8244_v42, 7 }
 0x9fd   : > { %10838 = vpow2.f32 %v8529_v37 }
 0x9fe   : > { %v8364_v62 = vsel %vm4185_vm6, %v8361_v44, %v8363_v18  ;;  %v7997_v1 = vpop.f32.mrf.mxu1 }
 0x9ff   : > { %v8444_v50 = vadd.f32 %v14638_v3, %v8364_v62 }
 0xa01   : > { %v8476_v38 = vsub.f32 0.0, %v8444_v50 }
 0xa03   : > { %v10839_v54 = vpop.eup %10838  ;;  %v8531_v63 = vmul.f32 1.442695, %v8476_v38 }
 0xa04   : > { %v8571_v41 = vadd.f32 1.0, %v10839_v54  ;;  %v15231_v54 = vld [vmem:[#allocation31_spill] sm:$0xff] }
 0xa05   : > { %10840 = vpow2.f32 %v8531_v63  ;;  %v8670_v63 = vunpack.c.l.bf16 %v15231_v54 }
 0xa06   : > { %10842 = vrcp.f32 %v8571_v41  ;;  %v7998_v34 = vpop.f32.mrf.mxu1 }
 0xa07   : > { %v8141_v57 = vrot.slane %v7998_v34, 2 }
 0xa09   : > { %v8245_v19 = vadd.f32 %v8141_v57, %v14630_v2 }
 0xa0b   : > { %v10841_v12 = vpop.eup %10840  ;;  %v8365_v49 = vrot.slane %v8245_v19, 7 }
 0xa0c   : > { %v10843_v0 = vpop.eup %10842  ;;  %v8572_v16 = vadd.f32 1.0, %v10841_v12 }
 0xa0d   : > { %v8635_v25 = vmul.f32 %v10843_v0, %v8443_v61  ;;  %v15230_v61 = vld [vmem:[#allocation29_spill] sm:$0xff] }
 0xa0e   : > { %10844 = vrcp.f32 %v8572_v16  ;;  %v8001_v23 = vpop.f32.mrf.mxu1  ;;  %v8669_v33 = vunpack.c.l.bf16 %v15230_v61 }
 0xa0f   : > { %v8699_v58 = vadd.f32 %v8667_v5, %v8635_v25  ;;  %v8142_v29 = vrot.slane %v8001_v23, 2 }
 0xa11   : > { %8731 = vst.msk [vmem:[%s14270_s26 + $0xb0] sm:$0xff] %vm636_vm1, %v8699_v58  ;;  %v8143_v45 = vsel %vm1435_vm3, %v8141_v57, %v8142_v29 }
 0xa12   : > { %v8246_v22 = vadd.f32 %v8143_v45, %v14647_v48 }
 0xa14   : > { %v10845_v27 = vpop.eup %10844  ;;  %v8366_v17 = vrot.slane %v8246_v22, 7 }
 0xa15   : > { %v8636_v46 = vmul.f32 %v10845_v27, %v8444_v50 }
 0xa16   : > { %v8367_v40 = vsel %vm4185_vm6, %v8365_v49, %v8366_v17  ;;  %v8003_v30 = vpop.f32.mrf.mxu1 }
 0xa17   : > { %v8700_v60 = vadd.f32 %v8668_v14, %v8636_v46  ;;  %v8445_v8 = vadd.f32 %v14638_v3, %v8367_v40  ;;  %v8144_v21 = vrot.slane %v8003_v30, 2  ;;  %v15232_v40 = vld [vmem:[#allocation33_spill] sm:$0xff] }
 0xa18   : > { %v8671_v30 = vunpack.c.l.bf16 %v15232_v40 }
 0xa19   : > { %8732 = vst.msk [vmem:[%s14270_s26 + $0xb8] sm:$0xff] %vm636_vm1, %v8700_v60  ;;  %v8477_v2 = vsub.f32 0.0, %v8445_v8  ;;  %v8145_v4 = vsel %vm1435_vm3, %v8142_v29, %v8144_v21 }
 0xa1a   : > { %v8247_v48 = vadd.f32 %v8145_v4, %v14657_v31 }
 0xa1b   : > { %v8533_v10 = vmul.f32 1.442695, %v8477_v2 }
 0xa1c   : > { %v8368_v39 = vrot.slane %v8247_v48, 7 }
 0xa1d   : > { %10846 = vpow2.f32 %v8533_v10 }
 0xa1e   : > { %v8369_v32 = vsel %vm4185_vm6, %v8366_v17, %v8368_v39  ;;  %v8006_v26 = vpop.f32.mrf.mxu1 }
 0xa1f   : > { %v8446_v47 = vadd.f32 %v14638_v3, %v8369_v32  ;;  %v15233_v26 = vld [vmem:[#allocation35_spill] sm:$0xff] }
 0xa21   : > { %v8478_v24 = vsub.f32 0.0, %v8446_v47 }
 0xa23   : > { %v10847_v44 = vpop.eup %10846  ;;  %v8535_v13 = vmul.f32 1.442695, %v8478_v24 }
 0xa24   : > { %v8573_v6 = vadd.f32 1.0, %v10847_v44 }
 0xa25   : > { %10848 = vpow2.f32 %v8535_v13 }
 0xa26   : > { %10850 = vrcp.f32 %v8573_v6  ;;  %v8007_v9 = vpop.f32.mrf.mxu1 }
 0xa27   : > { %v8146_v15 = vrot.slane %v8007_v9, 2 }
 0xa29   : > { %v8248_v1 = vadd.f32 %v8146_v15, %v14683_v53 }
 0xa2b   : > { %v10849_v7 = vpop.eup %10848  ;;  %v8370_v34 = vrot.slane %v8248_v1, 7 }
 0xa2c   : > { %v10851_v31 = vpop.eup %10850  ;;  %v8574_v59 = vadd.f32 1.0, %v10849_v7 }
 0xa2d   : > { %v8637_v42 = vmul.f32 %v10851_v31, %v8445_v8 }
 0xa2e   : > { %10852 = vrcp.f32 %v8574_v59  ;;  %v8010_v37 = vpop.f32.mrf.mxu1 }
 0xa2f   : > { %v8701_v18 = vadd.f32 %v8669_v33, %v8637_v42  ;;  %v8147_v62 = vrot.slane %v8010_v37, 2 }
 0xa31   : > { %8733 = vst.msk [vmem:[%s14270_s26 + $0xc0] sm:$0xff] %vm636_vm1, %v8701_v18  ;;  %v8148_v50 = vsel %vm1435_vm3, %v8146_v15, %v8147_v62 }
 0xa32   : > { %v8249_v38 = vadd.f32 %v8148_v50, %v14695_v55 }
 0xa34   : > { %v10853_v41 = vpop.eup %10852  ;;  %v8371_v12 = vrot.slane %v8249_v38, 7 }
 0xa35   : > { %v8638_v28 = vmul.f32 %v10853_v41, %v8446_v47  ;;  %v8672_v47 = vunpack.c.l.bf16 %v15233_v26 }
 0xa36   : > { %v8372_v5 = vsel %vm4185_vm6, %v8370_v34, %v8371_v12  ;;  %v8012_v0 = vpop.f32.mrf.mxu1  ;;  %v15234_v34 = vld [vmem:[#allocation38_spill] sm:$0xff] }
 0xa37   : > { %v8702_v16 = vadd.f32 %v8670_v63, %v8638_v28  ;;  %v8447_v57 = vadd.f32 %v14638_v3, %v8372_v5  ;;  %v8149_v25 = vrot.slane %v8012_v0, 2 }
 0xa39   : > { %8734 = vst.msk [vmem:[%s14270_s26 + $0xc8] sm:$0xff] %vm636_vm1, %v8702_v16  ;;  %v8479_v53 = vsub.f32 0.0, %v8447_v57  ;;  %v8150_v23 = vsel %vm1435_vm3, %v8147_v62, %v8149_v25 }
 0xa3a   : > { %v8250_v55 = vadd.f32 %v8150_v23, %v14705_v36 }
 0xa3b   : > { %v8537_v58 = vmul.f32 1.442695, %v8479_v53 }
 0xa3c   : > { %v8373_v29 = vrot.slane %v8250_v55, 7 }
 0xa3d   : > { %10854 = vpow2.f32 %v8537_v58  ;;  %v15235_v58 = vld [vmem:[#allocation40_spill] sm:$0xff] }
 0xa3e   : > { %v8374_v19 = vsel %vm4185_vm6, %v8371_v12, %v8373_v29  ;;  %v8015_v45 = vpop.f32.mrf.mxu1  ;;  %v8673_v12 = vunpack.c.l.bf16 %v15234_v34  ;;  %v8674_v29 = vunpack.c.l.bf16 %v15235_v58 }
 0xa3f   : > { %v8448_v22 = vadd.f32 %v14638_v3, %v8374_v19 }
 0xa41   : > { %v8480_v11 = vsub.f32 0.0, %v8448_v22 }
 0xa43   : > { %v10855_v14 = vpop.eup %10854  ;;  %v8539_v27 = vmul.f32 1.442695, %v8480_v11 }
 0xa44   : > { %v8575_v49 = vadd.f32 1.0, %v10855_v14 }
 0xa45   : > { %10856 = vpow2.f32 %v8539_v27 }
 0xa46   : > { %10858 = vrcp.f32 %v8575_v49  ;;  %v8016_v17 = vpop.f32.mrf.mxu1 }
 0xa47   : > { %v8151_v8 = vrot.slane %v8016_v17, 2 }
 0xa49   : > { %v8251_v10 = vadd.f32 %v8151_v8, %v14722_v35 }
 0xa4b   : > { %v10857_v46 = vpop.eup %10856  ;;  %v8375_v44 = vrot.slane %v8251_v10, 7 }
 0xa4c   : > { %v10859_v36 = vpop.eup %10858  ;;  %v8576_v60 = vadd.f32 1.0, %v10857_v46 }
 0xa4d   : > { %v8639_v21 = vmul.f32 %v10859_v36, %v8447_v57 }
 0xa4e   : > { %10860 = vrcp.f32 %v8576_v60  ;;  %v8019_v2 = vpop.f32.mrf.mxu1 }
 0xa4f   : > { %v8703_v4 = vadd.f32 %v8671_v30, %v8639_v21  ;;  %v8152_v48 = vrot.slane %v8019_v2, 2 }
 0xa51   : > { %8735 = vst.msk [vmem:[%s14270_s26 + $0xd0] sm:$0xff] %vm636_vm1, %v8703_v4  ;;  %v8153_v39 = vsel %vm1435_vm3, %v8151_v8, %v8152_v48 }
 0xa52   : > { %v8252_v32 = vadd.f32 %v8153_v39, %v14743_v43  ;;  %v15236_v39 = vld [vmem:[#allocation59_spill] sm:$0xff] }
 0xa54   : > { %v10861_v24 = vpop.eup %10860  ;;  %v8376_v13 = vrot.slane %v8252_v32, 7  ;;  %v8675_v32 = vunpack.c.l.bf16 %v15236_v39 }
 0xa55   : > { %v8640_v6 = vmul.f32 %v10861_v24, %v8448_v22 }
 0xa56   : > { %v8377_v9 = vsel %vm4185_vm6, %v8375_v44, %v8376_v13  ;;  %v8021_v7 = vpop.f32.mrf.mxu1 }
 0xa57   : > { %v8704_v61 = vadd.f32 %v8672_v47, %v8640_v6  ;;  %v8449_v33 = vadd.f32 %v14638_v3, %v8377_v9  ;;  %v8154_v31 = vrot.slane %v8021_v7, 2 }
 0xa59   : > { %8736 = vst.msk [vmem:[%s14270_s26 + $0xd8] sm:$0xff] %vm636_vm1, %v8704_v61  ;;  %v8481_v35 = vsub.f32 0.0, %v8449_v33  ;;  %v8155_v59 = vsel %vm1435_vm3, %v8152_v48, %v8154_v31 }
 0xa5a   : > { %v8253_v43 = vadd.f32 %v8155_v59, %v14753_v52 }
 0xa5b   : > { %v8541_v15 = vmul.f32 1.442695, %v8481_v35 }
 0xa5c   : > { %v8378_v42 = vrot.slane %v8253_v43, 7 }
 0xa5d   : > { %10862 = vpow2.f32 %v8541_v15 }
 0xa5e   : > { %v8379_v37 = vsel %vm4185_vm6, %v8376_v13, %v8378_v42  ;;  %v8024_v18 = vpop.f32.mrf.mxu1 }
 0xa5f   : > { %v8450_v62 = vadd.f32 %v14638_v3, %v8379_v37 }
 0xa61   : > { %v8482_v1 = vsub.f32 0.0, %v8450_v62 }
 0xa63   : > { %v10863_v50 = vpop.eup %10862  ;;  %v8543_v38 = vmul.f32 1.442695, %v8482_v1 }
 0xa64   : > { %v8577_v54 = vadd.f32 1.0, %v10863_v50 }
 0xa65   : > { %10864 = vpow2.f32 %v8543_v38 }
 0xa66   : > { %10866 = vrcp.f32 %v8577_v54  ;;  %v8025_v63 = vpop.f32.mrf.mxu1 }
 0xa67   : > { %v8156_v5 = vrot.slane %v8025_v63, 2 }
 0xa69   : > { %v8254_v53 = vadd.f32 %v8156_v5, %v14763_v51 }
 0xa6b   : > { %v10865_v41 = vpop.eup %10864  ;;  %v8380_v45 = vrot.slane %v8254_v53, 7 }
 0xa6c   : > { %v10867_v52 = vpop.eup %10866  ;;  %v8578_v28 = vadd.f32 1.0, %v10865_v41 }
 0xa6d   : > { %v8641_v0 = vmul.f32 %v10867_v52, %v8449_v33 }
 0xa6e   : > { %10868 = vrcp.f32 %v8578_v28  ;;  %v8028_v16 = vpop.f32.mrf.mxu1 }
 0xa6f   : > { %v8705_v57 = vadd.f32 %v8673_v12, %v8641_v0  ;;  %v8157_v25 = vrot.slane %v8028_v16, 2 }
 0xa71   : > { %8737 = vst.msk [vmem:[%s14270_s26 + $0xe0] sm:$0xff] %vm636_vm1, %v8705_v57  ;;  %v8158_v23 = vsel %vm1435_vm3, %v8156_v5, %v8157_v25 }
 0xa72   : > { %v8255_v55 = vadd.f32 %v8158_v23, %v14776_v56 }
 0xa74   : > { %v10869_v19 = vpop.eup %10868  ;;  %v8381_v22 = vrot.slane %v8255_v55, 7 }
 0xa75   : > { %v8642_v11 = vmul.f32 %v10869_v19, %v8450_v62 }
 0xa76   : > { %v8382_v14 = vsel %vm4185_vm6, %v8380_v45, %v8381_v22  ;;  %v8030_v27 = vpop.f32.mrf.mxu1 }
 0xa77   : > { %v8706_v49 = vadd.f32 %v8674_v29, %v8642_v11  ;;  %v8451_v17 = vadd.f32 %v14638_v3, %v8382_v14  ;;  %v8159_v46 = vrot.slane %v8030_v27, 2 }
 0xa79   : > { %8738 = vst.msk [vmem:[%s14270_s26 + $0xe8] sm:$0xff] %vm636_vm1, %v8706_v49  ;;  %v8483_v51 = vsub.f32 0.0, %v8451_v17  ;;  %v8160_v40 = vsel %vm1435_vm3, %v8157_v25, %v8159_v46 }
 0xa7a   : > { %v8256_v56 = vadd.f32 %v8160_v40, %v14786_v20 }
 0xa7b   : > { %v8545_v30 = vmul.f32 1.442695, %v8483_v51 }
 0xa7c   : > { %v8383_v36 = vrot.slane %v8256_v56, 7 }
 0xa7d   : > { %10870 = vpow2.f32 %v8545_v30 }
 0xa7e   : > { %v8384_v60 = vsel %vm4185_vm6, %v8381_v22, %v8383_v36 }
 0xa7f   : > { %v8452_v8 = vadd.f32 %v14638_v3, %v8384_v60  ;;  %v15237_v3 = vld [vmem:[#allocation37_spill] sm:$0xff] }
 0xa80   : > { %v8676_v44 = vunpack.c.l.bf16 %v15237_v3 }
 0xa81   : > { %v8484_v21 = vsub.f32 0.0, %v8452_v8 }
 0xa83   : > { %v10871_v2 = vpop.eup %10870  ;;  %v8547_v4 = vmul.f32 1.442695, %v8484_v21 }
 0xa84   : > { %v8579_v48 = vadd.f32 1.0, %v10871_v2 }
 0xa85   : > { %10872 = vpow2.f32 %v8547_v4 }
 0xa86   : > { %10874 = vrcp.f32 %v8579_v48 }
 0xa8b   : > { %v10873_v10 = vpop.eup %10872 }
 0xa8c   : > { %v10875_v20 = vpop.eup %10874  ;;  %v8580_v26 = vadd.f32 1.0, %v10873_v10 }
 0xa8d   : > { %v8643_v47 = vmul.f32 %v10875_v20, %v8451_v17 }
 0xa8e   : > { %10876 = vrcp.f32 %v8580_v26 }
 0xa8f   : > { %v8707_v24 = vadd.f32 %v8675_v32, %v8643_v47 }
 0xa91   : > { %8739 = vst.msk [vmem:[%s14270_s26 + $0xf0] sm:$0xff] %vm636_vm1, %v8707_v24 }
 0xa94   : > { %v10877_v13 = vpop.eup %10876 }
 0xa95   : > { %v8644_v6 = vmul.f32 %v10877_v13, %v8452_v8 }
 0xa97   : > { %v8708_v9 = vadd.f32 %v8676_v44, %v8644_v6 }
 0xa99   : > { %8740 = vst.msk [vmem:[%s14270_s26 + $0xf8] sm:$0xff] %vm636_vm1, %v8708_v9 }
 0xa9a   : > { %11018 = shalt.err (!%p11015_p4)
}
 0xa9b   : > { %s11062_s12 = smov 128   ;;  %s11063_s26 = smov 8  }
 0xa9c   : > { %10571 = dma.vmem_to_hbm [thread:$0]  (%p11144_p11), %s8755_s11, 4096, %s8757_s14, %s8742_s22, %s11062_s12, %s11062_s12, %s11063_s26  }
 0xa9d PF: > { %s8771_s28 = sand.u32 1, %s11045_s18   ;;  %p15238_p7 = scmp.ge.s32.totalorder %s11057_s21, 2 }
 0xa9e   : > { %s8772_s9 = scalar_lea.sflag [#allocation6], %s8771_s28 }
 0xa9f   : > { %p10578_p5 = pnand %p15238_p7, %p11148_p12 }
 0xaa1   : > { %p10579_p8 = pneg %p10578_p5 }
 0xaa3   : > { %11040 = dma.done.wait (%p10579_p8), %s8772_s9, 4096  }
 0xaa4   : > { %11042 = vsyncadd (%p10579_p8), %s8772_s9, 4294963200  ;;  %p18_p10 = scmp.ge.s32.totalorder %s11119_s24, 4   ;;  %s15239_s18 = smov %s11049_s19 }
 0xaa5   : > { %s15240_s19 = smov %s11053_s20  ;;  %s15241_s20 = smov %s11131_s27 }
 0xaa6   : > { %s15242_s21 = smov %s11119_s24  ;;  %20 = sbr.rel (!%p18_p10) target bundleno = 5 (0x5), region = 107 }
 0xaab   :  { %8778 = vsyncpa [#allocation5], 1 }
 0xaac   :  { %8780 = vsyncpa [#allocation5 + $0x1], 1 }
 0xaad   :  { %8781 = vsyncpa [#allocation6], 1 }
 0xaae   :  { %8783 = vsyncpa [#allocation6 + $0x1], 1 }

</bundles_post_ra>
